<compile_context>
chip_gen: v6e
topology: v6e:2x2x1
jax: 0.10.0
libtpu: 0.0.40
codegen_flags: <defaults>
</compile_context>

<pallas_src>
import functools

import jax
import jax.numpy as jnp
import numpy as np
from jax.experimental import pallas as pl
from jax.experimental.pallas import tpu as pltpu

_PADW = 5     # zero columns added on each side of W in the wrapper (>=2)
_COLS1 = 8    # conv1 is evaluated on W + 8 columns (keeps reshapes 8-aligned)


# ---------------------------------------------------------------------------
# Fused kernel: conv3x3+bias+ReLU -> conv3x3+bias+ReLU for one (batch, row-block)
# ---------------------------------------------------------------------------
def _unet_up_fused_kernel(x1_ref, x1t_ref, x1b_ref,
                          x2_ref, x2t_ref, x2b_ref,
                          w1a_ref, w1b_ref, b1_ref, w2_ref, b2_ref,
                          o_ref):
    blk = pl.program_id(1)
    nblk = pl.num_programs(1)
    th = x1_ref.shape[1]                 # rows in this output tile
    c1 = x1_ref.shape[3]
    c2 = x2_ref.shape[3]
    w_out = o_ref.shape[2]               # W (original width)
    cout = o_ref.shape[3]
    rows1 = th + 2                       # conv1 rows computed (+-1 halo row)
    cols1 = w_out + _COLS1               # conv1 cols computed (8-aligned)
    cdtype = x1_ref.dtype                # matmul operand dtype (bf16 or f32)

    first = blk == 0
    last = blk == nblk - 1
    keep_top = jnp.where(first, 0.0, 1.0).astype(cdtype)
    keep_bot = jnp.where(last, 0.0, 1.0).astype(cdtype)

    def assemble(main_ref, top_ref, bot_ref):
        # (TH+4, W+2*_PADW, C): main rows plus the +-2 halo rows fetched by the
        # overlapping BlockSpecs; halo rows outside the image are zeroed here.
        top = top_ref[0] * keep_top
        bot = bot_ref[0] * keep_bot
        return jnp.concatenate([top, main_ref[0], bot], axis=0)

    x1full = assemble(x1_ref, x1t_ref, x1b_ref)
    x2full = assemble(x2_ref, x2t_ref, x2b_ref)

    def dot(a, b):
        return jax.lax.dot_general(a, b, (((1,), (0,)), ((), ())),
                                   preferred_element_type=jnp.float32)

    # ---- conv1 + bias + ReLU over a (TH+2) x (W+8) window (split-Cin weights,
    # one shared f32 accumulator -> the HBM concat is never materialized) ----
    # TODO(synk): for lane-aligned channel counts (Cin % 128 == 0), build a
    # (rows, 9*Cin) im2col slab and issue one fat-K matmul per conv instead of
    # nine per-tap matmuls.
    acc1 = jnp.zeros((rows1 * cols1, cout), jnp.float32)
    for dy in range(3):
        for dx in range(3):
            p1 = x1full[dy:dy + rows1, dx:dx + cols1, :].reshape(rows1 * cols1, c1)
            p2 = x2full[dy:dy + rows1, dx:dx + cols1, :].reshape(rows1 * cols1, c2)
            acc1 = acc1 + dot(p1, w1a_ref[dy, dx]) + dot(p2, w1b_ref[dy, dx])
    acc1 = jnp.maximum(acc1 + b1_ref[...], 0.0)
    mid = acc1.reshape(rows1, cols1, cout)

    # Zero conv1 values that lie outside the image: they implement conv2's
    # "same" zero padding (top/bottom rows only at the image boundary, plus the
    # two columns just outside the image on the left/right).
    r_idx = jax.lax.broadcasted_iota(jnp.int32, (rows1, cols1, 1), 0)
    c_idx = jax.lax.broadcasted_iota(jnp.int32, (rows1, cols1, 1), 1)
    outside = ((c_idx == _PADW - 2) | (c_idx == _PADW + w_out - 1)
               | ((r_idx == 0) & first) | ((r_idx == rows1 - 1) & last))
    mid = jnp.where(outside, 0.0, mid).astype(cdtype)

    # ---- conv2 + bias + ReLU over the (TH, W) output tile ----
    acc2 = jnp.zeros((th * w_out, cout), jnp.float32)
    for dy in range(3):
        for dx in range(3):
            cstart = _PADW - 2 + dx
            p = mid[dy:dy + th, cstart:cstart + w_out, :].reshape(th * w_out, cout)
            acc2 = acc2 + dot(p, w2_ref[dy, dx])
    acc2 = jnp.maximum(acc2 + b2_ref[...], 0.0)
    o_ref[...] = acc2.reshape(1, th, w_out, cout).astype(o_ref.dtype)


# ---------------------------------------------------------------------------
# Plain-JAX glue: bilinear x2 upsample, align_corners=True (UpsamplingBilinear2d),
# expressed as two small interpolation-matrix matmuls (no gathers).
# ---------------------------------------------------------------------------
def _bilinear_matrix_align_corners(out_size, in_size):
    m = np.zeros((out_size, in_size), np.float32)
    if in_size == 1 or out_size == 1:
        m[:, 0] = 1.0
    else:
        scale = (in_size - 1) / (out_size - 1)
        for o in range(out_size):
            pos = o * scale
            i0 = min(int(np.floor(pos)), in_size - 1)
            i1 = min(i0 + 1, in_size - 1)
            f = pos - i0
            m[o, i0] += 1.0 - f
            m[o, i1] += f
    return jnp.asarray(m)


def upsample_bilinear_x2_align_corners(x_nhwc):
    n, h, w, c = x_nhwc.shape
    ah = _bilinear_matrix_align_corners(2 * h, h)
    aw = _bilinear_matrix_align_corners(2 * w, w)
    y = jnp.einsum("oh,nhwc->nowc", ah, x_nhwc.astype(jnp.float32))
    y = jnp.einsum("pw,nowc->nopc", aw, y)
    return y.astype(x_nhwc.dtype)
    # TODO(synk): fold the upsample into the Pallas kernel to remove this
    # (N,2H,2W,C2) HBM round trip (needs per-row align_corners weights in-kernel).


def _pick_row_block(h, w, c1, c2, cout, itemsize):
    """Largest even row block dividing H whose per-tile working set fits ~8 MiB
    (double-buffers comfortably even inside v7x's 64 MiB VMEM)."""
    budget = 8 * 1024 * 1024
    best = 2
    for th in range(2, h + 1, 2):
        if h % th:
            continue
        rows1 = th + 2
        cols1 = w + _COLS1
        est = (2 * (th + 4) * (w + 2 * _PADW) * (c1 + c2) * itemsize   # inputs (x2 buffers)
               + 2 * th * w * cout * 4                                 # output (x2 buffers)
               + 2 * rows1 * cols1 * cout * 4                          # conv1 accumulator / mid
               + 4 * rows1 * cols1 * max(c1, c2, cout) * itemsize)     # tap temporaries
        if est <= budget:
            best = th
    return best


# ---------------------------------------------------------------------------
# unetUp forward (NCHW in / NCHW out, PyTorch OIHW weights)
# ---------------------------------------------------------------------------
@functools.partial(jax.jit, static_argnames=("row_block", "compute_dtype"))
def unet_up_forward(inputs1_nchw, inputs2_nchw, w1, b1, w2, b2,
                    row_block=None, compute_dtype=jnp.bfloat16):
    x1 = jnp.transpose(inputs1_nchw, (0, 2, 3, 1))          # NHWC (boundary transpose)
    x2 = jnp.transpose(inputs2_nchw, (0, 2, 3, 1))
    x2u = upsample_bilinear_x2_align_corners(x2)            # (N, H, W, C2)

    n, h, w, c1 = x1.shape
    c2 = x2u.shape[-1]
    cout = w1.shape[0]
    assert x2u.shape[:3] == (n, h, w)
    assert w1.shape[1] == c1 + c2 and w2.shape == (cout, cout, 3, 3)
    assert h % 2 == 0
    # TODO(synk): support W not a multiple of 8 (needed for the 8-aligned
    # in-kernel reshapes; pad W inside the kernel instead).
    assert w % 8 == 0

    itemsize = jnp.dtype(compute_dtype).itemsize
    th = _pick_row_block(h, w, c1, c2, cout, itemsize) if row_block is None else int(row_block)
    assert h % th == 0 and th % 2 == 0
    nblk = h // th
    half = th // 2
    wp = w + 2 * _PADW

    # Cast to the matmul dtype and add the small W zero-pad in one fused HBM
    # pass.  No H padding and no channel-concat are materialized in HBM.
    def prep(t):
        return jnp.pad(t.astype(compute_dtype),
                       ((0, 0), (0, 0), (_PADW, _PADW), (0, 0)))

    x1p = prep(x1)
    x2p = prep(x2u)

    w1_hwio = jnp.transpose(w1, (2, 3, 1, 0)).astype(compute_dtype)   # (3,3,Cin,Cout)
    w1a = w1_hwio[:, :, :c1, :]                                       # inputs1 part of conv1
    w1b = w1_hwio[:, :, c1:, :]                                       # upsampled part of conv1
    w2_hwio = jnp.transpose(w2, (2, 3, 1, 0)).astype(compute_dtype)
    b1_2d = b1.reshape(1, cout).astype(jnp.float32)
    b2_2d = b2.reshape(1, cout).astype(jnp.float32)

    def main_spec(c):
        return pl.BlockSpec((1, th, wp, c), lambda ni, bi: (ni, bi, 0, 0))

    def top_spec(c):    # 2 rows just above the block (clamped; zeroed in-kernel at bi==0)
        return pl.BlockSpec((1, 2, wp, c),
                            lambda ni, bi: (ni, jnp.maximum(bi * half - 1, 0), 0, 0))

    def bot_spec(c):    # 2 rows just below the block (clamped; zeroed in-kernel at last bi)
        return pl.BlockSpec((1, 2, wp, c),
                            lambda ni, bi: (ni, jnp.minimum((bi + 1) * half, h // 2 - 1), 0, 0))

    def full_spec(a):
        nd = a.ndim
        return pl.BlockSpec(a.shape, lambda ni, bi: (0,) * nd)

    out_nhwc = pl.pallas_call(
        _unet_up_fused_kernel,
        out_shape=jax.ShapeDtypeStruct((n, h, w, cout), inputs1_nchw.dtype),
        grid=(n, nblk),
        in_specs=[main_spec(c1), top_spec(c1), bot_spec(c1),
                  main_spec(c2), top_spec(c2), bot_spec(c2),
                  full_spec(w1a), full_spec(w1b), full_spec(b1_2d),
                  full_spec(w2_hwio), full_spec(b2_2d)],
        out_specs=pl.BlockSpec((1, th, w, cout), lambda ni, bi: (ni, bi, 0, 0)),
        compiler_params=pltpu.CompilerParams(
            dimension_semantics=("parallel", "parallel"),
            vmem_limit_bytes=64 * 1024 * 1024),
    )(x1p, x1p, x1p, x2p, x2p, x2p, w1a, w1b, b1_2d, w2_hwio, b2_2d)

    return jnp.transpose(out_nhwc, (0, 3, 1, 2))             # back to NCHW


# Pure-JAX reference for the correctness check.
def _reference_forward(inputs1_nchw, inputs2_nchw, w1, b1, w2, b2):
    x1 = jnp.transpose(inputs1_nchw, (0, 2, 3, 1))
    x2 = jnp.transpose(inputs2_nchw, (0, 2, 3, 1))
    x = jnp.concatenate([x1, upsample_bilinear_x2_align_corners(x2)], axis=-1)

    def conv(xx, w_oihw, bb):
        w_hwio = jnp.transpose(w_oihw, (2, 3, 1, 0))
        y = jax.lax.conv_general_dilated(
            xx, w_hwio, window_strides=(1, 1), padding="SAME",
            dimension_numbers=("NHWC", "HWIO", "NHWC"))
        return jnp.maximum(y + bb[None, None, None, :], 0.0)

    y = conv(x, w1, b1)
    y = conv(y, w2, b2)
    return jnp.transpose(y, (0, 3, 1, 2))


if __name__ == "__main__":
    # Shapes consistent with the module: inputs1 (N,C1,H,W), inputs2 (N,C2,H/2,W/2),
    # in_size = C1 + C2, out_size = 4.
    N, C1, H, W = 2, 4, 16, 16
    C2 = 4
    in_size, out_size = C1 + C2, 4

    key = jax.random.PRNGKey(0)
    k1, k2, k3, k4, k5, k6 = jax.random.split(key, 6)

    inputs1 = jax.random.normal(k1, (N, C1, H, W), dtype=jnp.float32)
    inputs2 = jax.random.normal(k2, (N, C2, H // 2, W // 2), dtype=jnp.float32)

    fan1 = in_size * 9
    fan2 = out_size * 9
    w1 = jax.random.uniform(k3, (out_size, in_size, 3, 3), jnp.float32,
                            -1.0 / np.sqrt(fan1), 1.0 / np.sqrt(fan1))
    b1 = jax.random.uniform(k4, (out_size,), jnp.float32,
                            -1.0 / np.sqrt(fan1), 1.0 / np.sqrt(fan1))
    w2 = jax.random.uniform(k5, (out_size, out_size, 3, 3), jnp.float32,
                            -1.0 / np.sqrt(fan2), 1.0 / np.sqrt(fan2))
    b2 = jax.random.uniform(k6, (out_size,), jnp.float32,
                            -1.0 / np.sqrt(fan2), 1.0 / np.sqrt(fan2))

    ref = jax.block_until_ready(_reference_forward(inputs1, inputs2, w1, b1, w2, b2))

    # f32 compute, two row-blocks per image (exercises the halo exchange path).
    out_a = jax.block_until_ready(
        unet_up_forward(inputs1, inputs2, w1, b1, w2, b2,
                        row_block=8, compute_dtype=jnp.float32))
    assert out_a.shape == (N, out_size, H, W), out_a.shape
    np.testing.assert_allclose(np.asarray(out_a), np.asarray(ref), rtol=1e-4, atol=1e-4)

    # f32 compute, single row-block (both image-boundary halos zeroed).
    out_b = jax.block_until_ready(
        unet_up_forward(inputs1, inputs2, w1, b1, w2, b2,
                        row_block=16, compute_dtype=jnp.float32))
    np.testing.assert_allclose(np.asarray(out_b), np.asarray(ref), rtol=1e-4, atol=1e-4)

    # Default production configuration: bf16 matmuls, auto row block.
    out_c = jax.block_until_ready(unet_up_forward(inputs1, inputs2, w1, b1, w2, b2))
    assert out_c.shape == (N, out_size, H, W), out_c.shape
    np.testing.assert_allclose(np.asarray(out_c), np.asarray(ref), rtol=1e-1, atol=1e-1)

    print("KERNEL_OK")
</pallas_src>

<mosaic_0001>
module attributes {stable_mosaic.version = 11 : i64} {
  func.func @_unet_up_fused_kernel(%arg0: i32, %arg1: i32, %arg2: memref<1x8x26x4xf32, #tpu.memory_space<vmem>>, %arg3: memref<1x2x26x4xf32, #tpu.memory_space<vmem>>, %arg4: memref<1x2x26x4xf32, #tpu.memory_space<vmem>>, %arg5: memref<1x8x26x4xf32, #tpu.memory_space<vmem>>, %arg6: memref<1x2x26x4xf32, #tpu.memory_space<vmem>>, %arg7: memref<1x2x26x4xf32, #tpu.memory_space<vmem>>, %arg8: memref<3x3x4x4xf32, #tpu.memory_space<vmem>>, %arg9: memref<3x3x4x4xf32, #tpu.memory_space<vmem>>, %arg10: memref<1x4xf32, #tpu.memory_space<vmem>>, %arg11: memref<3x3x4x4xf32, #tpu.memory_space<vmem>>, %arg12: memref<1x4xf32, #tpu.memory_space<vmem>>, %arg13: memref<1x8x16x4xf32, #tpu.memory_space<vmem>>) attributes {dimension_semantics = [#tpu.dimension_semantics<parallel>, #tpu.dimension_semantics<parallel>], iteration_bounds = array<i64: 2, 2>, scalar_prefetch = 0 : i64, scratch_operands = 0 : i64, tpu.core_type = #tpu.core_type<tc>, window_params = [{transform_indices = @transform_0, window_bounds = array<i64: 1, 8, 26, 4>}, {transform_indices = @transform_1, window_bounds = array<i64: 1, 2, 26, 4>}, {transform_indices = @transform_2, window_bounds = array<i64: 1, 2, 26, 4>}, {transform_indices = @transform_3, window_bounds = array<i64: 1, 8, 26, 4>}, {transform_indices = @transform_4, window_bounds = array<i64: 1, 2, 26, 4>}, {transform_indices = @transform_5, window_bounds = array<i64: 1, 2, 26, 4>}, {pipeline_mode = #tpu.pipeline_mode<synchronous>, transform_indices = @transform_6, window_bounds = array<i64: 3, 3, 4, 4>}, {pipeline_mode = #tpu.pipeline_mode<synchronous>, transform_indices = @transform_7, window_bounds = array<i64: 3, 3, 4, 4>}, {pipeline_mode = #tpu.pipeline_mode<synchronous>, transform_indices = @transform_8, window_bounds = array<i64: 1, 4>}, {pipeline_mode = #tpu.pipeline_mode<synchronous>, transform_indices = @transform_9, window_bounds = array<i64: 3, 3, 4, 4>}, {pipeline_mode = #tpu.pipeline_mode<synchronous>, transform_indices = @transform_10, window_bounds = array<i64: 1, 4>}, {transform_indices = @transform_11, window_bounds = array<i64: 1, 8, 16, 4>}]} {
    %c0_i32 = arith.constant 0 : i32
    %0 = arith.cmpi eq, %arg1, %c0_i32 : i32
    %c1_i32 = arith.constant 1 : i32
    %1 = arith.cmpi eq, %arg1, %c1_i32 : i32
    %cst = arith.constant 0.000000e+00 : f32
    %cst_0 = arith.constant 1.000000e+00 : f32
    %2 = arith.select %0, %cst, %cst_0 : f32
    %cst_1 = arith.constant 0.000000e+00 : f32
    %cst_2 = arith.constant 1.000000e+00 : f32
    %3 = arith.select %1, %cst_1, %cst_2 : f32
    %c0 = arith.constant 0 : index
    %c0_3 = arith.constant 0 : index
    %c0_4 = arith.constant 0 : index
    %c0_5 = arith.constant 0 : index
    %4 = vector.load %arg3[%c0, %c0_3, %c0_4, %c0_5] : memref<1x2x26x4xf32, #tpu.memory_space<vmem>>, vector<1x2x26x4xf32>
    %5 = vector.shape_cast %4 : vector<1x2x26x4xf32> to vector<2x26x4xf32>
    %6 = vector.broadcast %2 : f32 to vector<2x26x4xf32>
    %7 = arith.mulf %5, %6 : vector<2x26x4xf32>
    %c0_6 = arith.constant 0 : index
    %c0_7 = arith.constant 0 : index
    %c0_8 = arith.constant 0 : index
    %c0_9 = arith.constant 0 : index
    %8 = vector.load %arg4[%c0_6, %c0_7, %c0_8, %c0_9] : memref<1x2x26x4xf32, #tpu.memory_space<vmem>>, vector<1x2x26x4xf32>
    %9 = vector.shape_cast %8 : vector<1x2x26x4xf32> to vector<2x26x4xf32>
    %10 = vector.broadcast %3 : f32 to vector<2x26x4xf32>
    %11 = arith.mulf %9, %10 : vector<2x26x4xf32>
    %c0_10 = arith.constant 0 : index
    %c0_11 = arith.constant 0 : index
    %c0_12 = arith.constant 0 : index
    %c0_13 = arith.constant 0 : index
    %12 = vector.load %arg2[%c0_10, %c0_11, %c0_12, %c0_13] : memref<1x8x26x4xf32, #tpu.memory_space<vmem>>, vector<1x8x26x4xf32>
    %13 = vector.shape_cast %12 : vector<1x8x26x4xf32> to vector<8x26x4xf32>
    %14 = tpu.concatenate %7, %13, %11 in 0 : vector<2x26x4xf32>, vector<8x26x4xf32>, vector<2x26x4xf32> -> vector<12x26x4xf32>
    %c0_14 = arith.constant 0 : index
    %c0_15 = arith.constant 0 : index
    %c0_16 = arith.constant 0 : index
    %c0_17 = arith.constant 0 : index
    %15 = vector.load %arg6[%c0_14, %c0_15, %c0_16, %c0_17] : memref<1x2x26x4xf32, #tpu.memory_space<vmem>>, vector<1x2x26x4xf32>
    %16 = vector.shape_cast %15 : vector<1x2x26x4xf32> to vector<2x26x4xf32>
    %17 = vector.broadcast %2 : f32 to vector<2x26x4xf32>
    %18 = arith.mulf %16, %17 : vector<2x26x4xf32>
    %c0_18 = arith.constant 0 : index
    %c0_19 = arith.constant 0 : index
    %c0_20 = arith.constant 0 : index
    %c0_21 = arith.constant 0 : index
    %19 = vector.load %arg7[%c0_18, %c0_19, %c0_20, %c0_21] : memref<1x2x26x4xf32, #tpu.memory_space<vmem>>, vector<1x2x26x4xf32>
    %20 = vector.shape_cast %19 : vector<1x2x26x4xf32> to vector<2x26x4xf32>
    %21 = vector.broadcast %3 : f32 to vector<2x26x4xf32>
    %22 = arith.mulf %20, %21 : vector<2x26x4xf32>
    %c0_22 = arith.constant 0 : index
    %c0_23 = arith.constant 0 : index
    %c0_24 = arith.constant 0 : index
    %c0_25 = arith.constant 0 : index
    %23 = vector.load %arg5[%c0_22, %c0_23, %c0_24, %c0_25] : memref<1x8x26x4xf32, #tpu.memory_space<vmem>>, vector<1x8x26x4xf32>
    %24 = vector.shape_cast %23 : vector<1x8x26x4xf32> to vector<8x26x4xf32>
    %25 = tpu.concatenate %18, %24, %22 in 0 : vector<2x26x4xf32>, vector<8x26x4xf32>, vector<2x26x4xf32> -> vector<12x26x4xf32>
    %cst_26 = arith.constant 0.000000e+00 : f32
    %26 = vector.broadcast %cst_26 : f32 to vector<240x4xf32>
    %27 = vector.extract_strided_slice %14 {offsets = [0, 0, 0], sizes = [10, 24, 4], strides = [1, 1, 1]} : vector<12x26x4xf32> to vector<10x24x4xf32>
    %28 = vector.shape_cast %27 : vector<10x24x4xf32> to vector<240x4xf32>
    %29 = vector.extract_strided_slice %25 {offsets = [0, 0, 0], sizes = [10, 24, 4], strides = [1, 1, 1]} : vector<12x26x4xf32> to vector<10x24x4xf32>
    %30 = vector.shape_cast %29 : vector<10x24x4xf32> to vector<240x4xf32>
    %c0_27 = arith.constant 0 : index
    %c0_28 = arith.constant 0 : index
    %c0_29 = arith.constant 0 : index
    %c0_30 = arith.constant 0 : index
    %31 = vector.load %arg8[%c0_27, %c0_28, %c0_29, %c0_30] : memref<3x3x4x4xf32, #tpu.memory_space<vmem>>, vector<1x1x4x4xf32>
    %32 = vector.shape_cast %31 : vector<1x1x4x4xf32> to vector<4x4xf32>
    %cst_31 = arith.constant dense<0.000000e+00> : vector<240x4xf32>
    %33 = tpu.matmul %28, %32, %cst_31 {dimension_numbers = #tpu.dot_dimension_numbers<[1], [0], [0], [1], [0, 0, 1, 1], [], []>} : vector<240x4xf32>, vector<4x4xf32>, vector<240x4xf32> -> vector<240x4xf32>
    %34 = arith.addf %26, %33 : vector<240x4xf32>
    %c0_32 = arith.constant 0 : index
    %c0_33 = arith.constant 0 : index
    %c0_34 = arith.constant 0 : index
    %c0_35 = arith.constant 0 : index
    %35 = vector.load %arg9[%c0_32, %c0_33, %c0_34, %c0_35] : memref<3x3x4x4xf32, #tpu.memory_space<vmem>>, vector<1x1x4x4xf32>
    %36 = vector.shape_cast %35 : vector<1x1x4x4xf32> to vector<4x4xf32>
    %cst_36 = arith.constant dense<0.000000e+00> : vector<240x4xf32>
    %37 = tpu.matmul %30, %36, %cst_36 {dimension_numbers = #tpu.dot_dimension_numbers<[1], [0], [0], [1], [0, 0, 1, 1], [], []>} : vector<240x4xf32>, vector<4x4xf32>, vector<240x4xf32> -> vector<240x4xf32>
    %38 = arith.addf %34, %37 : vector<240x4xf32>
    %39 = vector.extract_strided_slice %14 {offsets = [0, 1, 0], sizes = [10, 24, 4], strides = [1, 1, 1]} : vector<12x26x4xf32> to vector<10x24x4xf32>
    %40 = vector.shape_cast %39 : vector<10x24x4xf32> to vector<240x4xf32>
    %41 = vector.extract_strided_slice %25 {offsets = [0, 1, 0], sizes = [10, 24, 4], strides = [1, 1, 1]} : vector<12x26x4xf32> to vector<10x24x4xf32>
    %42 = vector.shape_cast %41 : vector<10x24x4xf32> to vector<240x4xf32>
    %c0_37 = arith.constant 0 : index
    %c1 = arith.constant 1 : index
    %c0_38 = arith.constant 0 : index
    %c0_39 = arith.constant 0 : index
    %43 = vector.load %arg8[%c0_37, %c1, %c0_38, %c0_39] : memref<3x3x4x4xf32, #tpu.memory_space<vmem>>, vector<1x1x4x4xf32>
    %44 = vector.shape_cast %43 : vector<1x1x4x4xf32> to vector<4x4xf32>
    %cst_40 = arith.constant dense<0.000000e+00> : vector<240x4xf32>
    %45 = tpu.matmul %40, %44, %cst_40 {dimension_numbers = #tpu.dot_dimension_numbers<[1], [0], [0], [1], [0, 0, 1, 1], [], []>} : vector<240x4xf32>, vector<4x4xf32>, vector<240x4xf32> -> vector<240x4xf32>
    %46 = arith.addf %38, %45 : vector<240x4xf32>
    %c0_41 = arith.constant 0 : index
    %c1_42 = arith.constant 1 : index
    %c0_43 = arith.constant 0 : index
    %c0_44 = arith.constant 0 : index
    %47 = vector.load %arg9[%c0_41, %c1_42, %c0_43, %c0_44] : memref<3x3x4x4xf32, #tpu.memory_space<vmem>>, vector<1x1x4x4xf32>
    %48 = vector.shape_cast %47 : vector<1x1x4x4xf32> to vector<4x4xf32>
    %cst_45 = arith.constant dense<0.000000e+00> : vector<240x4xf32>
    %49 = tpu.matmul %42, %48, %cst_45 {dimension_numbers = #tpu.dot_dimension_numbers<[1], [0], [0], [1], [0, 0, 1, 1], [], []>} : vector<240x4xf32>, vector<4x4xf32>, vector<240x4xf32> -> vector<240x4xf32>
    %50 = arith.addf %46, %49 : vector<240x4xf32>
    %51 = vector.extract_strided_slice %14 {offsets = [0, 2, 0], sizes = [10, 24, 4], strides = [1, 1, 1]} : vector<12x26x4xf32> to vector<10x24x4xf32>
    %52 = vector.shape_cast %51 : vector<10x24x4xf32> to vector<240x4xf32>
    %53 = vector.extract_strided_slice %25 {offsets = [0, 2, 0], sizes = [10, 24, 4], strides = [1, 1, 1]} : vector<12x26x4xf32> to vector<10x24x4xf32>
    %54 = vector.shape_cast %53 : vector<10x24x4xf32> to vector<240x4xf32>
    %c0_46 = arith.constant 0 : index
    %c2 = arith.constant 2 : index
    %c0_47 = arith.constant 0 : index
    %c0_48 = arith.constant 0 : index
    %55 = vector.load %arg8[%c0_46, %c2, %c0_47, %c0_48] : memref<3x3x4x4xf32, #tpu.memory_space<vmem>>, vector<1x1x4x4xf32>
    %56 = vector.shape_cast %55 : vector<1x1x4x4xf32> to vector<4x4xf32>
    %cst_49 = arith.constant dense<0.000000e+00> : vector<240x4xf32>
    %57 = tpu.matmul %52, %56, %cst_49 {dimension_numbers = #tpu.dot_dimension_numbers<[1], [0], [0], [1], [0, 0, 1, 1], [], []>} : vector<240x4xf32>, vector<4x4xf32>, vector<240x4xf32> -> vector<240x4xf32>
    %58 = arith.addf %50, %57 : vector<240x4xf32>
    %c0_50 = arith.constant 0 : index
    %c2_51 = arith.constant 2 : index
    %c0_52 = arith.constant 0 : index
    %c0_53 = arith.constant 0 : index
    %59 = vector.load %arg9[%c0_50, %c2_51, %c0_52, %c0_53] : memref<3x3x4x4xf32, #tpu.memory_space<vmem>>, vector<1x1x4x4xf32>
    %60 = vector.shape_cast %59 : vector<1x1x4x4xf32> to vector<4x4xf32>
    %cst_54 = arith.constant dense<0.000000e+00> : vector<240x4xf32>
    %61 = tpu.matmul %54, %60, %cst_54 {dimension_numbers = #tpu.dot_dimension_numbers<[1], [0], [0], [1], [0, 0, 1, 1], [], []>} : vector<240x4xf32>, vector<4x4xf32>, vector<240x4xf32> -> vector<240x4xf32>
    %62 = arith.addf %58, %61 : vector<240x4xf32>
    %63 = vector.extract_strided_slice %14 {offsets = [1, 0, 0], sizes = [10, 24, 4], strides = [1, 1, 1]} : vector<12x26x4xf32> to vector<10x24x4xf32>
    %64 = vector.shape_cast %63 : vector<10x24x4xf32> to vector<240x4xf32>
    %65 = vector.extract_strided_slice %25 {offsets = [1, 0, 0], sizes = [10, 24, 4], strides = [1, 1, 1]} : vector<12x26x4xf32> to vector<10x24x4xf32>
    %66 = vector.shape_cast %65 : vector<10x24x4xf32> to vector<240x4xf32>
    %c1_55 = arith.constant 1 : index
    %c0_56 = arith.constant 0 : index
    %c0_57 = arith.constant 0 : index
    %c0_58 = arith.constant 0 : index
    %67 = vector.load %arg8[%c1_55, %c0_56, %c0_57, %c0_58] : memref<3x3x4x4xf32, #tpu.memory_space<vmem>>, vector<1x1x4x4xf32>
    %68 = vector.shape_cast %67 : vector<1x1x4x4xf32> to vector<4x4xf32>
    %cst_59 = arith.constant dense<0.000000e+00> : vector<240x4xf32>
    %69 = tpu.matmul %64, %68, %cst_59 {dimension_numbers = #tpu.dot_dimension_numbers<[1], [0], [0], [1], [0, 0, 1, 1], [], []>} : vector<240x4xf32>, vector<4x4xf32>, vector<240x4xf32> -> vector<240x4xf32>
    %70 = arith.addf %62, %69 : vector<240x4xf32>
    %c1_60 = arith.constant 1 : index
    %c0_61 = arith.constant 0 : index
    %c0_62 = arith.constant 0 : index
    %c0_63 = arith.constant 0 : index
    %71 = vector.load %arg9[%c1_60, %c0_61, %c0_62, %c0_63] : memref<3x3x4x4xf32, #tpu.memory_space<vmem>>, vector<1x1x4x4xf32>
    %72 = vector.shape_cast %71 : vector<1x1x4x4xf32> to vector<4x4xf32>
    %cst_64 = arith.constant dense<0.000000e+00> : vector<240x4xf32>
    %73 = tpu.matmul %66, %72, %cst_64 {dimension_numbers = #tpu.dot_dimension_numbers<[1], [0], [0], [1], [0, 0, 1, 1], [], []>} : vector<240x4xf32>, vector<4x4xf32>, vector<240x4xf32> -> vector<240x4xf32>
    %74 = arith.addf %70, %73 : vector<240x4xf32>
    %75 = vector.extract_strided_slice %14 {offsets = [1, 1, 0], sizes = [10, 24, 4], strides = [1, 1, 1]} : vector<12x26x4xf32> to vector<10x24x4xf32>
    %76 = vector.shape_cast %75 : vector<10x24x4xf32> to vector<240x4xf32>
    %77 = vector.extract_strided_slice %25 {offsets = [1, 1, 0], sizes = [10, 24, 4], strides = [1, 1, 1]} : vector<12x26x4xf32> to vector<10x24x4xf32>
    %78 = vector.shape_cast %77 : vector<10x24x4xf32> to vector<240x4xf32>
    %c1_65 = arith.constant 1 : index
    %c1_66 = arith.constant 1 : index
    %c0_67 = arith.constant 0 : index
    %c0_68 = arith.constant 0 : index
    %79 = vector.load %arg8[%c1_65, %c1_66, %c0_67, %c0_68] : memref<3x3x4x4xf32, #tpu.memory_space<vmem>>, vector<1x1x4x4xf32>
    %80 = vector.shape_cast %79 : vector<1x1x4x4xf32> to vector<4x4xf32>
    %cst_69 = arith.constant dense<0.000000e+00> : vector<240x4xf32>
    %81 = tpu.matmul %76, %80, %cst_69 {dimension_numbers = #tpu.dot_dimension_numbers<[1], [0], [0], [1], [0, 0, 1, 1], [], []>} : vector<240x4xf32>, vector<4x4xf32>, vector<240x4xf32> -> vector<240x4xf32>
    %82 = arith.addf %74, %81 : vector<240x4xf32>
    %c1_70 = arith.constant 1 : index
    %c1_71 = arith.constant 1 : index
    %c0_72 = arith.constant 0 : index
    %c0_73 = arith.constant 0 : index
    %83 = vector.load %arg9[%c1_70, %c1_71, %c0_72, %c0_73] : memref<3x3x4x4xf32, #tpu.memory_space<vmem>>, vector<1x1x4x4xf32>
    %84 = vector.shape_cast %83 : vector<1x1x4x4xf32> to vector<4x4xf32>
    %cst_74 = arith.constant dense<0.000000e+00> : vector<240x4xf32>
    %85 = tpu.matmul %78, %84, %cst_74 {dimension_numbers = #tpu.dot_dimension_numbers<[1], [0], [0], [1], [0, 0, 1, 1], [], []>} : vector<240x4xf32>, vector<4x4xf32>, vector<240x4xf32> -> vector<240x4xf32>
    %86 = arith.addf %82, %85 : vector<240x4xf32>
    %87 = vector.extract_strided_slice %14 {offsets = [1, 2, 0], sizes = [10, 24, 4], strides = [1, 1, 1]} : vector<12x26x4xf32> to vector<10x24x4xf32>
    %88 = vector.shape_cast %87 : vector<10x24x4xf32> to vector<240x4xf32>
    %89 = vector.extract_strided_slice %25 {offsets = [1, 2, 0], sizes = [10, 24, 4], strides = [1, 1, 1]} : vector<12x26x4xf32> to vector<10x24x4xf32>
    %90 = vector.shape_cast %89 : vector<10x24x4xf32> to vector<240x4xf32>
    %c1_75 = arith.constant 1 : index
    %c2_76 = arith.constant 2 : index
    %c0_77 = arith.constant 0 : index
    %c0_78 = arith.constant 0 : index
    %91 = vector.load %arg8[%c1_75, %c2_76, %c0_77, %c0_78] : memref<3x3x4x4xf32, #tpu.memory_space<vmem>>, vector<1x1x4x4xf32>
    %92 = vector.shape_cast %91 : vector<1x1x4x4xf32> to vector<4x4xf32>
    %cst_79 = arith.constant dense<0.000000e+00> : vector<240x4xf32>
    %93 = tpu.matmul %88, %92, %cst_79 {dimension_numbers = #tpu.dot_dimension_numbers<[1], [0], [0], [1], [0, 0, 1, 1], [], []>} : vector<240x4xf32>, vector<4x4xf32>, vector<240x4xf32> -> vector<240x4xf32>
    %94 = arith.addf %86, %93 : vector<240x4xf32>
    %c1_80 = arith.constant 1 : index
    %c2_81 = arith.constant 2 : index
    %c0_82 = arith.constant 0 : index
    %c0_83 = arith.constant 0 : index
    %95 = vector.load %arg9[%c1_80, %c2_81, %c0_82, %c0_83] : memref<3x3x4x4xf32, #tpu.memory_space<vmem>>, vector<1x1x4x4xf32>
    %96 = vector.shape_cast %95 : vector<1x1x4x4xf32> to vector<4x4xf32>
    %cst_84 = arith.constant dense<0.000000e+00> : vector<240x4xf32>
    %97 = tpu.matmul %90, %96, %cst_84 {dimension_numbers = #tpu.dot_dimension_numbers<[1], [0], [0], [1], [0, 0, 1, 1], [], []>} : vector<240x4xf32>, vector<4x4xf32>, vector<240x4xf32> -> vector<240x4xf32>
    %98 = arith.addf %94, %97 : vector<240x4xf32>
    %99 = vector.extract_strided_slice %14 {offsets = [2, 0, 0], sizes = [10, 24, 4], strides = [1, 1, 1]} : vector<12x26x4xf32> to vector<10x24x4xf32>
    %100 = vector.shape_cast %99 : vector<10x24x4xf32> to vector<240x4xf32>
    %101 = vector.extract_strided_slice %25 {offsets = [2, 0, 0], sizes = [10, 24, 4], strides = [1, 1, 1]} : vector<12x26x4xf32> to vector<10x24x4xf32>
    %102 = vector.shape_cast %101 : vector<10x24x4xf32> to vector<240x4xf32>
    %c2_85 = arith.constant 2 : index
    %c0_86 = arith.constant 0 : index
    %c0_87 = arith.constant 0 : index
    %c0_88 = arith.constant 0 : index
    %103 = vector.load %arg8[%c2_85, %c0_86, %c0_87, %c0_88] : memref<3x3x4x4xf32, #tpu.memory_space<vmem>>, vector<1x1x4x4xf32>
    %104 = vector.shape_cast %103 : vector<1x1x4x4xf32> to vector<4x4xf32>
    %cst_89 = arith.constant dense<0.000000e+00> : vector<240x4xf32>
    %105 = tpu.matmul %100, %104, %cst_89 {dimension_numbers = #tpu.dot_dimension_numbers<[1], [0], [0], [1], [0, 0, 1, 1], [], []>} : vector<240x4xf32>, vector<4x4xf32>, vector<240x4xf32> -> vector<240x4xf32>
    %106 = arith.addf %98, %105 : vector<240x4xf32>
    %c2_90 = arith.constant 2 : index
    %c0_91 = arith.constant 0 : index
    %c0_92 = arith.constant 0 : index
    %c0_93 = arith.constant 0 : index
    %107 = vector.load %arg9[%c2_90, %c0_91, %c0_92, %c0_93] : memref<3x3x4x4xf32, #tpu.memory_space<vmem>>, vector<1x1x4x4xf32>
    %108 = vector.shape_cast %107 : vector<1x1x4x4xf32> to vector<4x4xf32>
    %cst_94 = arith.constant dense<0.000000e+00> : vector<240x4xf32>
    %109 = tpu.matmul %102, %108, %cst_94 {dimension_numbers = #tpu.dot_dimension_numbers<[1], [0], [0], [1], [0, 0, 1, 1], [], []>} : vector<240x4xf32>, vector<4x4xf32>, vector<240x4xf32> -> vector<240x4xf32>
    %110 = arith.addf %106, %109 : vector<240x4xf32>
    %111 = vector.extract_strided_slice %14 {offsets = [2, 1, 0], sizes = [10, 24, 4], strides = [1, 1, 1]} : vector<12x26x4xf32> to vector<10x24x4xf32>
    %112 = vector.shape_cast %111 : vector<10x24x4xf32> to vector<240x4xf32>
    %113 = vector.extract_strided_slice %25 {offsets = [2, 1, 0], sizes = [10, 24, 4], strides = [1, 1, 1]} : vector<12x26x4xf32> to vector<10x24x4xf32>
    %114 = vector.shape_cast %113 : vector<10x24x4xf32> to vector<240x4xf32>
    %c2_95 = arith.constant 2 : index
    %c1_96 = arith.constant 1 : index
    %c0_97 = arith.constant 0 : index
    %c0_98 = arith.constant 0 : index
    %115 = vector.load %arg8[%c2_95, %c1_96, %c0_97, %c0_98] : memref<3x3x4x4xf32, #tpu.memory_space<vmem>>, vector<1x1x4x4xf32>
    %116 = vector.shape_cast %115 : vector<1x1x4x4xf32> to vector<4x4xf32>
    %cst_99 = arith.constant dense<0.000000e+00> : vector<240x4xf32>
    %117 = tpu.matmul %112, %116, %cst_99 {dimension_numbers = #tpu.dot_dimension_numbers<[1], [0], [0], [1], [0, 0, 1, 1], [], []>} : vector<240x4xf32>, vector<4x4xf32>, vector<240x4xf32> -> vector<240x4xf32>
    %118 = arith.addf %110, %117 : vector<240x4xf32>
    %c2_100 = arith.constant 2 : index
    %c1_101 = arith.constant 1 : index
    %c0_102 = arith.constant 0 : index
    %c0_103 = arith.constant 0 : index
    %119 = vector.load %arg9[%c2_100, %c1_101, %c0_102, %c0_103] : memref<3x3x4x4xf32, #tpu.memory_space<vmem>>, vector<1x1x4x4xf32>
    %120 = vector.shape_cast %119 : vector<1x1x4x4xf32> to vector<4x4xf32>
    %cst_104 = arith.constant dense<0.000000e+00> : vector<240x4xf32>
    %121 = tpu.matmul %114, %120, %cst_104 {dimension_numbers = #tpu.dot_dimension_numbers<[1], [0], [0], [1], [0, 0, 1, 1], [], []>} : vector<240x4xf32>, vector<4x4xf32>, vector<240x4xf32> -> vector<240x4xf32>
    %122 = arith.addf %118, %121 : vector<240x4xf32>
    %123 = vector.extract_strided_slice %14 {offsets = [2, 2, 0], sizes = [10, 24, 4], strides = [1, 1, 1]} : vector<12x26x4xf32> to vector<10x24x4xf32>
    %124 = vector.shape_cast %123 : vector<10x24x4xf32> to vector<240x4xf32>
    %125 = vector.extract_strided_slice %25 {offsets = [2, 2, 0], sizes = [10, 24, 4], strides = [1, 1, 1]} : vector<12x26x4xf32> to vector<10x24x4xf32>
    %126 = vector.shape_cast %125 : vector<10x24x4xf32> to vector<240x4xf32>
    %c2_105 = arith.constant 2 : index
    %c2_106 = arith.constant 2 : index
    %c0_107 = arith.constant 0 : index
    %c0_108 = arith.constant 0 : index
    %127 = vector.load %arg8[%c2_105, %c2_106, %c0_107, %c0_108] : memref<3x3x4x4xf32, #tpu.memory_space<vmem>>, vector<1x1x4x4xf32>
    %128 = vector.shape_cast %127 : vector<1x1x4x4xf32> to vector<4x4xf32>
    %cst_109 = arith.constant dense<0.000000e+00> : vector<240x4xf32>
    %129 = tpu.matmul %124, %128, %cst_109 {dimension_numbers = #tpu.dot_dimension_numbers<[1], [0], [0], [1], [0, 0, 1, 1], [], []>} : vector<240x4xf32>, vector<4x4xf32>, vector<240x4xf32> -> vector<240x4xf32>
    %130 = arith.addf %122, %129 : vector<240x4xf32>
    %c2_110 = arith.constant 2 : index
    %c2_111 = arith.constant 2 : index
    %c0_112 = arith.constant 0 : index
    %c0_113 = arith.constant 0 : index
    %131 = vector.load %arg9[%c2_110, %c2_111, %c0_112, %c0_113] : memref<3x3x4x4xf32, #tpu.memory_space<vmem>>, vector<1x1x4x4xf32>
    %132 = vector.shape_cast %131 : vector<1x1x4x4xf32> to vector<4x4xf32>
    %cst_114 = arith.constant dense<0.000000e+00> : vector<240x4xf32>
    %133 = tpu.matmul %126, %132, %cst_114 {dimension_numbers = #tpu.dot_dimension_numbers<[1], [0], [0], [1], [0, 0, 1, 1], [], []>} : vector<240x4xf32>, vector<4x4xf32>, vector<240x4xf32> -> vector<240x4xf32>
    %134 = arith.addf %130, %133 : vector<240x4xf32>
    %c0_115 = arith.constant 0 : index
    %c0_116 = arith.constant 0 : index
    %135 = vector.load %arg10[%c0_115, %c0_116] : memref<1x4xf32, #tpu.memory_space<vmem>>, vector<1x4xf32>
    %136 = vector.broadcast %135 : vector<1x4xf32> to vector<240x4xf32>
    %137 = arith.addf %134, %136 : vector<240x4xf32>
    %cst_117 = arith.constant 0.000000e+00 : f32
    %138 = vector.broadcast %cst_117 : f32 to vector<240x4xf32>
    %139 = arith.maximumf %137, %138 : vector<240x4xf32>
    %140 = vector.shape_cast %139 : vector<240x4xf32> to vector<10x24x4xf32>
    %141 = tpu.iota {dimensions = array<i32: 0>} : vector<10x24x1xi32>
    %142 = tpu.iota {dimensions = array<i32: 1>} : vector<10x24x1xi32>
    %c3_i32 = arith.constant 3 : i32
    %143 = vector.broadcast %c3_i32 : i32 to vector<10x24x1xi32>
    %144 = arith.cmpi eq, %142, %143 : vector<10x24x1xi32>
    %c20_i32 = arith.constant 20 : i32
    %145 = vector.broadcast %c20_i32 : i32 to vector<10x24x1xi32>
    %146 = arith.cmpi eq, %142, %145 : vector<10x24x1xi32>
    %147 = arith.ori %144, %146 : vector<10x24x1xi1>
    %c0_i32_118 = arith.constant 0 : i32
    %148 = vector.broadcast %c0_i32_118 : i32 to vector<10x24x1xi32>
    %149 = arith.cmpi eq, %141, %148 : vector<10x24x1xi32>
    %150 = vector.broadcast %0 : i1 to vector<10x24x1xi1>
    %151 = arith.andi %149, %150 : vector<10x24x1xi1>
    %152 = arith.ori %147, %151 : vector<10x24x1xi1>
    %c9_i32 = arith.constant 9 : i32
    %153 = vector.broadcast %c9_i32 : i32 to vector<10x24x1xi32>
    %154 = arith.cmpi eq, %141, %153 : vector<10x24x1xi32>
    %155 = vector.broadcast %1 : i1 to vector<10x24x1xi1>
    %156 = arith.andi %154, %155 : vector<10x24x1xi1>
    %157 = arith.ori %152, %156 : vector<10x24x1xi1>
    %cst_119 = arith.constant 0.000000e+00 : f32
    %158 = vector.shape_cast %157 : vector<10x24x1xi1> to vector<10x24x1xi1>
    %159 = vector.broadcast %158 : vector<10x24x1xi1> to vector<10x24x4xi1>
    %160 = vector.broadcast %cst_119 : f32 to vector<10x24x4xf32>
    %161 = arith.select %159, %160, %140 : vector<10x24x4xi1>, vector<10x24x4xf32>
    %cst_120 = arith.constant 0.000000e+00 : f32
    %162 = vector.broadcast %cst_120 : f32 to vector<128x4xf32>
    %163 = vector.extract_strided_slice %161 {offsets = [0, 3, 0], sizes = [8, 16, 4], strides = [1, 1, 1]} : vector<10x24x4xf32> to vector<8x16x4xf32>
    %164 = vector.shape_cast %163 : vector<8x16x4xf32> to vector<128x4xf32>
    %c0_121 = arith.constant 0 : index
    %c0_122 = arith.constant 0 : index
    %c0_123 = arith.constant 0 : index
    %c0_124 = arith.constant 0 : index
    %165 = vector.load %arg11[%c0_121, %c0_122, %c0_123, %c0_124] : memref<3x3x4x4xf32, #tpu.memory_space<vmem>>, vector<1x1x4x4xf32>
    %166 = vector.shape_cast %165 : vector<1x1x4x4xf32> to vector<4x4xf32>
    %cst_125 = arith.constant dense<0.000000e+00> : vector<128x4xf32>
    %167 = tpu.matmul %164, %166, %cst_125 {dimension_numbers = #tpu.dot_dimension_numbers<[1], [0], [0], [1], [0, 0, 1, 1], [], []>} : vector<128x4xf32>, vector<4x4xf32>, vector<128x4xf32> -> vector<128x4xf32>
    %168 = arith.addf %162, %167 : vector<128x4xf32>
    %169 = vector.extract_strided_slice %161 {offsets = [0, 4, 0], sizes = [8, 16, 4], strides = [1, 1, 1]} : vector<10x24x4xf32> to vector<8x16x4xf32>
    %170 = vector.shape_cast %169 : vector<8x16x4xf32> to vector<128x4xf32>
    %c0_126 = arith.constant 0 : index
    %c1_127 = arith.constant 1 : index
    %c0_128 = arith.constant 0 : index
    %c0_129 = arith.constant 0 : index
    %171 = vector.load %arg11[%c0_126, %c1_127, %c0_128, %c0_129] : memref<3x3x4x4xf32, #tpu.memory_space<vmem>>, vector<1x1x4x4xf32>
    %172 = vector.shape_cast %171 : vector<1x1x4x4xf32> to vector<4x4xf32>
    %cst_130 = arith.constant dense<0.000000e+00> : vector<128x4xf32>
    %173 = tpu.matmul %170, %172, %cst_130 {dimension_numbers = #tpu.dot_dimension_numbers<[1], [0], [0], [1], [0, 0, 1, 1], [], []>} : vector<128x4xf32>, vector<4x4xf32>, vector<128x4xf32> -> vector<128x4xf32>
    %174 = arith.addf %168, %173 : vector<128x4xf32>
    %175 = vector.extract_strided_slice %161 {offsets = [0, 5, 0], sizes = [8, 16, 4], strides = [1, 1, 1]} : vector<10x24x4xf32> to vector<8x16x4xf32>
    %176 = vector.shape_cast %175 : vector<8x16x4xf32> to vector<128x4xf32>
    %c0_131 = arith.constant 0 : index
    %c2_132 = arith.constant 2 : index
    %c0_133 = arith.constant 0 : index
    %c0_134 = arith.constant 0 : index
    %177 = vector.load %arg11[%c0_131, %c2_132, %c0_133, %c0_134] : memref<3x3x4x4xf32, #tpu.memory_space<vmem>>, vector<1x1x4x4xf32>
    %178 = vector.shape_cast %177 : vector<1x1x4x4xf32> to vector<4x4xf32>
    %cst_135 = arith.constant dense<0.000000e+00> : vector<128x4xf32>
    %179 = tpu.matmul %176, %178, %cst_135 {dimension_numbers = #tpu.dot_dimension_numbers<[1], [0], [0], [1], [0, 0, 1, 1], [], []>} : vector<128x4xf32>, vector<4x4xf32>, vector<128x4xf32> -> vector<128x4xf32>
    %180 = arith.addf %174, %179 : vector<128x4xf32>
    %181 = vector.extract_strided_slice %161 {offsets = [1, 3, 0], sizes = [8, 16, 4], strides = [1, 1, 1]} : vector<10x24x4xf32> to vector<8x16x4xf32>
    %182 = vector.shape_cast %181 : vector<8x16x4xf32> to vector<128x4xf32>
    %c1_136 = arith.constant 1 : index
    %c0_137 = arith.constant 0 : index
    %c0_138 = arith.constant 0 : index
    %c0_139 = arith.constant 0 : index
    %183 = vector.load %arg11[%c1_136, %c0_137, %c0_138, %c0_139] : memref<3x3x4x4xf32, #tpu.memory_space<vmem>>, vector<1x1x4x4xf32>
    %184 = vector.shape_cast %183 : vector<1x1x4x4xf32> to vector<4x4xf32>
    %cst_140 = arith.constant dense<0.000000e+00> : vector<128x4xf32>
    %185 = tpu.matmul %182, %184, %cst_140 {dimension_numbers = #tpu.dot_dimension_numbers<[1], [0], [0], [1], [0, 0, 1, 1], [], []>} : vector<128x4xf32>, vector<4x4xf32>, vector<128x4xf32> -> vector<128x4xf32>
    %186 = arith.addf %180, %185 : vector<128x4xf32>
    %187 = vector.extract_strided_slice %161 {offsets = [1, 4, 0], sizes = [8, 16, 4], strides = [1, 1, 1]} : vector<10x24x4xf32> to vector<8x16x4xf32>
    %188 = vector.shape_cast %187 : vector<8x16x4xf32> to vector<128x4xf32>
    %c1_141 = arith.constant 1 : index
    %c1_142 = arith.constant 1 : index
    %c0_143 = arith.constant 0 : index
    %c0_144 = arith.constant 0 : index
    %189 = vector.load %arg11[%c1_141, %c1_142, %c0_143, %c0_144] : memref<3x3x4x4xf32, #tpu.memory_space<vmem>>, vector<1x1x4x4xf32>
    %190 = vector.shape_cast %189 : vector<1x1x4x4xf32> to vector<4x4xf32>
    %cst_145 = arith.constant dense<0.000000e+00> : vector<128x4xf32>
    %191 = tpu.matmul %188, %190, %cst_145 {dimension_numbers = #tpu.dot_dimension_numbers<[1], [0], [0], [1], [0, 0, 1, 1], [], []>} : vector<128x4xf32>, vector<4x4xf32>, vector<128x4xf32> -> vector<128x4xf32>
    %192 = arith.addf %186, %191 : vector<128x4xf32>
    %193 = vector.extract_strided_slice %161 {offsets = [1, 5, 0], sizes = [8, 16, 4], strides = [1, 1, 1]} : vector<10x24x4xf32> to vector<8x16x4xf32>
    %194 = vector.shape_cast %193 : vector<8x16x4xf32> to vector<128x4xf32>
    %c1_146 = arith.constant 1 : index
    %c2_147 = arith.constant 2 : index
    %c0_148 = arith.constant 0 : index
    %c0_149 = arith.constant 0 : index
    %195 = vector.load %arg11[%c1_146, %c2_147, %c0_148, %c0_149] : memref<3x3x4x4xf32, #tpu.memory_space<vmem>>, vector<1x1x4x4xf32>
    %196 = vector.shape_cast %195 : vector<1x1x4x4xf32> to vector<4x4xf32>
    %cst_150 = arith.constant dense<0.000000e+00> : vector<128x4xf32>
    %197 = tpu.matmul %194, %196, %cst_150 {dimension_numbers = #tpu.dot_dimension_numbers<[1], [0], [0], [1], [0, 0, 1, 1], [], []>} : vector<128x4xf32>, vector<4x4xf32>, vector<128x4xf32> -> vector<128x4xf32>
    %198 = arith.addf %192, %197 : vector<128x4xf32>
    %199 = vector.extract_strided_slice %161 {offsets = [2, 3, 0], sizes = [8, 16, 4], strides = [1, 1, 1]} : vector<10x24x4xf32> to vector<8x16x4xf32>
    %200 = vector.shape_cast %199 : vector<8x16x4xf32> to vector<128x4xf32>
    %c2_151 = arith.constant 2 : index
    %c0_152 = arith.constant 0 : index
    %c0_153 = arith.constant 0 : index
    %c0_154 = arith.constant 0 : index
    %201 = vector.load %arg11[%c2_151, %c0_152, %c0_153, %c0_154] : memref<3x3x4x4xf32, #tpu.memory_space<vmem>>, vector<1x1x4x4xf32>
    %202 = vector.shape_cast %201 : vector<1x1x4x4xf32> to vector<4x4xf32>
    %cst_155 = arith.constant dense<0.000000e+00> : vector<128x4xf32>
    %203 = tpu.matmul %200, %202, %cst_155 {dimension_numbers = #tpu.dot_dimension_numbers<[1], [0], [0], [1], [0, 0, 1, 1], [], []>} : vector<128x4xf32>, vector<4x4xf32>, vector<128x4xf32> -> vector<128x4xf32>
    %204 = arith.addf %198, %203 : vector<128x4xf32>
    %205 = vector.extract_strided_slice %161 {offsets = [2, 4, 0], sizes = [8, 16, 4], strides = [1, 1, 1]} : vector<10x24x4xf32> to vector<8x16x4xf32>
    %206 = vector.shape_cast %205 : vector<8x16x4xf32> to vector<128x4xf32>
    %c2_156 = arith.constant 2 : index
    %c1_157 = arith.constant 1 : index
    %c0_158 = arith.constant 0 : index
    %c0_159 = arith.constant 0 : index
    %207 = vector.load %arg11[%c2_156, %c1_157, %c0_158, %c0_159] : memref<3x3x4x4xf32, #tpu.memory_space<vmem>>, vector<1x1x4x4xf32>
    %208 = vector.shape_cast %207 : vector<1x1x4x4xf32> to vector<4x4xf32>
    %cst_160 = arith.constant dense<0.000000e+00> : vector<128x4xf32>
    %209 = tpu.matmul %206, %208, %cst_160 {dimension_numbers = #tpu.dot_dimension_numbers<[1], [0], [0], [1], [0, 0, 1, 1], [], []>} : vector<128x4xf32>, vector<4x4xf32>, vector<128x4xf32> -> vector<128x4xf32>
    %210 = arith.addf %204, %209 : vector<128x4xf32>
    %211 = vector.extract_strided_slice %161 {offsets = [2, 5, 0], sizes = [8, 16, 4], strides = [1, 1, 1]} : vector<10x24x4xf32> to vector<8x16x4xf32>
    %212 = vector.shape_cast %211 : vector<8x16x4xf32> to vector<128x4xf32>
    %c2_161 = arith.constant 2 : index
    %c2_162 = arith.constant 2 : index
    %c0_163 = arith.constant 0 : index
    %c0_164 = arith.constant 0 : index
    %213 = vector.load %arg11[%c2_161, %c2_162, %c0_163, %c0_164] : memref<3x3x4x4xf32, #tpu.memory_space<vmem>>, vector<1x1x4x4xf32>
    %214 = vector.shape_cast %213 : vector<1x1x4x4xf32> to vector<4x4xf32>
    %cst_165 = arith.constant dense<0.000000e+00> : vector<128x4xf32>
    %215 = tpu.matmul %212, %214, %cst_165 {dimension_numbers = #tpu.dot_dimension_numbers<[1], [0], [0], [1], [0, 0, 1, 1], [], []>} : vector<128x4xf32>, vector<4x4xf32>, vector<128x4xf32> -> vector<128x4xf32>
    %216 = arith.addf %210, %215 : vector<128x4xf32>
    %c0_166 = arith.constant 0 : index
    %c0_167 = arith.constant 0 : index
    %217 = vector.load %arg12[%c0_166, %c0_167] : memref<1x4xf32, #tpu.memory_space<vmem>>, vector<1x4xf32>
    %218 = vector.broadcast %217 : vector<1x4xf32> to vector<128x4xf32>
    %219 = arith.addf %216, %218 : vector<128x4xf32>
    %cst_168 = arith.constant 0.000000e+00 : f32
    %220 = vector.broadcast %cst_168 : f32 to vector<128x4xf32>
    %221 = arith.maximumf %219, %220 : vector<128x4xf32>
    %222 = vector.shape_cast %221 : vector<128x4xf32> to vector<1x8x16x4xf32>
    %c0_169 = arith.constant 0 : index
    %c0_170 = arith.constant 0 : index
    %c0_171 = arith.constant 0 : index
    %c0_172 = arith.constant 0 : index
    %223 = vector.load %arg13[%c0_169, %c0_170, %c0_171, %c0_172] : memref<1x8x16x4xf32, #tpu.memory_space<vmem>>, vector<1x8x16x4xf32>
    tpu.vector_store %arg13[%c0_169, %c0_170, %c0_171, %c0_172], %222 {strides = array<i32>} : memref<1x8x16x4xf32, #tpu.memory_space<vmem>>, vector<1x8x16x4xf32>,
    return
  }
  func.func @transform_0(%arg0: i32, %arg1: i32) -> (i32, i32, i32, i32) {
    %c0_i32 = arith.constant 0 : i32
    %c0_i32_0 = arith.constant 0 : i32
    %c0_i32_1 = arith.constant 0 : i32
    return %arg0, %arg1, %c0_i32, %c0_i32_0 : i32, i32, i32, i32
  }
  func.func @transform_1(%arg0: i32, %arg1: i32) -> (i32, i32, i32, i32) {
    %c4_i32 = arith.constant 4 : i32
    %0 = arith.muli %arg1, %c4_i32 : i32
    %c1_i32 = arith.constant 1 : i32
    %1 = arith.subi %0, %c1_i32 : i32
    %c0_i32 = arith.constant 0 : i32
    %2 = arith.maxsi %1, %c0_i32 : i32
    %c0_i32_0 = arith.constant 0 : i32
    %c0_i32_1 = arith.constant 0 : i32
    %c0_i32_2 = arith.constant 0 : i32
    return %arg0, %2, %c0_i32_0, %c0_i32_1 : i32, i32, i32, i32
  }
  func.func @transform_2(%arg0: i32, %arg1: i32) -> (i32, i32, i32, i32) {
    %c1_i32 = arith.constant 1 : i32
    %0 = arith.addi %arg1, %c1_i32 : i32
    %c4_i32 = arith.constant 4 : i32
    %1 = arith.muli %0, %c4_i32 : i32
    %c7_i32 = arith.constant 7 : i32
    %2 = arith.minsi %1, %c7_i32 : i32
    %c0_i32 = arith.constant 0 : i32
    %c0_i32_0 = arith.constant 0 : i32
    %c0_i32_1 = arith.constant 0 : i32
    return %arg0, %2, %c0_i32, %c0_i32_0 : i32, i32, i32, i32
  }
  func.func @transform_3(%arg0: i32, %arg1: i32) -> (i32, i32, i32, i32) {
    %c0_i32 = arith.constant 0 : i32
    %c0_i32_0 = arith.constant 0 : i32
    %c0_i32_1 = arith.constant 0 : i32
    return %arg0, %arg1, %c0_i32, %c0_i32_0 : i32, i32, i32, i32
  }
  func.func @transform_4(%arg0: i32, %arg1: i32) -> (i32, i32, i32, i32) {
    %c4_i32 = arith.constant 4 : i32
    %0 = arith.muli %arg1, %c4_i32 : i32
    %c1_i32 = arith.constant 1 : i32
    %1 = arith.subi %0, %c1_i32 : i32
    %c0_i32 = arith.constant 0 : i32
    %2 = arith.maxsi %1, %c0_i32 : i32
    %c0_i32_0 = arith.constant 0 : i32
    %c0_i32_1 = arith.constant 0 : i32
    %c0_i32_2 = arith.constant 0 : i32
    return %arg0, %2, %c0_i32_0, %c0_i32_1 : i32, i32, i32, i32
  }
  func.func @transform_5(%arg0: i32, %arg1: i32) -> (i32, i32, i32, i32) {
    %c1_i32 = arith.constant 1 : i32
    %0 = arith.addi %arg1, %c1_i32 : i32
    %c4_i32 = arith.constant 4 : i32
    %1 = arith.muli %0, %c4_i32 : i32
    %c7_i32 = arith.constant 7 : i32
    %2 = arith.minsi %1, %c7_i32 : i32
    %c0_i32 = arith.constant 0 : i32
    %c0_i32_0 = arith.constant 0 : i32
    %c0_i32_1 = arith.constant 0 : i32
    return %arg0, %2, %c0_i32, %c0_i32_0 : i32, i32, i32, i32
  }
  func.func @transform_6(%arg0: i32, %arg1: i32) -> (i32, i32, i32, i32) {
    %c0_i32 = arith.constant 0 : i32
    %c0_i32_0 = arith.constant 0 : i32
    %c0_i32_1 = arith.constant 0 : i32
    %c0_i32_2 = arith.constant 0 : i32
    %c0_i32_3 = arith.constant 0 : i32
    return %c0_i32, %c0_i32_0, %c0_i32_1, %c0_i32_2 : i32, i32, i32, i32
  }
  func.func @transform_7(%arg0: i32, %arg1: i32) -> (i32, i32, i32, i32) {
    %c0_i32 = arith.constant 0 : i32
    %c0_i32_0 = arith.constant 0 : i32
    %c0_i32_1 = arith.constant 0 : i32
    %c0_i32_2 = arith.constant 0 : i32
    %c0_i32_3 = arith.constant 0 : i32
    return %c0_i32, %c0_i32_0, %c0_i32_1, %c0_i32_2 : i32, i32, i32, i32
  }
  func.func @transform_8(%arg0: i32, %arg1: i32) -> (i32, i32) {
    %c0_i32 = arith.constant 0 : i32
    %c0_i32_0 = arith.constant 0 : i32
    %c0_i32_1 = arith.constant 0 : i32
    return %c0_i32, %c0_i32_0 : i32, i32
  }
  func.func @transform_9(%arg0: i32, %arg1: i32) -> (i32, i32, i32, i32) {
    %c0_i32 = arith.constant 0 : i32
    %c0_i32_0 = arith.constant 0 : i32
    %c0_i32_1 = arith.constant 0 : i32
    %c0_i32_2 = arith.constant 0 : i32
    %c0_i32_3 = arith.constant 0 : i32
    return %c0_i32, %c0_i32_0, %c0_i32_1, %c0_i32_2 : i32, i32, i32, i32
  }
  func.func @transform_10(%arg0: i32, %arg1: i32) -> (i32, i32) {
    %c0_i32 = arith.constant 0 : i32
    %c0_i32_0 = arith.constant 0 : i32
    %c0_i32_1 = arith.constant 0 : i32
    return %c0_i32, %c0_i32_0 : i32, i32
  }
  func.func @transform_11(%arg0: i32, %arg1: i32) -> (i32, i32, i32, i32) {
    %c0_i32 = arith.constant 0 : i32
    %c0_i32_0 = arith.constant 0 : i32
    %c0_i32_1 = arith.constant 0 : i32
    return %arg0, %arg1, %c0_i32, %c0_i32_0 : i32, i32, i32, i32
  }
}

</mosaic_0001>

<bundles_post_ra>
// kernel: unet_up_forward.1
= control target key start
LH: loop header
LB: loop body
LE: loop exit
PB: predicated region body
PF: predicated region fallthrough
CT: control target
= control target key end

     0   :  { %s11156_s17 = smov 0   ;;  %s11158_s18 = smov 0   ;;  %s15824_s0 = inlined_call_operand.vmem [shape: f32[2,16,26,4], index: 0, kind: input, shape index: {}, may-alias: {0,1,2}]   ;;  %s15825_s1 = inlined_call_operand.vmem [shape: f32[2,16,26,4], index: 1, kind: input, shape index: {}, may-alias: {0,1,2}]   ;;  %s15826_s2 = inlined_call_operand.vmem [shape: f32[2,16,26,4], index: 2, kind: input, shape index: {}, may-alias: {0,1,2}]   ;;  %s15827_s3 = inlined_call_operand.vmem [shape: f32[2,16,26,4], index: 3, kind: input, shape index: {}, may-alias: {3,4,5}]   ;;  %s15828_s4 = inlined_call_operand.vmem [shape: f32[2,16,26,4], index: 4, kind: input, shape index: {}, may-alias: {3,4,5}]   ;;  %s15829_s5 = inlined_call_operand.vmem [shape: f32[2,16,26,4], index: 5, kind: input, shape index: {}, may-alias: {3,4,5}]   ;;  %s15830_s6 = inlined_call_operand.vmem [shape: f32[3,3,4,4], index: 6, kind: input, shape index: {}]   ;;  %s15831_s7 = inlined_call_operand.vmem [shape: f32[3,3,4,4], index: 7, kind: input, shape index: {}]   ;;  %s15832_s8 = inlined_call_operand.vmem [shape: f32[1,4], index: 8, kind: input, shape index: {}]   ;;  %s15833_s9 = inlined_call_operand.vmem [shape: f32[3,3,4,4], index: 9, kind: input, shape index: {}]   ;;  %s15834_s10 = inlined_call_operand.vmem [shape: f32[1,4], index: 10, kind: input, shape index: {}]   ;;  %s15835_s11 = inlined_call_operand.vmem [shape: f32[2,16,16,4], index: 11, kind: output, shape index: {}]  }
   0x1   :  { %16109 = sst [smem:[#allocation108_spill]] %s15827_s3  ;;  %s11160_s19 = smov 0  }
   0x2   :  { %s11162_s20 = smov 0   ;;  %s11164_s21 = smov 0  }
   0x3 LB: > { %s30_s22 = sadd.s32 1, %s11086_s19  ;;  %s33_s23 = sadd.s32 1, %s11090_s20  ;;  %s11094_s21 = sphi %s11164_s21, %s21_s21   ;;  %s11090_s20 = sphi %s11162_s20, %s16749_s20   ;;  %s11086_s19 = sphi %s11160_s19, %s16748_s19   ;;  %s11082_s18 = sphi %s11158_s18, %s16747_s18   ;;  %s11078_s17 = sphi %s11156_s17, %s16746_s17  }
   0x4   : > { %p31_p0 = scmp.ge.s32.totalorder %s30_s22, 2  ;;  %p8365_p1 = scmp.ge.s32.totalorder %s11094_s21, 1 }
   0x5   : > { %p513_p2 = scmp.lt.s32.totalorder %s11094_s21, 5 }
   0x6   : > { %s16751_s22 = smov (%p31_p0, %s30_s22), 0  ;;  %s16753_s23 = smov (!%p31_p0, %s33_s23), %s11090_s20 }
   0x7   : > { %p514_p3 = pnand %p8365_p1, %p513_p2  ;;  %p35_p4 = scmp.ge.s32.totalorder %s16753_s23, 2 }
   0x9   : > { %s16755_s23 = smov (%p35_p4, %s16753_s23), 0  ;;  %517 = sbr.rel (%p514_p3) target bundleno = 1109 (0x455), region = 64 }
   0xa   : > { %16110 = sst [smem:[#allocation2_spill]] %s16755_s23 }
   0xe   : > { %v873_v0 = vld [vmem:[%s15831_s7] sm:$0xf]  ;;  %vm965_vm0 = vcmask 1043456   ;;  %s8366_s26 = sshll.u32 %s11078_s17, 3  ;;  %p630_p5 = scmp.lt.s32.totalorder %s11082_s18, 1  ;;  %vm874_vm1 = vcmask 31744  }
   0xf   : > { %10942 = vmatprep.subr.msk.mxu1 %vm965_vm0, %v873_v0  ;;  %p632_p6 = scmp.lt.s32.totalorder %s8366_s26, 15  ;;  %v872_v1 = vld [vmem:[%s15830_s6] sm:$0xf]  ;;  %9862 = vmatprep.subr.msk.mxu0 %vm965_vm0, %v873_v0  ;;  %s15836_s29 = sshll.u32 %s11078_s17, 2  ;;  %v11205_v2 = vld [vmem:[%s15830_s6 + $0x4] sm:$0xf] }
  0x10   : > { %10943 = vmatpush3.msk.msra.mxu1 %vm965_vm0, %v873_v0  ;;  %s16757_s18 = smov (!%p630_p5, %s11082_s18), 1  ;;  %9863 = vmatpush3.msk.msra.mxu0 %vm965_vm0, %v873_v0  ;;  %s8371_s14 = sadd.s32 4294967295, %s15836_s29  ;;  %v8494_v6 = vld [vmem:[%s15831_s7 + $0x4] sm:$0xf]  ;;  %v11318_v26 = vld [vmem:[%s15830_s6 + $0x8] sm:$0xf] }
  0x11   : > { %s16759_s26 = smov (!%p632_p6, %s8366_s26), 15  ;;  %9909 = vmatprep.subr.msk.mxu1 %vm965_vm0, %v872_v1  ;;  %9956 = vmatprep.subr.msk.mxu0 %vm965_vm0, %v11205_v2  ;;  %s11213_s13 = sshll.u32 %s16757_s18, 6  ;;  %v11350_v34 = vld [vmem:[%s15831_s7 + $0x8] sm:$0xf]  ;;  %vm2273_vm2 = vcmask 1045504   ;;  %vm1502_vm3 = vcmask 1046528  }
  0x12   : > { %s8367_s15 = sshll.u32 %s16759_s26, 2  ;;  %p642_p7 = scmp.gt.s32.totalorder %s8371_s14, 0  ;;  %vm6351_vm8 = vcmask 1044480   ;;  %vm6795_vm10 = vcmask 1042432  }
  0x13   : > { %s11219_s16 = sadd.s32 %s11213_s13, %s8367_s15  ;;  %s16111_s3 = sld [smem:[#allocation108_spill]] }
  0x14   : > { %s15837_s24 = sshll.u32 %s11219_s16, 3  ;;  %p738_p8 = scmp.eq.s32.totalorder %s11078_s17, 0 }
  0x15   : > { %s16761_s14 = smov (!%p642_p7, %s8371_s14), 0  ;;  %p739_p12 = scmp.eq.s32.totalorder %s11078_s17, 1 }
  0x16   : > { %s8372_s15 = sshll.u32 %s16761_s14, 1 }
  0x17   : > { %p647_p9 = scmp.lt.s32.totalorder %s8372_s15, 15 }
  0x18   : > { %s740_s25 = scalar_select %p738_p8, 0.0, 1.0 }
  0x19   : > { %s11227_s28 = scalar_lea.vmem %s16111_s3, %s15837_s24  ;;  %s16763_s15 = smov (!%p647_p9, %s8372_s15), 15 }
  0x1a   : > { %v11231_v3 = vld [vmem:[%s11227_s28 + $0xa8] sm:$0xff]  ;;  %v11234_v4 = vld [vmem:[%s11227_s28 + $0xb0] sm:$0xff]  ;;  %v11237_v5 = vld [vmem:[%s11227_s28 + $0xc0] sm:$0xff]  ;;  %s8373_s14 = sshll.u32 %s16763_s15, 2  ;;  %v11269_v11 = vstv %s740_s25 }
  0x1b   : > { %9897 = vmatprep.mubr.msk.f32.mxu1 %vm874_vm1, %v11231_v3  ;;  %v11250_v7 = vld [vmem:[%s11227_s28 + $0xc8] sm:$0xff]  ;;  %v11255_v8 = vld [vmem:[%s11227_s28 + $0xd0] sm:$0xff]  ;;  %v11263_v9 = vld [vmem:[%s11227_s28 + $0xe0] sm:$0xff]  ;;  %s651_s27 = sadd.s32 %s8373_s14, %s11213_s13  ;;  %s16121_s14 = sshll.u32 %s11219_s16, 3 }
  0x1c   : > { %9898 = vmatmul.mubr.msk.f32.vlgmr.msra.gmra.mxu1 %vm874_vm1, %v11234_v4  ;;  %16112 = vst [vmem:[#allocation3_spill] sm:$0xff] %v11250_v7  ;;  %16113 = vst [vmem:[#allocation4_spill] sm:$0xff] %v11255_v8  ;;  %v11267_v10 = vld [vmem:[%s11227_s28 + $0xe8] sm:$0xff]  ;;  %s8375_s30 = sshll.u32 %s651_s27, 3  ;;  %v11284_v12 = vld [vmem:[%s11227_s28 + $0xf0] sm:$0xff]  ;;  %s11374_s12 = scalar_lea.vmem %s15824_s0, %s16121_s14 }
  0x1d   : > { %9910 = vmatpush3.msk.msra.mxu1 %vm965_vm0, %v872_v1  ;;  %9900 = vmatprep.mubr.msk.f32.mxu1 %vm874_vm1, %v11237_v5  ;;  %16114 = vst [vmem:[#allocation5_spill] sm:$0xff] %v11263_v9  ;;  %16115 = vst [vmem:[#allocation6_spill] sm:$0xff] %v11267_v10  ;;  %s11274_s24 = scalar_lea.vmem %s15825_s1, %s8375_s30  ;;  %s11279_s15 = scalar_lea.vmem %s15828_s4, %s8375_s30  ;;  %v11367_v38 = vld [vmem:[%s11227_s28] sm:$0xff]  ;;  %v11391_v41 = vld [vmem:[%s11227_s28 + $0x8] sm:$0xff] }
  0x1e   : > { %10003 = vmatprep.subr.msk.mxu1 %vm965_vm0, %v8494_v6  ;;  %16116 = vst [vmem:[#allocation7_spill] sm:$0xff] %v11284_v12  ;;  %v808_v13 = vld [vmem:[%s11279_s15] sm:$0xff]  ;;  %v809_v14 = vld [vmem:[%s11279_s15 + $0x8] sm:$0xff]  ;;  %v810_v15 = vld [vmem:[%s11279_s15 + $0x10] sm:$0xff]  ;;  %s16286_s16 = sshll.u32 %s11078_s17, 2 }
  0x1f   : > { %v11292_v16 = vmul.f32 %v808_v13, %v11269_v11  ;;  %v11295_v17 = vmul.f32 %v809_v14, %v11269_v11  ;;  %v11298_v18 = vmul.f32 %v810_v15, %v11269_v11  ;;  %v812_v19 = vld [vmem:[%s11279_s15 + $0x20] sm:$0xff]  ;;  %v813_v21 = vld [vmem:[%s11279_s15 + $0x28] sm:$0xff]  ;;  %v744_v24 = vld [vmem:[%s11274_s24 + $0x10] sm:$0xff]  ;;  %16120 = vst [vmem:[#allocation11_spill] sm:$0xff] %v11367_v38 }
  0x20   : > { %9901 = vmatmul.mubr.msk.f32.gmra.mxu1 %vm874_vm1, %v11250_v7  ;;  %v742_v20 = vld [vmem:[%s11274_s24] sm:$0xff]  ;;  %v743_v23 = vld [vmem:[%s11274_s24 + $0x8] sm:$0xff]  ;;  %v11323_v27 = vmul.f32 %v812_v19, %v11269_v11  ;;  %v11331_v29 = vmul.f32 %v813_v21, %v11269_v11  ;;  %v814_v30 = vld [vmem:[%s11279_s15 + $0x30] sm:$0xff]  ;;  %v11335_v31 = vmul.f32 %v11269_v11, %v744_v24  ;;  %16123 = vst [vmem:[#allocation13_spill] sm:$0xff] %v11391_v41 }
  0x21   : > { %9903 = vmatprep.mubr.msk.f32.mxu1 %vm874_vm1, %v11255_v8  ;;  %16117 = vst [vmem:[#allocation8_spill] sm:$0xff] %v11298_v18  ;;  %v11304_v22 = vmul.f32 %v11269_v11, %v742_v20  ;;  %9864 = vmatprep.mubr.msk.f32.mxu0 %vm874_vm1, %v11292_v16  ;;  %v11313_v25 = vmul.f32 %v11269_v11, %v743_v23  ;;  %v746_v28 = vld [vmem:[%s11274_s24 + $0x20] sm:$0xff]  ;;  %v747_v32 = vld [vmem:[%s11274_s24 + $0x28] sm:$0xff]  ;;  %v748_v37 = vld [vmem:[%s11274_s24 + $0x30] sm:$0xff]  ;;  %v15842_v20 = vrot.slane %v11298_v18, 2 }
  0x22   : > { %9865 = vmatmul.mubr.msk.f32.vlgmr.msra.gmra.mxu0 %vm874_vm1, %v11295_v17  ;;  %16118 = vst [vmem:[#allocation9_spill] sm:$0xff] %v11331_v29  ;;  %16119 = vst [vmem:[#allocation10_spill] sm:$0xff] %v11335_v31  ;;  %v11345_v33 = vmul.f32 %v11269_v11, %v746_v28  ;;  %v11355_v35 = vmul.f32 %v814_v30, %v11269_v11  ;;  %v11359_v36 = vmul.f32 %v11269_v11, %v747_v32  ;;  %v815_v40 = vld [vmem:[%s11279_s15 + $0x38] sm:$0x3]  ;;  %v11394_v42 = vld [vmem:[%s11374_s12] sm:$0xff] }
  0x23   : > { %9867 = vmatprep.mubr.msk.f32.mxu0 %vm874_vm1, %v11298_v18  ;;  %9957 = vmatpush3.msk.msra.mxu0 %vm965_vm0, %v11205_v2  ;;  %v11381_v39 = vmul.f32 %v11269_v11, %v748_v37  ;;  %16124 = vst [vmem:[#allocation14_spill] sm:$0xff] %v11394_v42  ;;  %v11397_v43 = vld [vmem:[%s11227_s28 + $0x10] sm:$0xff]  ;;  %v11400_v44 = vmul.f32 %v815_v40, %v11269_v11  ;;  %v11409_v45 = vld [vmem:[%s11374_s12 + $0x8] sm:$0xff]  ;;  %v11414_v46 = vld [vmem:[%s11227_s28 + $0x20] sm:$0xff]  ;;  %v15838_v54 = vrot.slane %v11335_v31, 2  ;;  %v2274_v58 = vrot.slane %v11304_v22, 2 }
  0x24   : > { %9904 = vmatmul.mubr.msk.f32.gmra.mxu1 %vm874_vm1, %v11263_v9  ;;  %10050 = vmatprep.subr.msk.mxu0 %vm965_vm0, %v11318_v26  ;;  %16125 = vst [vmem:[#allocation15_spill] sm:$0xff] %v11409_v45  ;;  %v11417_v47 = vld [vmem:[%s11374_s12 + $0x10] sm:$0xff]  ;;  %v11420_v48 = vld [vmem:[%s11227_s28 + $0x28] sm:$0xff]  ;;  %v11429_v49 = vld [vmem:[%s11374_s12 + $0x20] sm:$0xff]  ;;  %v2275_v59 = vrot.slane %v11313_v25, 2  ;;  %v1503_v28 = vrot.slane %v11304_v22, 1 }
  0x25   : > { %9906 = vmatprep.mubr.msk.f32.mxu1 %vm874_vm1, %v11267_v10  ;;  %16122 = vst [vmem:[#allocation12_spill] sm:$0xff] %v11381_v39  ;;  %16126 = vst [vmem:[#allocation16_spill] sm:$0xff] %v11417_v47  ;;  %v11434_v50 = vld [vmem:[%s11227_s28 + $0x30] sm:$0xff]  ;;  %v11437_v51 = vld [vmem:[%s11374_s12 + $0x28] sm:$0xff]  ;;  %v1504_v30 = vrot.slane %v11313_v25, 1  ;;  %v2344_v37 = vrot.slane %v11292_v16, 2 }
  0x26   : > { %9868 = vmatmul.mubr.msk.f32.gmra.mxu0 %vm874_vm1, %v11323_v27  ;;  %16127 = vst [vmem:[#allocation17_spill] sm:$0xff] %v11420_v48  ;;  %16128 = vst [vmem:[#allocation18_spill] sm:$0xff] %v11429_v49  ;;  %v11440_v52 = vld [vmem:[%s11227_s28 + $0x40] sm:$0xff]  ;;  %v11449_v53 = vld [vmem:[%s11374_s12 + $0x30] sm:$0xff]  ;;  %v11483_v63 = vsel %vm2273_vm2, %v2274_v58, %v2275_v59  ;;  %v11488_v0 = vsel %vm2273_vm2, %v2275_v59, %v15838_v54  ;;  %v2345_v40 = vrot.slane %v11295_v17, 2 }
  0x27   : > { %9870 = vmatprep.mubr.msk.f32.mxu0 %vm874_vm1, %v11331_v29  ;;  %16129 = vst [vmem:[#allocation19_spill] sm:$0xff] %v11440_v52  ;;  %v11455_v55 = vld [vmem:[%s11227_s28 + $0x48] sm:$0xff]  ;;  %v11458_v56 = vld [vmem:[%s11374_s12 + $0x40] sm:$0xff]  ;;  %v11461_v57 = vld [vmem:[%s11227_s28 + $0x50] sm:$0xff]  ;;  %v1527_v7 = vrot.slane %v11449_v53, 1 }
  0x28   : > { %9907 = vmatmul.mubr.msk.f32.gmra.mxu1 %vm874_vm1, %v11284_v12  ;;  %16130 = vst [vmem:[#allocation20_spill] sm:$0xff] %v11458_v56  ;;  %v11472_v60 = vld [vmem:[%s11374_s12 + $0x48] sm:$0xff]  ;;  %v11477_v61 = vld [vmem:[%s11227_s28 + $0x60] sm:$0xff]  ;;  %v11480_v62 = vld [vmem:[%s11374_s12 + $0x50] sm:$0xff]  ;;  %v11566_v54 = vsel %vm2273_vm2, %v2345_v40, %v15842_v20  ;;  %v1505_v12 = vsel %vm1502_vm3, %v1503_v28, %v1504_v30  ;;  %v1511_v20 = vrot.slane %v11359_v36, 1 }
  0x29   : > { %9911 = vmatprep.mubr.msk.f32.mxu1 %vm874_vm1, %v11304_v22  ;;  %16131 = vst [vmem:[#allocation21_spill] sm:$0xff] %v11472_v60  ;;  %16132 = vst [vmem:[#allocation22_spill] sm:$0xff] %v11488_v0  ;;  %v11491_v1 = vld [vmem:[%s11227_s28 + $0x68] sm:$0xff]  ;;  %v11500_v2 = vld [vmem:[%s11374_s12 + $0x60] sm:$0xff]  ;;  %v1513_v0 = vrot.slane %v11381_v39, 1 }
  0x2a   : > { %9871 = vmatmul.mubr.msk.f32.gmra.mxu0 %vm874_vm1, %v11355_v35  ;;  %16133 = vst [vmem:[#allocation23_spill] sm:$0xff] %v11491_v1  ;;  %v11508_v13 = vld [vmem:[%s11374_s12 + $0x68] sm:$0xff]  ;;  %v11511_v14 = vld [vmem:[%s11227_s28 + $0x80] sm:$0xff]  ;;  %v745_v15 = vld [vmem:[%s11274_s24 + $0x18] sm:$0x3] }
  0x2b   : > { %9873 = vmatprep.mubr.msk.f32.mxu0 %vm874_vm1, %v11367_v38  ;;  %v11521_v19 = vld [vmem:[%s11374_s12 + $0x70] sm:$0xff]  ;;  %v11527_v21 = vld [vmem:[%s11227_s28 + $0x88] sm:$0xff]  ;;  %v11530_v23 = vld [vmem:[%s11374_s12 + $0x80] sm:$0xff]  ;;  %v11538_v32 = vmul.f32 %v11269_v11, %v745_v15  ;;  %v11561_v15 = vsel %vm2273_vm2, %v2344_v37, %v2345_v40  ;;  %16136 = vst [vmem:[#allocation26_spill] sm:$0xff] %v11566_v54  ;;  %v1510_v40 = vrot.slane %v11345_v33, 1 }
  0x2c   : > { %9912 = vmatmul.mubr.msk.f32.vlgmr.msra.gmra.mxu1 %vm874_vm1, %v11313_v25  ;;  %v11533_v24 = vld [vmem:[%s11227_s28 + $0x90] sm:$0xff]  ;;  %v11549_v22 = vld [vmem:[%s11374_s12 + $0x88] sm:$0xff]  ;;  %v1506_v25 = vrot.slane %v11335_v31, 1  ;;  %v11555_v58 = vld [vmem:[%s11227_s28 + $0xa0] sm:$0xff]  ;;  %16135 = vst [vmem:[#allocation25_spill] sm:$0xff] %v11561_v15 }
  0x2d   : > { %10004 = vmatpush3.msk.msra.mxu1 %vm965_vm0, %v8494_v6  ;;  %9914 = vmatprep.mubr.msk.f32.mxu1 %vm874_vm1, %v11335_v31  ;;  %v11505_v6 = vld [vmem:[%s11227_s28 + $0x70] sm:$0xff]  ;;  %16134 = vst [vmem:[#allocation24_spill] sm:$0xff] %v11549_v22  ;;  %v1508_v10 = vrot.slane %v11538_v32, 1  ;;  %v749_v9 = vld [vmem:[%s11274_s24 + $0x38] sm:$0x3]  ;;  %v11578_v37 = vld [vmem:[%s11374_s12 + $0xa0] sm:$0xff] }
  0x2e   : > { %10097 = vmatprep.subr.msk.mxu1 %vm965_vm0, %v11350_v34  ;;  %9874 = vmatmul.mubr.msk.f32.gmra.mxu0 %vm874_vm1, %v11391_v41  ;;  %v11558_v59 = vld [vmem:[%s11374_s12 + $0x90] sm:$0xff]  ;;  %v1507_v28 = vsel %vm1502_vm3, %v1504_v30, %v1506_v25  ;;  %v11585_v54 = vld [vmem:[%s11374_s12 + $0xa8] sm:$0xff]  ;;  %v11588_v15 = vmul.f32 %v11269_v11, %v749_v9  ;;  %v1518_v31 = vrot.slane %v11409_v45, 1  ;;  %s9148_s24 = sadd.s32 4, %s16286_s16 }
  0x2f   : > { %9876 = vmatprep.mubr.msk.f32.mxu0 %vm874_vm1, %v11397_v43  ;;  %v1509_v8 = vsel %vm1502_vm3, %v1506_v25, %v1508_v10  ;;  %v11603_v9 = vld [vmem:[%s11374_s12 + $0xb0] sm:$0xff]  ;;  %v11607_v10 = vsel %vm1502_vm3, %v1510_v40, %v1511_v20  ;;  %v11611_v25 = vld [vmem:[%s11374_s12 + $0xc0] sm:$0xff]  ;;  %v1520_v40 = vrot.slane %v11417_v47, 1  ;;  %p661_p10 = scmp.lt.s32.totalorder %s9148_s24, 7 }
  0x30   : > { %9915 = vmatmul.mubr.msk.f32.gmra.mxu1 %vm874_vm1, %v11345_v33  ;;  %16137 = vst [vmem:[#allocation27_spill] sm:$0xff] %v11588_v15  ;;  %16139 = vst [vmem:[#allocation29_spill] sm:$0xff] %v11607_v10  ;;  %v1515_v30 = vrot.slane %v11588_v15, 1 }
  0x31   : > { %9917 = vmatprep.mubr.msk.f32.mxu1 %vm874_vm1, %v11359_v36  ;;  %16140 = vst [vmem:[#allocation30_spill] sm:$0xff] %v11611_v25  ;;  %s16765_s24 = smov (!%p661_p10, %s9148_s24), 7 }
  0x32   : > { %9877 = vmatmul.mubr.msk.f32.gmra.mxu0 %vm874_vm1, %v11414_v46  ;;  %s8377_s23 = sshll.u32 %s16765_s24, 1 }
  0x33   : > { %9879 = vmatprep.mubr.msk.f32.mxu0 %vm874_vm1, %v11420_v48  ;;  %p666_p11 = scmp.lt.s32.totalorder %s8377_s23, 15 }
  0x34   : > { %9918 = vmatmul.mubr.msk.f32.gmra.mxu1 %vm874_vm1, %v11381_v39  ;;  %v1517_v39 = vrot.slane %v11394_v42, 1  ;;  %s14473_s24 = scalar_select %p738_p8, 1, 0 }
  0x35   : > { %9920 = vmatprep.mubr.msk.f32.mxu1 %vm874_vm1, %v11394_v42  ;;  %s16767_s23 = smov (!%p666_p11, %s8377_s23), 15 }
  0x36   : > { %9880 = vmatmul.mubr.msk.f32.gmra.mxu0 %vm874_vm1, %v11434_v50  ;;  %v11644_v42 = vsel %vm1502_vm3, %v1517_v39, %v1518_v31  ;;  %v11661_v39 = vsel %vm1502_vm3, %v1518_v31, %v1520_v40  ;;  %v1586_v31 = vrot.slane %v11298_v18, 1  ;;  %s8378_s29 = sshll.u32 %s16767_s23, 2 }
  0x37   : > { %9882 = vmatprep.mubr.msk.f32.mxu0 %vm874_vm1, %v11440_v52  ;;  %16145 = vst [vmem:[#allocation35_spill] sm:$0xff] %v11644_v42  ;;  %16146 = vst [vmem:[#allocation36_spill] sm:$0xff] %v11661_v39  ;;  %s12562_s25 = sadd.s32 %s8378_s29, %s11213_s13 }
  0x38   : > { %9921 = vmatmul.mubr.msk.f32.gmra.mxu1 %vm874_vm1, %v11409_v45  ;;  %v11641_v45 = vld [vmem:[%s11374_s12 + $0xd0] sm:$0xff]  ;;  %s8380_s14 = sshll.u32 %s12562_s25, 3 }
  0x39   : > { %9923 = vmatprep.mubr.msk.f32.mxu1 %vm874_vm1, %v11417_v47  ;;  %v1584_v47 = vrot.slane %v11295_v17, 1  ;;  %s741_s13 = scalar_select %p739_p12, 0.0, 1.0 }
  0x3a   : > { %9883 = vmatmul.mubr.msk.f32.gmra.mxu0 %vm874_vm1, %v11455_v55  ;;  %s12589_s16 = scalar_lea.vmem %s15826_s2, %s8380_s14  ;;  %s12671_s29 = scalar_lea.vmem %s15829_s5, %s8380_s14 }
  0x3b   : > { %9885 = vmatprep.mubr.msk.f32.mxu0 %vm874_vm1, %v11461_v57 }
  0x3c   : > { %9924 = vmatmul.mubr.msk.f32.gmra.mxu1 %vm874_vm1, %v11429_v49 }
  0x3d   : > { %9926 = vmatprep.mubr.msk.f32.mxu1 %vm874_vm1, %v11437_v51 }
  0x3e   : > { %9886 = vmatmul.mubr.msk.f32.gmra.mxu0 %vm874_vm1, %v11477_v61 }
  0x3f   : > { %9888 = vmatprep.mubr.msk.f32.mxu0 %vm874_vm1, %v11491_v1 }
  0x40   : > { %9927 = vmatmul.mubr.msk.f32.gmra.mxu1 %vm874_vm1, %v11449_v53 }
  0x41   : > { %9929 = vmatprep.mubr.msk.f32.mxu1 %vm874_vm1, %v11458_v56 }
  0x42   : > { %9889 = vmatmul.mubr.msk.f32.gmra.mxu0 %vm874_vm1, %v11505_v6 }
  0x43   : > { %9891 = vmatprep.mubr.msk.f32.mxu0 %vm874_vm1, %v11511_v14 }
  0x44   : > { %9930 = vmatmul.mubr.msk.f32.gmra.mxu1 %vm874_vm1, %v11472_v60 }
  0x45   : > { %9932 = vmatprep.mubr.msk.f32.mxu1 %vm874_vm1, %v11480_v62 }
  0x46   : > { %9892 = vmatmul.mubr.msk.f32.gmra.mxu0 %vm874_vm1, %v11527_v21 }
  0x47   : > { %9894 = vmatprep.mubr.msk.f32.mxu0 %vm874_vm1, %v11533_v24 }
  0x48   : > { %9933 = vmatmul.mubr.msk.f32.gmra.mxu1 %vm874_vm1, %v11500_v2 }
  0x49   : > { %9935 = vmatprep.mubr.msk.f32.mxu1 %vm874_vm1, %v11508_v13 }
  0x4a   : > { %9895 = vmatmul.mubr.msk.f32.gmra.mxu0 %vm874_vm1, %v11555_v58 }
  0x4b   : > { %9958 = vmatprep.mubr.msk.f32.mxu0 %vm874_vm1, %v1505_v12  ;;  %v11597_v12 = vld [vmem:[%s15830_s6 + $0xc] sm:$0xf] }
  0x4c   : > { %9936 = vmatmul.mubr.msk.f32.gmra.mxu1 %vm874_vm1, %v11521_v19  ;;  %16138 = vst [vmem:[#allocation28_spill] sm:$0xff] %v11597_v12 }
  0x4d   : > { %9938 = vmatprep.mubr.msk.f32.mxu1 %vm874_vm1, %v11530_v23 }
  0x4e   : > { %9959 = vmatmul.mubr.msk.f32.vlgmr.msra.gmra.mxu0 %vm874_vm1, %v1507_v28  ;;  %v11616_v28 = vsel %vm1502_vm3, %v1511_v20, %v1513_v0  ;;  %v11637_v20 = vsel %vm1502_vm3, %v1513_v0, %v1515_v30  ;;  %v11655_v0 = vld [vmem:[%s11374_s12 + $0xe0] sm:$0xff]  ;;  %v1524_v30 = vrot.slane %v11429_v49, 1  ;;  %v11674_v49 = vld [vmem:[%s11374_s12 + $0x38] sm:$0x3] }
  0x4f   : > { %9961 = vmatprep.mubr.msk.f32.mxu0 %vm874_vm1, %v1509_v8  ;;  %10051 = vmatpush3.msk.msra.mxu0 %vm965_vm0, %v11318_v26  ;;  %16141 = vst [vmem:[#allocation31_spill] sm:$0xff] %v11616_v28  ;;  %v11625_v8 = vld [vmem:[%s11374_s12 + $0x18] sm:$0x3]  ;;  %v11632_v26 = vld [vmem:[%s11374_s12 + $0xc8] sm:$0xff]  ;;  %16144 = vst [vmem:[#allocation34_spill] sm:$0xff] %v11637_v20 }
  0x50   : > { %9939 = vmatmul.mubr.msk.f32.gmra.mxu1 %vm874_vm1, %v11549_v22  ;;  %10144 = vmatprep.subr.msk.mxu0 %vm965_vm0, %v11597_v12  ;;  %16142 = vst [vmem:[#allocation32_spill] sm:$0xff] %v11625_v8  ;;  %16143 = vst [vmem:[#allocation33_spill] sm:$0xff] %v11632_v26  ;;  %v811_v12 = vld [vmem:[%s11279_s15 + $0x18] sm:$0x3]  ;;  %s14545_s15 = scalar_select %p739_p12, 1, 0 }
  0x51   : > { %9941 = vmatprep.mubr.msk.f32.mxu1 %vm874_vm1, %v11558_v59 }
  0x52   : > { %9962 = vmatmul.mubr.msk.f32.gmra.mxu0 %vm874_vm1, %v11607_v10  ;;  %v1522_v10 = vrot.slane %v11625_v8, 1  ;;  %v11665_v8 = vld [vmem:[%s11374_s12 + $0xe8] sm:$0xff] }
  0x53   : > { %9964 = vmatprep.mubr.msk.f32.mxu0 %vm874_vm1, %v11616_v28  ;;  %v1525_v28 = vrot.slane %v11437_v51, 1  ;;  %16147 = vst [vmem:[#allocation37_spill] sm:$0xff] %v11665_v8 }
  0x54   : > { %9942 = vmatmul.mubr.msk.f32.gmra.mxu1 %vm874_vm1, %v11578_v37  ;;  %v11670_v15 = vsel %vm1502_vm3, %v1520_v40, %v1522_v10  ;;  %v1531_v40 = vrot.slane %v11458_v56, 1  ;;  %v1593_v56 = vrot.slane %v11355_v35, 1 }
  0x55   : > { %9944 = vmatprep.mubr.msk.f32.mxu1 %vm874_vm1, %v11585_v54  ;;  %16148 = vst [vmem:[#allocation38_spill] sm:$0xff] %v11670_v15  ;;  %v11692_v17 = vsel %vm1502_vm3, %v1524_v30, %v1525_v28  ;;  %v11697_v10 = vsel %vm1502_vm3, %v1525_v28, %v1527_v7  ;;  %v1590_v28 = vrot.slane %v11323_v27, 1  ;;  %v1591_v30 = vrot.slane %v11331_v29, 1 }
  0x56   : > { %9965 = vmatmul.mubr.msk.f32.gmra.mxu0 %vm874_vm1, %v11637_v20  ;;  %v1583_v20 = vrot.slane %v11292_v16, 1  ;;  %v11687_v16 = vld [vmem:[%s11374_s12 + $0xf0] sm:$0xff]  ;;  %16150 = vst [vmem:[#allocation40_spill] sm:$0xff] %v11692_v17  ;;  %16151 = vst [vmem:[#allocation41_spill] sm:$0xff] %v11697_v10 }
  0x57   : > { %9967 = vmatprep.mubr.msk.f32.mxu0 %vm874_vm1, %v11644_v42  ;;  %v11677_v42 = vmul.f32 %v811_v12, %v11269_v11  ;;  %v1529_v11 = vrot.slane %v11674_v49, 1 }
  0x58   : > { %9945 = vmatmul.mubr.msk.f32.gmra.mxu1 %vm874_vm1, %v11603_v9  ;;  %v1585_v12 = vsel %vm1502_vm3, %v1583_v20, %v1584_v47  ;;  %v1587_v20 = vsel %vm1502_vm3, %v1584_v47, %v1586_v31 }
  0x59   : > { %9947 = vmatprep.mubr.msk.f32.mxu1 %vm874_vm1, %v11611_v25  ;;  %16149 = vst [vmem:[#allocation39_spill] sm:$0xff] %v11677_v42  ;;  %v1588_v18 = vrot.slane %v11677_v42, 1  ;;  %v11716_v42 = vsel %vm1502_vm3, %v1527_v7, %v1529_v11  ;;  %v11736_v7 = vsel %vm1502_vm3, %v1590_v28, %v1591_v30  ;;  %v1598_v11 = vrot.slane %v11391_v41, 1 }
  0x5a   : > { %9968 = vmatmul.mubr.msk.f32.gmra.mxu0 %vm874_vm1, %v11661_v39  ;;  %v1532_v39 = vrot.slane %v11472_v60, 1  ;;  %16152 = vst [vmem:[#allocation42_spill] sm:$0xff] %v11716_v42  ;;  %v1534_v60 = vrot.slane %v11480_v62, 1  ;;  %16154 = vst [vmem:[#allocation44_spill] sm:$0xff] %v11736_v7  ;;  %v11750_v28 = vsel %vm1502_vm3, %v1591_v30, %v1593_v56  ;;  %v1541_v41 = vrot.slane %v11521_v19, 1 }
  0x5b   : > { %9970 = vmatprep.mubr.msk.f32.mxu0 %vm874_vm1, %v11670_v15  ;;  %v11705_v15 = vld [vmem:[%s11374_s12 + $0x58] sm:$0x3]  ;;  %v1589_v47 = vsel %vm1502_vm3, %v1586_v31, %v1588_v18  ;;  %v1595_v18 = vrot.slane %v11400_v44, 1  ;;  %v1597_v31 = vrot.slane %v11367_v38, 1  ;;  %16156 = vst [vmem:[#allocation46_spill] sm:$0xff] %v11750_v28 }
  0x5c   : > { %9948 = vmatmul.mubr.msk.f32.gmra.mxu1 %vm874_vm1, %v11632_v26  ;;  %v11757_v38 = vld [vmem:[%s11374_s12 + $0x78] sm:$0x3] }
  0x5d   : > { %9950 = vmatprep.mubr.msk.f32.mxu1 %vm874_vm1, %v11641_v45 }
  0x5e   : > { %9971 = vmatmul.mubr.msk.f32.gmra.mxu0 %vm874_vm1, %v11692_v17  ;;  %v11721_v17 = vsel %vm1502_vm3, %v1531_v40, %v1532_v39  ;;  %v11744_v40 = vsel %vm1502_vm3, %v1532_v39, %v1534_v60  ;;  %v1600_v39 = vrot.slane %v11397_v43, 1 }
  0x5f   : > { %9973 = vmatprep.mubr.msk.f32.mxu0 %vm874_vm1, %v11697_v10  ;;  %16153 = vst [vmem:[#allocation43_spill] sm:$0xff] %v11721_v17  ;;  %v11729_v10 = vld [vmem:[%s15831_s7 + $0xc] sm:$0xf]  ;;  %16155 = vst [vmem:[#allocation45_spill] sm:$0xff] %v11744_v40 }
  0x60   : > { %9951 = vmatmul.mubr.msk.f32.gmra.mxu1 %vm874_vm1, %v11655_v0 }
  0x61   : > { %9953 = vmatprep.mubr.msk.f32.mxu1 %vm874_vm1, %v11665_v8 }
  0x62   : > { %9974 = vmatmul.mubr.msk.f32.gmra.mxu0 %vm874_vm1, %v11716_v42 }
  0x63   : > { %9976 = vmatprep.mubr.msk.f32.mxu0 %vm874_vm1, %v11721_v17  ;;  %v11760_v17 = vld [vmem:[%s11227_s28 + $0x18] sm:$0x3] }
  0x64   : > { %9954 = vmatmul.mubr.msk.f32.gmra.mxu1 %vm874_vm1, %v11687_v16 }
  0x65   : > { %10005 = vmatprep.mubr.msk.f32.mxu1 %vm874_vm1, %v1585_v12  ;;  %v1536_v12 = vrot.slane %v11705_v15, 1 }
  0x66   : > { %9977 = vmatmul.mubr.msk.f32.gmra.mxu0 %vm874_vm1, %v11744_v40  ;;  %v1602_v40 = vrot.slane %v11760_v17, 1 }
  0x67   : > { %v11753_v42 = vsel %vm1502_vm3, %v1534_v60, %v1536_v12  ;;  %v11771_v60 = vsel %vm1502_vm3, %v1593_v56, %v1595_v18  ;;  %v1543_v12 = vrot.slane %v11757_v38, 1  ;;  %v1545_v56 = vrot.slane %v11530_v23, 1 }
  0x68   : > { %10006 = vmatmul.mubr.msk.f32.vlgmr.msra.gmra.mxu1 %vm874_vm1, %v1587_v20  ;;  %v1538_v20 = vrot.slane %v11500_v2, 1  ;;  %16157 = vst [vmem:[#allocation47_spill] sm:$0xff] %v11753_v42  ;;  %16158 = vst [vmem:[#allocation48_spill] sm:$0xff] %v11771_v60  ;;  %9979 = vmatprep.mubr.msk.f32.mxu0 %vm874_vm1, %v11753_v42  ;;  %v1546_v18 = vrot.slane %v11549_v22, 1  ;;  %v1605_v42 = vrot.slane %v11420_v48, 1  ;;  %v11811_v22 = vsel %vm1502_vm3, %v1600_v39, %v1602_v40 }
  0x69   : > { %10098 = vmatpush3.msk.msra.mxu1 %vm965_vm0, %v11350_v34  ;;  %10008 = vmatprep.mubr.msk.f32.mxu1 %vm874_vm1, %v1589_v47  ;;  %v1539_v34 = vrot.slane %v11508_v13, 1  ;;  %v11781_v47 = vsel %vm1502_vm3, %v1597_v31, %v1598_v11  ;;  %v11799_v31 = vsel %vm1502_vm3, %v1598_v11, %v1600_v39  ;;  %16164 = vst [vmem:[#allocation54_spill] sm:$0xff] %v11811_v22 }
  0x6a   : > { %10191 = vmatprep.subr.msk.mxu1 %vm965_vm0, %v11729_v10  ;;  %16160 = vst [vmem:[#allocation50_spill] sm:$0xff] %v11781_v47  ;;  %16162 = vst [vmem:[#allocation52_spill] sm:$0xff] %v11799_v31  ;;  %v11817_v11 = vsel %vm1502_vm3, %v1545_v56, %v1546_v18 }
  0x6b   : > { %v11777_v30 = vsel %vm1502_vm3, %v1538_v20, %v1539_v34  ;;  %v11792_v20 = vld [vmem:[%s11374_s12 + $0x98] sm:$0x3]  ;;  %16165 = vst [vmem:[#allocation55_spill] sm:$0xff] %v11817_v11 }
  0x6c   : > { %10009 = vmatmul.mubr.msk.f32.gmra.mxu1 %vm874_vm1, %v11736_v7  ;;  %16159 = vst [vmem:[#allocation49_spill] sm:$0xff] %v11777_v30  ;;  %9980 = vmatmul.mubr.msk.f32.gmra.mxu0 %vm874_vm1, %v11777_v30  ;;  %v1607_v7 = vrot.slane %v11434_v50, 1  ;;  %v1548_v30 = vrot.slane %v11558_v59, 1  ;;  %v1550_v48 = vrot.slane %v11792_v20, 1 }
  0x6d   : > { %10011 = vmatprep.mubr.msk.f32.mxu1 %vm874_vm1, %v11750_v28  ;;  %v11785_v28 = vsel %vm1502_vm3, %v1539_v34, %v1541_v41  ;;  %v1604_v34 = vrot.slane %v11414_v46, 1 }
  0x6e   : > { %16161 = vst [vmem:[#allocation51_spill] sm:$0xff] %v11785_v28  ;;  %9982 = vmatprep.mubr.msk.f32.mxu0 %vm874_vm1, %v11785_v28  ;;  %v11830_v40 = vsel %vm1502_vm3, %v1605_v42, %v1607_v7  ;;  %v11837_v56 = vsel %vm1502_vm3, %v1546_v18, %v1548_v30  ;;  %v11847_v28 = vld [vmem:[%s11374_s12 + $0xb8] sm:$0x3] }
  0x6f   : > { %16167 = vst [vmem:[#allocation57_spill] sm:$0xff] %v11830_v40  ;;  %16168 = vst [vmem:[#allocation58_spill] sm:$0xff] %v11837_v56 }
  0x70   : > { %10012 = vmatmul.mubr.msk.f32.gmra.mxu1 %vm874_vm1, %v11771_v60  ;;  %v11807_v60 = vsel %vm1502_vm3, %v1541_v41, %v1543_v12  ;;  %v11827_v41 = vsel %vm1502_vm3, %v1604_v34, %v1605_v42  ;;  %v1611_v12 = vrot.slane %v11440_v52, 1  ;;  %v1612_v34 = vrot.slane %v11455_v55, 1  ;;  %v11850_v52 = vld [vmem:[%s11227_s28 + $0x58] sm:$0x3] }
  0x71   : > { %10014 = vmatprep.mubr.msk.f32.mxu1 %vm874_vm1, %v11781_v47  ;;  %16163 = vst [vmem:[#allocation53_spill] sm:$0xff] %v11807_v60  ;;  %v11814_v47 = vld [vmem:[%s11227_s28 + $0x38] sm:$0x3]  ;;  %9983 = vmatmul.mubr.msk.f32.gmra.mxu0 %vm874_vm1, %v11807_v60  ;;  %16166 = vst [vmem:[#allocation56_spill] sm:$0xff] %v11827_v41  ;;  %v1552_v60 = vrot.slane %v11578_v37, 1  ;;  %v1555_v42 = vrot.slane %v11603_v9, 1 }
  0x72   : > { %v1609_v39 = vrot.slane %v11814_v47, 1  ;;  %9985 = vmatprep.mubr.msk.f32.mxu0 %vm874_vm1, %v11817_v11  ;;  %v1557_v11 = vrot.slane %v11847_v28, 1 }
  0x74   : > { %10015 = vmatmul.mubr.msk.f32.gmra.mxu1 %vm874_vm1, %v11799_v31  ;;  %v11843_v31 = vsel %vm1502_vm3, %v1548_v30, %v1550_v48  ;;  %v11859_v18 = vsel %vm1502_vm3, %v1607_v7, %v1609_v39  ;;  %v1614_v48 = vrot.slane %v11461_v57, 1  ;;  %v1559_v7 = vrot.slane %v11611_v25, 1  ;;  %v11902_v25 = vld [vmem:[%s11227_s28 + $0x78] sm:$0x3] }
  0x75   : > { %10017 = vmatprep.mubr.msk.f32.mxu1 %vm874_vm1, %v11811_v22  ;;  %v1553_v22 = vrot.slane %v11585_v54, 1  ;;  %16169 = vst [vmem:[#allocation59_spill] sm:$0xff] %v11843_v31  ;;  %9986 = vmatmul.mubr.msk.f32.gmra.mxu0 %vm874_vm1, %v11837_v56  ;;  %16170 = vst [vmem:[#allocation60_spill] sm:$0xff] %v11859_v18  ;;  %v1616_v56 = vrot.slane %v11850_v52, 1  ;;  %v1560_v39 = vrot.slane %v11632_v26, 1  ;;  %v1562_v26 = vrot.slane %v11641_v45, 1 }
  0x76   : > { %9988 = vmatprep.mubr.msk.f32.mxu0 %vm874_vm1, %v11843_v31  ;;  %v1619_v31 = vrot.slane %v11491_v1, 1  ;;  %16177 = vst [vmem:[#allocation67_spill] sm:$0xff] %v11902_v25 }
  0x77   : > { %v11865_v30 = vsel %vm1502_vm3, %v1552_v60, %v1553_v22  ;;  %v11880_v60 = vld [vmem:[%s11374_s12 + $0xd8] sm:$0x3] }
  0x78   : > { %10018 = vmatmul.mubr.msk.f32.gmra.mxu1 %vm874_vm1, %v11827_v41  ;;  %16171 = vst [vmem:[#allocation61_spill] sm:$0xff] %v11865_v30  ;;  %v11869_v41 = vsel %vm1502_vm3, %v1611_v12, %v1612_v34  ;;  %v11887_v12 = vsel %vm1502_vm3, %v1612_v34, %v1614_v48  ;;  %v11905_v34 = vsel %vm1502_vm3, %v1559_v7, %v1560_v39  ;;  %v1564_v1 = vrot.slane %v11880_v60, 1 }
  0x79   : > { %10020 = vmatprep.mubr.msk.f32.mxu1 %vm874_vm1, %v11830_v40  ;;  %16172 = vst [vmem:[#allocation62_spill] sm:$0xff] %v11869_v41  ;;  %v11873_v40 = vsel %vm1502_vm3, %v1553_v22, %v1555_v42  ;;  %9989 = vmatmul.mubr.msk.f32.gmra.mxu0 %vm874_vm1, %v11865_v30  ;;  %16174 = vst [vmem:[#allocation64_spill] sm:$0xff] %v11887_v12  ;;  %v1618_v22 = vrot.slane %v11477_v61, 1  ;;  %v11898_v30 = vsel %vm1502_vm3, %v1614_v48, %v1616_v56 }
  0x7a   : > { %16173 = vst [vmem:[#allocation63_spill] sm:$0xff] %v11873_v40  ;;  %9991 = vmatprep.mubr.msk.f32.mxu0 %vm874_vm1, %v11873_v40  ;;  %16176 = vst [vmem:[#allocation66_spill] sm:$0xff] %v11898_v30  ;;  %v1567_v56 = vrot.slane %v11665_v8, 1  ;;  %v1623_v48 = vrot.slane %v11902_v25, 1  ;;  %v11923_v7 = vsel %vm1502_vm3, %v1560_v39, %v1562_v26  ;;  %v11931_v40 = vsel %vm1502_vm3, %v1562_v26, %v1564_v1  ;;  %v11935_v8 = vld [vmem:[%s11374_s12 + $0xf8] sm:$0x3] }
  0x7b   : > { %16178 = vst [vmem:[#allocation68_spill] sm:$0xff] %v11905_v34  ;;  %16180 = vst [vmem:[#allocation70_spill] sm:$0xff] %v11923_v7  ;;  %v11938_v25 = vld [vmem:[%s11227_s28 + $0x98] sm:$0x3]  ;;  %v1628_v1 = vrot.slane %v11533_v24, 1  ;;  %v1571_v39 = vrot.slane %v11935_v8, 1 }
  0x7c   : > { %10021 = vmatmul.mubr.msk.f32.gmra.mxu1 %vm874_vm1, %v11859_v18  ;;  %v11894_v18 = vsel %vm1502_vm3, %v1555_v42, %v1557_v11  ;;  %v1566_v11 = vrot.slane %v11655_v0, 1  ;;  %v11917_v42 = vsel %vm1502_vm3, %v1618_v22, %v1619_v31  ;;  %16182 = vst [vmem:[#allocation72_spill] sm:$0xff] %v11931_v40  ;;  %v1569_v22 = vrot.slane %v11687_v16, 1 }
  0x7d   : > { %10023 = vmatprep.mubr.msk.f32.mxu1 %vm874_vm1, %v11869_v41  ;;  %16175 = vst [vmem:[#allocation65_spill] sm:$0xff] %v11894_v18  ;;  %v1621_v41 = vrot.slane %v11505_v6, 1  ;;  %9992 = vmatmul.mubr.msk.f32.gmra.mxu0 %vm874_vm1, %v11894_v18  ;;  %16179 = vst [vmem:[#allocation69_spill] sm:$0xff] %v11917_v42 }
  0x7e   : > { %9994 = vmatprep.mubr.msk.f32.mxu0 %vm874_vm1, %v11905_v34  ;;  %v11953_v26 = vsel %vm1502_vm3, %v1566_v11, %v1567_v56  ;;  %v1633_v11 = vrot.slane %v11231_v3, 1 }
  0x7f   : > { %v11926_v18 = vsel %vm1502_vm3, %v1619_v31, %v1621_v41  ;;  %v11947_v31 = vsel %vm1502_vm3, %v1621_v41, %v1623_v48  ;;  %16184 = vst [vmem:[#allocation74_spill] sm:$0xff] %v11953_v26 }
  0x80   : > { %10024 = vmatmul.mubr.msk.f32.gmra.mxu1 %vm874_vm1, %v11887_v12  ;;  %16181 = vst [vmem:[#allocation71_spill] sm:$0xff] %v11926_v18  ;;  %v1626_v12 = vrot.slane %v11527_v21, 1  ;;  %16183 = vst [vmem:[#allocation73_spill] sm:$0xff] %v11947_v31 }
  0x81   : > { %10026 = vmatprep.mubr.msk.f32.mxu1 %vm874_vm1, %v11898_v30  ;;  %v1625_v30 = vrot.slane %v11511_v14, 1  ;;  %9995 = vmatmul.mubr.msk.f32.gmra.mxu0 %vm874_vm1, %v11923_v7  ;;  %v1630_v7 = vrot.slane %v11938_v25, 1 }
  0x82   : > { %9997 = vmatprep.mubr.msk.f32.mxu0 %vm874_vm1, %v11931_v40  ;;  %v11970_v41 = vsel %vm1502_vm3, %v1626_v12, %v1628_v1  ;;  %v12011_v40 = vld [vmem:[%s11227_s28 + $0xd8] sm:$0x3] }
  0x83   : > { %16187 = vst [vmem:[#allocation77_spill] sm:$0xff] %v11970_v41  ;;  %v11980_v48 = vsel %vm1502_vm3, %v1628_v1, %v1630_v7 }
  0x84   : > { %10027 = vmatmul.mubr.msk.f32.gmra.mxu1 %vm874_vm1, %v11917_v42  ;;  %v11957_v42 = vsel %vm1502_vm3, %v1625_v30, %v1626_v12  ;;  %v1632_v30 = vrot.slane %v11555_v58, 1  ;;  %16189 = vst [vmem:[#allocation79_spill] sm:$0xff] %v11980_v48  ;;  %v2279_v12 = vrot.slane %v11538_v32, 2  ;;  %v2281_v32 = vrot.slane %v11345_v33, 2 }
  0x85   : > { %10029 = vmatprep.mubr.msk.f32.mxu1 %vm874_vm1, %v11926_v18  ;;  %16185 = vst [vmem:[#allocation75_spill] sm:$0xff] %v11957_v42  ;;  %v11961_v18 = vsel %vm1502_vm3, %v1567_v56, %v1569_v22  ;;  %9998 = vmatmul.mubr.msk.f32.gmra.mxu0 %vm874_vm1, %v11953_v26  ;;  %v11977_v56 = vsel %vm1502_vm3, %v1569_v22, %v1571_v39  ;;  %v1635_v26 = vrot.slane %v11234_v4, 1  ;;  %v1639_v4 = vrot.slane %v11237_v5, 1  ;;  %v16192_v39 = vld [vmem:[#allocation3_spill] sm:$0xff]  ;;  %v12018_v5 = vld [vmem:[%s15830_s6 + $0x10] sm:$0xf] }
  0x86   : > { %16186 = vst [vmem:[#allocation76_spill] sm:$0xff] %v11961_v18  ;;  %10000 = vmatprep.mubr.msk.f32.mxu0 %vm874_vm1, %v11961_v18  ;;  %16188 = vst [vmem:[#allocation78_spill] sm:$0xff] %v11977_v56  ;;  %v11994_v3 = vsel %vm1502_vm3, %v1632_v30, %v1633_v11  ;;  %v2282_v22 = vrot.slane %v11359_v36, 2  ;;  %v16195_v18 = vld [vmem:[#allocation12_spill] sm:$0xff] }
  0x87   : > { %16190 = vst [vmem:[#allocation80_spill] sm:$0xff] %v11994_v3  ;;  %v12003_v1 = vsel %vm1502_vm3, %v1633_v11, %v1635_v26  ;;  %16196 = vst [vmem:[#allocation3_spill] sm:$0xff] %v12011_v40  ;;  %v16200_v11 = vld [vmem:[#allocation4_spill] sm:$0xff] }
  0x88   : > { %10030 = vmatmul.mubr.msk.f32.gmra.mxu1 %vm874_vm1, %v11947_v31  ;;  %16191 = vst [vmem:[#allocation81_spill] sm:$0xff] %v12003_v1  ;;  %v2284_v31 = vrot.slane %v16195_v18, 2  ;;  %v16204_v18 = vld [vmem:[#allocation28_spill] sm:$0xff] }
  0x89   : > { %10032 = vmatprep.mubr.msk.f32.mxu1 %vm874_vm1, %v11957_v42  ;;  %v11984_v42 = vld [vmem:[%s11227_s28 + $0xb8] sm:$0x3]  ;;  %10001 = vmatmul.mubr.msk.f32.gmra.mxu0 %vm874_vm1, %v11977_v56  ;;  %v1640_v56 = vrot.slane %v16192_v39, 1  ;;  %v16202_v39 = vld [vmem:[#allocation27_spill] sm:$0xff] }
  0x8a   : > { %v1637_v7 = vrot.slane %v11984_v42, 1  ;;  %10052 = vmatprep.mubr.msk.f32.mxu0 %vm874_vm1, %v11483_v63  ;;  %v16198_v63 = vld [vmem:[#allocation22_spill] sm:$0xff] }
  0x8b   : > { %v12034_v34 = vsel %vm1502_vm3, %v1639_v4, %v1640_v56  ;;  %v16209_v4 = vld [vmem:[#allocation5_spill] sm:$0xff] }
  0x8c   : > { %10033 = vmatmul.mubr.msk.f32.gmra.mxu1 %vm874_vm1, %v11970_v41  ;;  %16203 = vst [vmem:[#allocation27_spill] sm:$0xff] %v12034_v34 }
  0x8d   : > { %10035 = vmatprep.mubr.msk.f32.mxu1 %vm874_vm1, %v11980_v48  ;;  %v16193_v48 = vld [vmem:[#allocation10_spill] sm:$0xff]  ;;  %10053 = vmatmul.mubr.msk.f32.vlgmr.msra.gmra.mxu0 %vm874_vm1, %v16198_v63  ;;  %v1644_v63 = vrot.slane %v12011_v40, 1 }
  0x8e   : > { %v16194_v41 = vrot.slane %v16193_v48, 2  ;;  %16197 = vst [vmem:[#allocation10_spill] sm:$0xff] %v12018_v5  ;;  %v1642_v48 = vrot.slane %v16200_v11, 1  ;;  %10145 = vmatpush3.msk.msra.mxu0 %vm965_vm0, %v16204_v18  ;;  %v12068_v40 = vld [vmem:[%s11227_s28 + $0xf8] sm:$0x3] }
  0x8f   : > { %10238 = vmatprep.subr.msk.mxu0 %vm965_vm0, %v12018_v5  ;;  %v16214_v5 = vld [vmem:[#allocation7_spill] sm:$0xff] }
  0x90   : > { %v2280_v30 = vsel %vm2273_vm2, %v16194_v41, %v2279_v12  ;;  %10036 = vmatmul.mubr.msk.f32.gmra.mxu1 %vm874_vm1, %v11994_v3  ;;  %v12025_v41 = vsel %vm1502_vm3, %v1635_v26, %v1637_v7  ;;  %v12030_v12 = vsel %vm2273_vm2, %v2281_v32, %v2282_v22  ;;  %v2286_v3 = vrot.slane %v16202_v39, 2  ;;  %v16206_v7 = vld [vmem:[#allocation14_spill] sm:$0xff] }
  0x91   : > { %10038 = vmatprep.mubr.msk.f32.mxu1 %vm874_vm1, %v12003_v1  ;;  %16199 = vst [vmem:[#allocation22_spill] sm:$0xff] %v12025_v41  ;;  %10055 = vmatprep.mubr.msk.f32.mxu0 %vm874_vm1, %v2280_v30  ;;  %16201 = vst [vmem:[#allocation4_spill] sm:$0xff] %v12030_v12  ;;  %v12040_v26 = vsel %vm2273_vm2, %v2282_v22, %v2284_v31  ;;  %v2288_v11 = vrot.slane %v16206_v7, 2  ;;  %v16207_v30 = vld [vmem:[#allocation15_spill] sm:$0xff]  ;;  %v12053_v18 = vsel %vm1502_vm3, %v1640_v56, %v1642_v48  ;;  %v16210_v22 = vld [vmem:[#allocation6_spill] sm:$0xff] }
  0x92   : > { %16205 = vst [vmem:[#allocation28_spill] sm:$0xff] %v12040_v26  ;;  %v2289_v1 = vrot.slane %v16207_v30, 2  ;;  %10056 = vmatmul.mubr.msk.f32.gmra.mxu0 %vm874_vm1, %v12030_v12  ;;  %16208 = vst [vmem:[#allocation82_spill] sm:$0xff] %v12053_v18  ;;  %v1646_v32 = vrot.slane %v16209_v4, 1  ;;  %v1647_v39 = vrot.slane %v16210_v22, 1  ;;  %v12060_v30 = vsel %vm2273_vm2, %v2284_v31, %v2286_v3  ;;  %v16216_v4 = vld [vmem:[#allocation32_spill] sm:$0xff] }
  0x93   : > { %10058 = vmatprep.mubr.msk.f32.mxu0 %vm874_vm1, %v12040_v26  ;;  %16211 = vst [vmem:[#allocation5_spill] sm:$0xff] %v12060_v30  ;;  %v12064_v12 = vsel %vm1502_vm3, %v1642_v48, %v1644_v63  ;;  %v2293_v22 = vrot.slane %v16216_v4, 2  ;;  %v1651_v3 = vrot.slane %v12068_v40, 1  ;;  %v16219_v48 = vld [vmem:[#allocation18_spill] sm:$0xff] }
  0x94   : > { %10039 = vmatmul.mubr.msk.f32.gmra.mxu1 %vm874_vm1, %v12025_v41  ;;  %v16212_v41 = vld [vmem:[#allocation16_spill] sm:$0xff]  ;;  %16213 = vst [vmem:[#allocation6_spill] sm:$0xff] %v12064_v12  ;;  %v12071_v56 = vsel %vm2273_vm2, %v2288_v11, %v2289_v1  ;;  %v12081_v31 = vsel %vm1502_vm3, %v1646_v32, %v1647_v39  ;;  %v2295_v63 = vrot.slane %v16219_v48, 2  ;;  %v2296_v11 = vrot.slane %v11437_v51, 2 }
  0x95   : > { %10041 = vmatprep.mubr.msk.f32.mxu1 %vm874_vm1, %v12034_v34  ;;  %v2291_v7 = vrot.slane %v16212_v41, 2  ;;  %v1649_v34 = vrot.slane %v16214_v5, 1  ;;  %16215 = vst [vmem:[#allocation16_spill] sm:$0xff] %v12071_v56  ;;  %16217 = vst [vmem:[#allocation7_spill] sm:$0xff] %v12081_v31  ;;  %v2298_v32 = vrot.slane %v11449_v53, 2 }
  0x96   : > { %10059 = vmatmul.mubr.msk.f32.gmra.mxu0 %vm874_vm1, %v12060_v30 }
  0x97   : > { %10061 = vmatprep.mubr.msk.f32.mxu0 %vm874_vm1, %v12071_v56  ;;  %v12087_v5 = vsel %vm2273_vm2, %v2289_v1, %v2291_v7  ;;  %v12092_v4 = vsel %vm1502_vm3, %v1647_v39, %v1649_v34  ;;  %v12105_v1 = vsel %vm1502_vm3, %v1649_v34, %v1651_v3  ;;  %v2300_v39 = vrot.slane %v11674_v49, 2  ;;  %v16228_v34 = vld [vmem:[#allocation25_spill] sm:$0xff] }
  0x98   : > { %10042 = vmatmul.mubr.msk.f32.gmra.mxu1 %vm874_vm1, %v12053_v18  ;;  %16218 = vst [vmem:[#allocation32_spill] sm:$0xff] %v12087_v5  ;;  %16220 = vst [vmem:[#allocation18_spill] sm:$0xff] %v12092_v4  ;;  %v16227_v18 = vld [vmem:[#allocation39_spill] sm:$0xff]  ;;  %v2351_v49 = vrot.slane %v11323_v27, 2  ;;  %v2352_v3 = vrot.slane %v11331_v29, 2  ;;  %v16232_v29 = vld [vmem:[#allocation26_spill] sm:$0xff] }
  0x99   : > { %10044 = vmatprep.mubr.msk.f32.mxu1 %vm874_vm1, %v12064_v12  ;;  %v12095_v12 = vsel %vm2273_vm2, %v2291_v7, %v2293_v22  ;;  %16222 = vst [vmem:[#allocation84_spill] sm:$0xff] %v12105_v1  ;;  %v12110_v7 = vsel %vm2273_vm2, %v2295_v63, %v2296_v11  ;;  %v12114_v22 = vsel %vm2273_vm2, %v2296_v11, %v2298_v32  ;;  %v2354_v11 = vrot.slane %v11355_v35, 2 }
  0x9a   : > { %16221 = vst [vmem:[#allocation83_spill] sm:$0xff] %v12095_v12  ;;  %10062 = vmatmul.mubr.msk.f32.gmra.mxu0 %vm874_vm1, %v12087_v5  ;;  %16223 = vst [vmem:[#allocation85_spill] sm:$0xff] %v12110_v7  ;;  %v16226_v5 = vld [vmem:[#allocation21_spill] sm:$0xff]  ;;  %v12130_v63 = vsel %vm2273_vm2, %v2298_v32, %v2300_v39 }
  0x9b   : > { %10064 = vmatprep.mubr.msk.f32.mxu0 %vm874_vm1, %v12095_v12  ;;  %16224 = vst [vmem:[#allocation86_spill] sm:$0xff] %v12114_v22  ;;  %v2303_v30 = vrot.slane %v16226_v5, 2  ;;  %v12146_v32 = vld [vmem:[%s15831_s7 + $0x10] sm:$0xf]  ;;  %v12165_v39 = vsel %vm2273_vm2, %v2352_v3, %v2354_v11 }
  0x9c   : > { %10045 = vmatmul.mubr.msk.f32.gmra.mxu1 %vm874_vm1, %v12081_v31  ;;  %v16225_v31 = vld [vmem:[#allocation20_spill] sm:$0xff] }
  0x9d   : > { %10047 = vmatprep.mubr.msk.f32.mxu1 %vm874_vm1, %v12092_v4  ;;  %v2302_v56 = vrot.slane %v16225_v31, 2  ;;  %v2349_v4 = vrot.slane %v16227_v18, 2  ;;  %16229 = vst [vmem:[#allocation20_spill] sm:$0xff] %v12130_v63  ;;  %v2305_v18 = vrot.slane %v11480_v62, 2 }
  0x9e   : > { %10065 = vmatmul.mubr.msk.f32.gmra.mxu0 %vm874_vm1, %v12110_v7  ;;  %v2307_v7 = vrot.slane %v11705_v15, 2  ;;  %v2309_v15 = vrot.slane %v11500_v2, 2 }
  0x9f   : > { %10067 = vmatprep.mubr.msk.f32.mxu0 %vm874_vm1, %v12114_v22 }
  0xa0   : > { %10048 = vmatmul.mubr.msk.f32.gmra.mxu1 %vm874_vm1, %v12105_v1  ;;  %v12135_v1 = vsel %vm2273_vm2, %v2302_v56, %v2303_v30  ;;  %v2310_v56 = vrot.slane %v11508_v13, 2 }
  0xa1   : > { %10099 = vmatprep.mubr.msk.f32.mxu1 %vm874_vm1, %v16228_v34  ;;  %v16230_v34 = vld [vmem:[#allocation8_spill] sm:$0xff] }
  0xa2   : > { %v16231_v12 = vrot.slane %v16230_v34, 2  ;;  %10068 = vmatmul.mubr.msk.f32.gmra.mxu0 %vm874_vm1, %v12130_v63  ;;  %v16234_v63 = vld [vmem:[#allocation13_spill] sm:$0xff] }
  0xa3   : > { %10070 = vmatprep.mubr.msk.f32.mxu0 %vm874_vm1, %v12135_v1  ;;  %v2359_v22 = vrot.slane %v16234_v63, 2 }
  0xa4   : > { %v2350_v26 = vsel %vm2273_vm2, %v16231_v12, %v2349_v4  ;;  %10100 = vmatmul.mubr.msk.f32.vlgmr.msra.gmra.mxu1 %vm874_vm1, %v16232_v29  ;;  %v12155_v12 = vsel %vm2273_vm2, %v2351_v49, %v2352_v3  ;;  %v2356_v29 = vrot.slane %v11400_v44, 2  ;;  %v12161_v4 = vsel %vm2273_vm2, %v2303_v30, %v2305_v18 }
  0xa5   : > { %10192 = vmatpush3.msk.msra.mxu1 %vm965_vm0, %v11729_v10  ;;  %10102 = vmatprep.mubr.msk.f32.mxu1 %vm874_vm1, %v2350_v26  ;;  %v16233_v10 = vld [vmem:[#allocation11_spill] sm:$0xff]  ;;  %v12170_v49 = vsel %vm2273_vm2, %v2305_v18, %v2307_v7  ;;  %v2312_v44 = vrot.slane %v11521_v19, 2  ;;  %v2361_v30 = vrot.slane %v11397_v43, 2  ;;  %v12188_v7 = vsel %vm2273_vm2, %v2309_v15, %v2310_v56  ;;  %v16240_v15 = vld [vmem:[#allocation17_spill] sm:$0xff] }
  0xa6   : > { %v2358_v34 = vrot.slane %v16233_v10, 2  ;;  %10285 = vmatprep.subr.msk.mxu1 %vm965_vm0, %v12146_v32  ;;  %10071 = vmatmul.mubr.msk.f32.gmra.mxu0 %vm874_vm1, %v12161_v4  ;;  %v12182_v26 = vsel %vm2273_vm2, %v2354_v11, %v2356_v29  ;;  %16236 = vst [vmem:[#allocation39_spill] sm:$0xff] %v12188_v7  ;;  %v2314_v3 = vrot.slane %v11757_v38, 2  ;;  %v2363_v18 = vrot.slane %v11760_v17, 2  ;;  %v16239_v29 = vld [vmem:[#allocation24_spill] sm:$0xff] }
  0xa7   : > { %16235 = vst [vmem:[#allocation21_spill] sm:$0xff] %v12182_v26  ;;  %10073 = vmatprep.mubr.msk.f32.mxu0 %vm874_vm1, %v12170_v49  ;;  %v12196_v10 = vsel %vm2273_vm2, %v2310_v56, %v2312_v44  ;;  %v2316_v11 = vrot.slane %v11530_v23, 2  ;;  %v2317_v43 = vrot.slane %v16239_v29, 2  ;;  %v12207_v38 = vsel %vm2273_vm2, %v2359_v22, %v2361_v30 }
  0xa8   : > { %10103 = vmatmul.mubr.msk.f32.gmra.mxu1 %vm874_vm1, %v12155_v12  ;;  %v12192_v63 = vsel %vm2273_vm2, %v2358_v34, %v2359_v22  ;;  %16238 = vst [vmem:[#allocation8_spill] sm:$0xff] %v12196_v10  ;;  %v2365_v17 = vrot.slane %v11414_v46, 2  ;;  %v2366_v56 = vrot.slane %v16240_v15, 2  ;;  %v12214_v34 = vsel %vm2273_vm2, %v2312_v44, %v2314_v3 }
  0xa9   : > { %10105 = vmatprep.mubr.msk.f32.mxu1 %vm874_vm1, %v12165_v39  ;;  %16237 = vst [vmem:[#allocation25_spill] sm:$0xff] %v12192_v63  ;;  %16241 = vst [vmem:[#allocation26_spill] sm:$0xff] %v12214_v34  ;;  %v12222_v22 = vsel %vm2273_vm2, %v2316_v11, %v2317_v43  ;;  %v2321_v46 = vrot.slane %v11792_v20, 2  ;;  %v2323_v44 = vrot.slane %v11578_v37, 2  ;;  %v2370_v3 = vrot.slane %v11814_v47, 2  ;;  %v16247_v11 = vld [vmem:[#allocation19_spill] sm:$0xff] }
  0xaa   : > { %10074 = vmatmul.mubr.msk.f32.gmra.mxu0 %vm874_vm1, %v12188_v7  ;;  %v12218_v7 = vsel %vm2273_vm2, %v2361_v30, %v2363_v18  ;;  %16243 = vst [vmem:[#allocation13_spill] sm:$0xff] %v12222_v22  ;;  %v2324_v30 = vrot.slane %v11585_v54, 2  ;;  %v2372_v15 = vrot.slane %v16247_v11, 2 }
  0xab   : > { %10076 = vmatprep.mubr.msk.f32.mxu0 %vm874_vm1, %v12196_v10  ;;  %16242 = vst [vmem:[#allocation11_spill] sm:$0xff] %v12218_v7 }
  0xac   : > { %10106 = vmatmul.mubr.msk.f32.gmra.mxu1 %vm874_vm1, %v12182_v26  ;;  %v2319_v26 = vrot.slane %v11558_v59, 2 }
  0xad   : > { %10108 = vmatprep.mubr.msk.f32.mxu1 %vm874_vm1, %v12192_v63  ;;  %v2368_v63 = vrot.slane %v11434_v50, 2  ;;  %v12234_v50 = vsel %vm2273_vm2, %v2365_v17, %v2366_v56  ;;  %v2326_v17 = vrot.slane %v11603_v9, 2 }
  0xae   : > { %10077 = vmatmul.mubr.msk.f32.gmra.mxu0 %vm874_vm1, %v12214_v34  ;;  %16244 = vst [vmem:[#allocation24_spill] sm:$0xff] %v12234_v50  ;;  %v12240_v20 = vsel %vm2273_vm2, %v2317_v43, %v2319_v26  ;;  %v12248_v34 = vsel %vm2273_vm2, %v2319_v26, %v2321_v46  ;;  %v2375_v43 = vrot.slane %v11461_v57, 2  ;;  %v2328_v26 = vrot.slane %v11847_v28, 2 }
  0xaf   : > { %10079 = vmatprep.mubr.msk.f32.mxu0 %vm874_vm1, %v12222_v22  ;;  %16245 = vst [vmem:[#allocation17_spill] sm:$0xff] %v12240_v20  ;;  %v12243_v18 = vsel %vm2273_vm2, %v2366_v56, %v2368_v63  ;;  %16248 = vst [vmem:[#allocation19_spill] sm:$0xff] %v12248_v34  ;;  %v12258_v47 = vsel %vm2273_vm2, %v2368_v63, %v2370_v3  ;;  %v2377_v46 = vrot.slane %v11850_v52, 2  ;;  %v16253_v63 = vld [vmem:[#allocation30_spill] sm:$0xff]  ;;  %v2333_v28 = vrot.slane %v11641_v45, 2 }
  0xb0   : > { %10109 = vmatmul.mubr.msk.f32.gmra.mxu1 %vm874_vm1, %v12207_v38  ;;  %16246 = vst [vmem:[#allocation87_spill] sm:$0xff] %v12243_v18  ;;  %16249 = vst [vmem:[#allocation88_spill] sm:$0xff] %v12258_v47  ;;  %v12272_v11 = vsel %vm2273_vm2, %v2324_v30, %v2326_v17  ;;  %v2330_v3 = vrot.slane %v16253_v63, 2 }
  0xb1   : > { %10111 = vmatprep.mubr.msk.f32.mxu1 %vm874_vm1, %v12218_v7  ;;  %v2373_v7 = vrot.slane %v11455_v55, 2  ;;  %v12264_v55 = vsel %vm2273_vm2, %v2323_v44, %v2324_v30  ;;  %16252 = vst [vmem:[#allocation91_spill] sm:$0xff] %v12272_v11  ;;  %v2379_v44 = vrot.slane %v11477_v61, 2  ;;  %v16256_v30 = vld [vmem:[#allocation23_spill] sm:$0xff] }
  0xb2   : > { %10080 = vmatmul.mubr.msk.f32.gmra.mxu0 %vm874_vm1, %v12240_v20  ;;  %16250 = vst [vmem:[#allocation89_spill] sm:$0xff] %v12264_v55 }
  0xb3   : > { %10082 = vmatprep.mubr.msk.f32.mxu0 %vm874_vm1, %v12248_v34  ;;  %v12268_v56 = vsel %vm2273_vm2, %v2372_v15, %v2373_v7  ;;  %v12284_v52 = vsel %vm2273_vm2, %v2373_v7, %v2375_v43  ;;  %v2380_v15 = vrot.slane %v16256_v30, 2  ;;  %v2335_v7 = vrot.slane %v11880_v60, 2  ;;  %v16263_v60 = vld [vmem:[#allocation37_spill] sm:$0xff] }
  0xb4   : > { %10112 = vmatmul.mubr.msk.f32.gmra.mxu1 %vm874_vm1, %v12234_v50  ;;  %16251 = vst [vmem:[#allocation90_spill] sm:$0xff] %v12268_v56  ;;  %16255 = vst [vmem:[#allocation30_spill] sm:$0xff] %v12284_v52  ;;  %v2387_v30 = vrot.slane %v11527_v21, 2 }
  0xb5   : > { %10114 = vmatprep.mubr.msk.f32.mxu1 %vm874_vm1, %v12243_v18  ;;  %v16254_v18 = vld [vmem:[#allocation33_spill] sm:$0xff] }
  0xb6   : > { %v2331_v57 = vrot.slane %v16254_v18, 2  ;;  %10083 = vmatmul.mubr.msk.f32.gmra.mxu0 %vm874_vm1, %v12264_v55  ;;  %v12294_v55 = vsel %vm2273_vm2, %v2375_v43, %v2377_v46  ;;  %v16262_v43 = vld [vmem:[#allocation67_spill] sm:$0xff]  ;;  %v2338_v46 = vrot.slane %v16263_v60, 2 }
  0xb7   : > { %10085 = vmatprep.mubr.msk.f32.mxu0 %vm874_vm1, %v12272_v11  ;;  %16258 = vst [vmem:[#allocation23_spill] sm:$0xff] %v12294_v55 }
  0xb8   : > { %10115 = vmatmul.mubr.msk.f32.gmra.mxu1 %vm874_vm1, %v12258_v47  ;;  %v12291_v47 = vsel %vm2273_vm2, %v2326_v17, %v2328_v26  ;;  %v12298_v34 = vsel %vm2273_vm2, %v2330_v3, %v2331_v57  ;;  %v12306_v61 = vsel %vm2273_vm2, %v2331_v57, %v2333_v28  ;;  %v2337_v17 = vrot.slane %v11655_v0, 2 }
  0xb9   : > { %10117 = vmatprep.mubr.msk.f32.mxu1 %vm874_vm1, %v12268_v56  ;;  %16257 = vst [vmem:[#allocation33_spill] sm:$0xff] %v12291_v47  ;;  %v2382_v56 = vrot.slane %v11505_v6, 2  ;;  %16259 = vst [vmem:[#allocation92_spill] sm:$0xff] %v12298_v34  ;;  %v12312_v6 = vsel %vm2273_vm2, %v2379_v44, %v2380_v15  ;;  %v2384_v26 = vrot.slane %v16262_v43, 2  ;;  %v2386_v57 = vrot.slane %v11511_v14, 2 }
  0xba   : > { %10086 = vmatmul.mubr.msk.f32.gmra.mxu0 %vm874_vm1, %v12291_v47  ;;  %16260 = vst [vmem:[#allocation93_spill] sm:$0xff] %v12306_v61  ;;  %16261 = vst [vmem:[#allocation94_spill] sm:$0xff] %v12312_v6  ;;  %v2340_v44 = vrot.slane %v11687_v16, 2  ;;  %v2389_v14 = vrot.slane %v11533_v24, 2  ;;  %v12340_v21 = vsel %vm2273_vm2, %v2337_v17, %v2338_v46  ;;  %v2391_v43 = vrot.slane %v11938_v25, 2 }
  0xbb   : > { %10088 = vmatprep.mubr.msk.f32.mxu0 %vm874_vm1, %v12298_v34  ;;  %v12319_v3 = vsel %vm2273_vm2, %v2380_v15, %v2382_v56  ;;  %v12334_v15 = vsel %vm2273_vm2, %v2382_v56, %v2384_v26  ;;  %16267 = vst [vmem:[#allocation96_spill] sm:$0xff] %v12340_v21  ;;  %v12361_v56 = vld [vmem:[%s11227_s28 + $0xa8] sm:$0xff] }
  0xbc   : > { %10118 = vmatmul.mubr.msk.f32.gmra.mxu1 %vm874_vm1, %v12284_v52  ;;  %16264 = vst [vmem:[#allocation67_spill] sm:$0xff] %v12319_v3  ;;  %16266 = vst [vmem:[#allocation95_spill] sm:$0xff] %v12334_v15  ;;  %v12357_v24 = vsel %vm2273_vm2, %v2387_v30, %v2389_v14  ;;  %v2394_v25 = vrot.slane %v12361_v56, 2  ;;  %v12370_v26 = vsel %vm2273_vm2, %v2389_v14, %v2391_v43  ;;  %v12392_v14 = vld [vmem:[%s11227_s28 + $0xc0] sm:$0xff]  ;;  %v12396_v43 = vld [vmem:[%s11227_s28 + $0xc8] sm:$0xff] }
  0xbd   : > { %10120 = vmatprep.mubr.msk.f32.mxu1 %vm874_vm1, %v12294_v55  ;;  %v12324_v55 = vsel %vm2273_vm2, %v2333_v28, %v2335_v7  ;;  %v2342_v28 = vrot.slane %v11935_v8, 2  ;;  %v12344_v7 = vsel %vm2273_vm2, %v2386_v57, %v2387_v30  ;;  %16270 = vst [vmem:[#allocation99_spill] sm:$0xff] %v12357_v24  ;;  %v2393_v8 = vrot.slane %v11555_v58, 2  ;;  %16272 = vst [vmem:[#allocation101_spill] sm:$0xff] %v12370_v26 }
  0xbe   : > { %16265 = vst [vmem:[#allocation37_spill] sm:$0xff] %v12324_v55  ;;  %10089 = vmatmul.mubr.msk.f32.gmra.mxu0 %vm874_vm1, %v12306_v61  ;;  %16268 = vst [vmem:[#allocation97_spill] sm:$0xff] %v12344_v7  ;;  %v2398_v30 = vrot.slane %v11984_v42, 2  ;;  %v12404_v42 = vld [vmem:[%s15830_s6 + $0x14] sm:$0xf] }
  0xbf   : > { %10091 = vmatprep.mubr.msk.f32.mxu0 %vm874_vm1, %v12324_v55  ;;  %v12367_v17 = vsel %vm2273_vm2, %v2340_v44, %v2342_v28  ;;  %v12383_v58 = vsel %vm2273_vm2, %v2393_v8, %v2394_v25  ;;  %v2400_v28 = vrot.slane %v12392_v14, 2  ;;  %v12414_v8 = vld [vmem:[%s11227_s28 + $0xd0] sm:$0xff] }
  0xc0   : > { %10121 = vmatmul.mubr.msk.f32.gmra.mxu1 %vm874_vm1, %v12312_v6  ;;  %16271 = vst [vmem:[#allocation100_spill] sm:$0xff] %v12367_v17  ;;  %16273 = vst [vmem:[#allocation102_spill] sm:$0xff] %v12383_v58 }
  0xc1   : > { %10123 = vmatprep.mubr.msk.f32.mxu1 %vm874_vm1, %v12319_v3  ;;  %v12348_v3 = vsel %vm2273_vm2, %v2338_v46, %v2340_v44  ;;  %v12373_v46 = vld [vmem:[%s11227_s28 + $0xb0] sm:$0xff] }
  0xc2   : > { %16269 = vst [vmem:[#allocation98_spill] sm:$0xff] %v12348_v3  ;;  %10092 = vmatmul.mubr.msk.f32.gmra.mxu0 %vm874_vm1, %v12340_v21  ;;  %v2396_v57 = vrot.slane %v12373_v46, 2 }
  0xc3   : > { %10094 = vmatprep.mubr.msk.f32.mxu0 %vm874_vm1, %v12348_v3  ;;  %v16279_v3 = vld [vmem:[#allocation10_spill] sm:$0xff] }
  0xc4   : > { %10124 = vmatmul.mubr.msk.f32.gmra.mxu1 %vm874_vm1, %v12334_v15  ;;  %v12389_v44 = vsel %vm2273_vm2, %v2394_v25, %v2396_v57  ;;  %v2403_v25 = vrot.slane %v12414_v8, 2 }
  0xc5   : > { %10126 = vmatprep.mubr.msk.f32.mxu1 %vm874_vm1, %v12344_v7  ;;  %16274 = vst [vmem:[#allocation103_spill] sm:$0xff] %v12389_v44 }
  0xc6   : > { %10095 = vmatmul.mubr.msk.f32.gmra.mxu0 %vm874_vm1, %v12367_v17  ;;  %v2401_v17 = vrot.slane %v12396_v43, 2 }
  0xc7   : > { %10146 = vmatprep.mubr.msk.f32.mxu0 %vm874_vm1, %v11345_v33  ;;  %v12411_v33 = vsel %vm2273_vm2, %v2396_v57, %v2398_v30  ;;  %v16280_v57 = vld [vmem:[#allocation14_spill] sm:$0xff]  ;;  %v12441_v30 = vld [vmem:[%s11227_s28 + $0xe8] sm:$0xff] }
  0xc8   : > { %10127 = vmatmul.mubr.msk.f32.gmra.mxu1 %vm874_vm1, %v12357_v24  ;;  %16275 = vst [vmem:[#allocation104_spill] sm:$0xff] %v12411_v33  ;;  %v16278_v24 = vld [vmem:[#allocation3_spill] sm:$0xff] }
  0xc9   : > { %10129 = vmatprep.mubr.msk.f32.mxu1 %vm874_vm1, %v12370_v26  ;;  %v12420_v26 = vsel %vm2273_vm2, %v2400_v28, %v2401_v17  ;;  %v2408_v28 = vrot.slane %v12441_v30, 2 }
  0xca   : > { %10147 = vmatmul.mubr.msk.f32.vlgmr.msra.gmra.mxu0 %vm874_vm1, %v11359_v36  ;;  %v2405_v36 = vrot.slane %v16278_v24, 2  ;;  %v12437_v24 = vld [vmem:[%s11227_s28 + $0xe0] sm:$0xff] }
  0xcb   : > { %10239 = vmatpush3.msk.msra.mxu0 %vm965_vm0, %v16279_v3  ;;  %v2407_v3 = vrot.slane %v12437_v24, 2 }
  0xcc   : > { %10130 = vmatmul.mubr.msk.f32.gmra.mxu1 %vm874_vm1, %v12383_v58  ;;  %v16276_v58 = vld [vmem:[#allocation12_spill] sm:$0xff]  ;;  %10332 = vmatprep.subr.msk.mxu0 %vm965_vm0, %v12404_v42 }
  0xcd   : > { %10132 = vmatprep.mubr.msk.f32.mxu1 %vm874_vm1, %v12389_v44  ;;  %10149 = vmatprep.mubr.msk.f32.mxu0 %vm874_vm1, %v16276_v58  ;;  %16277 = vst [vmem:[#allocation12_spill] sm:$0xff] %v12420_v26  ;;  %v12434_v58 = vsel %vm2273_vm2, %v2401_v17, %v2403_v25  ;;  %v16282_v44 = vld [vmem:[#allocation15_spill] sm:$0xff] }
  0xce   : > { %10150 = vmatmul.mubr.msk.f32.gmra.mxu0 %vm874_vm1, %v16280_v57  ;;  %16281 = vst [vmem:[#allocation3_spill] sm:$0xff] %v12434_v58  ;;  %v12447_v57 = vsel %vm2273_vm2, %v2403_v25, %v2405_v36  ;;  %v10994_v36 = vld [vmem:[%s11227_s28 + $0x10] sm:$0xff] }
  0xcf   : > { %10152 = vmatprep.mubr.msk.f32.mxu0 %vm874_vm1, %v16282_v44  ;;  %16283 = vst [vmem:[#allocation10_spill] sm:$0xff] %v12447_v57  ;;  %v2412_v44 = vrot.slane %v12068_v40, 2 }
  0xd0   : > { %10133 = vmatmul.mubr.msk.f32.gmra.mxu1 %vm874_vm1, %v12411_v33  ;;  %v12450_v33 = vld [vmem:[%s11227_s28 + $0xf0] sm:$0xff] }
  0xd1   : > { %10135 = vmatprep.mubr.msk.f32.mxu1 %vm874_vm1, %v12420_v26  ;;  %v2410_v17 = vrot.slane %v12450_v33, 2  ;;  %v12460_v26 = vsel %vm2273_vm2, %v2407_v3, %v2408_v28 }
  0xd2   : > { %10153 = vmatmul.mubr.msk.f32.gmra.mxu0 %vm874_vm1, %v16212_v41  ;;  %16284 = vst [vmem:[#allocation14_spill] sm:$0xff] %v12460_v26 }
  0xd3   : > { %10155 = vmatprep.mubr.msk.f32.mxu0 %vm874_vm1, %v16219_v48  ;;  %v12466_v25 = vsel %vm2273_vm2, %v2408_v28, %v2410_v17  ;;  %v12477_v41 = vsel %vm2273_vm2, %v2410_v17, %v2412_v44  ;;  %v16288_v48 = vld [vmem:[#allocation9_spill] sm:$0xff]  ;;  %v10996_v44 = vld [vmem:[%s11227_s28 + $0x28] sm:$0xff] }
  0xd4   : > { %10136 = vmatmul.mubr.msk.f32.gmra.mxu1 %vm874_vm1, %v12434_v58  ;;  %16285 = vst [vmem:[#allocation15_spill] sm:$0xff] %v12466_v25  ;;  %16287 = vst [vmem:[#allocation105_spill] sm:$0xff] %v12477_v41 }
  0xd5   : > { %10138 = vmatprep.mubr.msk.f32.mxu1 %vm874_vm1, %v12447_v57 }
  0xd6   : > { %10156 = vmatmul.mubr.msk.f32.gmra.mxu0 %vm874_vm1, %v11437_v51 }
  0xd7   : > { %10158 = vmatprep.mubr.msk.f32.mxu0 %vm874_vm1, %v11449_v53 }
  0xd8   : > { %10139 = vmatmul.mubr.msk.f32.gmra.mxu1 %vm874_vm1, %v12460_v26 }
  0xd9   : > { %10141 = vmatprep.mubr.msk.f32.mxu1 %vm874_vm1, %v12466_v25 }
  0xda   : > { %10159 = vmatmul.mubr.msk.f32.gmra.mxu0 %vm874_vm1, %v16225_v31  ;;  %v12502_v31 = vld [vmem:[%s15831_s7 + $0x14] sm:$0xf] }
  0xdb   : > { %10161 = vmatprep.mubr.msk.f32.mxu0 %vm874_vm1, %v16226_v5 }
  0xdc   : > { %v12481_v40 = vpop.f32.mrf.mxu1  ;;  %10142 = vmatmul.mubr.msk.f32.gmra.mxu1 %vm874_vm1, %v12477_v41  ;;  %v760_v41 = vld [vmem:[%s12589_s16 + $0x8] sm:$0xff] }
  0xdd   : > { %10193 = vmatprep.mubr.msk.f32.mxu1 %vm874_vm1, %v11323_v27 }
  0xde   : > { %v12491_v51 = vpop.f32.mrf.mxu1  ;;  %10162 = vmatmul.mubr.msk.f32.gmra.mxu0 %vm874_vm1, %v11480_v62  ;;  %v10992_v62 = vld [vmem:[%s11227_s28] sm:$0xff] }
  0xdf   : > { %10164 = vmatprep.mubr.msk.f32.mxu0 %vm874_vm1, %v11500_v2 }
  0xe0   : > { %v12495_v53 = vpop.f32.mrf.mxu1  ;;  %10194 = vmatmul.mubr.msk.f32.vlgmr.msra.gmra.mxu1 %vm874_vm1, %v16288_v48 }
  0xe1   : > { %10286 = vmatpush3.msk.msra.mxu1 %vm965_vm0, %v12146_v32  ;;  %10196 = vmatprep.mubr.msk.f32.mxu1 %vm874_vm1, %v11355_v35  ;;  %v10993_v32 = vld [vmem:[%s11227_s28 + $0x8] sm:$0xff] }
  0xe2   : > { %v12510_v27 = vpop.f32.mrf.mxu1  ;;  %10379 = vmatprep.subr.msk.mxu1 %vm965_vm0, %v12502_v31  ;;  %10165 = vmatmul.mubr.msk.f32.gmra.mxu0 %vm874_vm1, %v11508_v13  ;;  %v9866_v3 = vpop.f32.mrf.mxu0  ;;  %v10995_v13 = vld [vmem:[%s11227_s28 + $0x20] sm:$0xff] }
  0xe3   : > { %10167 = vmatprep.mubr.msk.f32.mxu0 %vm874_vm1, %v11521_v19 }
  0xe4   : > { %v12517_v5 = vpop.f32.mrf.mxu1  ;;  %10197 = vmatmul.mubr.msk.f32.gmra.mxu1 %vm874_vm1, %v10992_v62  ;;  %v1035_v28 = vpop.f32.mrf.mxu0  ;;  %v10997_v62 = vld [vmem:[%s11227_s28 + $0x30] sm:$0xff] }
  0xe5   : > { %10199 = vmatprep.mubr.msk.f32.mxu1 %vm874_vm1, %v10993_v32 }
  0xe6   : > { %v12527_v35 = vpop.f32.mrf.mxu1  ;;  %10168 = vmatmul.mubr.msk.f32.gmra.mxu0 %vm874_vm1, %v11530_v23  ;;  %v9869_v48 = vpop.f32.mrf.mxu0 }
  0xe7   : > { %10170 = vmatprep.mubr.msk.f32.mxu0 %vm874_vm1, %v16239_v29 }
  0xe8   : > { %v12529_v2 = vpop.f32.mrf.mxu1  ;;  %10200 = vmatmul.mubr.msk.f32.gmra.mxu1 %vm874_vm1, %v10994_v36  ;;  %v1045_v32 = vpop.f32.mrf.mxu0 }
  0xe9   : > { %10202 = vmatprep.mubr.msk.f32.mxu1 %vm874_vm1, %v10995_v13 }
  0xea   : > { %v12539_v19 = vpop.f32.mrf.mxu1  ;;  %10171 = vmatmul.mubr.msk.f32.gmra.mxu0 %vm874_vm1, %v11558_v59  ;;  %v9872_v59 = vpop.f32.mrf.mxu0 }
  0xeb   : > { %10173 = vmatprep.mubr.msk.f32.mxu0 %vm874_vm1, %v11578_v37 }
  0xec   : > { %v9913_v17 = vpop.f32.mrf.mxu1  ;;  %10203 = vmatmul.mubr.msk.f32.gmra.mxu1 %vm874_vm1, %v10996_v44  ;;  %v10998_v44 = vld [vmem:[%s11227_s28 + $0x40] sm:$0xff] }
  0xed   : > { %v12545_v23 = vadd.f32 %v9913_v17, %v9866_v3  ;;  %10205 = vmatprep.mubr.msk.f32.mxu1 %vm874_vm1, %v10997_v62  ;;  %v10999_v17 = vld [vmem:[%s11227_s28 + $0x48] sm:$0xff] }
  0xee   : > { %v1343_v29 = vpop.f32.mrf.mxu1  ;;  %10174 = vmatmul.mubr.msk.f32.gmra.mxu0 %vm874_vm1, %v11585_v54 }
  0xef   : > { %v12551_v36 = vadd.f32 %v1343_v29, %v1035_v28  ;;  %10176 = vmatprep.mubr.msk.f32.mxu0 %vm874_vm1, %v11603_v9  ;;  %v1055_v28 = vpop.f32.mrf.mxu0  ;;  %v11001_v9 = vld [vmem:[%s11227_s28 + $0x60] sm:$0xff] }
  0xf0   : > { %v9916_v13 = vpop.f32.mrf.mxu1  ;;  %10206 = vmatmul.mubr.msk.f32.gmra.mxu1 %vm874_vm1, %v10998_v44 }
  0xf1   : > { %v12557_v3 = vadd.f32 %v9916_v13, %v9869_v48  ;;  %10208 = vmatprep.mubr.msk.f32.mxu1 %vm874_vm1, %v10999_v17  ;;  %v11000_v48 = vld [vmem:[%s11227_s28 + $0x50] sm:$0xff]  ;;  %v9875_v29 = vpop.f32.mrf.mxu0 }
  0xf2   : > { %v1353_v37 = vpop.f32.mrf.mxu1  ;;  %10177 = vmatmul.mubr.msk.f32.gmra.mxu0 %vm874_vm1, %v16253_v63 }
  0xf3   : > { %v12567_v62 = vadd.f32 %v1353_v37, %v1045_v32  ;;  %10179 = vmatprep.mubr.msk.f32.mxu0 %vm874_vm1, %v16254_v18  ;;  %v1065_v44 = vpop.f32.mrf.mxu0 }
  0xf4   : > { %v9919_v54 = vpop.f32.mrf.mxu1  ;;  %10209 = vmatmul.mubr.msk.f32.gmra.mxu1 %vm874_vm1, %v11000_v48  ;;  %v759_v48 = vld [vmem:[%s12589_s16] sm:$0xff] }
  0xf5   : > { %v12574_v13 = vadd.f32 %v9919_v54, %v9872_v59  ;;  %10211 = vmatprep.mubr.msk.f32.mxu1 %vm874_vm1, %v11001_v9  ;;  %v11002_v59 = vld [vmem:[%s11227_s28 + $0x68] sm:$0xff]  ;;  %v9878_v18 = vpop.f32.mrf.mxu0  ;;  %v12602_v9 = vstv %s741_s13 }
  0xf6   : > { %v1363_v32 = vpop.f32.mrf.mxu1  ;;  %10180 = vmatmul.mubr.msk.f32.gmra.mxu0 %vm874_vm1, %v11641_v45  ;;  %v11004_v45 = vld [vmem:[%s11227_s28 + $0x80] sm:$0xff] }
  0xf7   : > { %v12582_v17 = vadd.f32 %v1363_v32, %v1055_v28  ;;  %v11003_v28 = vld [vmem:[%s11227_s28 + $0x70] sm:$0xff]  ;;  %10182 = vmatprep.mubr.msk.f32.mxu0 %vm874_vm1, %v11655_v0  ;;  %v1075_v32 = vpop.f32.mrf.mxu0  ;;  %v12614_v0 = vmul.f32 %v12602_v9, %v759_v48 }
  0xf8   : > { %v9922_v63 = vpop.f32.mrf.mxu1  ;;  %10212 = vmatmul.mubr.msk.f32.gmra.mxu1 %vm874_vm1, %v11002_v59 }
  0xf9   : > { %v12595_v37 = vadd.f32 %v9922_v63, %v9875_v29  ;;  %10214 = vmatprep.mubr.msk.f32.mxu1 %vm874_vm1, %v11003_v28  ;;  %v9881_v29 = vpop.f32.mrf.mxu0  ;;  %16289 = vst [vmem:[#allocation9_spill] sm:$0xff] %v12614_v0  ;;  %v11005_v28 = vld [vmem:[%s11227_s28 + $0x88] sm:$0xff] }
  0xfa   : > { %v1373_v54 = vpop.f32.mrf.mxu1  ;;  %10183 = vmatmul.mubr.msk.f32.gmra.mxu0 %vm874_vm1, %v16263_v60 }
  0xfb   : > { %v12604_v59 = vadd.f32 %v1373_v54, %v1065_v44  ;;  %10185 = vmatprep.mubr.msk.f32.mxu0 %vm874_vm1, %v11687_v16  ;;  %v12621_v54 = vmul.f32 %v12602_v9, %v760_v41  ;;  %v1085_v26 = vpop.f32.mrf.mxu0 }
  0xfc   : > { %v9925_v25 = vpop.f32.mrf.mxu1  ;;  %10215 = vmatmul.mubr.msk.f32.gmra.mxu1 %vm874_vm1, %v11004_v45  ;;  %v761_v45 = vld [vmem:[%s12589_s16 + $0x10] sm:$0xff] }
  0xfd   : > { %v12611_v63 = vadd.f32 %v9925_v25, %v9878_v18  ;;  %10217 = vmatprep.mubr.msk.f32.mxu1 %vm874_vm1, %v11005_v28  ;;  %16290 = vst [vmem:[#allocation106_spill] sm:$0xff] %v12621_v54  ;;  %v11006_v25 = vld [vmem:[%s11227_s28 + $0x90] sm:$0xff]  ;;  %v9884_v18 = vpop.f32.mrf.mxu0  ;;  %v12633_v16 = vmul.f32 %v12602_v9, %v761_v45  ;;  %v11007_v28 = vld [vmem:[%s11227_s28 + $0xa0] sm:$0xff] }
  0xfe   : > { %v1383_v44 = vpop.f32.mrf.mxu1  ;;  %10186 = vmatmul.mubr.msk.f32.gmra.mxu0 %vm874_vm1, %v12614_v0 }
  0xff   : > { %v12624_v57 = vadd.f32 %v1383_v44, %v1075_v32  ;;  %16291 = vst [vmem:[#allocation107_spill] sm:$0xff] %v12633_v16  ;;  %10188 = vmatprep.mubr.msk.f32.mxu0 %vm874_vm1, %v12621_v54  ;;  %v1095_v32 = vpop.f32.mrf.mxu0 }
 0x100   : > { %v9928_v60 = vpop.f32.mrf.mxu1  ;;  %10218 = vmatmul.mubr.msk.f32.gmra.mxu1 %vm874_vm1, %v11006_v25 }
 0x101   : > { %v12630_v48 = vadd.f32 %v9928_v60, %v9881_v29  ;;  %10220 = vmatprep.mubr.msk.f32.mxu1 %vm874_vm1, %v11007_v28  ;;  %v9887_v29 = vpop.f32.mrf.mxu0  ;;  %v16292_v60 = vld [vmem:[#allocation29_spill] sm:$0xff] }
 0x102   : > { %v1393_v41 = vpop.f32.mrf.mxu1  ;;  %10189 = vmatmul.mubr.msk.f32.gmra.mxu0 %vm874_vm1, %v12633_v16 }
 0x103   : > { %v12639_v44 = vadd.f32 %v1393_v41, %v1085_v26  ;;  %10240 = vmatprep.mubr.msk.f32.mxu0 %vm874_vm1, %v16292_v60  ;;  %v1105_v26 = vpop.f32.mrf.mxu0 }
 0x104   : > { %v9931_v25 = vpop.f32.mrf.mxu1  ;;  %10221 = vmatmul.mubr.msk.f32.gmra.mxu1 %vm874_vm1, %v12361_v56  ;;  %v12658_v56 = vld [vmem:[%s15830_s6 + $0x18] sm:$0xf] }
 0x105   : > { %v12645_v45 = vadd.f32 %v9931_v25, %v9884_v18  ;;  %10223 = vmatprep.mubr.msk.f32.mxu1 %vm874_vm1, %v12373_v46  ;;  %v9890_v18 = vpop.f32.mrf.mxu0  ;;  %v16293_v25 = vld [vmem:[#allocation31_spill] sm:$0xff] }
 0x106   : > { %v1403_v28 = vpop.f32.mrf.mxu1  ;;  %10241 = vmatmul.mubr.msk.f32.vlgmr.msra.gmra.mxu0 %vm874_vm1, %v16293_v25 }
 0x107   : > { %v12651_v41 = vadd.f32 %v1403_v28, %v1095_v32  ;;  %10333 = vmatpush3.msk.msra.mxu0 %vm965_vm0, %v12404_v42  ;;  %v16295_v28 = vld [vmem:[#allocation35_spill] sm:$0xff] }
 0x108   : > { %v9934_v58 = vpop.f32.mrf.mxu1  ;;  %10224 = vmatmul.mubr.msk.f32.gmra.mxu1 %vm874_vm1, %v12392_v14  ;;  %v16294_v14 = vld [vmem:[#allocation34_spill] sm:$0xff]  ;;  %10426 = vmatprep.subr.msk.mxu0 %vm965_vm0, %v12658_v56  ;;  %v824_v42 = vld [vmem:[%s12671_s29] sm:$0xff] }
 0x109   : > { %v12662_v46 = vadd.f32 %v9934_v58, %v9887_v29  ;;  %10226 = vmatprep.mubr.msk.f32.mxu1 %vm874_vm1, %v12396_v43  ;;  %10243 = vmatprep.mubr.msk.f32.mxu0 %vm874_vm1, %v16294_v14  ;;  %v1115_v58 = vpop.f32.mrf.mxu0 }
 0x10a   : > { %v1413_v32 = vpop.f32.mrf.mxu1  ;;  %10244 = vmatmul.mubr.msk.f32.gmra.mxu0 %vm874_vm1, %v16295_v28  ;;  %v16297_v28 = vld [vmem:[#allocation38_spill] sm:$0xff] }
 0x10b   : > { %v12677_v29 = vadd.f32 %v1413_v32, %v1105_v26  ;;  %v9893_v60 = vpop.f32.mrf.mxu0  ;;  %v16296_v26 = vld [vmem:[#allocation36_spill] sm:$0xff] }
 0x10c   : > { %v9937_v43 = vpop.f32.mrf.mxu1  ;;  %10227 = vmatmul.mubr.msk.f32.gmra.mxu1 %vm874_vm1, %v12414_v8  ;;  %10246 = vmatprep.mubr.msk.f32.mxu0 %vm874_vm1, %v16296_v26  ;;  %v825_v32 = vld [vmem:[%s12671_s29 + $0x8] sm:$0xff] }
 0x10d   : > { %v12685_v25 = vadd.f32 %v9937_v43, %v9890_v18  ;;  %10229 = vmatprep.mubr.msk.f32.mxu1 %vm874_vm1, %v12437_v24  ;;  %v1125_v7 = vpop.f32.mrf.mxu0  ;;  %v12698_v18 = vmul.f32 %v824_v42, %v12602_v9  ;;  %v12707_v26 = vmul.f32 %v825_v32, %v12602_v9 }
 0x10e   : > { %v1423_v14 = vpop.f32.mrf.mxu1  ;;  %10247 = vmatmul.mubr.msk.f32.gmra.mxu0 %vm874_vm1, %v16297_v28 }
 0x10f   : > { %v12693_v21 = vadd.f32 %v1423_v14, %v1115_v58  ;;  %v9896_v43 = vpop.f32.mrf.mxu0  ;;  %v826_v58 = vld [vmem:[%s12671_s29 + $0x10] sm:$0xff]  ;;  %v16298_v14 = vld [vmem:[#allocation40_spill] sm:$0xff] }
 0x110   : > { %v9940_v8 = vpop.f32.mrf.mxu1  ;;  %10230 = vmatmul.mubr.msk.f32.gmra.mxu1 %vm874_vm1, %v12441_v30  ;;  %10249 = vmatprep.mubr.msk.f32.mxu0 %vm874_vm1, %v16298_v14 }
 0x111   : > { %v12702_v24 = vadd.f32 %v9940_v8, %v9893_v60  ;;  %10232 = vmatprep.mubr.msk.f32.mxu1 %vm874_vm1, %v12450_v33  ;;  %v1135_v15 = vpop.f32.mrf.mxu0  ;;  %v12717_v60 = vmul.f32 %v826_v58, %v12602_v9  ;;  %v16299_v33 = vld [vmem:[#allocation41_spill] sm:$0xff] }
 0x112   : > { %v1433_v30 = vpop.f32.mrf.mxu1  ;;  %10250 = vmatmul.mubr.msk.f32.gmra.mxu0 %vm874_vm1, %v16299_v33 }
 0x113   : > { %v12712_v42 = vadd.f32 %v1433_v30, %v1125_v7  ;;  %v9960_v8 = vpop.f32.mrf.mxu0  ;;  %v16300_v7 = vld [vmem:[#allocation42_spill] sm:$0xff] }
 0x114   : > { %v9943_v55 = vpop.f32.mrf.mxu1  ;;  %10233 = vmatmul.mubr.msk.f32.gmra.mxu1 %vm874_vm1, %v12698_v18  ;;  %v1934_v14 = vadd.f32 %v9960_v8, %v12545_v23  ;;  %10252 = vmatprep.mubr.msk.f32.mxu0 %vm874_vm1, %v16300_v7  ;;  %v16302_v23 = vld [vmem:[#allocation44_spill] sm:$0xff] }
 0x115   : > { %v12721_v32 = vadd.f32 %v9943_v55, %v9896_v43  ;;  %10235 = vmatprep.mubr.msk.f32.mxu1 %vm874_vm1, %v12707_v26  ;;  %v1784_v28 = vpop.f32.mrf.mxu0  ;;  %v16301_v43 = vld [vmem:[#allocation43_spill] sm:$0xff] }
 0x116   : > { %v1443_v30 = vpop.f32.mrf.mxu1  ;;  %v1933_v58 = vadd.f32 %v1784_v28, %v12551_v36  ;;  %10253 = vmatmul.mubr.msk.f32.gmra.mxu0 %vm874_vm1, %v16301_v43  ;;  %v16304_v43 = vld [vmem:[#allocation46_spill] sm:$0xff] }
 0x117   : > { %v12728_v61 = vadd.f32 %v1443_v30, %v1135_v15  ;;  %v9963_v55 = vpop.f32.mrf.mxu0  ;;  %v16303_v15 = vld [vmem:[#allocation45_spill] sm:$0xff] }
 0x118   : > { %v9946_v6 = vpop.f32.mrf.mxu1  ;;  %10236 = vmatmul.mubr.msk.f32.gmra.mxu1 %vm874_vm1, %v12717_v60  ;;  %v1936_v8 = vadd.f32 %v9963_v55, %v12557_v3  ;;  %10255 = vmatprep.mubr.msk.f32.mxu0 %vm874_vm1, %v16303_v15  ;;  %v16305_v3 = vld [vmem:[#allocation47_spill] sm:$0xff]  ;;  %v16312_v15 = vld [vmem:[#allocation54_spill] sm:$0xff] }
 0x119   : > { %v12736_v33 = vadd.f32 %v9946_v6, %v12481_v40  ;;  %10287 = vmatprep.mubr.msk.f32.mxu1 %vm874_vm1, %v16302_v23  ;;  %v1794_v28 = vpop.f32.mrf.mxu0  ;;  %v12752_v6 = vld [vmem:[%s15831_s7 + $0x18] sm:$0xf]  ;;  %v16307_v23 = vld [vmem:[#allocation48_spill] sm:$0xff] }
 0x11a   : > { %v1453_v36 = vpop.f32.mrf.mxu1  ;;  %v1935_v7 = vadd.f32 %v1794_v28, %v12567_v62  ;;  %10256 = vmatmul.mubr.msk.f32.gmra.mxu0 %vm874_vm1, %v16305_v3  ;;  %v16306_v62 = vld [vmem:[#allocation49_spill] sm:$0xff] }
 0x11b   : > { %v12744_v30 = vadd.f32 %v1453_v36, %v12491_v51  ;;  %v9966_v40 = vpop.f32.mrf.mxu0  ;;  %10258 = vmatprep.mubr.msk.f32.mxu0 %vm874_vm1, %v16306_v62 }
 0x11c   : > { %v9949_v34 = vpop.f32.mrf.mxu1  ;;  %10288 = vmatmul.mubr.msk.f32.vlgmr.msra.gmra.mxu1 %vm874_vm1, %v16304_v43  ;;  %v1938_v51 = vadd.f32 %v9966_v40, %v12574_v13  ;;  %v16309_v40 = vld [vmem:[#allocation51_spill] sm:$0xff] }
 0x11d   : > { %v12757_v55 = vadd.f32 %v9949_v34, %v12495_v53  ;;  %10380 = vmatpush3.msk.msra.mxu1 %vm965_vm0, %v12502_v31  ;;  %10290 = vmatprep.mubr.msk.f32.mxu1 %vm874_vm1, %v16307_v23  ;;  %v1804_v36 = vpop.f32.mrf.mxu0  ;;  %v16308_v31 = vld [vmem:[#allocation50_spill] sm:$0xff]  ;;  %v16310_v23 = vld [vmem:[#allocation52_spill] sm:$0xff] }
 0x11e   : > { %v1463_v43 = vpop.f32.mrf.mxu1  ;;  %10473 = vmatprep.subr.msk.mxu1 %vm965_vm0, %v12752_v6  ;;  %v1937_v34 = vadd.f32 %v1804_v36, %v12582_v17  ;;  %10259 = vmatmul.mubr.msk.f32.gmra.mxu0 %vm874_vm1, %v16309_v40 }
 0x11f   : > { %v12767_v28 = vadd.f32 %v1463_v43, %v12510_v27  ;;  %v9969_v13 = vpop.f32.mrf.mxu0  ;;  %v16311_v43 = vld [vmem:[#allocation53_spill] sm:$0xff] }
 0x120   : > { %v9952_v53 = vpop.f32.mrf.mxu1  ;;  %10291 = vmatmul.mubr.msk.f32.gmra.mxu1 %vm874_vm1, %v16308_v31  ;;  %v1940_v27 = vadd.f32 %v9969_v13, %v12595_v37  ;;  %10261 = vmatprep.mubr.msk.f32.mxu0 %vm874_vm1, %v16311_v43  ;;  %v16314_v13 = vld [vmem:[#allocation56_spill] sm:$0xff] }
 0x121   : > { %v12777_v62 = vadd.f32 %v9952_v53, %v12517_v5  ;;  %10293 = vmatprep.mubr.msk.f32.mxu1 %vm874_vm1, %v16310_v23  ;;  %v1814_v36 = vpop.f32.mrf.mxu0  ;;  %v16313_v53 = vld [vmem:[#allocation55_spill] sm:$0xff] }
 0x122   : > { %v1473_v17 = vpop.f32.mrf.mxu1  ;;  %v12788_v31 = vadd.f32 %v1814_v36, %v12604_v59  ;;  %10262 = vmatmul.mubr.msk.f32.gmra.mxu0 %vm874_vm1, %v16313_v53 }
 0x123   : > { %v12785_v3 = vadd.f32 %v1473_v17, %v12527_v35  ;;  %v9972_v5 = vpop.f32.mrf.mxu0  ;;  %v16315_v17 = vld [vmem:[#allocation58_spill] sm:$0xff] }
 0x124   : > { %v9955_v40 = vpop.f32.mrf.mxu1  ;;  %10294 = vmatmul.mubr.msk.f32.gmra.mxu1 %vm874_vm1, %v16312_v15  ;;  %v12800_v35 = vadd.f32 %v9972_v5, %v12611_v63  ;;  %10264 = vmatprep.mubr.msk.f32.mxu0 %vm874_vm1, %v16315_v17  ;;  %v16318_v5 = vld [vmem:[#allocation60_spill] sm:$0xff] }
 0x125   : > { %v12795_v37 = vadd.f32 %v9955_v40, %v12529_v2  ;;  %10296 = vmatprep.mubr.msk.f32.mxu1 %vm874_vm1, %v16314_v13  ;;  %v1824_v36 = vpop.f32.mrf.mxu0  ;;  %v16316_v2 = vld [vmem:[#allocation57_spill] sm:$0xff]  ;;  %v16317_v13 = vld [vmem:[#allocation59_spill] sm:$0xff] }
 0x126   : > { %v1483_v59 = vpop.f32.mrf.mxu1  ;;  %v12808_v43 = vadd.f32 %v1824_v36, %v12624_v57  ;;  %10265 = vmatmul.mubr.msk.f32.gmra.mxu0 %vm874_vm1, %v16317_v13  ;;  %v16320_v13 = vld [vmem:[#allocation62_spill] sm:$0xff] }
 0x127   : > { %v12805_v15 = vadd.f32 %v1483_v59, %v12539_v19  ;;  %v9975_v40 = vpop.f32.mrf.mxu0  ;;  %v16319_v19 = vld [vmem:[#allocation61_spill] sm:$0xff] }
 0x128   : > { %v10007_v53 = vpop.f32.mrf.mxu1  ;;  %10297 = vmatmul.mubr.msk.f32.gmra.mxu1 %vm874_vm1, %v16316_v2  ;;  %v12819_v17 = vadd.f32 %v9975_v40, %v12630_v48  ;;  %10267 = vmatprep.mubr.msk.f32.mxu0 %vm874_vm1, %v16319_v19  ;;  %v16322_v40 = vld [vmem:[#allocation64_spill] sm:$0xff] }
 0x129   : > { %v12814_v63 = vadd.f32 %v10007_v53, %v1934_v14  ;;  %10299 = vmatprep.mubr.msk.f32.mxu1 %vm874_vm1, %v16318_v5  ;;  %v1834_v59 = vpop.f32.mrf.mxu0  ;;  %v16321_v53 = vld [vmem:[#allocation63_spill] sm:$0xff] }
 0x12a   : > { %v2094_v57 = vpop.f32.mrf.mxu1  ;;  %v12826_v2 = vadd.f32 %v1834_v59, %v12639_v44  ;;  %10268 = vmatmul.mubr.msk.f32.gmra.mxu0 %vm874_vm1, %v16321_v53 }
 0x12b   : > { %v12823_v36 = vadd.f32 %v2094_v57, %v1933_v58  ;;  %v9978_v14 = vpop.f32.mrf.mxu0  ;;  %v16323_v58 = vld [vmem:[#allocation65_spill] sm:$0xff] }
 0x12c   : > { %v10010_v23 = vpop.f32.mrf.mxu1  ;;  %10300 = vmatmul.mubr.msk.f32.gmra.mxu1 %vm874_vm1, %v16320_v13  ;;  %v12837_v19 = vadd.f32 %v9978_v14, %v12645_v45  ;;  %10270 = vmatprep.mubr.msk.f32.mxu0 %vm874_vm1, %v16323_v58  ;;  %v16326_v14 = vld [vmem:[#allocation69_spill] sm:$0xff] }
 0x12d   : > { %v12832_v48 = vadd.f32 %v10010_v23, %v1936_v8  ;;  %10302 = vmatprep.mubr.msk.f32.mxu1 %vm874_vm1, %v16322_v40  ;;  %v1844_v57 = vpop.f32.mrf.mxu0  ;;  %v16324_v8 = vld [vmem:[#allocation66_spill] sm:$0xff]  ;;  %v16325_v40 = vld [vmem:[#allocation68_spill] sm:$0xff] }
 0x12e   : > { %v2104_v44 = vpop.f32.mrf.mxu1  ;;  %v12844_v13 = vadd.f32 %v1844_v57, %v12651_v41  ;;  %10271 = vmatmul.mubr.msk.f32.gmra.mxu0 %vm874_vm1, %v16325_v40 }
 0x12f   : > { %v12841_v59 = vadd.f32 %v2104_v44, %v1935_v7  ;;  %v9981_v23 = vpop.f32.mrf.mxu0  ;;  %v16327_v7 = vld [vmem:[#allocation70_spill] sm:$0xff] }
 0x130   : > { %v10013_v53 = vpop.f32.mrf.mxu1  ;;  %10303 = vmatmul.mubr.msk.f32.gmra.mxu1 %vm874_vm1, %v16324_v8  ;;  %v12855_v58 = vadd.f32 %v9981_v23, %v12662_v46  ;;  %10273 = vmatprep.mubr.msk.f32.mxu0 %vm874_vm1, %v16327_v7  ;;  %v762_v8 = vld [vmem:[%s12589_s16 + $0x18] sm:$0x3]  ;;  %v16330_v23 = vld [vmem:[#allocation73_spill] sm:$0xff] }
 0x131   : > { %v12850_v45 = vadd.f32 %v10013_v53, %v1938_v51  ;;  %10305 = vmatprep.mubr.msk.f32.mxu1 %vm874_vm1, %v16326_v14  ;;  %v1854_v44 = vpop.f32.mrf.mxu0  ;;  %v16328_v51 = vld [vmem:[#allocation71_spill] sm:$0xff]  ;;  %v16329_v14 = vld [vmem:[#allocation72_spill] sm:$0xff]  ;;  %v12881_v7 = vmul.f32 %v12602_v9, %v762_v8 }
 0x132   : > { %v2114_v41 = vpop.f32.mrf.mxu1  ;;  %v12863_v5 = vadd.f32 %v1854_v44, %v12677_v29  ;;  %10274 = vmatmul.mubr.msk.f32.gmra.mxu0 %vm874_vm1, %v16329_v14  ;;  %v3553_v44 = vrot.slane %v12614_v0, 1  ;;  %v16333_v0 = vld [vmem:[#allocation76_spill] sm:$0xff] }
 0x133   : > { %v12859_v57 = vadd.f32 %v2114_v41, %v1937_v34  ;;  %v9984_v53 = vpop.f32.mrf.mxu0  ;;  %v16331_v41 = vld [vmem:[#allocation74_spill] sm:$0xff] }
 0x134   : > { %v10016_v40 = vpop.f32.mrf.mxu1  ;;  %10306 = vmatmul.mubr.msk.f32.gmra.mxu1 %vm874_vm1, %v16328_v51  ;;  %v12874_v34 = vadd.f32 %v9984_v53, %v12685_v25  ;;  %10276 = vmatprep.mubr.msk.f32.mxu0 %vm874_vm1, %v16331_v41  ;;  %v3554_v51 = vrot.slane %v12621_v54, 1  ;;  %v16334_v54 = vld [vmem:[#allocation77_spill] sm:$0xff] }
 0x135   : > { %v12869_v46 = vadd.f32 %v10016_v40, %v1940_v27  ;;  %10308 = vmatprep.mubr.msk.f32.mxu1 %vm874_vm1, %v16330_v23  ;;  %v1864_v14 = vpop.f32.mrf.mxu0  ;;  %v3556_v40 = vrot.slane %v12633_v16, 1  ;;  %v16332_v23 = vld [vmem:[#allocation75_spill] sm:$0xff] }
 0x136   : > { %v2124_v29 = vpop.f32.mrf.mxu1  ;;  %v12888_v25 = vadd.f32 %v1864_v14, %v12693_v21  ;;  %10277 = vmatmul.mubr.msk.f32.gmra.mxu0 %vm874_vm1, %v16333_v0  ;;  %v12905_v21 = vsel %vm1502_vm3, %v3553_v44, %v3554_v51 }
 0x137   : > { %v12884_v27 = vadd.f32 %v2124_v29, %v12788_v31  ;;  %v9987_v41 = vpop.f32.mrf.mxu0  ;;  %v16335_v29 = vld [vmem:[#allocation78_spill] sm:$0xff]  ;;  %16336 = vst [vmem:[#allocation29_spill] sm:$0xff] %v12905_v21 }
 0x138   : > { %v10019_v53 = vpop.f32.mrf.mxu1  ;;  %10309 = vmatmul.mubr.msk.f32.gmra.mxu1 %vm874_vm1, %v16332_v23  ;;  %v12900_v31 = vadd.f32 %v9987_v41, %v12702_v24  ;;  %10279 = vmatprep.mubr.msk.f32.mxu0 %vm874_vm1, %v16335_v29  ;;  %v3558_v23 = vrot.slane %v12881_v7, 1  ;;  %v16338_v41 = vld [vmem:[#allocation79_spill] sm:$0xff] }
 0x139   : > { %v12895_v8 = vadd.f32 %v10019_v53, %v12800_v35  ;;  %10311 = vmatprep.mubr.msk.f32.mxu1 %vm874_vm1, %v16334_v54  ;;  %v1874_v16 = vpop.f32.mrf.mxu0  ;;  %v12912_v35 = vsel %vm1502_vm3, %v3554_v51, %v3556_v40  ;;  %v16339_v54 = vld [vmem:[#allocation80_spill] sm:$0xff] }
 0x13a   : > { %v2134_v14 = vpop.f32.mrf.mxu1  ;;  %16337 = vst [vmem:[#allocation31_spill] sm:$0xff] %v12912_v35  ;;  %v12915_v53 = vadd.f32 %v1874_v16, %v12712_v42  ;;  %10280 = vmatmul.mubr.msk.f32.gmra.mxu0 %vm874_vm1, %v12905_v21  ;;  %v12932_v16 = vsel %vm1502_vm3, %v3556_v40, %v3558_v23  ;;  %v16341_v21 = vld [vmem:[#allocation81_spill] sm:$0xff]  ;;  %v16342_v23 = vld [vmem:[#allocation22_spill] sm:$0xff]  ;;  %v16343_v40 = vld [vmem:[#allocation4_spill] sm:$0xff] }
 0x13b   : > { %v12909_v0 = vadd.f32 %v2134_v14, %v12808_v43  ;;  %v9990_v29 = vpop.f32.mrf.mxu0  ;;  %10282 = vmatprep.mubr.msk.f32.mxu0 %vm874_vm1, %v12912_v35  ;;  %16340 = vst [vmem:[#allocation34_spill] sm:$0xff] %v12932_v16 }
 0x13c   : > { %v10022_v24 = vpop.f32.mrf.mxu1  ;;  %10312 = vmatmul.mubr.msk.f32.gmra.mxu1 %vm874_vm1, %v16338_v41  ;;  %v12927_v43 = vadd.f32 %v9990_v29, %v12721_v32  ;;  %v16352_v41 = vld [vmem:[#allocation18_spill] sm:$0xff] }
 0x13d   : > { %v12922_v44 = vadd.f32 %v10022_v24, %v12819_v17  ;;  %10314 = vmatprep.mubr.msk.f32.mxu1 %vm874_vm1, %v16339_v54  ;;  %v1884_v51 = vpop.f32.mrf.mxu0 }
 0x13e   : > { %v2144_v42 = vpop.f32.mrf.mxu1  ;;  %v12938_v17 = vadd.f32 %v1884_v51, %v12728_v61  ;;  %10283 = vmatmul.mubr.msk.f32.gmra.mxu0 %vm874_vm1, %v12932_v16 }
 0x13f   : > { %v12935_v14 = vadd.f32 %v2144_v42, %v12826_v2  ;;  %v9993_v32 = vpop.f32.mrf.mxu0  ;;  %10334 = vmatprep.mubr.msk.f32.mxu0 %vm874_vm1, %v16343_v40 }
 0x140   : > { %v10025_v24 = vpop.f32.mrf.mxu1  ;;  %10315 = vmatmul.mubr.msk.f32.gmra.mxu1 %vm874_vm1, %v16341_v21  ;;  %v12950_v2 = vadd.f32 %v9993_v32, %v12736_v33  ;;  %v12965_v33 = vld [vmem:[%s15830_s6 + $0x1c] sm:$0xf] }
 0x141   : > { %v12945_v29 = vadd.f32 %v10025_v24, %v12837_v19  ;;  %10317 = vmatprep.mubr.msk.f32.mxu1 %vm874_vm1, %v16342_v23  ;;  %v1894_v42 = vpop.f32.mrf.mxu0  ;;  %v16344_v24 = vld [vmem:[#allocation27_spill] sm:$0xff]  ;;  %v16345_v23 = vld [vmem:[#allocation28_spill] sm:$0xff] }
 0x142   : > { %v2154_v61 = vpop.f32.mrf.mxu1  ;;  %v12958_v16 = vadd.f32 %v1894_v42, %v12744_v30  ;;  %10335 = vmatmul.mubr.msk.f32.vlgmr.msra.gmra.mxu0 %vm874_vm1, %v16345_v23 }
 0x143   : > { %v12955_v51 = vadd.f32 %v2154_v61, %v12844_v13  ;;  %v9996_v32 = vpop.f32.mrf.mxu0  ;;  %v16346_v13 = vld [vmem:[#allocation82_spill] sm:$0xff]  ;;  %v16347_v61 = vld [vmem:[#allocation5_spill] sm:$0xff]  ;;  %10427 = vmatpush3.msk.msra.mxu0 %vm965_vm0, %v12658_v56 }
 0x144   : > { %v10028_v19 = vpop.f32.mrf.mxu1  ;;  %10318 = vmatmul.mubr.msk.f32.gmra.mxu1 %vm874_vm1, %v16344_v24  ;;  %v12975_v30 = vadd.f32 %v9996_v32, %v12757_v55  ;;  %10337 = vmatprep.mubr.msk.f32.mxu0 %vm874_vm1, %v16347_v61  ;;  %v827_v24 = vld [vmem:[%s12671_s29 + $0x18] sm:$0x3]  ;;  %v16349_v61 = vld [vmem:[#allocation16_spill] sm:$0xff] }
 0x145   : > { %v12970_v40 = vadd.f32 %v10028_v19, %v12855_v58  ;;  %10320 = vmatprep.mubr.msk.f32.mxu1 %vm874_vm1, %v16346_v13  ;;  %v1904_v21 = vpop.f32.mrf.mxu0  ;;  %10520 = vmatprep.subr.msk.mxu0 %vm965_vm0, %v12965_v33  ;;  %v16348_v19 = vld [vmem:[#allocation6_spill] sm:$0xff]  ;;  %v16350_v13 = vld [vmem:[#allocation7_spill] sm:$0xff] }
 0x146   : > { %v2164_v42 = vpop.f32.mrf.mxu1  ;;  %v12988_v58 = vadd.f32 %v1904_v21, %v12767_v28  ;;  %10338 = vmatmul.mubr.msk.f32.gmra.mxu0 %vm874_vm1, %v16349_v61  ;;  %v13002_v28 = vmul.f32 %v827_v24, %v12602_v9 }
 0x147   : > { %v12983_v23 = vadd.f32 %v2164_v42, %v12863_v5  ;;  %v9999_v32 = vpop.f32.mrf.mxu0  ;;  %v3561_v5 = vrot.slane %v12698_v18, 1  ;;  %v3562_v42 = vrot.slane %v12707_v26, 1 }
 0x148   : > { %v10031_v55 = vpop.f32.mrf.mxu1  ;;  %10321 = vmatmul.mubr.msk.f32.gmra.mxu1 %vm874_vm1, %v16348_v19  ;;  %v13005_v21 = vadd.f32 %v9999_v32, %v12777_v62  ;;  %v16351_v19 = vld [vmem:[#allocation32_spill] sm:$0xff]  ;;  %v16353_v62 = vld [vmem:[#allocation83_spill] sm:$0xff] }
 0x149   : > { %v12995_v56 = vadd.f32 %v10031_v55, %v12874_v34  ;;  %10323 = vmatprep.mubr.msk.f32.mxu1 %vm874_vm1, %v16350_v13  ;;  %10340 = vmatprep.mubr.msk.f32.mxu0 %vm874_vm1, %v16351_v19  ;;  %v3564_v34 = vrot.slane %v12717_v60, 1  ;;  %v1914_v55 = vpop.f32.mrf.mxu0  ;;  %v16354_v19 = vld [vmem:[#allocation84_spill] sm:$0xff] }
 0x14a   : > { %v2174_v61 = vpop.f32.mrf.mxu1  ;;  %v13014_v13 = vadd.f32 %v1914_v55, %v12785_v3  ;;  %10341 = vmatmul.mubr.msk.f32.gmra.mxu0 %vm874_vm1, %v16353_v62  ;;  %v3566_v3 = vrot.slane %v13002_v28, 1  ;;  %v16356_v55 = vld [vmem:[#allocation85_spill] sm:$0xff] }
 0x14b   : > { %v13011_v35 = vadd.f32 %v2174_v61, %v12888_v25  ;;  %v10002_v24 = vpop.f32.mrf.mxu0  ;;  %v13026_v25 = vsel %vm1502_vm3, %v3561_v5, %v3562_v42  ;;  %10343 = vmatprep.mubr.msk.f32.mxu0 %vm874_vm1, %v16356_v55  ;;  %v13035_v62 = vsel %vm1502_vm3, %v3562_v42, %v3564_v34 }
 0x14c   : > { %v10034_v54 = vpop.f32.mrf.mxu1  ;;  %10324 = vmatmul.mubr.msk.f32.gmra.mxu1 %vm874_vm1, %v16352_v41  ;;  %16355 = vst [vmem:[#allocation44_spill] sm:$0xff] %v13026_v25  ;;  %v13030_v61 = vadd.f32 %v10002_v24, %v12795_v37  ;;  %v16357_v24 = vld [vmem:[#allocation86_spill] sm:$0xff] }
 0x14d   : > { %v13021_v32 = vadd.f32 %v10034_v54, %v12900_v31  ;;  %10326 = vmatprep.mubr.msk.f32.mxu1 %vm874_vm1, %v16354_v19  ;;  %v1924_v54 = vpop.f32.mrf.mxu0 }
 0x14e   : > { %v2184_v41 = vpop.f32.mrf.mxu1  ;;  %v13041_v19 = vadd.f32 %v1924_v54, %v12805_v15  ;;  %10344 = vmatmul.mubr.msk.f32.gmra.mxu0 %vm874_vm1, %v16357_v24 }
 0x14f   : > { %v13038_v31 = vadd.f32 %v2184_v41, %v12915_v53  ;;  %v10054_v37 = vpop.f32.mrf.mxu0  ;;  %v13053_v53 = vsel %vm1502_vm3, %v3564_v34, %v3566_v3  ;;  %v16358_v41 = vld [vmem:[#allocation20_spill] sm:$0xff] }
 0x150   : > { %v10037_v5 = vpop.f32.mrf.mxu1  ;;  %10327 = vmatmul.mubr.msk.f32.gmra.mxu1 %vm874_vm1, %v13026_v25  ;;  %v2695_v15 = vadd.f32 %v10054_v37, %v12814_v63  ;;  %10346 = vmatprep.mubr.msk.f32.mxu0 %vm874_vm1, %v16358_v41 }
 0x151   : > { %v13048_v55 = vadd.f32 %v10037_v5, %v12927_v43  ;;  %10329 = vmatprep.mubr.msk.f32.mxu1 %vm874_vm1, %v13035_v62  ;;  %v2545_v54 = vpop.f32.mrf.mxu0 }
 0x152   : > { %v2194_v42 = vpop.f32.mrf.mxu1  ;;  %v2694_v24 = vadd.f32 %v2545_v54, %v12823_v36  ;;  %10347 = vmatmul.mubr.msk.f32.gmra.mxu0 %vm874_vm1, %v12135_v1  ;;  %v16360_v54 = vld [vmem:[#allocation21_spill] sm:$0xff] }
 0x153   : > { %v13059_v25 = vadd.f32 %v2194_v42, %v12938_v17  ;;  %v10057_v5 = vpop.f32.mrf.mxu0  ;;  %10349 = vmatprep.mubr.msk.f32.mxu0 %vm874_vm1, %v12161_v4 }
 0x154   : > { %v10040_v43 = vpop.f32.mrf.mxu1  ;;  %10330 = vmatmul.mubr.msk.f32.gmra.mxu1 %vm874_vm1, %v13053_v53  ;;  %v2697_v34 = vadd.f32 %v10057_v5, %v12832_v48 }
 0x155   : > { %v13067_v63 = vadd.f32 %v10040_v43, %v12950_v2  ;;  %10381 = vmatprep.mubr.msk.f32.mxu1 %vm874_vm1, %v12155_v12  ;;  %v2555_v17 = vpop.f32.mrf.mxu0  ;;  %v13083_v12 = vld [vmem:[%s15831_s7 + $0x1c] sm:$0xf] }
 0x156   : > { %v2204_v36 = vpop.f32.mrf.mxu1  ;;  %v2696_v37 = vadd.f32 %v2555_v17, %v12841_v59  ;;  %10350 = vmatmul.mubr.msk.f32.gmra.mxu0 %vm874_vm1, %v12170_v49 }
 0x157   : > { %v13075_v3 = vadd.f32 %v2204_v36, %v12958_v16  ;;  %v10060_v48 = vpop.f32.mrf.mxu0  ;;  %v16359_v16 = vld [vmem:[#allocation39_spill] sm:$0xff] }
 0x158   : > { %v10043_v42 = vpop.f32.mrf.mxu1  ;;  %10382 = vmatmul.mubr.msk.f32.vlgmr.msra.gmra.mxu1 %vm874_vm1, %v12165_v39  ;;  %v2699_v59 = vadd.f32 %v10060_v48, %v12850_v45  ;;  %10352 = vmatprep.mubr.msk.f32.mxu0 %vm874_vm1, %v16359_v16 }
 0x159   : > { %v13088_v2 = vadd.f32 %v10043_v42, %v12975_v30  ;;  %10474 = vmatpush3.msk.msra.mxu1 %vm965_vm0, %v12752_v6  ;;  %10384 = vmatprep.mubr.msk.f32.mxu1 %vm874_vm1, %v16360_v54  ;;  %v2565_v43 = vpop.f32.mrf.mxu0  ;;  %v16361_v6 = vld [vmem:[#allocation25_spill] sm:$0xff]  ;;  %v16362_v42 = vld [vmem:[#allocation26_spill] sm:$0xff] }
 0x15a   : > { %v2214_v39 = vpop.f32.mrf.mxu1  ;;  %10567 = vmatprep.subr.msk.mxu1 %vm965_vm0, %v13083_v12  ;;  %v2698_v30 = vadd.f32 %v2565_v43, %v12859_v57  ;;  %10353 = vmatmul.mubr.msk.f32.gmra.mxu0 %vm874_vm1, %v12196_v10  ;;  %v16363_v10 = vld [vmem:[#allocation11_spill] sm:$0xff] }
 0x15b   : > { %v13098_v5 = vadd.f32 %v2214_v39, %v12988_v58  ;;  %v10063_v45 = vpop.f32.mrf.mxu0  ;;  %10355 = vmatprep.mubr.msk.f32.mxu0 %vm874_vm1, %v16362_v42 }
 0x15c   : > { %v10046_v36 = vpop.f32.mrf.mxu1  ;;  %10385 = vmatmul.mubr.msk.f32.gmra.mxu1 %vm874_vm1, %v16361_v6  ;;  %v2701_v58 = vadd.f32 %v10063_v45, %v12869_v46 }
 0x15d   : > { %v13108_v17 = vadd.f32 %v10046_v36, %v13005_v21  ;;  %10387 = vmatprep.mubr.msk.f32.mxu1 %vm874_vm1, %v12207_v38  ;;  %v2575_v48 = vpop.f32.mrf.mxu0 }
 0x15e   : > { %v2224_v57 = vpop.f32.mrf.mxu1  ;;  %v2700_v54 = vadd.f32 %v2575_v48, %v12884_v27  ;;  %10356 = vmatmul.mubr.msk.f32.gmra.mxu0 %vm874_vm1, %v12222_v22  ;;  %v16364_v22 = vld [vmem:[#allocation87_spill] sm:$0xff] }
 0x15f   : > { %v13116_v39 = vadd.f32 %v2224_v57, %v13014_v13  ;;  %v10066_v21 = vpop.f32.mrf.mxu0  ;;  %10358 = vmatprep.mubr.msk.f32.mxu0 %vm874_vm1, %v12240_v20 }
 0x160   : > { %v10049_v43 = vpop.f32.mrf.mxu1  ;;  %10388 = vmatmul.mubr.msk.f32.gmra.mxu1 %vm874_vm1, %v16363_v10  ;;  %v2703_v36 = vadd.f32 %v10066_v21, %v12895_v8  ;;  %v16366_v21 = vld [vmem:[#allocation88_spill] sm:$0xff]  ;;  %v16382_v10 = vld [vmem:[#allocation99_spill] sm:$0xff] }
 0x161   : > { %v13124_v46 = vadd.f32 %v10049_v43, %v13030_v61  ;;  %10390 = vmatprep.mubr.msk.f32.mxu1 %vm874_vm1, %v12234_v50  ;;  %v2585_v13 = vpop.f32.mrf.mxu0  ;;  %v16365_v43 = vld [vmem:[#allocation19_spill] sm:$0xff] }
 0x162   : > { %v2234_v27 = vpop.f32.mrf.mxu1  ;;  %v13135_v57 = vadd.f32 %v2585_v13, %v12909_v0  ;;  %10359 = vmatmul.mubr.msk.f32.gmra.mxu0 %vm874_vm1, %v16365_v43  ;;  %v16368_v43 = vld [vmem:[#allocation90_spill] sm:$0xff] }
 0x163   : > { %v13132_v45 = vadd.f32 %v2234_v27, %v13041_v19  ;;  %v10069_v61 = vpop.f32.mrf.mxu0  ;;  %v16367_v19 = vld [vmem:[#allocation89_spill] sm:$0xff] }
 0x164   : > { %v10101_v48 = vpop.f32.mrf.mxu1  ;;  %10391 = vmatmul.mubr.msk.f32.gmra.mxu1 %vm874_vm1, %v16364_v22  ;;  %v13146_v20 = vadd.f32 %v10069_v61, %v12922_v44  ;;  %10361 = vmatprep.mubr.msk.f32.mxu0 %vm874_vm1, %v16367_v19 }
 0x165   : > { %v13141_v8 = vadd.f32 %v10101_v48, %v2695_v15  ;;  %10393 = vmatprep.mubr.msk.f32.mxu1 %vm874_vm1, %v16366_v21  ;;  %v2595_v27 = vpop.f32.mrf.mxu0  ;;  %v16380_v21 = vld [vmem:[#allocation97_spill] sm:$0xff] }
 0x166   : > { %v2855_v0 = vpop.f32.mrf.mxu1  ;;  %v13153_v22 = vadd.f32 %v2595_v27, %v12935_v14  ;;  %10362 = vmatmul.mubr.msk.f32.gmra.mxu0 %vm874_vm1, %v12272_v11  ;;  %v16369_v11 = vld [vmem:[#allocation23_spill] sm:$0xff] }
 0x167   : > { %v13150_v13 = vadd.f32 %v2855_v0, %v2694_v24  ;;  %v10072_v15 = vpop.f32.mrf.mxu0  ;;  %10364 = vmatprep.mubr.msk.f32.mxu0 %vm874_vm1, %v12291_v47 }
 0x168   : > { %v10104_v50 = vpop.f32.mrf.mxu1  ;;  %10394 = vmatmul.mubr.msk.f32.gmra.mxu1 %vm874_vm1, %v16368_v43  ;;  %v13164_v48 = vadd.f32 %v10072_v15, %v12945_v29  ;;  %v16371_v15 = vld [vmem:[#allocation94_spill] sm:$0xff] }
 0x169   : > { %v13159_v44 = vadd.f32 %v10104_v50, %v2697_v34  ;;  %10396 = vmatprep.mubr.msk.f32.mxu1 %vm874_vm1, %v12284_v52  ;;  %v2605_v24 = vpop.f32.mrf.mxu0  ;;  %v16370_v34 = vld [vmem:[#allocation92_spill] sm:$0xff] }
 0x16a   : > { %v2865_v14 = vpop.f32.mrf.mxu1  ;;  %v13171_v0 = vadd.f32 %v2605_v24, %v12955_v51  ;;  %10365 = vmatmul.mubr.msk.f32.gmra.mxu0 %vm874_vm1, %v16370_v34  ;;  %v16373_v34 = vld [vmem:[#allocation67_spill] sm:$0xff] }
 0x16b   : > { %v13168_v61 = vadd.f32 %v2865_v14, %v2696_v37  ;;  %v10075_v50 = vpop.f32.mrf.mxu0  ;;  %v16372_v37 = vld [vmem:[#allocation93_spill] sm:$0xff] }
 0x16c   : > { %v10107_v27 = vpop.f32.mrf.mxu1  ;;  %10397 = vmatmul.mubr.msk.f32.gmra.mxu1 %vm874_vm1, %v16369_v11  ;;  %v13182_v47 = vadd.f32 %v10075_v50, %v12970_v40  ;;  %10367 = vmatprep.mubr.msk.f32.mxu0 %vm874_vm1, %v16372_v37  ;;  %v16375_v50 = vld [vmem:[#allocation95_spill] sm:$0xff] }
 0x16d   : > { %v13177_v29 = vadd.f32 %v10107_v27, %v2699_v59  ;;  %10399 = vmatprep.mubr.msk.f32.mxu1 %vm874_vm1, %v16371_v15  ;;  %v2615_v14 = vpop.f32.mrf.mxu0  ;;  %v16374_v27 = vld [vmem:[#allocation37_spill] sm:$0xff]  ;;  %v16378_v15 = vld [vmem:[#allocation106_spill] sm:$0xff] }
 0x16e   : > { %v2875_v51 = vpop.f32.mrf.mxu1  ;;  %v13189_v11 = vadd.f32 %v2615_v14, %v12983_v23  ;;  %10368 = vmatmul.mubr.msk.f32.gmra.mxu0 %vm874_vm1, %v16374_v27  ;;  %v16379_v27 = vld [vmem:[#allocation107_spill] sm:$0xff] }
 0x16f   : > { %v13186_v24 = vadd.f32 %v2875_v51, %v2698_v30  ;;  %v10078_v59 = vpop.f32.mrf.mxu0  ;;  %v16376_v30 = vld [vmem:[#allocation96_spill] sm:$0xff]  ;;  %v16377_v51 = vld [vmem:[#allocation9_spill] sm:$0xff] }
 0x170   : > { %v10110_v52 = vpop.f32.mrf.mxu1  ;;  %10400 = vmatmul.mubr.msk.f32.gmra.mxu1 %vm874_vm1, %v16373_v34  ;;  %v13200_v37 = vadd.f32 %v10078_v59, %v12995_v56  ;;  %10370 = vmatprep.mubr.msk.f32.mxu0 %vm874_vm1, %v16376_v30  ;;  %v4080_v14 = vrot.slane %v16377_v51, 2  ;;  %v4081_v34 = vrot.slane %v16378_v15, 2  ;;  %v16381_v59 = vld [vmem:[#allocation98_spill] sm:$0xff] }
 0x171   : > { %v13195_v40 = vadd.f32 %v10110_v52, %v2701_v58  ;;  %10402 = vmatprep.mubr.msk.f32.mxu1 %vm874_vm1, %v16375_v50  ;;  %v2625_v43 = vpop.f32.mrf.mxu0  ;;  %v4083_v52 = vrot.slane %v16379_v27, 2 }
 0x172   : > { %v2885_v23 = vpop.f32.mrf.mxu1  ;;  %v13210_v58 = vadd.f32 %v2625_v43, %v13011_v35  ;;  %10371 = vmatmul.mubr.msk.f32.gmra.mxu0 %vm874_vm1, %v16381_v59  ;;  %v13226_v35 = vsel %vm2273_vm2, %v4080_v14, %v4081_v34  ;;  %v16387_v14 = vld [vmem:[#allocation102_spill] sm:$0xff] }
 0x173   : > { %v13206_v19 = vadd.f32 %v2885_v23, %v2700_v54  ;;  %v10081_v56 = vpop.f32.mrf.mxu0  ;;  %v16383_v23 = vld [vmem:[#allocation100_spill] sm:$0xff]  ;;  %16384 = vst [vmem:[#allocation46_spill] sm:$0xff] %v13226_v35 }
 0x174   : > { %v10113_v50 = vpop.f32.mrf.mxu1  ;;  %10403 = vmatmul.mubr.msk.f32.gmra.mxu1 %vm874_vm1, %v16380_v21  ;;  %v13221_v54 = vadd.f32 %v10081_v56, %v13021_v32  ;;  %10373 = vmatprep.mubr.msk.f32.mxu0 %vm874_vm1, %v16383_v23  ;;  %v4085_v21 = vrot.slane %v12881_v7, 2  ;;  %v16386_v56 = vld [vmem:[#allocation101_spill] sm:$0xff] }
 0x175   : > { %v13216_v30 = vadd.f32 %v10113_v50, %v2703_v36  ;;  %10405 = vmatprep.mubr.msk.f32.mxu1 %vm874_vm1, %v16382_v10  ;;  %v2635_v42 = vpop.f32.mrf.mxu0  ;;  %v13233_v36 = vsel %vm2273_vm2, %v4081_v34, %v4083_v52 }
 0x176   : > { %v2895_v43 = vpop.f32.mrf.mxu1  ;;  %16385 = vst [vmem:[#allocation48_spill] sm:$0xff] %v13233_v36  ;;  %v13236_v50 = vadd.f32 %v2635_v42, %v13038_v31  ;;  %10374 = vmatmul.mubr.msk.f32.gmra.mxu0 %vm874_vm1, %v13226_v35  ;;  %v13253_v31 = vsel %vm2273_vm2, %v4083_v52, %v4085_v21  ;;  %v16389_v35 = vld [vmem:[#allocation103_spill] sm:$0xff]  ;;  %v16390_v52 = vld [vmem:[#allocation104_spill] sm:$0xff] }
 0x177   : > { %v13230_v59 = vadd.f32 %v2895_v43, %v13135_v57  ;;  %v10084_v23 = vpop.f32.mrf.mxu0  ;;  %10376 = vmatprep.mubr.msk.f32.mxu0 %vm874_vm1, %v13233_v36  ;;  %16388 = vst [vmem:[#allocation4_spill] sm:$0xff] %v13253_v31  ;;  %v16395_v36 = vld [vmem:[#allocation15_spill] sm:$0xff] }
 0x178   : > { %v10116_v32 = vpop.f32.mrf.mxu1  ;;  %10406 = vmatmul.mubr.msk.f32.gmra.mxu1 %vm874_vm1, %v16386_v56  ;;  %v13248_v57 = vadd.f32 %v10084_v23, %v13048_v55 }
 0x179   : > { %v13243_v7 = vadd.f32 %v10116_v32, %v13146_v20  ;;  %10408 = vmatprep.mubr.msk.f32.mxu1 %vm874_vm1, %v16387_v14  ;;  %v2645_v34 = vpop.f32.mrf.mxu0  ;;  %v16396_v14 = vld [vmem:[#allocation105_spill] sm:$0xff] }
 0x17a   : > { %v2905_v42 = vpop.f32.mrf.mxu1  ;;  %v13259_v20 = vadd.f32 %v2645_v34, %v13059_v25  ;;  %10377 = vmatmul.mubr.msk.f32.gmra.mxu0 %vm874_vm1, %v13253_v31  ;;  %v11008_v25 = vld [vmem:[%s11374_s12] sm:$0xff] }
 0x17b   : > { %v13256_v43 = vadd.f32 %v2905_v42, %v13153_v22  ;;  %v10087_v55 = vpop.f32.mrf.mxu0  ;;  %10428 = vmatprep.mubr.msk.f32.mxu0 %vm874_vm1, %v11008_v25  ;;  %v16392_v25 = vld [vmem:[#allocation3_spill] sm:$0xff] }
 0x17c   : > { %v10119_v32 = vpop.f32.mrf.mxu1  ;;  %10409 = vmatmul.mubr.msk.f32.gmra.mxu1 %vm874_vm1, %v16389_v35  ;;  %v13271_v22 = vadd.f32 %v10087_v55, %v13067_v63  ;;  %v13286_v63 = vld [vmem:[%s15830_s6 + $0x20] sm:$0xf] }
 0x17d   : > { %v13266_v21 = vadd.f32 %v10119_v32, %v13164_v48  ;;  %10411 = vmatprep.mubr.msk.f32.mxu1 %vm874_vm1, %v16390_v52  ;;  %v2655_v42 = vpop.f32.mrf.mxu0  ;;  %v16391_v32 = vld [vmem:[#allocation12_spill] sm:$0xff] }
 0x17e   : > { %v2915_v23 = vpop.f32.mrf.mxu1  ;;  %v13279_v31 = vadd.f32 %v2655_v42, %v13075_v3  ;;  %v11009_v52 = vld [vmem:[%s11374_s12 + $0x8] sm:$0xff] }
 0x17f   : > { %v13276_v34 = vadd.f32 %v2915_v23, %v13171_v0  ;;  %v10090_v55 = vpop.f32.mrf.mxu0  ;;  %10429 = vmatmul.mubr.msk.f32.vlgmr.msra.gmra.mxu0 %vm874_vm1, %v11009_v52  ;;  %v11010_v23 = vld [vmem:[%s11374_s12 + $0x10] sm:$0xff] }
 0x180   : > { %v10122_v48 = vpop.f32.mrf.mxu1  ;;  %10412 = vmatmul.mubr.msk.f32.gmra.mxu1 %vm874_vm1, %v16391_v32  ;;  %v13296_v3 = vadd.f32 %v10090_v55, %v13088_v2  ;;  %10431 = vmatprep.mubr.msk.f32.mxu0 %vm874_vm1, %v11010_v23  ;;  %v11011_v23 = vld [vmem:[%s11374_s12 + $0x20] sm:$0xff] }
 0x181   : > { %v13291_v0 = vadd.f32 %v10122_v48, %v13182_v47  ;;  %10414 = vmatprep.mubr.msk.f32.mxu1 %vm874_vm1, %v16392_v25  ;;  %10521 = vmatpush3.msk.msra.mxu0 %vm965_vm0, %v12965_v33  ;;  %v2665_v32 = vpop.f32.mrf.mxu0  ;;  %v16393_v48 = vld [vmem:[#allocation10_spill] sm:$0xff]  ;;  %v11012_v25 = vld [vmem:[%s11374_s12 + $0x28] sm:$0xff] }
 0x182   : > { %v2925_v42 = vpop.f32.mrf.mxu1  ;;  %10614 = vmatprep.subr.msk.mxu0 %vm965_vm0, %v13286_v63  ;;  %v13308_v47 = vadd.f32 %v2665_v32, %v13098_v5  ;;  %v4088_v5 = vrot.slane %v12707_v26, 2 }
 0x183   : > { %v13303_v52 = vadd.f32 %v2925_v42, %v13189_v11  ;;  %v10093_v55 = vpop.f32.mrf.mxu0  ;;  %10432 = vmatmul.mubr.msk.f32.gmra.mxu0 %vm874_vm1, %v11011_v23  ;;  %v16394_v11 = vld [vmem:[#allocation14_spill] sm:$0xff]  ;;  %v4087_v42 = vrot.slane %v12698_v18, 2  ;;  %v4090_v23 = vrot.slane %v12717_v60, 2 }
 0x184   : > { %v10125_v2 = vpop.f32.mrf.mxu1  ;;  %10415 = vmatmul.mubr.msk.f32.gmra.mxu1 %vm874_vm1, %v16393_v48  ;;  %v13322_v32 = vadd.f32 %v10093_v55, %v13108_v17  ;;  %10434 = vmatprep.mubr.msk.f32.mxu0 %vm874_vm1, %v11012_v25  ;;  %v11013_v55 = vld [vmem:[%s11374_s12 + $0x30] sm:$0xff] }
 0x185   : > { %v13315_v33 = vadd.f32 %v10125_v2, %v13200_v37  ;;  %10417 = vmatprep.mubr.msk.f32.mxu1 %vm874_vm1, %v16394_v11  ;;  %v2675_v35 = vpop.f32.mrf.mxu0 }
 0x186   : > { %v2935_v48 = vpop.f32.mrf.mxu1  ;;  %v13331_v2 = vadd.f32 %v2675_v35, %v13116_v39  ;;  %v4092_v39 = vrot.slane %v13002_v28, 2 }
 0x187   : > { %v13328_v37 = vadd.f32 %v2935_v48, %v13210_v58  ;;  %v10096_v17 = vpop.f32.mrf.mxu0  ;;  %10435 = vmatmul.mubr.msk.f32.gmra.mxu0 %vm874_vm1, %v11013_v55  ;;  %v13343_v58 = vsel %vm2273_vm2, %v4087_v42, %v4088_v5  ;;  %v11014_v48 = vld [vmem:[%s11374_s12 + $0x40] sm:$0xff] }
 0x188   : > { %v10128_v11 = vpop.f32.mrf.mxu1  ;;  %10418 = vmatmul.mubr.msk.f32.gmra.mxu1 %vm874_vm1, %v16395_v36  ;;  %v13347_v35 = vadd.f32 %v10096_v17, %v13124_v46  ;;  %10437 = vmatprep.mubr.msk.f32.mxu0 %vm874_vm1, %v11014_v48  ;;  %v13352_v36 = vsel %vm2273_vm2, %v4088_v5, %v4090_v23  ;;  %v11015_v46 = vld [vmem:[%s11374_s12 + $0x48] sm:$0xff]  ;;  %v11016_v5 = vld [vmem:[%s11374_s12 + $0x50] sm:$0xff] }
 0x189   : > { %v13338_v25 = vadd.f32 %v10128_v11, %v13221_v54  ;;  %10420 = vmatprep.mubr.msk.f32.mxu1 %vm874_vm1, %v16396_v14  ;;  %16397 = vst [vmem:[#allocation28_spill] sm:$0xff] %v13352_v36  ;;  %v2685_v54 = vpop.f32.mrf.mxu0 }
 0x18a   : > { %v2945_v55 = vpop.f32.mrf.mxu1  ;;  %v13358_v42 = vadd.f32 %v2685_v54, %v13132_v45 }
 0x18b   : > { %v13355_v11 = vadd.f32 %v2945_v55, %v13236_v50  ;;  %v10148_v28 = vpop.f32.mrf.mxu0  ;;  %10438 = vmatmul.mubr.msk.f32.gmra.mxu0 %vm874_vm1, %v11015_v46  ;;  %v13370_v50 = vsel %vm2273_vm2, %v4090_v23, %v4092_v39 }
 0x18c   : > { %v10131_v14 = vpop.f32.mrf.mxu1  ;;  %10421 = vmatmul.mubr.msk.f32.gmra.mxu1 %vm874_vm1, %v13343_v58  ;;  %16398 = vst [vmem:[#allocation5_spill] sm:$0xff] %v13370_v50  ;;  %v13373_v45 = vadd.f32 %v10148_v28, %v13141_v8  ;;  %10440 = vmatprep.mubr.msk.f32.mxu0 %vm874_vm1, %v11016_v5  ;;  %v11017_v8 = vld [vmem:[%s11374_s12 + $0x60] sm:$0xff] }
 0x18d   : > { %v13365_v17 = vadd.f32 %v10131_v14, %v13248_v57  ;;  %10423 = vmatprep.mubr.msk.f32.mxu1 %vm874_vm1, %v13352_v36  ;;  %v3114_v55 = vpop.f32.mrf.mxu0  ;;  %v11018_v28 = vld [vmem:[%s11227_s28] sm:$0xff] }
 0x18e   : > { %v2955_v48 = vpop.f32.mrf.mxu1  ;;  %v13381_v14 = vadd.f32 %v3114_v55, %v13150_v13  ;;  %v11019_v13 = vld [vmem:[%s11374_s12 + $0x68] sm:$0xff] }
 0x18f   : > { %v13378_v54 = vadd.f32 %v2955_v48, %v13259_v20  ;;  %v10151_v23 = vpop.f32.mrf.mxu0  ;;  %10441 = vmatmul.mubr.msk.f32.gmra.mxu0 %vm874_vm1, %v11017_v8  ;;  %v11021_v8 = vld [vmem:[%s11374_s12 + $0x70] sm:$0xff] }
 0x190   : > { %v10134_v57 = vpop.f32.mrf.mxu1  ;;  %10424 = vmatmul.mubr.msk.f32.gmra.mxu1 %vm874_vm1, %v13370_v50  ;;  %v13393_v20 = vadd.f32 %v10151_v23, %v13159_v44  ;;  %10443 = vmatprep.mubr.msk.f32.mxu0 %vm874_vm1, %v11019_v13  ;;  %v13408_v44 = vld [vmem:[%s15831_s7 + $0x20] sm:$0xf]  ;;  %v16441_v50 = vld [vmem:[#allocation81_spill] sm:$0xff] }
 0x191   : > { %v13388_v39 = vadd.f32 %v10134_v57, %v13271_v22  ;;  %10475 = vmatprep.mubr.msk.f32.mxu1 %vm874_vm1, %v11018_v28  ;;  %v3124_v5 = vpop.f32.mrf.mxu0  ;;  %v11020_v57 = vld [vmem:[%s11227_s28 + $0x8] sm:$0xff]  ;;  %v11022_v28 = vld [vmem:[%s11374_s12 + $0x80] sm:$0xff] }
 0x192   : > { %v2965_v46 = vpop.f32.mrf.mxu1  ;;  %v13401_v55 = vadd.f32 %v3124_v5, %v13168_v61 }
 0x193   : > { %v13398_v48 = vadd.f32 %v2965_v46, %v13279_v31  ;;  %v10154_v23 = vpop.f32.mrf.mxu0  ;;  %10444 = vmatmul.mubr.msk.f32.gmra.mxu0 %vm874_vm1, %v11021_v8  ;;  %v11023_v46 = vld [vmem:[%s11227_s28 + $0x10] sm:$0xff] }
 0x194   : > { %v10137_v22 = vpop.f32.mrf.mxu1  ;;  %10476 = vmatmul.mubr.msk.f32.vlgmr.msra.gmra.mxu1 %vm874_vm1, %v11020_v57  ;;  %v13418_v61 = vadd.f32 %v10154_v23, %v13177_v29  ;;  %10446 = vmatprep.mubr.msk.f32.mxu0 %vm874_vm1, %v11022_v28  ;;  %v11025_v23 = vld [vmem:[%s11374_s12 + $0x88] sm:$0xff]  ;;  %v11027_v28 = vld [vmem:[%s11374_s12 + $0x90] sm:$0xff] }
 0x195   : > { %v13413_v31 = vadd.f32 %v10137_v22, %v13296_v3  ;;  %10568 = vmatpush3.msk.msra.mxu1 %vm965_vm0, %v13083_v12  ;;  %10478 = vmatprep.mubr.msk.f32.mxu1 %vm874_vm1, %v11023_v46  ;;  %v3134_v5 = vpop.f32.mrf.mxu0  ;;  %v11024_v22 = vld [vmem:[%s11227_s28 + $0x20] sm:$0xff] }
 0x196   : > { %v2975_v13 = vpop.f32.mrf.mxu1  ;;  %10661 = vmatprep.subr.msk.mxu1 %vm965_vm0, %v13408_v44  ;;  %v13430_v12 = vadd.f32 %v3134_v5, %v13186_v24 }
 0x197   : > { %v13425_v3 = vadd.f32 %v2975_v13, %v13308_v47  ;;  %v10157_v57 = vpop.f32.mrf.mxu0  ;;  %10447 = vmatmul.mubr.msk.f32.gmra.mxu0 %vm874_vm1, %v11025_v23  ;;  %v11026_v47 = vld [vmem:[%s11227_s28 + $0x28] sm:$0xff] }
 0x198   : > { %v10140_v29 = vpop.f32.mrf.mxu1  ;;  %10479 = vmatmul.mubr.msk.f32.gmra.mxu1 %vm874_vm1, %v11024_v22  ;;  %v13442_v24 = vadd.f32 %v10157_v57, %v13195_v40  ;;  %10449 = vmatprep.mubr.msk.f32.mxu0 %vm874_vm1, %v11027_v28  ;;  %v11029_v40 = vld [vmem:[%s11374_s12 + $0xa0] sm:$0xff] }
 0x199   : > { %v13437_v8 = vadd.f32 %v10140_v29, %v13322_v32  ;;  %10481 = vmatprep.mubr.msk.f32.mxu1 %vm874_vm1, %v11026_v47  ;;  %v3144_v46 = vpop.f32.mrf.mxu0  ;;  %v11028_v29 = vld [vmem:[%s11227_s28 + $0x30] sm:$0xff]  ;;  %v11030_v47 = vld [vmem:[%s11227_s28 + $0x40] sm:$0xff] }
 0x19a   : > { %v2985_v13 = vpop.f32.mrf.mxu1  ;;  %v13450_v22 = vadd.f32 %v3144_v46, %v13206_v19 }
 0x19b   : > { %v13447_v5 = vadd.f32 %v2985_v13, %v13331_v2  ;;  %v10160_v23 = vpop.f32.mrf.mxu0  ;;  %10450 = vmatmul.mubr.msk.f32.gmra.mxu0 %vm874_vm1, %v11029_v40  ;;  %v11031_v2 = vld [vmem:[%s11374_s12 + $0xa8] sm:$0xff] }
 0x19c   : > { %v10143_v32 = vpop.f32.mrf.mxu1  ;;  %10482 = vmatmul.mubr.msk.f32.gmra.mxu1 %vm874_vm1, %v11028_v29  ;;  %v13462_v19 = vadd.f32 %v10160_v23, %v13216_v30  ;;  %10452 = vmatprep.mubr.msk.f32.mxu0 %vm874_vm1, %v11031_v2  ;;  %v11033_v30 = vld [vmem:[%s11374_s12 + $0xb0] sm:$0xff] }
 0x19d   : > { %v13457_v57 = vadd.f32 %v10143_v32, %v13347_v35  ;;  %10484 = vmatprep.mubr.msk.f32.mxu1 %vm874_vm1, %v11030_v47  ;;  %v3154_v13 = vpop.f32.mrf.mxu0  ;;  %v11032_v32 = vld [vmem:[%s11227_s28 + $0x48] sm:$0xff]  ;;  %v11034_v47 = vld [vmem:[%s11227_s28 + $0x50] sm:$0xff] }
 0x19e   : > { %v2995_v28 = vpop.f32.mrf.mxu1  ;;  %v13470_v29 = vadd.f32 %v3154_v13, %v13230_v59 }
 0x19f   : > { %v13467_v46 = vadd.f32 %v2995_v28, %v13358_v42  ;;  %v10163_v40 = vpop.f32.mrf.mxu0  ;;  %10453 = vmatmul.mubr.msk.f32.gmra.mxu0 %vm874_vm1, %v11033_v30  ;;  %v11035_v42 = vld [vmem:[%s11374_s12 + $0xc0] sm:$0xff] }
 0x1a0   : > { %v10195_v35 = vpop.f32.mrf.mxu1  ;;  %10485 = vmatmul.mubr.msk.f32.gmra.mxu1 %vm874_vm1, %v11032_v32  ;;  %v13482_v59 = vadd.f32 %v10163_v40, %v13243_v7  ;;  %10455 = vmatprep.mubr.msk.f32.mxu0 %vm874_vm1, %v11035_v42  ;;  %v11037_v7 = vld [vmem:[%s11374_s12 + $0xc8] sm:$0xff] }
 0x1a1   : > { %v13477_v23 = vadd.f32 %v10195_v35, %v13373_v45  ;;  %10487 = vmatprep.mubr.msk.f32.mxu1 %vm874_vm1, %v11034_v47  ;;  %v3164_v28 = vpop.f32.mrf.mxu0  ;;  %v11036_v35 = vld [vmem:[%s11227_s28 + $0x60] sm:$0xff]  ;;  %v11038_v47 = vld [vmem:[%s11227_s28 + $0x68] sm:$0xff] }
 0x1a2   : > { %v3373_v2 = vpop.f32.mrf.mxu1  ;;  %v13490_v32 = vadd.f32 %v3164_v28, %v13256_v43 }
 0x1a3   : > { %v13487_v13 = vadd.f32 %v3373_v2, %v13381_v14  ;;  %v10166_v30 = vpop.f32.mrf.mxu0  ;;  %10456 = vmatmul.mubr.msk.f32.gmra.mxu0 %vm874_vm1, %v11037_v7  ;;  %v11039_v14 = vld [vmem:[%s11374_s12 + $0xd0] sm:$0xff] }
 0x1a4   : > { %v10198_v45 = vpop.f32.mrf.mxu1  ;;  %10488 = vmatmul.mubr.msk.f32.gmra.mxu1 %vm874_vm1, %v11036_v35  ;;  %v13502_v43 = vadd.f32 %v10166_v30, %v13266_v21  ;;  %10458 = vmatprep.mubr.msk.f32.mxu0 %vm874_vm1, %v11039_v14  ;;  %v11041_v21 = vld [vmem:[%s11374_s12 + $0xe0] sm:$0xff] }
 0x1a5   : > { %v13497_v40 = vadd.f32 %v10198_v45, %v13393_v20  ;;  %10490 = vmatprep.mubr.msk.f32.mxu1 %vm874_vm1, %v11038_v47  ;;  %v3174_v2 = vpop.f32.mrf.mxu0  ;;  %v11040_v45 = vld [vmem:[%s11227_s28 + $0x70] sm:$0xff]  ;;  %v11042_v47 = vld [vmem:[%s11227_s28 + $0x80] sm:$0xff] }
 0x1a6   : > { %v3383_v42 = vpop.f32.mrf.mxu1  ;;  %v13510_v35 = vadd.f32 %v3174_v2, %v13276_v34 }
 0x1a7   : > { %v13507_v28 = vadd.f32 %v3383_v42, %v13401_v55  ;;  %v10169_v7 = vpop.f32.mrf.mxu0  ;;  %10459 = vmatmul.mubr.msk.f32.gmra.mxu0 %vm874_vm1, %v11041_v21  ;;  %v11043_v55 = vld [vmem:[%s11374_s12 + $0xe8] sm:$0xff] }
 0x1a8   : > { %v10201_v20 = vpop.f32.mrf.mxu1  ;;  %10491 = vmatmul.mubr.msk.f32.gmra.mxu1 %vm874_vm1, %v11040_v45  ;;  %v13522_v34 = vadd.f32 %v10169_v7, %v13291_v0  ;;  %10461 = vmatprep.mubr.msk.f32.mxu0 %vm874_vm1, %v11043_v55  ;;  %v11045_v7 = vld [vmem:[%s11374_s12 + $0xf0] sm:$0xff]  ;;  %v763_v55 = vld [vmem:[%s12589_s16 + $0x20] sm:$0xff] }
 0x1a9   : > { %v13517_v30 = vadd.f32 %v10201_v20, %v13418_v61  ;;  %10493 = vmatprep.mubr.msk.f32.mxu1 %vm874_vm1, %v11042_v47  ;;  %v3184_v42 = vpop.f32.mrf.mxu0  ;;  %v11044_v20 = vld [vmem:[%s11227_s28 + $0x88] sm:$0xff]  ;;  %v11046_v47 = vld [vmem:[%s11227_s28 + $0x90] sm:$0xff] }
 0x1aa   : > { %v3393_v14 = vpop.f32.mrf.mxu1  ;;  %v13530_v45 = vadd.f32 %v3184_v42, %v13303_v52 }
 0x1ab   : > { %v13527_v2 = vadd.f32 %v3393_v14, %v13430_v12  ;;  %v10172_v0 = vpop.f32.mrf.mxu0  ;;  %10462 = vmatmul.mubr.msk.f32.gmra.mxu0 %vm874_vm1, %v11045_v7  ;;  %v11047_v7 = vld [vmem:[%s11227_s28 + $0xa0] sm:$0xff] }
 0x1ac   : > { %v10204_v61 = vpop.f32.mrf.mxu1  ;;  %10494 = vmatmul.mubr.msk.f32.gmra.mxu1 %vm874_vm1, %v11044_v20  ;;  %v13542_v52 = vadd.f32 %v10172_v0, %v13315_v33  ;;  %10464 = vmatprep.mubr.msk.f32.mxu0 %vm874_vm1, %v16377_v51  ;;  %v764_v20 = vld [vmem:[%s12589_s16 + $0x28] sm:$0xff] }
 0x1ad   : > { %v13537_v21 = vadd.f32 %v10204_v61, %v13442_v24  ;;  %10496 = vmatprep.mubr.msk.f32.mxu1 %vm874_vm1, %v11046_v47  ;;  %v3194_v14 = vpop.f32.mrf.mxu0  ;;  %v11048_v0 = vld [vmem:[%s11227_s28 + $0xa8] sm:$0xff] }
 0x1ae   : > { %v3403_v12 = vpop.f32.mrf.mxu1  ;;  %v13552_v24 = vadd.f32 %v3194_v14, %v13328_v37 }
 0x1af   : > { %v13548_v42 = vadd.f32 %v3403_v12, %v13450_v22  ;;  %v10175_v33 = vpop.f32.mrf.mxu0  ;;  %10465 = vmatmul.mubr.msk.f32.gmra.mxu0 %vm874_vm1, %v16378_v15  ;;  %v13562_v22 = vmul.f32 %v12602_v9, %v763_v55  ;;  %v13572_v12 = vmul.f32 %v12602_v9, %v764_v20  ;;  %v765_v15 = vld [vmem:[%s12589_s16 + $0x30] sm:$0xff] }
 0x1b0   : > { %v10207_v61 = vpop.f32.mrf.mxu1  ;;  %10497 = vmatmul.mubr.msk.f32.gmra.mxu1 %vm874_vm1, %v11047_v7  ;;  %v13567_v37 = vadd.f32 %v10175_v33, %v13338_v25  ;;  %10467 = vmatprep.mubr.msk.f32.mxu0 %vm874_vm1, %v16379_v27  ;;  %v11049_v7 = vld [vmem:[%s11227_s28 + $0xb0] sm:$0xff]  ;;  %v13589_v20 = vmul.f32 %v12602_v9, %v765_v15 }
 0x1b1   : > { %v13559_v51 = vadd.f32 %v10207_v61, %v13462_v19  ;;  %10499 = vmatprep.mubr.msk.f32.mxu1 %vm874_vm1, %v11048_v0  ;;  %v3204_v19 = vpop.f32.mrf.mxu0 }
 0x1b2   : > { %v3413_v47 = vpop.f32.mrf.mxu1  ;;  %v13579_v55 = vadd.f32 %v3204_v19, %v13355_v11  ;;  %v11051_v19 = vld [vmem:[%s11227_s28 + $0xc8] sm:$0xff] }
 0x1b3   : > { %v13576_v14 = vadd.f32 %v3413_v47, %v13470_v29  ;;  %v10178_v25 = vpop.f32.mrf.mxu0  ;;  %10468 = vmatmul.mubr.msk.f32.gmra.mxu0 %vm874_vm1, %v13562_v22  ;;  %v11050_v29 = vld [vmem:[%s11227_s28 + $0xc0] sm:$0xff] }
 0x1b4   : > { %v10210_v61 = vpop.f32.mrf.mxu1  ;;  %10500 = vmatmul.mubr.msk.f32.gmra.mxu1 %vm874_vm1, %v11049_v7  ;;  %v13594_v11 = vadd.f32 %v10178_v25, %v13365_v17  ;;  %10470 = vmatprep.mubr.msk.f32.mxu0 %vm874_vm1, %v13572_v12  ;;  %v11052_v7 = vld [vmem:[%s11227_s28 + $0xd0] sm:$0xff] }
 0x1b5   : > { %v13586_v27 = vadd.f32 %v10210_v61, %v13482_v59  ;;  %10502 = vmatprep.mubr.msk.f32.mxu1 %vm874_vm1, %v11050_v29  ;;  %v3214_v0 = vpop.f32.mrf.mxu0 }
 0x1b6   : > { %v3423_v33 = vpop.f32.mrf.mxu1  ;;  %v13602_v59 = vadd.f32 %v3214_v0, %v13378_v54  ;;  %v16399_v54 = vld [vmem:[#allocation35_spill] sm:$0xff] }
 0x1b7   : > { %v13599_v47 = vadd.f32 %v3423_v33, %v13490_v32  ;;  %v10181_v61 = vpop.f32.mrf.mxu0  ;;  %10471 = vmatmul.mubr.msk.f32.gmra.mxu0 %vm874_vm1, %v13589_v20 }
 0x1b8   : > { %v10213_v15 = vpop.f32.mrf.mxu1  ;;  %10503 = vmatmul.mubr.msk.f32.gmra.mxu1 %vm874_vm1, %v11051_v19  ;;  %v13614_v32 = vadd.f32 %v10181_v61, %v13388_v39  ;;  %10522 = vmatprep.mubr.msk.f32.mxu0 %vm874_vm1, %v16399_v54  ;;  %v11054_v61 = vld [vmem:[%s11227_s28 + $0xe8] sm:$0xff] }
 0x1b9   : > { %v13609_v17 = vadd.f32 %v10213_v15, %v13502_v43  ;;  %10505 = vmatprep.mubr.msk.f32.mxu1 %vm874_vm1, %v11052_v7  ;;  %v3224_v29 = vpop.f32.mrf.mxu0  ;;  %v11053_v43 = vld [vmem:[%s11227_s28 + $0xe0] sm:$0xff]  ;;  %v16400_v7 = vld [vmem:[#allocation36_spill] sm:$0xff] }
 0x1ba   : > { %v3433_v25 = vpop.f32.mrf.mxu1  ;;  %v13622_v0 = vadd.f32 %v3224_v29, %v13398_v48  ;;  %v16401_v48 = vld [vmem:[#allocation38_spill] sm:$0xff] }
 0x1bb   : > { %v13619_v33 = vadd.f32 %v3433_v25, %v13510_v35  ;;  %v10184_v15 = vpop.f32.mrf.mxu0  ;;  %10523 = vmatmul.mubr.msk.f32.vlgmr.msra.gmra.mxu0 %vm874_vm1, %v16400_v7 }
 0x1bc   : > { %v10216_v19 = vpop.f32.mrf.mxu1  ;;  %10506 = vmatmul.mubr.msk.f32.gmra.mxu1 %vm874_vm1, %v11053_v43  ;;  %v13634_v35 = vadd.f32 %v10184_v15, %v13413_v31  ;;  %10525 = vmatprep.mubr.msk.f32.mxu0 %vm874_vm1, %v16401_v48  ;;  %v11055_v43 = vld [vmem:[%s11227_s28 + $0xf0] sm:$0xff]  ;;  %v16402_v15 = vld [vmem:[#allocation40_spill] sm:$0xff] }
 0x1bd   : > { %v13629_v39 = vadd.f32 %v10216_v19, %v13522_v34  ;;  %10508 = vmatprep.mubr.msk.f32.mxu1 %vm874_vm1, %v11054_v61  ;;  %10615 = vmatpush3.msk.msra.mxu0 %vm965_vm0, %v13286_v63  ;;  %v3234_v25 = vpop.f32.mrf.mxu0  ;;  %v828_v63 = vld [vmem:[%s12671_s29 + $0x20] sm:$0xff]  ;;  %v829_v48 = vld [vmem:[%s12671_s29 + $0x28] sm:$0xff] }
 0x1be   : > { %v3443_v54 = vpop.f32.mrf.mxu1  ;;  %v13644_v34 = vadd.f32 %v3234_v25, %v13425_v3  ;;  %v16403_v3 = vld [vmem:[#allocation41_spill] sm:$0xff] }
 0x1bf   : > { %v13641_v29 = vadd.f32 %v3443_v54, %v13530_v45  ;;  %v10187_v31 = vpop.f32.mrf.mxu0  ;;  %10526 = vmatmul.mubr.msk.f32.gmra.mxu0 %vm874_vm1, %v16402_v15 }
 0x1c0   : > { %v10219_v19 = vpop.f32.mrf.mxu1  ;;  %10509 = vmatmul.mubr.msk.f32.gmra.mxu1 %vm874_vm1, %v11055_v43  ;;  %v13657_v45 = vadd.f32 %v10187_v31, %v13437_v8  ;;  %10528 = vmatprep.mubr.msk.f32.mxu0 %vm874_vm1, %v16403_v3  ;;  %v16404_v43 = vld [vmem:[#allocation42_spill] sm:$0xff] }
 0x1c1   : > { %v13651_v7 = vadd.f32 %v10219_v19, %v13542_v52  ;;  %10511 = vmatprep.mubr.msk.f32.mxu1 %vm874_vm1, %v12698_v18  ;;  %v3244_v54 = vpop.f32.mrf.mxu0  ;;  %v13671_v18 = vmul.f32 %v828_v63, %v12602_v9 }
 0x1c2   : > { %v3453_v61 = vpop.f32.mrf.mxu1  ;;  %v13666_v52 = vadd.f32 %v3244_v54, %v13447_v5  ;;  %v13681_v5 = vmul.f32 %v829_v48, %v12602_v9 }
 0x1c3   : > { %v13663_v25 = vadd.f32 %v3453_v61, %v13552_v24  ;;  %v10190_v8 = vpop.f32.mrf.mxu0  ;;  %10529 = vmatmul.mubr.msk.f32.gmra.mxu0 %vm874_vm1, %v16404_v43  ;;  %v830_v24 = vld [vmem:[%s12671_s29 + $0x30] sm:$0xff] }
 0x1c4   : > { %v10222_v19 = vpop.f32.mrf.mxu1  ;;  %10512 = vmatmul.mubr.msk.f32.gmra.mxu1 %vm874_vm1, %v12707_v26  ;;  %v3292_v15 = vadd.f32 %v10190_v8, %v13457_v57  ;;  %v16405_v26 = vld [vmem:[#allocation43_spill] sm:$0xff] }
 0x1c5   : > { %v13676_v31 = vadd.f32 %v10222_v19, %v13567_v37  ;;  %10514 = vmatprep.mubr.msk.f32.mxu1 %vm874_vm1, %v12717_v60  ;;  %10531 = vmatprep.mubr.msk.f32.mxu0 %vm874_vm1, %v16405_v26  ;;  %v3254_v3 = vpop.f32.mrf.mxu0  ;;  %v13694_v60 = vmul.f32 %v830_v24, %v12602_v9  ;;  %v16406_v19 = vld [vmem:[#allocation45_spill] sm:$0xff] }
 0x1c6   : > { %v3463_v63 = vpop.f32.mrf.mxu1  ;;  %v3291_v37 = vadd.f32 %v3254_v3, %v13467_v46  ;;  %v16407_v46 = vld [vmem:[#allocation47_spill] sm:$0xff]  ;;  %v16408_v3 = vld [vmem:[#allocation49_spill] sm:$0xff] }
 0x1c7   : > { %v13688_v61 = vadd.f32 %v3463_v63, %v13579_v55  ;;  %v10242_v48 = vpop.f32.mrf.mxu0  ;;  %10532 = vmatmul.mubr.msk.f32.gmra.mxu0 %vm874_vm1, %v16406_v19 }
 0x1c8   : > { %v10225_v54 = vpop.f32.mrf.mxu1  ;;  %10515 = vmatmul.mubr.msk.f32.gmra.mxu1 %vm874_vm1, %v13671_v18  ;;  %v3795_v55 = vadd.f32 %v10242_v48, %v13477_v23  ;;  %10534 = vmatprep.mubr.msk.f32.mxu0 %vm874_vm1, %v16407_v46 }
 0x1c9   : > { %v13699_v57 = vadd.f32 %v10225_v54, %v13594_v11  ;;  %10517 = vmatprep.mubr.msk.f32.mxu1 %vm874_vm1, %v13681_v5  ;;  %v3645_v43 = vpop.f32.mrf.mxu0  ;;  %v16409_v54 = vld [vmem:[#allocation50_spill] sm:$0xff] }
 0x1ca   : > { %v3473_v8 = vpop.f32.mrf.mxu1  ;;  %v3794_v26 = vadd.f32 %v3645_v43, %v13487_v13 }
 0x1cb   : > { %v13707_v24 = vadd.f32 %v3473_v8, %v13602_v59  ;;  %v10245_v11 = vpop.f32.mrf.mxu0  ;;  %10535 = vmatmul.mubr.msk.f32.gmra.mxu0 %vm874_vm1, %v16408_v3  ;;  %v16410_v59 = vld [vmem:[#allocation51_spill] sm:$0xff]  ;;  %v16411_v3 = vld [vmem:[#allocation52_spill] sm:$0xff] }
 0x1cc   : > { %v10228_v63 = vpop.f32.mrf.mxu1  ;;  %10518 = vmatmul.mubr.msk.f32.gmra.mxu1 %vm874_vm1, %v13694_v60  ;;  %v3797_v48 = vadd.f32 %v10245_v11, %v13497_v40  ;;  %10537 = vmatprep.mubr.msk.f32.mxu0 %vm874_vm1, %v16410_v59 }
 0x1cd   : > { %v13715_v23 = vadd.f32 %v10228_v63, %v13614_v32  ;;  %10569 = vmatprep.mubr.msk.f32.mxu1 %vm874_vm1, %v16409_v54  ;;  %v3655_v19 = vpop.f32.mrf.mxu0  ;;  %v16412_v63 = vld [vmem:[#allocation53_spill] sm:$0xff]  ;;  %v16414_v54 = vld [vmem:[#allocation54_spill] sm:$0xff] }
 0x1ce   : > { %v3483_v13 = vpop.f32.mrf.mxu1  ;;  %v3796_v8 = vadd.f32 %v3655_v19, %v13507_v28 }
 0x1cf   : > { %v13723_v46 = vadd.f32 %v3483_v13, %v13622_v0  ;;  %v10248_v32 = vpop.f32.mrf.mxu0  ;;  %10538 = vmatmul.mubr.msk.f32.gmra.mxu0 %vm874_vm1, %v16412_v63  ;;  %v16413_v0 = vld [vmem:[#allocation55_spill] sm:$0xff] }
 0x1d0   : > { %v10231_v43 = vpop.f32.mrf.mxu1  ;;  %10570 = vmatmul.mubr.msk.f32.vlgmr.msra.gmra.mxu1 %vm874_vm1, %v16411_v3  ;;  %v3799_v11 = vadd.f32 %v10248_v32, %v13517_v30  ;;  %10540 = vmatprep.mubr.msk.f32.mxu0 %vm874_vm1, %v16413_v0  ;;  %v16416_v3 = vld [vmem:[#allocation58_spill] sm:$0xff]  ;;  %v16417_v32 = vld [vmem:[#allocation57_spill] sm:$0xff] }
 0x1d1   : > { %v13731_v40 = vadd.f32 %v10231_v43, %v13634_v35  ;;  %10662 = vmatpush3.msk.msra.mxu1 %vm965_vm0, %v13408_v44  ;;  %10572 = vmatprep.mubr.msk.f32.mxu1 %vm874_vm1, %v16414_v54  ;;  %v3665_v59 = vpop.f32.mrf.mxu0  ;;  %v16415_v43 = vld [vmem:[#allocation56_spill] sm:$0xff] }
 0x1d2   : > { %v3493_v28 = vpop.f32.mrf.mxu1  ;;  %v3798_v19 = vadd.f32 %v3665_v59, %v13527_v2 }
 0x1d3   : > { %v13741_v13 = vadd.f32 %v3493_v28, %v13644_v34  ;;  %v10251_v44 = vpop.f32.mrf.mxu0  ;;  %10541 = vmatmul.mubr.msk.f32.gmra.mxu0 %vm874_vm1, %v16416_v3  ;;  %v16418_v34 = vld [vmem:[#allocation59_spill] sm:$0xff] }
 0x1d4   : > { %v10234_v35 = vpop.f32.mrf.mxu1  ;;  %10573 = vmatmul.mubr.msk.f32.gmra.mxu1 %vm874_vm1, %v16415_v43  ;;  %v3801_v63 = vadd.f32 %v10251_v44, %v13537_v21  ;;  %10543 = vmatprep.mubr.msk.f32.mxu0 %vm874_vm1, %v16418_v34  ;;  %v16419_v43 = vld [vmem:[#allocation60_spill] sm:$0xff]  ;;  %v16421_v44 = vld [vmem:[#allocation62_spill] sm:$0xff] }
 0x1d5   : > { %v13749_v30 = vadd.f32 %v10234_v35, %v13657_v45  ;;  %10575 = vmatprep.mubr.msk.f32.mxu1 %vm874_vm1, %v16417_v32  ;;  %v3675_v0 = vpop.f32.mrf.mxu0  ;;  %v16420_v35 = vld [vmem:[#allocation61_spill] sm:$0xff] }
 0x1d6   : > { %v3503_v2 = vpop.f32.mrf.mxu1  ;;  %v13760_v54 = vadd.f32 %v3675_v0, %v13548_v42 }
 0x1d7   : > { %v13757_v28 = vadd.f32 %v3503_v2, %v13666_v52  ;;  %v10254_v45 = vpop.f32.mrf.mxu0  ;;  %10544 = vmatmul.mubr.msk.f32.gmra.mxu0 %vm874_vm1, %v16420_v35  ;;  %v16422_v52 = vld [vmem:[#allocation63_spill] sm:$0xff] }
 0x1d8   : > { %v10237_v59 = vpop.f32.mrf.mxu1  ;;  %10576 = vmatmul.mubr.msk.f32.gmra.mxu1 %vm874_vm1, %v16419_v43  ;;  %v13771_v3 = vadd.f32 %v10254_v45, %v13559_v51  ;;  %10546 = vmatprep.mubr.msk.f32.mxu0 %vm874_vm1, %v16422_v52  ;;  %v16423_v43 = vld [vmem:[#allocation64_spill] sm:$0xff]  ;;  %v16425_v45 = vld [vmem:[#allocation66_spill] sm:$0xff] }
 0x1d9   : > { %v13766_v21 = vadd.f32 %v10237_v59, %v3292_v15  ;;  %10578 = vmatprep.mubr.msk.f32.mxu1 %vm874_vm1, %v16421_v44  ;;  %v3685_v32 = vpop.f32.mrf.mxu0  ;;  %v16424_v59 = vld [vmem:[#allocation65_spill] sm:$0xff] }
 0x1da   : > { %v3513_v42 = vpop.f32.mrf.mxu1  ;;  %v13778_v2 = vadd.f32 %v3685_v32, %v13576_v14 }
 0x1db   : > { %v13775_v34 = vadd.f32 %v3513_v42, %v3291_v37  ;;  %v10257_v15 = vpop.f32.mrf.mxu0  ;;  %10547 = vmatmul.mubr.msk.f32.gmra.mxu0 %vm874_vm1, %v16424_v59  ;;  %v16426_v37 = vld [vmem:[#allocation68_spill] sm:$0xff] }
 0x1dc   : > { %v10289_v0 = vpop.f32.mrf.mxu1  ;;  %10579 = vmatmul.mubr.msk.f32.gmra.mxu1 %vm874_vm1, %v16423_v43  ;;  %v13789_v35 = vadd.f32 %v10257_v15, %v13586_v27  ;;  %10549 = vmatprep.mubr.msk.f32.mxu0 %vm874_vm1, %v16426_v37  ;;  %v16427_v43 = vld [vmem:[#allocation69_spill] sm:$0xff]  ;;  %v16429_v15 = vld [vmem:[#allocation71_spill] sm:$0xff] }
 0x1dd   : > { %v13784_v51 = vadd.f32 %v10289_v0, %v3795_v55  ;;  %10581 = vmatprep.mubr.msk.f32.mxu1 %vm874_vm1, %v16425_v45  ;;  %v3695_v44 = vpop.f32.mrf.mxu0  ;;  %v16428_v0 = vld [vmem:[#allocation70_spill] sm:$0xff] }
 0x1de   : > { %v3901_v14 = vpop.f32.mrf.mxu1  ;;  %v13796_v42 = vadd.f32 %v3695_v44, %v13599_v47 }
 0x1df   : > { %v13793_v52 = vadd.f32 %v3901_v14, %v3794_v26  ;;  %v10260_v55 = vpop.f32.mrf.mxu0  ;;  %10550 = vmatmul.mubr.msk.f32.gmra.mxu0 %vm874_vm1, %v16428_v0  ;;  %v16430_v26 = vld [vmem:[#allocation72_spill] sm:$0xff] }
 0x1e0   : > { %v10292_v32 = vpop.f32.mrf.mxu1  ;;  %10582 = vmatmul.mubr.msk.f32.gmra.mxu1 %vm874_vm1, %v16427_v43  ;;  %v13807_v59 = vadd.f32 %v10260_v55, %v13609_v17  ;;  %10552 = vmatprep.mubr.msk.f32.mxu0 %vm874_vm1, %v16430_v26  ;;  %v16432_v43 = vld [vmem:[#allocation74_spill] sm:$0xff]  ;;  %v16433_v55 = vld [vmem:[#allocation75_spill] sm:$0xff] }
 0x1e1   : > { %v13802_v27 = vadd.f32 %v10292_v32, %v3797_v48  ;;  %10584 = vmatprep.mubr.msk.f32.mxu1 %vm874_vm1, %v16429_v15  ;;  %v3705_v45 = vpop.f32.mrf.mxu0  ;;  %v16431_v48 = vld [vmem:[#allocation73_spill] sm:$0xff] }
 0x1e2   : > { %v3911_v47 = vpop.f32.mrf.mxu1  ;;  %v13814_v14 = vadd.f32 %v3705_v45, %v13619_v33 }
 0x1e3   : > { %v13811_v37 = vadd.f32 %v3911_v47, %v3796_v8  ;;  %v10263_v32 = vpop.f32.mrf.mxu0  ;;  %10553 = vmatmul.mubr.msk.f32.gmra.mxu0 %vm874_vm1, %v16432_v43  ;;  %v16434_v8 = vld [vmem:[#allocation76_spill] sm:$0xff]  ;;  %v766_v47 = vld [vmem:[%s12589_s16 + $0x38] sm:$0x3] }
 0x1e4   : > { %v10295_v44 = vpop.f32.mrf.mxu1  ;;  %10585 = vmatmul.mubr.msk.f32.gmra.mxu1 %vm874_vm1, %v16431_v48  ;;  %v13825_v0 = vadd.f32 %v10263_v32, %v13629_v39  ;;  %10555 = vmatprep.mubr.msk.f32.mxu0 %vm874_vm1, %v16434_v8  ;;  %v16436_v43 = vld [vmem:[#allocation78_spill] sm:$0xff]  ;;  %v16437_v32 = vld [vmem:[#allocation79_spill] sm:$0xff]  ;;  %v5125_v8 = vrot.slane %v13562_v22, 1 }
 0x1e5   : > { %v13820_v17 = vadd.f32 %v10295_v44, %v3799_v11  ;;  %10587 = vmatprep.mubr.msk.f32.mxu1 %vm874_vm1, %v16433_v55  ;;  %v3715_v15 = vpop.f32.mrf.mxu0  ;;  %v16435_v11 = vld [vmem:[#allocation77_spill] sm:$0xff] }
 0x1e6   : > { %v3921_v33 = vpop.f32.mrf.mxu1  ;;  %v13833_v45 = vadd.f32 %v3715_v15, %v13641_v29  ;;  %v16438_v55 = vld [vmem:[#allocation29_spill] sm:$0xff]  ;;  %v13851_v15 = vmul.f32 %v12602_v9, %v766_v47 }
 0x1e7   : > { %v13829_v26 = vadd.f32 %v3921_v33, %v3798_v19  ;;  %v10266_v44 = vpop.f32.mrf.mxu0  ;;  %10556 = vmatmul.mubr.msk.f32.gmra.mxu0 %vm874_vm1, %v16436_v43  ;;  %v5126_v33 = vrot.slane %v13572_v12, 1  ;;  %v16439_v43 = vld [vmem:[#allocation80_spill] sm:$0xff] }
 0x1e8   : > { %v10298_v48 = vpop.f32.mrf.mxu1  ;;  %10588 = vmatmul.mubr.msk.f32.gmra.mxu1 %vm874_vm1, %v16435_v11  ;;  %v13844_v19 = vadd.f32 %v10266_v44, %v13651_v7  ;;  %10558 = vmatprep.mubr.msk.f32.mxu0 %vm874_vm1, %v16438_v55  ;;  %v16440_v55 = vld [vmem:[#allocation31_spill] sm:$0xff] }
 0x1e9   : > { %v13839_v39 = vadd.f32 %v10298_v48, %v3801_v63  ;;  %10590 = vmatprep.mubr.msk.f32.mxu1 %vm874_vm1, %v16437_v32  ;;  %v3725_v11 = vpop.f32.mrf.mxu0  ;;  %v5128_v48 = vrot.slane %v13589_v20, 1 }
 0x1ea   : > { %v3931_v29 = vpop.f32.mrf.mxu1  ;;  %v13858_v7 = vadd.f32 %v3725_v11, %v13663_v25  ;;  %v5127_v25 = vsel %vm1502_vm3, %v5125_v8, %v5126_v33 }
 0x1eb   : > { %v13854_v63 = vadd.f32 %v3931_v29, %v13760_v54  ;;  %v10269_v32 = vpop.f32.mrf.mxu0  ;;  %10559 = vmatmul.mubr.msk.f32.gmra.mxu0 %vm874_vm1, %v16440_v55  ;;  %v16442_v29 = vld [vmem:[#allocation34_spill] sm:$0xff] }
 0x1ec   : > { %v10301_v44 = vpop.f32.mrf.mxu1  ;;  %10591 = vmatmul.mubr.msk.f32.gmra.mxu1 %vm874_vm1, %v16439_v43  ;;  %v13870_v54 = vadd.f32 %v10269_v32, %v13676_v31  ;;  %10561 = vmatprep.mubr.msk.f32.mxu0 %vm874_vm1, %v16442_v29  ;;  %v5130_v43 = vrot.slane %v13851_v15, 1  ;;  %v16443_v31 = vld [vmem:[#allocation22_spill] sm:$0xff]  ;;  %v16444_v29 = vld [vmem:[#allocation27_spill] sm:$0xff] }
 0x1ed   : > { %v13865_v47 = vadd.f32 %v10301_v44, %v13771_v3  ;;  %10593 = vmatprep.mubr.msk.f32.mxu1 %vm874_vm1, %v16441_v50  ;;  %v3735_v36 = vpop.f32.mrf.mxu0  ;;  %v5129_v3 = vsel %vm1502_vm3, %v5126_v33, %v5128_v48 }
 0x1ee   : > { %v3941_v11 = vpop.f32.mrf.mxu1  ;;  %v13881_v44 = vadd.f32 %v3735_v36, %v13688_v61  ;;  %v5131_v36 = vsel %vm1502_vm3, %v5128_v48, %v5130_v43  ;;  %v16447_v48 = vld [vmem:[#allocation16_spill] sm:$0xff] }
 0x1ef   : > { %v13877_v55 = vadd.f32 %v3941_v11, %v13778_v2  ;;  %v10272_v32 = vpop.f32.mrf.mxu0  ;;  %10562 = vmatmul.mubr.msk.f32.gmra.mxu0 %vm874_vm1, %v5127_v25 }
 0x1f0   : > { %v10304_v50 = vpop.f32.mrf.mxu1  ;;  %10594 = vmatmul.mubr.msk.f32.gmra.mxu1 %vm874_vm1, %v16443_v31  ;;  %v13892_v2 = vadd.f32 %v10272_v32, %v13699_v57  ;;  %10564 = vmatprep.mubr.msk.f32.mxu0 %vm874_vm1, %v5129_v3  ;;  %v16446_v3 = vld [vmem:[#allocation6_spill] sm:$0xff] }
 0x1f1   : > { %v13887_v8 = vadd.f32 %v10304_v50, %v13789_v35  ;;  %10596 = vmatprep.mubr.msk.f32.mxu1 %vm874_vm1, %v16444_v29  ;;  %v3745_v33 = vpop.f32.mrf.mxu0  ;;  %v16445_v50 = vld [vmem:[#allocation82_spill] sm:$0xff] }
 0x1f2   : > { %v3951_v61 = vpop.f32.mrf.mxu1  ;;  %v13900_v25 = vadd.f32 %v3745_v33, %v13707_v24  ;;  %v16449_v33 = vld [vmem:[#allocation32_spill] sm:$0xff] }
 0x1f3   : > { %v13897_v11 = vadd.f32 %v3951_v61, %v13796_v42  ;;  %v10275_v31 = vpop.f32.mrf.mxu0  ;;  %10565 = vmatmul.mubr.msk.f32.gmra.mxu0 %vm874_vm1, %v5131_v36  ;;  %v16448_v36 = vld [vmem:[#allocation7_spill] sm:$0xff] }
 0x1f4   : > { %v10307_v35 = vpop.f32.mrf.mxu1  ;;  %10597 = vmatmul.mubr.msk.f32.gmra.mxu1 %vm874_vm1, %v16445_v50  ;;  %v13911_v42 = vadd.f32 %v10275_v31, %v13715_v23  ;;  %10616 = vmatprep.mubr.msk.f32.mxu0 %vm874_vm1, %v16447_v48  ;;  %v16451_v50 = vld [vmem:[#allocation83_spill] sm:$0xff]  ;;  %v831_v31 = vld [vmem:[%s12671_s29 + $0x38] sm:$0x3] }
 0x1f5   : > { %v13906_v57 = vadd.f32 %v10307_v35, %v13807_v59  ;;  %10599 = vmatprep.mubr.msk.f32.mxu1 %vm874_vm1, %v16446_v3  ;;  %v3755_v43 = vpop.f32.mrf.mxu0  ;;  %v16450_v35 = vld [vmem:[#allocation18_spill] sm:$0xff] }
 0x1f6   : > { %v3961_v24 = vpop.f32.mrf.mxu1  ;;  %v13919_v29 = vadd.f32 %v3755_v43, %v13723_v46  ;;  %v16452_v43 = vld [vmem:[#allocation84_spill] sm:$0xff] }
 0x1f7   : > { %v13916_v32 = vadd.f32 %v3961_v24, %v13814_v14  ;;  %v10278_v61 = vpop.f32.mrf.mxu0  ;;  %10617 = vmatmul.mubr.msk.f32.vlgmr.msra.gmra.mxu0 %vm874_vm1, %v16449_v33  ;;  %v5134_v33 = vrot.slane %v13681_v5, 1 }
 0x1f8   : > { %v10310_v59 = vpop.f32.mrf.mxu1  ;;  %10600 = vmatmul.mubr.msk.f32.gmra.mxu1 %vm874_vm1, %v16448_v36  ;;  %v13931_v14 = vadd.f32 %v10278_v61, %v13731_v40  ;;  %10619 = vmatprep.mubr.msk.f32.mxu0 %vm874_vm1, %v16451_v50  ;;  %v16453_v36 = vld [vmem:[#allocation85_spill] sm:$0xff]  ;;  %v16454_v61 = vld [vmem:[#allocation44_spill] sm:$0xff]  ;;  %v16455_v50 = vld [vmem:[#allocation86_spill] sm:$0xff] }
 0x1f9   : > { %v13926_v23 = vadd.f32 %v10310_v59, %v13825_v0  ;;  %10602 = vmatprep.mubr.msk.f32.mxu1 %vm874_vm1, %v16450_v35  ;;  %v3765_v3 = vpop.f32.mrf.mxu0 }
 0x1fa   : > { %v3971_v46 = vpop.f32.mrf.mxu1  ;;  %v13940_v24 = vadd.f32 %v3765_v3, %v13741_v13  ;;  %v13954_v13 = vmul.f32 %v831_v31, %v12602_v9 }
 0x1fb   : > { %v13937_v48 = vadd.f32 %v3971_v46, %v13833_v45  ;;  %v10281_v59 = vpop.f32.mrf.mxu0  ;;  %10620 = vmatmul.mubr.msk.f32.gmra.mxu0 %vm874_vm1, %v16453_v36  ;;  %v5133_v45 = vrot.slane %v13671_v18, 1 }
 0x1fc   : > { %v10313_v0 = vpop.f32.mrf.mxu1  ;;  %10603 = vmatmul.mubr.msk.f32.gmra.mxu1 %vm874_vm1, %v16452_v43  ;;  %v13957_v35 = vadd.f32 %v10281_v59, %v13749_v30  ;;  %10622 = vmatprep.mubr.msk.f32.mxu0 %vm874_vm1, %v16455_v50  ;;  %v5138_v31 = vrot.slane %v13954_v13, 1 }
 0x1fd   : > { %v13947_v40 = vadd.f32 %v10313_v0, %v13844_v19  ;;  %10605 = vmatprep.mubr.msk.f32.mxu1 %vm874_vm1, %v16454_v61  ;;  %v5136_v19 = vrot.slane %v13694_v60, 1  ;;  %v3775_v3 = vpop.f32.mrf.mxu0 }
 0x1fe   : > { %v3981_v46 = vpop.f32.mrf.mxu1  ;;  %v13966_v43 = vadd.f32 %v3775_v3, %v13757_v28 }
 0x1ff   : > { %v13963_v0 = vadd.f32 %v3981_v46, %v13858_v7  ;;  %v10284_v9 = vpop.f32.mrf.mxu0  ;;  %10623 = vmatmul.mubr.msk.f32.gmra.mxu0 %vm874_vm1, %v16358_v41  ;;  %v5135_v7 = vsel %vm1502_vm3, %v5133_v45, %v5134_v33  ;;  %v5137_v59 = vsel %vm1502_vm3, %v5134_v33, %v5136_v19 }
 0x200   : > { %v10316_v36 = vpop.f32.mrf.mxu1  ;;  %10606 = vmatmul.mubr.msk.f32.gmra.mxu1 %vm874_vm1, %v13035_v62  ;;  %v3823_v28 = vadd.f32 %v10284_v9, %v13766_v21  ;;  %10625 = vmatprep.mubr.msk.f32.mxu0 %vm874_vm1, %v12135_v1  ;;  %v5139_v1 = vsel %vm1502_vm3, %v5136_v19, %v5138_v31 }
 0x201   : > { %v13973_v30 = vadd.f32 %v10316_v36, %v13870_v54  ;;  %10608 = vmatprep.mubr.msk.f32.mxu1 %vm874_vm1, %v13053_v53  ;;  %v3785_v61 = vpop.f32.mrf.mxu0 }
 0x202   : > { %v3991_v62 = vpop.f32.mrf.mxu1  ;;  %v3822_v54 = vadd.f32 %v3785_v61, %v13775_v34  ;;  %v16460_v61 = vld [vmem:[#allocation24_spill] sm:$0xff] }
 0x203   : > { %v13984_v41 = vadd.f32 %v3991_v62, %v13881_v44  ;;  %v10336_v53 = vpop.f32.mrf.mxu0  ;;  %10626 = vmatmul.mubr.msk.f32.gmra.mxu0 %vm874_vm1, %v12161_v4 }
 0x204   : > { %v10319_v50 = vpop.f32.mrf.mxu1  ;;  %10609 = vmatmul.mubr.msk.f32.gmra.mxu1 %vm874_vm1, %v5135_v7  ;;  %v4321_v45 = vadd.f32 %v10336_v53, %v13784_v51  ;;  %10628 = vmatprep.mubr.msk.f32.mxu0 %vm874_vm1, %v12170_v49  ;;  %v16456_v51 = vld [vmem:[#allocation8_spill] sm:$0xff]  ;;  %v16462_v53 = vld [vmem:[#allocation87_spill] sm:$0xff] }
 0x205   : > { %v13991_v21 = vadd.f32 %v10319_v50, %v13892_v2  ;;  %10611 = vmatprep.mubr.msk.f32.mxu1 %vm874_vm1, %v5137_v59  ;;  %v4171_v44 = vpop.f32.mrf.mxu0  ;;  %v16461_v50 = vld [vmem:[#allocation17_spill] sm:$0xff] }
 0x206   : > { %v4001_v34 = vpop.f32.mrf.mxu1  ;;  %v4320_v46 = vadd.f32 %v4171_v44, %v13793_v52 }
 0x207   : > { %v13999_v33 = vadd.f32 %v4001_v34, %v13900_v25  ;;  %v10339_v2 = vpop.f32.mrf.mxu0  ;;  %10629 = vmatmul.mubr.msk.f32.gmra.mxu0 %vm874_vm1, %v16359_v16 }
 0x208   : > { %v10322_v4 = vpop.f32.mrf.mxu1  ;;  %10612 = vmatmul.mubr.msk.f32.gmra.mxu1 %vm874_vm1, %v5139_v1  ;;  %v4323_v49 = vadd.f32 %v10339_v2, %v13802_v27  ;;  %10631 = vmatprep.mubr.msk.f32.mxu0 %vm874_vm1, %v16456_v51  ;;  %v16458_v27 = vld [vmem:[#allocation11_spill] sm:$0xff]  ;;  %v16464_v51 = vld [vmem:[#allocation88_spill] sm:$0xff] }
 0x209   : > { %v14006_v19 = vadd.f32 %v10322_v4, %v13911_v42  ;;  %10663 = vmatprep.mubr.msk.f32.mxu1 %vm874_vm1, %v16361_v6  ;;  %v4181_v52 = vpop.f32.mrf.mxu0  ;;  %v16457_v42 = vld [vmem:[#allocation26_spill] sm:$0xff] }
 0x20a   : > { %v4011_v25 = vpop.f32.mrf.mxu1  ;;  %v4322_v36 = vadd.f32 %v4181_v52, %v13811_v37 }
 0x20b   : > { %v14014_v3 = vadd.f32 %v4011_v25, %v13919_v29  ;;  %v10342_v16 = vpop.f32.mrf.mxu0  ;;  %10632 = vmatmul.mubr.msk.f32.gmra.mxu0 %vm874_vm1, %v16457_v42  ;;  %v16459_v29 = vld [vmem:[#allocation13_spill] sm:$0xff] }
 0x20c   : > { %v10325_v9 = vpop.f32.mrf.mxu1  ;;  %10664 = vmatmul.mubr.msk.f32.vlgmr.msra.gmra.mxu1 %vm874_vm1, %v12207_v38  ;;  %v4325_v7 = vadd.f32 %v10342_v16, %v13820_v17  ;;  %10634 = vmatprep.mubr.msk.f32.mxu0 %vm874_vm1, %v16459_v29  ;;  %v16465_v25 = vld [vmem:[#allocation89_spill] sm:$0xff]  ;;  %v16467_v16 = vld [vmem:[#allocation91_spill] sm:$0xff]  ;;  %v16468_v29 = vld [vmem:[#allocation30_spill] sm:$0xff] }
 0x20d   : > { %v14022_v6 = vadd.f32 %v10325_v9, %v13931_v14  ;;  %10666 = vmatprep.mubr.msk.f32.mxu1 %vm874_vm1, %v16458_v27  ;;  %v4191_v31 = vpop.f32.mrf.mxu0 }
 0x20e   : > { %v4021_v37 = vpop.f32.mrf.mxu1  ;;  %v4324_v38 = vadd.f32 %v4191_v31, %v13829_v26 }
 0x20f   : > { %v14030_v62 = vadd.f32 %v4021_v37, %v13940_v24  ;;  %v10345_v14 = vpop.f32.mrf.mxu0  ;;  %10635 = vmatmul.mubr.msk.f32.gmra.mxu0 %vm874_vm1, %v16461_v50  ;;  %v16463_v24 = vld [vmem:[#allocation19_spill] sm:$0xff] }
 0x210   : > { %v10328_v59 = vpop.f32.mrf.mxu1  ;;  %10667 = vmatmul.mubr.msk.f32.gmra.mxu1 %vm874_vm1, %v16460_v61  ;;  %v4327_v1 = vadd.f32 %v10345_v14, %v13839_v39  ;;  %10637 = vmatprep.mubr.msk.f32.mxu0 %vm874_vm1, %v16463_v24  ;;  %v16466_v39 = vld [vmem:[#allocation90_spill] sm:$0xff]  ;;  %v16471_v61 = vld [vmem:[#allocation92_spill] sm:$0xff] }
 0x211   : > { %v14038_v17 = vadd.f32 %v10328_v59, %v13957_v35  ;;  %10669 = vmatprep.mubr.msk.f32.mxu1 %vm874_vm1, %v16462_v53  ;;  %v4201_v34 = vpop.f32.mrf.mxu0  ;;  %v16470_v59 = vld [vmem:[#allocation23_spill] sm:$0xff]  ;;  %v16472_v24 = vld [vmem:[#allocation94_spill] sm:$0xff] }
 0x212   : > { %v4031_v26 = vpop.f32.mrf.mxu1  ;;  %v4326_v4 = vadd.f32 %v4201_v34, %v13854_v63 }
 0x213   : > { %v14046_v44 = vadd.f32 %v4031_v26, %v13966_v43  ;;  %v10348_v35 = vpop.f32.mrf.mxu0  ;;  %10638 = vmatmul.mubr.msk.f32.gmra.mxu0 %vm874_vm1, %v16465_v25 }
 0x214   : > { %v10331_v2 = vpop.f32.mrf.mxu1  ;;  %10670 = vmatmul.mubr.msk.f32.gmra.mxu1 %vm874_vm1, %v16464_v51  ;;  %v4329_v9 = vadd.f32 %v10348_v35, %v13865_v47  ;;  %10640 = vmatprep.mubr.msk.f32.mxu0 %vm874_vm1, %v16467_v16  ;;  %v16475_v51 = vld [vmem:[#allocation37_spill] sm:$0xff]  ;;  %v16476_v16 = vld [vmem:[#allocation95_spill] sm:$0xff] }
 0x215   : > { %v14053_v52 = vadd.f32 %v10331_v2, %v3823_v28  ;;  %10672 = vmatprep.mubr.msk.f32.mxu1 %vm874_vm1, %v16466_v39  ;;  %v14060_v63 = vpop.f32.mrf.mxu0  ;;  %v16469_v28 = vld [vmem:[#allocation33_spill] sm:$0xff]  ;;  %v16474_v2 = vld [vmem:[#allocation67_spill] sm:$0xff] }
 0x216   : > { %v4041_v43 = vpop.f32.mrf.mxu1 }
 0x217   : > { %v14062_v42 = vadd.f32 %v4041_v43, %v3822_v54  ;;  %v10351_v37 = vpop.f32.mrf.mxu0  ;;  %10641 = vmatmul.mubr.msk.f32.gmra.mxu0 %vm874_vm1, %v16469_v28 }
 0x218   : > { %v10383_v27 = vpop.f32.mrf.mxu1  ;;  %10673 = vmatmul.mubr.msk.f32.gmra.mxu1 %vm874_vm1, %v16468_v29  ;;  %v4331_v47 = vadd.f32 %v10351_v37, %v13887_v8  ;;  %10643 = vmatprep.mubr.msk.f32.mxu0 %vm874_vm1, %v16471_v61  ;;  %v16478_v29 = vld [vmem:[#allocation97_spill] sm:$0xff]  ;;  %v16479_v37 = vld [vmem:[#allocation98_spill] sm:$0xff] }
 0x219   : > { %v14068_v31 = vadd.f32 %v10383_v27, %v4321_v45  ;;  %10675 = vmatprep.mubr.msk.f32.mxu1 %vm874_vm1, %v16470_v59  ;;  %v14075_v14 = vpop.f32.mrf.mxu0  ;;  %v16473_v45 = vld [vmem:[#allocation93_spill] sm:$0xff] }
 0x21a   : > { %v4427_v54 = vpop.f32.mrf.mxu1 }
 0x21b   : > { %v14077_v50 = vadd.f32 %v4427_v54, %v4320_v46  ;;  %v10354_v26 = vpop.f32.mrf.mxu0  ;;  %10644 = vmatmul.mubr.msk.f32.gmra.mxu0 %vm874_vm1, %v16473_v45  ;;  %v5653_v45 = vrot.slane %v13572_v12, 2  ;;  %v16487_v12 = vld [vmem:[#allocation4_spill] sm:$0xff] }
 0x21c   : > { %v10386_v53 = vpop.f32.mrf.mxu1  ;;  %10676 = vmatmul.mubr.msk.f32.gmra.mxu1 %vm874_vm1, %v16472_v24  ;;  %v4333_v8 = vadd.f32 %v10354_v26, %v13906_v57  ;;  %10646 = vmatprep.mubr.msk.f32.mxu0 %vm874_vm1, %v16475_v51  ;;  %v16482_v24 = vld [vmem:[#allocation46_spill] sm:$0xff]  ;;  %v5652_v26 = vrot.slane %v13562_v22, 2 }
 0x21d   : > { %v14083_v34 = vadd.f32 %v10386_v53, %v4323_v49  ;;  %10678 = vmatprep.mubr.msk.f32.mxu1 %vm874_vm1, %v16474_v2  ;;  %v14090_v35 = vpop.f32.mrf.mxu0  ;;  %v16477_v49 = vld [vmem:[#allocation96_spill] sm:$0xff] }
 0x21e   : > { %v4437_v46 = vpop.f32.mrf.mxu1 }
 0x21f   : > { %v14092_v25 = vadd.f32 %v4437_v46, %v4322_v36  ;;  %v10357_v43 = vpop.f32.mrf.mxu0  ;;  %10647 = vmatmul.mubr.msk.f32.gmra.mxu0 %vm874_vm1, %v16477_v49  ;;  %v16484_v46 = vld [vmem:[#allocation102_spill] sm:$0xff] }
 0x220   : > { %v10389_v39 = vpop.f32.mrf.mxu1  ;;  %10679 = vmatmul.mubr.msk.f32.gmra.mxu1 %vm874_vm1, %v16476_v16  ;;  %v4335_v57 = vadd.f32 %v10357_v43, %v13926_v23  ;;  %10649 = vmatprep.mubr.msk.f32.mxu0 %vm874_vm1, %v16479_v37  ;;  %v16486_v16 = vld [vmem:[#allocation103_spill] sm:$0xff]  ;;  %v5657_v43 = vrot.slane %v13851_v15, 2  ;;  %v16488_v37 = vld [vmem:[#allocation104_spill] sm:$0xff] }
 0x221   : > { %v14098_v27 = vadd.f32 %v10389_v39, %v4325_v7  ;;  %10681 = vmatprep.mubr.msk.f32.mxu1 %vm874_vm1, %v16478_v29  ;;  %v14105_v28 = vpop.f32.mrf.mxu0  ;;  %v16481_v7 = vld [vmem:[#allocation100_spill] sm:$0xff] }
 0x222   : > { %v4447_v36 = vpop.f32.mrf.mxu1 }
 0x223   : > { %v14107_v59 = vadd.f32 %v4447_v36, %v4324_v38  ;;  %v10360_v54 = vpop.f32.mrf.mxu0  ;;  %10650 = vmatmul.mubr.msk.f32.gmra.mxu0 %vm874_vm1, %v16481_v7 }
 0x224   : > { %v10392_v61 = vpop.f32.mrf.mxu1  ;;  %10682 = vmatmul.mubr.msk.f32.gmra.mxu1 %vm874_vm1, %v16382_v10  ;;  %v4337_v23 = vadd.f32 %v10360_v54, %v13947_v40  ;;  %10652 = vmatprep.mubr.msk.f32.mxu0 %vm874_vm1, %v16482_v24  ;;  %v16485_v40 = vld [vmem:[#allocation48_spill] sm:$0xff] }
 0x225   : > { %16480 = vst [vmem:[#allocation20_spill] sm:$0xff] %v14107_v59  ;;  %v14113_v53 = vadd.f32 %v10392_v61, %v4327_v1  ;;  %10684 = vmatprep.mubr.msk.f32.mxu1 %vm874_vm1, %v16386_v56  ;;  %v14122_v10 = vpop.f32.mrf.mxu0  ;;  %v5655_v1 = vrot.slane %v13589_v20, 2  ;;  %v5654_v20 = vsel %vm2273_vm2, %v5652_v26, %v5653_v45  ;;  %v16489_v61 = vld [vmem:[#allocation12_spill] sm:$0xff]  ;;  %v16490_v26 = vld [vmem:[#allocation3_spill] sm:$0xff] }
 0x226   : > { %v4457_v38 = vpop.f32.mrf.mxu1 }
 0x227   : > { %v14124_v2 = vadd.f32 %v4457_v38, %v4326_v4  ;;  %v10363_v56 = vpop.f32.mrf.mxu0  ;;  %10653 = vmatmul.mubr.msk.f32.gmra.mxu0 %vm874_vm1, %v16485_v40  ;;  %v5656_v29 = vsel %vm2273_vm2, %v5653_v45, %v5655_v1  ;;  %v5658_v15 = vsel %vm2273_vm2, %v5655_v1, %v5657_v43  ;;  %v8975_v1 = vld [vmem:[%s15833_s9 + $0x4] sm:$0xf] }
 0x228   : > { %v10395_v51 = vpop.f32.mrf.mxu1  ;;  %10685 = vmatmul.mubr.msk.f32.gmra.mxu1 %vm874_vm1, %v16484_v46  ;;  %v4339_v22 = vadd.f32 %v10363_v56, %v13973_v30  ;;  %10655 = vmatprep.mubr.msk.f32.mxu0 %vm874_vm1, %v16487_v12 }
 0x229   : > { %16483 = vst [vmem:[#allocation39_spill] sm:$0xff] %v14124_v2  ;;  %v14131_v39 = vadd.f32 %v10395_v51, %v4329_v9  ;;  %10687 = vmatprep.mubr.msk.f32.mxu1 %vm874_vm1, %v16486_v16  ;;  %v14142_v49 = vpop.f32.mrf.mxu0  ;;  %v16491_v51 = vld [vmem:[#allocation10_spill] sm:$0xff]  ;;  %10708 = vmatprep.subr.msk.mxu0 %vm965_vm0, %v8975_v1 }
 0x22a   : > { %v14139_v4 = vpop.f32.mrf.mxu1  ;;  %v16492_v16 = vld [vmem:[#allocation14_spill] sm:$0xff]  ;;  %10709 = vmatpush3.msk.msra.mxu0 %vm965_vm0, %v8975_v1  ;;  %v16495_v1 = vld [vmem:[#allocation28_spill] sm:$0xff] }
 0x22b   : > { %v10366_v36 = vpop.f32.mrf.mxu0  ;;  %10656 = vmatmul.mubr.msk.f32.gmra.mxu0 %vm874_vm1, %v5654_v20 }
 0x22c   : > { %v10398_v9 = vpop.f32.mrf.mxu1  ;;  %10688 = vmatmul.mubr.msk.f32.gmra.mxu1 %vm874_vm1, %v16488_v37  ;;  %v4341_v54 = vadd.f32 %v10366_v36, %v13991_v21  ;;  %10658 = vmatprep.mubr.msk.f32.mxu0 %vm874_vm1, %v5656_v29  ;;  %v16494_v37 = vld [vmem:[#allocation105_spill] sm:$0xff] }
 0x22d   : > { %v14148_v30 = vadd.f32 %v10398_v9, %v4331_v47  ;;  %10690 = vmatprep.mubr.msk.f32.mxu1 %vm874_vm1, %v16489_v61  ;;  %v14157_v24 = vpop.f32.mrf.mxu0 }
 0x22e   : > { %v14155_v7 = vpop.f32.mrf.mxu1 }
 0x22f   : > { %v10369_v45 = vpop.f32.mrf.mxu0  ;;  %10659 = vmatmul.mubr.msk.f32.gmra.mxu0 %vm874_vm1, %v5658_v15  ;;  %v5660_v15 = vrot.slane %v13681_v5, 2  ;;  %v5664_v5 = vrot.slane %v13954_v13, 2 }
 0x230   : > { %v10401_v38 = vpop.f32.mrf.mxu1  ;;  %10691 = vmatmul.mubr.msk.f32.gmra.mxu1 %vm874_vm1, %v16490_v26  ;;  %v4343_v21 = vadd.f32 %v10369_v45, %v14006_v19  ;;  %v16493_v19 = vld [vmem:[#allocation15_spill] sm:$0xff]  ;;  %v5662_v26 = vrot.slane %v13694_v60, 2 }
 0x231   : > { %v14162_v47 = vadd.f32 %v10401_v38, %v4333_v8  ;;  %10693 = vmatprep.mubr.msk.f32.mxu1 %vm874_vm1, %v16491_v51  ;;  %v14172_v56 = vpop.f32.mrf.mxu0 }
 0x232   : > { %v14167_v46 = vpop.f32.mrf.mxu1  ;;  %v5663_v60 = vsel %vm2273_vm2, %v5660_v15, %v5662_v26 }
 0x233   : > { %v10372_v8 = vpop.f32.mrf.mxu0 }
 0x234   : > { %v10404_v40 = vpop.f32.mrf.mxu1  ;;  %10694 = vmatmul.mubr.msk.f32.gmra.mxu1 %vm874_vm1, %v16492_v16  ;;  %v4345_v20 = vadd.f32 %v10372_v8, %v14022_v6 }
 0x235   : > { %v14178_v12 = vadd.f32 %v10404_v40, %v4335_v57  ;;  %10696 = vmatprep.mubr.msk.f32.mxu1 %vm874_vm1, %v16493_v19  ;;  %v14185_v29 = vpop.f32.mrf.mxu0  ;;  %v5659_v57 = vrot.slane %v13671_v18, 2 }
 0x236   : > { %v14183_v43 = vpop.f32.mrf.mxu1 }
 0x237   : > { %v10375_v36 = vpop.f32.mrf.mxu0  ;;  %v5661_v18 = vsel %vm2273_vm2, %v5659_v57, %v5660_v15 }
 0x238   : > { %v10407_v9 = vpop.f32.mrf.mxu1  ;;  %10697 = vmatmul.mubr.msk.f32.gmra.mxu1 %vm874_vm1, %v16494_v37  ;;  %v4347_v6 = vadd.f32 %v10375_v36, %v14038_v17  ;;  %v5665_v37 = vsel %vm2273_vm2, %v5662_v26, %v5664_v5 }
 0x239   : > { %v14189_v61 = vadd.f32 %v10407_v9, %v4337_v23  ;;  %10699 = vmatprep.mubr.msk.f32.mxu1 %vm874_vm1, %v13343_v58  ;;  %v14199_v45 = vpop.f32.mrf.mxu0  ;;  %v16496_v58 = vld [vmem:[#allocation5_spill] sm:$0xff] }
 0x23a   : > { %v14196_v38 = vpop.f32.mrf.mxu1 }
 0x23b   : > { %v10378_v23 = vpop.f32.mrf.mxu0 }
 0x23c   : > { %v10410_v51 = vpop.f32.mrf.mxu1  ;;  %10700 = vmatmul.mubr.msk.f32.gmra.mxu1 %vm874_vm1, %v16495_v1  ;;  %v4349_v17 = vadd.f32 %v10378_v23, %v14053_v52 }
 0x23d   : > { %v14203_v40 = vadd.f32 %v10410_v51, %v4339_v22  ;;  %10702 = vmatprep.mubr.msk.f32.mxu1 %vm874_vm1, %v16496_v58  ;;  %v14213_v8 = vpop.f32.mrf.mxu0 }
 0x23e   : > { %v14210_v16 = vpop.f32.mrf.mxu1 }
 0x23f   : > { %v10430_v22 = vpop.f32.mrf.mxu0 }
 0x240   : > { %v10413_v19 = vpop.f32.mrf.mxu1  ;;  %10703 = vmatmul.mubr.msk.f32.gmra.mxu1 %vm874_vm1, %v5661_v18  ;;  %v4836_v13 = vadd.f32 %v10430_v22, %v14068_v31 }
 0x241   : > { %v14216_v9 = vadd.f32 %v10413_v19, %v4341_v54  ;;  %10705 = vmatprep.mubr.msk.f32.mxu1 %vm874_vm1, %v5663_v60  ;;  %v14223_v52 = vpop.f32.mrf.mxu0 }
 0x242   : > { %v14221_v36 = vpop.f32.mrf.mxu1 }
 0x243   : > { %v10433_v15 = vpop.f32.mrf.mxu0 }
 0x244   : > { %v10416_v57 = vpop.f32.mrf.mxu1  ;;  %10706 = vmatmul.mubr.msk.f32.gmra.mxu1 %vm874_vm1, %v5665_v37  ;;  %v4838_v1 = vadd.f32 %v10433_v15, %v14083_v34 }
 0x245   : > { %v14226_v51 = vadd.f32 %v10416_v57, %v4343_v21  ;;  %v14231_v23 = vpop.f32.mrf.mxu0 }
 0x246   : > { %v14229_v54 = vpop.f32.mrf.mxu1 }
 0x247   : > { %v10436_v26 = vpop.f32.mrf.mxu0 }
 0x248   : > { %v10419_v58 = vpop.f32.mrf.mxu1  ;;  %v4840_v31 = vadd.f32 %v10436_v26, %v14098_v27 }
 0x249   : > { %v14233_v18 = vadd.f32 %v10419_v58, %v4345_v20  ;;  %v14238_v60 = vpop.f32.mrf.mxu0  ;;  %v6392_v20 = vld [vmem:[%s15833_s9] sm:$0xf] }
 0x24a   : > { %v14236_v5 = vpop.f32.mrf.mxu1  ;;  %16498 = vst [vmem:[#allocation25_spill] sm:$0xff] %v14238_v60  ;;  %10734 = vmatprep.subr.msk.mxu1 %vm965_vm0, %v6392_v20 }
 0x24b   : > { %16497 = vst [vmem:[#allocation21_spill] sm:$0xff] %v14236_v5  ;;  %v10439_v22 = vpop.f32.mrf.mxu0  ;;  %10735 = vmatpush3.msk.msra.mxu1 %vm965_vm0, %v6392_v20 }
 0x24c   : > { %v10422_v19 = vpop.f32.mrf.mxu1  ;;  %v4842_v34 = vadd.f32 %v10439_v22, %v14113_v53 }
 0x24d   : > { %v14240_v21 = vadd.f32 %v10422_v19, %v4347_v6  ;;  %v14245_v57 = vpop.f32.mrf.mxu0 }
 0x24e   : > { %v14243_v37 = vpop.f32.mrf.mxu1  ;;  %16500 = vst [vmem:[#allocation106_spill] sm:$0xff] %v14245_v57 }
 0x24f   : > { %16499 = vst [vmem:[#allocation9_spill] sm:$0xff] %v14243_v37  ;;  %v10442_v27 = vpop.f32.mrf.mxu0 }
 0x250   : > { %v10425_v15 = vpop.f32.mrf.mxu1  ;;  %v4844_v26 = vadd.f32 %v10442_v27, %v14131_v39 }
 0x251   : > { %v14250_v58 = vadd.f32 %v10425_v15, %v4349_v17  ;;  %v14257_v53 = vpop.f32.mrf.mxu0 }
 0x252   : > { %v14254_v6 = vpop.f32.mrf.mxu1  ;;  %16501 = vst [vmem:[#allocation107_spill] sm:$0xff] %v14257_v53 }
 0x253   : > { %v10445_v22 = vpop.f32.mrf.mxu0 }
 0x254   : > { %v10477_v19 = vpop.f32.mrf.mxu1  ;;  %v4846_v57 = vadd.f32 %v10445_v22, %v14148_v30 }
 0x255   : > { %v14259_v37 = vadd.f32 %v10477_v19, %v4836_v13  ;;  %v14264_v17 = vpop.f32.mrf.mxu0 }
 0x256   : > { %v14262_v2 = vpop.f32.mrf.mxu1 }
 0x257   : > { %16502 = vst [vmem:[#allocation99_spill] sm:$0xff] %v14259_v37  ;;  %16503 = vst [vmem:[#allocation101_spill] sm:$0xff] %v14262_v2  ;;  %v10448_v60 = vpop.f32.mrf.mxu0 }
 0x258   : > { %v10480_v15 = vpop.f32.mrf.mxu1  ;;  %v4848_v39 = vadd.f32 %v10448_v60, %v14162_v47 }
 0x259   : > { %v14266_v59 = vadd.f32 %v10480_v15, %v4838_v1  ;;  %v14271_v20 = vpop.f32.mrf.mxu0 }
 0x25a   : > { %v14269_v27 = vpop.f32.mrf.mxu1  ;;  %16505 = vst [vmem:[#allocation36_spill] sm:$0xff] %v14271_v20 }
 0x25b   : > { %16504 = vst [vmem:[#allocation35_spill] sm:$0xff] %v14266_v59  ;;  %v10451_v5 = vpop.f32.mrf.mxu0 }
 0x25c   : > { %v10483_v53 = vpop.f32.mrf.mxu1  ;;  %v4850_v30 = vadd.f32 %v10451_v5, %v14178_v12 }
 0x25d   : > { %v14273_v13 = vadd.f32 %v10483_v53, %v4840_v31  ;;  %v14278_v22 = vpop.f32.mrf.mxu0 }
 0x25e   : > { %v14276_v19 = vpop.f32.mrf.mxu1  ;;  %16508 = vst [vmem:[#allocation41_spill] sm:$0xff] %v14278_v22 }
 0x25f   : > { %16506 = vst [vmem:[#allocation38_spill] sm:$0xff] %v14273_v13  ;;  %16507 = vst [vmem:[#allocation40_spill] sm:$0xff] %v14276_v19  ;;  %v10454_v2 = vpop.f32.mrf.mxu0 }
 0x260   : > { %v10486_v37 = vpop.f32.mrf.mxu1  ;;  %v4852_v47 = vadd.f32 %v10454_v2, %v14189_v61 }
 0x261   : > { %v14280_v1 = vadd.f32 %v10486_v37, %v4842_v34  ;;  %v14285_v15 = vpop.f32.mrf.mxu0 }
 0x262   : > { %v14283_v60 = vpop.f32.mrf.mxu1  ;;  %16510 = vst [vmem:[#allocation43_spill] sm:$0xff] %v14285_v15 }
 0x263   : > { %16509 = vst [vmem:[#allocation42_spill] sm:$0xff] %v14280_v1  ;;  %v10457_v20 = vpop.f32.mrf.mxu0 }
 0x264   : > { %v10489_v59 = vpop.f32.mrf.mxu1  ;;  %v4854_v53 = vadd.f32 %v10457_v20, %v14203_v40 }
 0x265   : > { %v5103_v31 = vadd.f32 %v10489_v59, %v4844_v26  ;;  %v14290_v5 = vpop.f32.mrf.mxu0 }
 0x266   : > { %v14288_v12 = vpop.f32.mrf.mxu1 }
 0x267   : > { %16511 = vst [vmem:[#allocation45_spill] sm:$0xff] %v14288_v12  ;;  %v10460_v19 = vpop.f32.mrf.mxu0 }
 0x268   : > { %v10492_v13 = vpop.f32.mrf.mxu1  ;;  %v4856_v34 = vadd.f32 %v10460_v19, %v14216_v9 }
 0x269   : > { %v14292_v22 = vadd.f32 %v10492_v13, %v4846_v57  ;;  %v14297_v61 = vpop.f32.mrf.mxu0 }
 0x26a   : > { %v14295_v2 = vpop.f32.mrf.mxu1 }
 0x26b   : > { %16512 = vst [vmem:[#allocation47_spill] sm:$0xff] %v14292_v22  ;;  %16513 = vst [vmem:[#allocation49_spill] sm:$0xff] %v14295_v2  ;;  %v10463_v1 = vpop.f32.mrf.mxu0 }
 0x26c   : > { %v10495_v37 = vpop.f32.mrf.mxu1  ;;  %v4858_v59 = vadd.f32 %v10463_v1, %v14226_v51 }
 0x26d   : > { %v14299_v15 = vadd.f32 %v10495_v37, %v4848_v39  ;;  %v14304_v26 = vpop.f32.mrf.mxu0  ;;  %v14314_v39 = vld [vmem:[%s15833_s9 + $0x8] sm:$0xf] }
 0x26e   : > { %v14302_v40 = vpop.f32.mrf.mxu1  ;;  %16516 = vst [vmem:[#allocation52_spill] sm:$0xff] %v14304_v26  ;;  %16518 = vst [vmem:[#allocation55_spill] sm:$0xff] %v14314_v39  ;;  %10760 = vmatprep.subr.msk.mxu0 %vm965_vm0, %v14314_v39 }
 0x26f   : > { %16514 = vst [vmem:[#allocation50_spill] sm:$0xff] %v14299_v15  ;;  %16515 = vst [vmem:[#allocation51_spill] sm:$0xff] %v14302_v40  ;;  %v10466_v12 = vpop.f32.mrf.mxu0 }
 0x270   : > { %v10498_v20 = vpop.f32.mrf.mxu1  ;;  %v4860_v13 = vadd.f32 %v10466_v12, %v14233_v18 }
 0x271   : > { %v5109_v57 = vadd.f32 %v10498_v20, %v4850_v30  ;;  %v14309_v19 = vpop.f32.mrf.mxu0 }
 0x272   : > { %v14307_v9 = vpop.f32.mrf.mxu1 }
 0x273   : > { %16517 = vst [vmem:[#allocation53_spill] sm:$0xff] %v14307_v9  ;;  %v10469_v51 = vpop.f32.mrf.mxu0 }
 0x274   : > { %v10501_v37 = vpop.f32.mrf.mxu1  ;;  %v4862_v30 = vadd.f32 %v10469_v51, %v14240_v21 }
 0x275   : > { %v14318_v1 = vadd.f32 %v10501_v37, %v4852_v47  ;;  %v14323_v18 = vpop.f32.mrf.mxu0 }
 0x276   : > { %v14321_v20 = vpop.f32.mrf.mxu1  ;;  %16521 = vst [vmem:[#allocation58_spill] sm:$0xff] %v14323_v18 }
 0x277   : > { %16519 = vst [vmem:[#allocation54_spill] sm:$0xff] %v14318_v1  ;;  %16520 = vst [vmem:[#allocation56_spill] sm:$0xff] %v14321_v20  ;;  %v10472_v15 = vpop.f32.mrf.mxu0 }
 0x278   : > { %v10504_v12 = vpop.f32.mrf.mxu1  ;;  %v4864_v9 = vadd.f32 %v10472_v15, %v14250_v58 }
 0x279   : > { %v14325_v22 = vadd.f32 %v10504_v12, %v4854_v53  ;;  %v14330_v2 = vpop.f32.mrf.mxu0 }
 0x27a   : > { %v14328_v40 = vpop.f32.mrf.mxu1 }
 0x27b   : > { %16522 = vst [vmem:[#allocation57_spill] sm:$0xff] %v14325_v22  ;;  %16523 = vst [vmem:[#allocation59_spill] sm:$0xff] %v14328_v40  ;;  %v14332_v26 = vpop.f32.mrf.mxu0 }
 0x27c   : > { %v10507_v39 = vpop.f32.mrf.mxu1  ;;  %16524 = vst [vmem:[#allocation60_spill] sm:$0xff] %v14332_v26 }
 0x27d   : > { %v5115_v47 = vadd.f32 %v10507_v39, %v4856_v34  ;;  %v14336_v21 = vpop.f32.mrf.mxu0 }
 0x27e   : > { %v14334_v37 = vpop.f32.mrf.mxu1  ;;  %16526 = vst [vmem:[#allocation62_spill] sm:$0xff] %v14336_v21 }
 0x27f   : > { %16525 = vst [vmem:[#allocation61_spill] sm:$0xff] %v14334_v37  ;;  %v14338_v1 = vpop.f32.mrf.mxu0 }
 0x280   : > { %v10510_v51 = vpop.f32.mrf.mxu1  ;;  %16527 = vst [vmem:[#allocation63_spill] sm:$0xff] %v14338_v1 }
 0x281   : > { %v5117_v20 = vadd.f32 %v10510_v51, %v4858_v59  ;;  %v14342_v12 = vpop.f32.mrf.mxu0 }
 0x282   : > { %v14340_v53 = vpop.f32.mrf.mxu1  ;;  %16529 = vst [vmem:[#allocation65_spill] sm:$0xff] %v14342_v12 }
 0x283   : > { %16528 = vst [vmem:[#allocation64_spill] sm:$0xff] %v14340_v53  ;;  %v14344_v15 = vpop.f32.mrf.mxu0 }
 0x284   : > { %v10513_v58 = vpop.f32.mrf.mxu1  ;;  %16530 = vst [vmem:[#allocation66_spill] sm:$0xff] %v14344_v15 }
 0x285   : > { %v5119_v22 = vadd.f32 %v10513_v58, %v4860_v13  ;;  %v14348_v26 = vpop.f32.mrf.mxu0 }
 0x286   : > { %v14346_v40 = vpop.f32.mrf.mxu1  ;;  %16531 = vst [vmem:[#allocation68_spill] sm:$0xff] %v14348_v26 }
 0x287   : > { %v14350_v39 = vpop.f32.mrf.mxu0 }
 0x288   : > { %v10516_v34 = vpop.f32.mrf.mxu1  ;;  %16532 = vst [vmem:[#allocation69_spill] sm:$0xff] %v14350_v39 }
 0x289   : > { %v5121_v21 = vadd.f32 %v10516_v34, %v4862_v30  ;;  %v14354_v1 = vpop.f32.mrf.mxu0  ;;  %v14369_v30 = vld [vmem:[%s15833_s9 + $0xc] sm:$0xf] }
 0x28a   : > { %v14352_v37 = vpop.f32.mrf.mxu1  ;;  %16534 = vst [vmem:[#allocation71_spill] sm:$0xff] %v14354_v1  ;;  %16539 = vst [vmem:[#allocation76_spill] sm:$0xff] %v14369_v30  ;;  %10786 = vmatprep.subr.msk.mxu1 %vm965_vm0, %v14369_v30 }
 0x28b   : > { %16533 = vst [vmem:[#allocation70_spill] sm:$0xff] %v14352_v37  ;;  %v10536_v51 = vpop.f32.mrf.mxu0 }
 0x28c   : > { %v10519_v59 = vpop.f32.mrf.mxu1  ;;  %v5375_v12 = vadd.f32 %v10536_v51, %v5103_v31 }
 0x28d   : > { %v14356_v53 = vadd.f32 %v10519_v59, %v4864_v9  ;;  %v14358_v15 = vpop.f32.mrf.mxu0 }
 0x28e   : > { %v5085_v18 = vpop.f32.mrf.mxu1  ;;  %16535 = vst [vmem:[#allocation72_spill] sm:$0xff] %v14358_v15 }
 0x28f   : > { %v14362_v58 = vpop.f32.mrf.mxu0 }
 0x290   : > { %v14360_v13 = vpop.f32.mrf.mxu1  ;;  %16537 = vst [vmem:[#allocation74_spill] sm:$0xff] %v14362_v58 }
 0x291   : > { %16536 = vst [vmem:[#allocation73_spill] sm:$0xff] %v14360_v13  ;;  %v14371_v34 = vpop.f32.mrf.mxu0 }
 0x292   : > { %v14364_v26 = vpop.f32.mrf.mxu1  ;;  %16540 = vst [vmem:[#allocation77_spill] sm:$0xff] %v14371_v34 }
 0x293   : > { %16538 = vst [vmem:[#allocation75_spill] sm:$0xff] %v14364_v26  ;;  %v14377_v9 = vpop.f32.mrf.mxu0 }
 0x294   : > { %v14375_v31 = vpop.f32.mrf.mxu1  ;;  %16542 = vst [vmem:[#allocation79_spill] sm:$0xff] %v14377_v9 }
 0x295   : > { %16541 = vst [vmem:[#allocation78_spill] sm:$0xff] %v14375_v31  ;;  %v14381_v51 = vpop.f32.mrf.mxu0 }
 0x296   : > { %v14379_v59 = vpop.f32.mrf.mxu1  ;;  %16544 = vst [vmem:[#allocation80_spill] sm:$0xff] %v14381_v51 }
 0x297   : > { %16543 = vst [vmem:[#allocation29_spill] sm:$0xff] %v14379_v59  ;;  %v10545_v26 = vpop.f32.mrf.mxu0 }
 0x298   : > { %v14383_v13 = vpop.f32.mrf.mxu1  ;;  %v5381_v58 = vadd.f32 %v10545_v26, %v5109_v57 }
 0x299   : > { %16545 = vst [vmem:[#allocation31_spill] sm:$0xff] %v14383_v13  ;;  %v14387_v1 = vpop.f32.mrf.mxu0 }
 0x29a   : > { %v14385_v15 = vpop.f32.mrf.mxu1  ;;  %16547 = vst [vmem:[#allocation34_spill] sm:$0xff] %v14387_v1 }
 0x29b   : > { %16546 = vst [vmem:[#allocation81_spill] sm:$0xff] %v14385_v15  ;;  %v14391_v39 = vpop.f32.mrf.mxu0 }
 0x29c   : > { %v14389_v34 = vpop.f32.mrf.mxu1  ;;  %16549 = vst [vmem:[#allocation27_spill] sm:$0xff] %v14391_v39 }
 0x29d   : > { %16548 = vst [vmem:[#allocation22_spill] sm:$0xff] %v14389_v34  ;;  %v14395_v31 = vpop.f32.mrf.mxu0 }
 0x29e   : > { %v14393_v30 = vpop.f32.mrf.mxu1  ;;  %16551 = vst [vmem:[#allocation6_spill] sm:$0xff] %v14395_v31 }
 0x29f   : > { %16550 = vst [vmem:[#allocation82_spill] sm:$0xff] %v14393_v30  ;;  %v14397_v59 = vpop.f32.mrf.mxu0 }
 0x2a0   : > { %v10583_v9 = vpop.f32.mrf.mxu1  ;;  %16552 = vst [vmem:[#allocation16_spill] sm:$0xff] %v14397_v59 }
 0x2a1   : > { %v14399_v51 = vadd.f32 %v10583_v9, %v5375_v12  ;;  %v14403_v26 = vpop.f32.mrf.mxu0 }
 0x2a2   : > { %v14401_v13 = vpop.f32.mrf.mxu1 }
 0x2a3   : > { %16553 = vst [vmem:[#allocation7_spill] sm:$0xff] %v14399_v51  ;;  %16554 = vst [vmem:[#allocation32_spill] sm:$0xff] %v14401_v13  ;;  %v10554_v15 = vpop.f32.mrf.mxu0 }
 0x2a4   : > { %v14405_v57 = vpop.f32.mrf.mxu1  ;;  %v5387_v1 = vadd.f32 %v10554_v15, %v5115_v47 }
 0x2a5   : > { %16555 = vst [vmem:[#allocation18_spill] sm:$0xff] %v14405_v57  ;;  %v14409_v39 = vpop.f32.mrf.mxu0 }
 0x2a6   : > { %v14407_v34 = vpop.f32.mrf.mxu1 }
 0x2a7   : > { %16556 = vst [vmem:[#allocation83_spill] sm:$0xff] %v14407_v34  ;;  %v10557_v31 = vpop.f32.mrf.mxu0 }
 0x2a8   : > { %v14411_v30 = vpop.f32.mrf.mxu1  ;;  %v14413_v37 = vadd.f32 %v10557_v31, %v5117_v20 }
 0x2a9   : > { %16557 = vst [vmem:[#allocation84_spill] sm:$0xff] %v14411_v30  ;;  %v14417_v12 = vpop.f32.mrf.mxu0  ;;  %v4348_v30 = vadd.f32 %v14213_v8, %v14062_v42  ;;  %v4332_v8 = vadd.f32 %v14090_v35, %v13916_v32 }
 0x2aa   : > { %v14415_v59 = vpop.f32.mrf.mxu1  ;;  %16559 = vst [vmem:[#allocation44_spill] sm:$0xff] %v14417_v12 }
 0x2ab   : > { %16558 = vst [vmem:[#allocation85_spill] sm:$0xff] %v14415_v59  ;;  %v10560_v51 = vpop.f32.mrf.mxu0  ;;  %v4604_v31 = vadd.f32 %v14254_v6, %v4348_v30  ;;  %v4334_v6 = vadd.f32 %v14105_v28, %v13937_v48  ;;  %v4340_v48 = vadd.f32 %v14157_v24, %v13999_v33  ;;  %v4588_v35 = vadd.f32 %v14167_v46, %v4332_v8 }
 0x2ac   : > { %v10592_v9 = vpop.f32.mrf.mxu1  ;;  %v14421_v57 = vadd.f32 %v10560_v51, %v5119_v22  ;;  %v4328_v22 = vadd.f32 %v14060_v63, %v13877_v55  ;;  %v4330_v51 = vadd.f32 %v14075_v14, %v13897_v11  ;;  %v4338_v11 = vadd.f32 %v14142_v49, %v13984_v41 }
 0x2ad   : > { %v14419_v13 = vadd.f32 %v10592_v9, %v5381_v58  ;;  %v14425_v15 = vpop.f32.mrf.mxu0  ;;  %v4863_v9 = vadd.f32 %v14330_v2, %v4604_v31  ;;  %v4344_v41 = vadd.f32 %v14185_v29, %v14030_v62  ;;  %v4346_v33 = vadd.f32 %v14199_v45, %v14046_v44  ;;  %v16561_v45 = vld [vmem:[#allocation20_spill] sm:$0xff]  ;;  %v16564_v31 = vld [vmem:[#allocation106_spill] sm:$0xff] }
 0x2ae   : > { %v14423_v47 = vpop.f32.mrf.mxu1  ;;  %v4584_v55 = vadd.f32 %v14139_v4, %v4328_v22  ;;  %v4586_v14 = vadd.f32 %v14155_v7, %v4330_v51  ;;  %v4590_v4 = vadd.f32 %v14183_v43, %v4334_v6  ;;  %v4596_v24 = vadd.f32 %v14221_v36, %v4340_v48 }
 0x2af   : > { %v10563_v20 = vpop.f32.mrf.mxu0  ;;  %v5122_v2 = vadd.f32 %v5085_v18, %v4863_v9  ;;  %v4837_v43 = vadd.f32 %v14231_v23, %v14092_v25  ;;  %v16567_v23 = vld [vmem:[#allocation101_spill] sm:$0xff] }
 0x2b0   : > { %v14429_v34 = vpop.f32.mrf.mxu1  ;;  %v14432_v59 = vadd.f32 %v10563_v20, %v5121_v21  ;;  %v4336_v21 = vadd.f32 %v14122_v10, %v13963_v0  ;;  %v4342_v0 = vadd.f32 %v14172_v56, %v14014_v3  ;;  %v6245_v10 = vlaneseq  ;;  %v16563_v20 = vld [vmem:[#allocation39_spill] sm:$0xff] }
 0x2b1   : > { %v14438_v58 = vpop.f32.mrf.mxu0  ;;  %v4594_v3 = vadd.f32 %v14210_v16, %v4338_v11  ;;  %v4835_v56 = vadd.f32 %v14223_v52, %v14077_v50  ;;  %v16562_v16 = vld [vmem:[#allocation25_spill] sm:$0xff]  ;;  %v4841_v22 = vadd.f32 %v16564_v31, %v16563_v20  ;;  %v16566_v52 = vld [vmem:[#allocation107_spill] sm:$0xff] }
 0x2b2   : > { %v14434_v12 = vpop.f32.mrf.mxu1  ;;  %v4592_v49 = vadd.f32 %v14196_v38, %v4336_v21  ;;  %v4598_v29 = vadd.f32 %v14229_v54, %v4342_v0  ;;  %v16560_v38 = vld [vmem:[#allocation21_spill] sm:$0xff]  ;;  %v4839_v36 = vadd.f32 %v16562_v16, %v16561_v45  ;;  %v14498_v50 = vshrl.u32 %v6245_v10, 7 }
 0x2b3   : > { %v10566_v63 = vpop.f32.mrf.mxu0  ;;  %v4843_v25 = vadd.f32 %v16566_v52, %v4584_v55  ;;  %v4845_v54 = vadd.f32 %v14264_v17, %v4586_v14  ;;  %v5094_v8 = vadd.f32 %v16567_v23, %v4835_v56  ;;  %v6259_v21 = vstv %s14473_s24  ;;  %v16569_v10 = vld [vmem:[#allocation41_spill] sm:$0xff]  ;;  %v16570_v14 = vld [vmem:[#allocation40_spill] sm:$0xff]  ;;  %s8397_s24 = sshll.u32 %s16759_s26, 1 }
 0x2b4   : > { %v14443_v42 = vpop.f32.mrf.mxu1  ;;  %v14456_v30 = vadd.f32 %v10566_v63, %v14356_v53  ;;  %v4600_v53 = vadd.f32 %v16560_v38, %v4344_v41  ;;  %v5096_v63 = vadd.f32 %v14269_v27, %v4837_v43  ;;  %v14512_v0 = vadd.s32 16, %v14498_v50  ;;  %v16571_v27 = vld [vmem:[#allocation43_spill] sm:$0xff]  ;;  %v16572_v43 = vld [vmem:[#allocation45_spill] sm:$0xff] }
 0x2b5   : > { %v5357_v28 = vpop.f32.mrf.mxu0  ;;  %v4849_v17 = vadd.f32 %v16569_v10, %v4590_v4  ;;  %v5098_v41 = vadd.f32 %v16570_v14, %v4839_v36  ;;  %v4853_v56 = vadd.f32 %v14290_v5, %v4594_v3  ;;  %v16573_v4 = vld [vmem:[#allocation52_spill] sm:$0xff]  ;;  %v16574_v16 = vld [vmem:[#allocation49_spill] sm:$0xff]  ;;  %v16584_v10 = vld [vmem:[#allocation35_spill] sm:$0xff]  ;;  %vm14579_vm4 = vcmp.eq.s32.totalorder %v6259_v21, 1 }
 0x2b6   : > { %v14458_v32 = vpop.f32.mrf.mxu1  ;;  %v14469_v7 = vadd.f32 %v5357_v28, %v5122_v2  ;;  %v4859_v11 = vadd.f32 %v14309_v19, %v4600_v53  ;;  %v16568_v28 = vld [vmem:[#allocation36_spill] sm:$0xff]  ;;  %v4851_v19 = vadd.f32 %v16571_v27, %v4592_v49  ;;  %v4857_v45 = vadd.f32 %v16573_v4, %v4598_v29  ;;  %v16589_v4 = vld [vmem:[#allocation38_spill] sm:$0xff] }
 0x2b7   : > { %v14479_v46 = vpop.f32.mrf.mxu0  ;;  %v4847_v55 = vadd.f32 %v16568_v28, %v4588_v35  ;;  %v4855_v35 = vadd.f32 %v14297_v61, %v4596_v24  ;;  %v5104_v36 = vadd.f32 %v16574_v16, %v4845_v54  ;;  %v16579_v24 = vld [vmem:[#allocation99_spill] sm:$0xff]  ;;  %v16580_v29 = vld [vmem:[#allocation60_spill] sm:$0xff]  ;;  %vm6249_vm5 = vcmp.eq.s32.totalorder %v14498_v50, 3  ;;  %v16614_v21 = vld [vmem:[#allocation22_spill] sm:$0xff] }
 0x2b8   : > { %v10601_v18 = vpop.f32.mrf.mxu1  ;;  %v5118_v38 = vadd.f32 %v14346_v40, %v4859_v11  ;;  %v5367_v23 = vadd.f32 %v16580_v29, %v16579_v24  ;;  %v16581_v54 = vld [vmem:[#allocation59_spill] sm:$0xff]  ;;  %v16582_v11 = vld [vmem:[#allocation61_spill] sm:$0xff]  ;;  %vm6254_vm6 = vcmp.eq.s32.totalorder %v14512_v0, 20  ;;  %vm6261_vm7 = vmor %vm6249_vm5, %vm14579_vm4 }
 0x2b9   : > { %v14481_v62 = vadd.f32 %v10601_v18, %v5387_v1  ;;  %v16565_v1 = vld [vmem:[#allocation9_spill] sm:$0xff]  ;;  %v14496_v9 = vpop.f32.mrf.mxu0  ;;  %v5100_v18 = vadd.f32 %v14283_v60, %v4841_v22  ;;  %v16575_v60 = vld [vmem:[#allocation51_spill] sm:$0xff]  ;;  %v16576_v22 = vld [vmem:[#allocation58_spill] sm:$0xff]  ;;  %v5114_v28 = vadd.f32 %v16582_v11, %v4855_v35 }
 0x2ba   : > { %v14489_v44 = vpop.f32.mrf.mxu1  ;;  %v4602_v51 = vadd.f32 %v16565_v1, %v4346_v33  ;;  %v5106_v20 = vadd.f32 %v16575_v60, %v4847_v55  ;;  %v16577_v1 = vld [vmem:[#allocation53_spill] sm:$0xff]  ;;  %v5390_v3 = vadd.f32 %v14425_v15, %v5118_v38  ;;  %v16590_v35 = vld [vmem:[#allocation66_spill] sm:$0xff]  ;;  %v16591_v60 = vld [vmem:[#allocation64_spill] sm:$0xff] }
 0x2bb   : > { %v14506_v2 = vpop.f32.mrf.mxu0  ;;  %v5108_v5 = vadd.f32 %v16577_v1, %v4849_v17  ;;  %v16585_v17 = vld [vmem:[#allocation63_spill] sm:$0xff]  ;;  %v16588_v38 = vld [vmem:[#allocation65_spill] sm:$0xff]  ;;  %v5371_v16 = vadd.f32 %v16590_v35, %v16589_v4  ;;  %vm6263_vm9 = vmor %vm6254_vm6, %vm14579_vm4 }
 0x2bc   : > { %v10604_v6 = vpop.f32.mrf.mxu1  ;;  %v4861_v49 = vadd.f32 %v16576_v22, %v4602_v51  ;;  %v16583_v51 = vld [vmem:[#allocation62_spill] sm:$0xff]  ;;  %v5369_v14 = vadd.f32 %v16585_v17, %v16584_v10  ;;  %v16592_v22 = vld [vmem:[#allocation68_spill] sm:$0xff]  ;;  %v16594_v24 = vld [vmem:[#allocation69_spill] sm:$0xff] }
 0x2bd   : > { %v14509_v48 = vadd.f32 %v10604_v6, %v14413_v37  ;;  %v5102_v37 = vadd.f32 %v16572_v43, %v4843_v25  ;;  %v14524_v53 = vpop.f32.mrf.mxu0  ;;  %v16578_v25 = vld [vmem:[#allocation56_spill] sm:$0xff]  ;;  %v5112_v6 = vadd.f32 %v16581_v54, %v4853_v56  ;;  %v5366_v15 = vadd.f32 %v16583_v51, %v5094_v8  ;;  %v16595_v54 = vld [vmem:[#allocation71_spill] sm:$0xff]  ;;  %v16599_v17 = vld [vmem:[#allocation74_spill] sm:$0xff] }
 0x2be   : > { %v14518_v33 = vpop.f32.mrf.mxu1  ;;  %v5110_v61 = vadd.f32 %v16578_v25, %v4851_v19  ;;  %v5368_v56 = vadd.f32 %v16588_v38, %v5096_v63  ;;  %v5370_v1 = vadd.f32 %v16592_v22, %v5098_v41  ;;  %v16593_v25 = vld [vmem:[#allocation42_spill] sm:$0xff]  ;;  %v16597_v63 = vld [vmem:[#allocation72_spill] sm:$0xff]  ;;  %v16598_v10 = vld [vmem:[#allocation47_spill] sm:$0xff] }
 0x2bf   : > { %v14533_v52 = vpop.f32.mrf.mxu0  ;;  %v5373_v29 = vadd.f32 %v16594_v24, %v16593_v25  ;;  %v16601_v35 = vld [vmem:[#allocation77_spill] sm:$0xff]  ;;  %v16602_v22 = vld [vmem:[#allocation75_spill] sm:$0xff]  ;;  %v16603_v25 = vld [vmem:[#allocation78_spill] sm:$0xff] }
 0x2c0   : > { %v10607_v31 = vpop.f32.mrf.mxu1 }
 0x2c1   : > { %v14536_v40 = vadd.f32 %v10607_v31, %v14421_v57  ;;  %v16586_v57 = vld [vmem:[#allocation70_spill] sm:$0xff]  ;;  %v14551_v43 = vpop.f32.mrf.mxu0  ;;  %v5116_v31 = vadd.f32 %v16591_v60, %v4857_v45  ;;  %v5377_v45 = vadd.f32 %v16599_v17, %v16598_v10  ;;  %v5376_v60 = vadd.f32 %v16601_v35, %v5104_v36  ;;  %v16610_v10 = vld [vmem:[#allocation29_spill] sm:$0xff]  ;;  %v16611_v17 = vld [vmem:[#allocation31_spill] sm:$0xff] }
 0x2c2   : > { %v5593_v55 = vpop.f32.mrf.mxu1  ;;  %v5120_v27 = vadd.f32 %v16586_v57, %v4861_v49  ;;  %v5372_v49 = vadd.f32 %v16595_v54, %v5100_v18  ;;  %v16600_v57 = vld [vmem:[#allocation73_spill] sm:$0xff]  ;;  %v5622_v18 = vadd.f32 %v16602_v22, %v5366_v15  ;;  %v16609_v54 = vld [vmem:[#allocation80_spill] sm:$0xff]  ;;  %v5624_v36 = vadd.f32 %v16610_v10, %v5368_v56 }
 0x2c3   : > { %v14553_v19 = vadd.f32 %v5593_v55, %v5390_v3  ;;  %v14564_v51 = vpop.f32.mrf.mxu0  ;;  %v5374_v55 = vadd.f32 %v16597_v63, %v5102_v37  ;;  %v5623_v41 = vadd.f32 %v16600_v57, %v5367_v23  ;;  %v16607_v37 = vld [vmem:[#allocation50_spill] sm:$0xff]  ;;  %v5378_v63 = vadd.f32 %v16609_v54, %v5106_v20  ;;  %v16618_v54 = vld [vmem:[#allocation57_spill] sm:$0xff]  ;;  %v16619_v56 = vld [vmem:[#allocation16_spill] sm:$0xff] }
 0x2c4   : > { %v10610_v8 = vpop.f32.mrf.mxu1  ;;  %v5392_v11 = vadd.f32 %v14438_v58, %v5120_v27  ;;  %v5625_v58 = vadd.f32 %v16603_v25, %v5369_v14  ;;  %v5627_v15 = vadd.f32 %v16611_v17, %v5371_v16  ;;  %v16612_v14 = vld [vmem:[#allocation34_spill] sm:$0xff]  ;;  %v5629_v22 = vadd.f32 %v16614_v21, %v5373_v29 }
 0x2c5   : > { %16587 = vst [vmem:[#allocation86_spill] sm:$0xff] %v14553_v19  ;;  %v14567_v3 = vadd.f32 %v10610_v8, %v14432_v59  ;;  %v5773_v27 = vpop.f32.mrf.mxu0  ;;  %v16608_v8 = vld [vmem:[#allocation79_spill] sm:$0xff]  ;;  %v5380_v35 = vadd.f32 %v16612_v14, %v5108_v5  ;;  %v5385_v10 = vadd.f32 %v16619_v56, %v16618_v54  ;;  %v16620_v16 = vld [vmem:[#allocation82_spill] sm:$0xff]  ;;  %v5384_v5 = vadd.f32 %v14403_v26, %v5112_v6 }
 0x2c6   : > { %v5603_v38 = vpop.f32.mrf.mxu1  ;;  %v5379_v23 = vadd.f32 %v16608_v8, %v16607_v37  ;;  %v16617_v8 = vld [vmem:[#allocation6_spill] sm:$0xff]  ;;  %v5628_v17 = vadd.f32 %v16620_v16, %v5372_v49  ;;  %v5893_v29 = vadd.f32 %v14479_v46, %v5623_v41  ;;  %v16624_v49 = vld [vmem:[#allocation84_spill] sm:$0xff]  ;;  %v14615_v26 = vld [vmem:[%s15832_s8] ss:$0 sm:$0xff]  ;;  %v5899_v16 = vadd.f32 %v14564_v51, %v5629_v22 }
 0x2c7   : > { %16596 = vst [vmem:[#allocation8_spill] sm:$0xff] %v14567_v3  ;;  %v14577_v24 = vadd.f32 %v5603_v38, %v5392_v11  ;;  %v16613_v11 = vld [vmem:[#allocation81_spill] sm:$0xff]  ;;  %v10630_v25 = vpop.f32.mrf.mxu0  ;;  %v16616_v3 = vld [vmem:[#allocation27_spill] sm:$0xff]  ;;  %v5382_v20 = vadd.f32 %v16617_v8, %v5110_v61  ;;  %v5386_v61 = vadd.f32 %v14409_v39, %v5114_v28  ;;  %v16625_v46 = vld [vmem:[#allocation44_spill] sm:$0xff]  ;;  %v14621_v28 = vadd.f32 %v14423_v47, %v5380_v35 }
 0x2c8   : > { %v10613_v57 = vpop.f32.mrf.mxu1  ;;  %v5626_v38 = vadd.f32 %v16613_v11, %v5370_v1  ;;  %v16621_v1 = vld [vmem:[#allocation32_spill] sm:$0xff]  ;;  %v5635_v8 = vadd.f32 %v16624_v49, %v5379_v23  ;;  %v5388_v6 = vadd.f32 %v16625_v46, %v5116_v31  ;;  %v14630_v23 = vadd.f32 %v14443_v42, %v5385_v10 }
 0x2c9   : > { %16604 = vst [vmem:[#allocation26_spill] sm:$0xff] %v14577_v24  ;;  %v14593_v4 = vadd.f32 %v10613_v57, %v14456_v30  ;;  %v16615_v24 = vld [vmem:[#allocation54_spill] sm:$0xff]  ;;  %v5630_v14 = vadd.f32 %v16621_v1, %v5374_v55  ;;  %v5783_v11 = vpop.f32.mrf.mxu0  ;;  %v16623_v57 = vld [vmem:[#allocation83_spill] sm:$0xff]  ;;  %v5892_v55 = vadd.f32 %v14496_v9, %v5622_v18  ;;  %v14633_v31 = vadd.f32 %v14458_v32, %v5384_v5 }
 0x2ca   : > { %v5383_v37 = vadd.f32 %v16616_v3, %v16615_v24  ;;  %v5613_v19 = vpop.f32.mrf.mxu1  ;;  %v16622_v3 = vld [vmem:[#allocation18_spill] sm:$0xff]  ;;  %v5632_v21 = vadd.f32 %v16623_v57, %v5376_v60  ;;  %v14627_v60 = vadd.f32 %v14434_v12, %v5382_v20  ;;  %v5895_v9 = vadd.f32 %v14506_v2, %v5625_v58 }
 0x2cb   : > { %v14605_v30 = vadd.f32 %v5613_v19, %v14469_v7  ;;  %v5633_v24 = vadd.f32 %v16622_v3, %v5377_v45  ;;  %v16626_v7 = vld [vmem:[#allocation85_spill] sm:$0xff]  ;;  %v10633_v41 = vpop.f32.mrf.mxu0  ;;  %v14638_v35 = vadd.f32 %v14489_v44, %v5386_v61  ;;  %v5897_v12 = vadd.f32 %v14533_v52, %v5627_v15  ;;  %v16627_v44 = vld [vmem:[#allocation7_spill] sm:$0xff] }
 0x2cc   : > { %v10665_v54 = vpop.f32.mrf.mxu1  ;;  %v5634_v19 = vadd.f32 %v16626_v7, %v5378_v63  ;;  %v14624_v45 = vadd.f32 %v14429_v34, %v5383_v37  ;;  %v5894_v34 = vadd.f32 %v14524_v53, %v5624_v36  ;;  %v14643_v42 = vadd.f32 %v14518_v33, %v5388_v6 }
 0x2cd   : > { %v6149_v39 = vadd.f32 %v10665_v54, %v5893_v29  ;;  %v5793_v18 = vpop.f32.mrf.mxu0  ;;  %v5896_v32 = vadd.f32 %v14551_v43, %v5626_v38  ;;  %v14648_v5 = vadd.f32 %v5773_v27, %v5628_v17  ;;  %v14651_v1 = vadd.f32 %v10630_v25, %v16627_v44 }
 0x2ce   : > { %v5999_v56 = vpop.f32.mrf.mxu1  ;;  %v14653_v53 = vadd.f32 %v5783_v11, %v5630_v14  ;;  %v14664_v15 = vadd.f32 %v10633_v41, %v5633_v24  ;;  %v14666_v38 = vadd.f32 %v5793_v18, %v5632_v21 }
 0x2cf   : > { %v6186_v63 = vadd.f32 %v14615_v26, %v6149_v39  ;;  %v6148_v47 = vadd.f32 %v5999_v56, %v5892_v55  ;;  %v10636_v20 = vpop.f32.mrf.mxu0 }
 0x2d0   : > { %v10668_v37 = vpop.f32.mrf.mxu1  ;;  %v14668_v22 = vadd.f32 %v10636_v20, %v5635_v8 }
 0x2d1   : > { %v6216_v10 = vmax.f32 %v6186_v63, 0.0  ;;  %v6185_v2 = vadd.f32 %v14615_v26, %v6148_v47  ;;  %v6151_v58 = vadd.f32 %v10668_v37, %v5895_v9  ;;  %v5803_v43 = vpop.f32.mrf.mxu0 }
 0x2d2   : > { %v6009_v33 = vpop.f32.mrf.mxu1  ;;  %v14676_v24 = vadd.f32 %v5803_v43, %v5634_v19 }
 0x2d3   : > { %v14661_v52 = vsel %vm14579_vm4, 0.0, %v6216_v10  ;;  %v6215_v36 = vmax.f32 %v6185_v2, 0.0  ;;  %v6188_v51 = vadd.f32 %v14615_v26, %v6151_v58  ;;  %v6150_v27 = vadd.f32 %v6009_v33, %v5894_v34  ;;  %v10639_v29 = vpop.f32.mrf.mxu0 }
 0x2d4   : > { %v6353_v25 = vrot.slane %v14661_v52, 3  ;;  %v10671_v17 = vpop.f32.mrf.mxu1  ;;  %v6394_v57 = vrot.slane %v14661_v52, 4  ;;  %v16086_v49 = vrot.slane %v14661_v52, 5  ;;  %v14691_v39 = vadd.f32 %v10639_v29, %v14419_v13 }
 0x2d5   : > { %v14671_v14 = vsel %vm6261_vm7, 0.0, %v6215_v36  ;;  %v6218_v11 = vmax.f32 %v6188_v51, 0.0  ;;  %v6187_v61 = vadd.f32 %v14615_v26, %v6150_v27  ;;  %v6153_v3 = vadd.f32 %v10671_v17, %v5897_v12  ;;  %v5813_v46 = vpop.f32.mrf.mxu0 }
 0x2d6   : > { %v6393_v21 = vrot.slane %v14671_v14, 4  ;;  %v6019_v8 = vpop.f32.mrf.mxu1  ;;  %v6352_v19 = vrot.slane %v14671_v14, 3  ;;  %v6796_v41 = vrot.slane %v14671_v14, 5  ;;  %v16635_v14 = vld [vmem:[#allocation8_spill] sm:$0xff] }
 0x2d7   : > { %v14685_v54 = vsel %vm6249_vm5, 0.0, %v6218_v11  ;;  %v6217_v6 = vmax.f32 %v6187_v61, 0.0  ;;  %v6190_v7 = vadd.f32 %v14615_v26, %v6153_v3  ;;  %v6152_v55 = vadd.f32 %v6019_v8, %v5896_v32  ;;  %v10642_v18 = vpop.f32.mrf.mxu0 }
 0x2d8   : > { %v6357_v59 = vrot.slane %v14685_v54, 3  ;;  %v10674_v56 = vpop.f32.mrf.mxu1  ;;  %v6398_v12 = vrot.slane %v14685_v54, 4  ;;  %v14700_v32 = vadd.f32 %v5813_v46, %v14621_v28  ;;  %v6395_v44 = vsel %vm965_vm0, %v6393_v21, %v6394_v57 }
 0x2d9   : > { %v14694_v9 = vsel %vm6263_vm9, 0.0, %v6217_v6  ;;  %v6220_v63 = vmax.f32 %v6190_v7, 0.0  ;;  %v6189_v47 = vadd.f32 %v14615_v26, %v6152_v55  ;;  %v6155_v34 = vadd.f32 %v10674_v56, %v5899_v16  ;;  %v5823_v2 = vpop.f32.mrf.mxu0  ;;  %10710 = vmatprep.mubr.msk.f32.mxu0 %vm874_vm1, %v6395_v44 }
 0x2da   : > { %v6396_v13 = vrot.slane %v14694_v9, 4  ;;  %v6029_v20 = vpop.f32.mrf.mxu1  ;;  %v6355_v33 = vrot.slane %v14694_v9, 3  ;;  %v14714_v28 = vadd.f32 %v10642_v18, %v14624_v45  ;;  %v6354_v45 = vsel %vm6351_vm8, %v6352_v19, %v6353_v25 }
 0x2db   : > { %v14705_v10 = vsel %vm6254_vm6, 0.0, %v6220_v63  ;;  %v14707_v58 = vmax.f32 %v6189_v47, 0.0  ;;  %v6192_v16 = vadd.f32 %v14615_v26, %v6155_v34  ;;  %v10645_v11 = vpop.f32.mrf.mxu0  ;;  %v6154_v21 = vadd.f32 %v6029_v20, %v14648_v5  ;;  %10736 = vmatprep.mubr.msk.f32.mxu1 %vm874_vm1, %v6354_v45 }
 0x2dc   : > { %v6360_v36 = vrot.slane %v14705_v10, 3  ;;  %v10677_v51 = vpop.f32.mrf.mxu1  ;;  %v6401_v27 = vrot.slane %v14705_v10, 4  ;;  %v14730_v6 = vadd.f32 %v5823_v2, %v14627_v60  ;;  %v14734_v55 = vadd.f32 %v10645_v11, %v14630_v23  ;;  %v16630_v11 = vld [vmem:[#allocation55_spill] sm:$0xff] }
 0x2dd   : > { %v6358_v17 = vrot.slane %v14707_v58, 3  ;;  %v6399_v29 = vrot.slane %v14707_v58, 4  ;;  %v14721_v61 = vmax.f32 %v6192_v16, 0.0  ;;  %v6157_v8 = vadd.f32 %v10677_v51, %v14651_v1  ;;  %v5833_v56 = vpop.f32.mrf.mxu0 }
 0x2de   : > { %v6039_v46 = vpop.f32.mrf.mxu1  ;;  %v6397_v18 = vsel %vm965_vm0, %v6394_v57, %v6396_v13  ;;  %v6191_v5 = vadd.f32 %v14615_v26, %v6154_v21  ;;  %v6356_v60 = vsel %vm6351_vm8, %v6353_v25, %v6355_v33  ;;  %v14765_v25 = vld [vmem:[%s15833_s9 + $0x10] sm:$0xf]  ;;  %v16631_v21 = vld [vmem:[#allocation76_spill] sm:$0xff] }
 0x2df   : > { %v6363_v19 = vrot.slane %v14721_v61, 3  ;;  %v6194_v1 = vadd.f32 %v14615_v26, %v6157_v8  ;;  %10711 = vmatmul.mubr.msk.f32.vlgmr.msra.gmra.mxu0 %vm874_vm1, %v6397_v18  ;;  %v10648_v23 = vpop.f32.mrf.mxu0  ;;  %10737 = vmatmul.mubr.msk.f32.vlgmr.msra.gmra.mxu1 %vm874_vm1, %v6356_v60  ;;  %v6156_v47 = vadd.f32 %v6039_v46, %v14653_v53  ;;  %v14749_v34 = vsel %vm965_vm0, %v6398_v12, %v6399_v29 }
 0x2e0   : > { %v10680_v63 = vpop.f32.mrf.mxu1  ;;  %16628 = vst [vmem:[#allocation11_spill] sm:$0xff] %v14749_v34  ;;  %v14752_v13 = vsel %vm6351_vm8, %v6357_v59, %v6358_v17  ;;  %v6404_v20 = vrot.slane %v14721_v61, 4  ;;  %v6221_v2 = vmax.f32 %v6191_v5, 0.0  ;;  %10713 = vmatprep.mubr.msk.f32.mxu0 %vm874_vm1, %v14749_v34  ;;  %v14760_v53 = vsel %vm965_vm0, %v6399_v29, %v6401_v27  ;;  %10761 = vmatpush3.msk.msra.mxu0 %vm965_vm0, %v16630_v11  ;;  %v14778_v27 = vld [vmem:[%s15833_s9 + $0x14] sm:$0xf] }
 0x2e1   : > { %v6159_v57 = vadd.f32 %v10680_v63, %v14664_v15  ;;  %v6224_v16 = vmax.f32 %v6194_v1, 0.0  ;;  %10739 = vmatprep.mubr.msk.f32.mxu1 %vm874_vm1, %v14752_v13  ;;  %16629 = vst [vmem:[#allocation13_spill] sm:$0xff] %v14760_v53  ;;  %v5843_v59 = vpop.f32.mrf.mxu0  ;;  %v6193_v12 = vadd.f32 %v14615_v26, %v6156_v47  ;;  %v14770_v33 = vsel %vm6351_vm8, %v6358_v17, %v6360_v36 }
 0x2e2   : > { %v6049_v15 = vpop.f32.mrf.mxu1  ;;  %v14783_v45 = vsel %vm6249_vm5, 0.0, %v6221_v2  ;;  %v14796_v17 = vsel %vm6795_vm10, %v6796_v41, %v16086_v49  ;;  %10787 = vmatpush3.msk.msra.mxu1 %vm965_vm0, %v16631_v21  ;;  %v14801_v8 = vadd.f32 %v5833_v56, %v14633_v31  ;;  %v14806_v5 = vadd.f32 %v10648_v23, %v14481_v62  ;;  %10812 = vmatprep.subr.msk.mxu0 %vm965_vm0, %v14765_v25  ;;  %v16638_v49 = vld [vmem:[#allocation26_spill] sm:$0xff] }
 0x2e3   : > { %v6196_v44 = vadd.f32 %v14615_v26, %v6159_v57  ;;  %v6158_v51 = vadd.f32 %v6049_v15, %v14666_v38  ;;  %v14787_v36 = vsel %vm6249_vm5, 0.0, %v6224_v16  ;;  %10714 = vmatmul.mubr.msk.f32.gmra.mxu0 %vm874_vm1, %v14760_v53  ;;  %v6362_v46 = vrot.slane %v14783_v45, 3  ;;  %v10651_v1 = vpop.f32.mrf.mxu0  ;;  %10740 = vmatmul.mubr.msk.f32.gmra.mxu1 %vm874_vm1, %v14770_v33 }
 0x2e4   : > { %v10683_v38 = vpop.f32.mrf.mxu1  ;;  %v6403_v18 = vrot.slane %v14783_v45, 4  ;;  %v6367_v41 = vrot.slane %v14787_v36, 3  ;;  %v14815_v31 = vadd.f32 %v5843_v59, %v14638_v35  ;;  %v6223_v56 = vmax.f32 %v6193_v12, 0.0  ;;  %10838 = vmatprep.subr.msk.mxu1 %vm965_vm0, %v14778_v27 }
 0x2e5   : > { %v6226_v62 = vmax.f32 %v6196_v44, 0.0  ;;  %v5853_v63 = vpop.f32.mrf.mxu0  ;;  %v6195_v23 = vadd.f32 %v14615_v26, %v6158_v51  ;;  %v6161_v47 = vadd.f32 %v10683_v38, %v14668_v22  ;;  %v6408_v2 = vrot.slane %v14787_v36, 4 }
 0x2e6   : > { %v6059_v60 = vpop.f32.mrf.mxu1  ;;  %v14824_v57 = vsel %vm965_vm0, %v6403_v18, %v6404_v20  ;;  %v14829_v35 = vsel %vm6254_vm6, 0.0, %v6223_v56  ;;  %v14836_v16 = vsel %vm6351_vm8, %v6362_v46, %v6363_v19  ;;  %v14842_v44 = vadd.f32 %v10651_v1, %v14509_v48 }
 0x2e7   : > { %16632 = vst [vmem:[#allocation24_spill] sm:$0xff] %v14824_v57  ;;  %10716 = vmatprep.mubr.msk.f32.mxu0 %vm874_vm1, %v14824_v57  ;;  %v6160_v22 = vadd.f32 %v6059_v60, %v14676_v24  ;;  %v6406_v12 = vrot.slane %v14829_v35, 4  ;;  %v14846_v51 = vsel %vm6254_vm6, 0.0, %v6226_v62  ;;  %v10654_v11 = vpop.f32.mrf.mxu0  ;;  %10742 = vmatprep.mubr.msk.f32.mxu1 %vm874_vm1, %v14836_v16  ;;  %v6365_v38 = vrot.slane %v14829_v35, 3 }
 0x2e8   : > { %v10686_v15 = vpop.f32.mrf.mxu1  ;;  %v14853_v21 = vadd.f32 %v5853_v63, %v14643_v42  ;;  %v14855_v46 = vmax.f32 %v6195_v23, 0.0  ;;  %v6370_v48 = vrot.slane %v14846_v51, 3  ;;  %v6198_v1 = vadd.f32 %v14615_v26, %v6161_v47 }
 0x2e9   : > { %v5863_v56 = vpop.f32.mrf.mxu0  ;;  %v6197_v60 = vadd.f32 %v14615_v26, %v6160_v22  ;;  %v6163_v62 = vadd.f32 %v10686_v15, %v14691_v39  ;;  %v6411_v59 = vrot.slane %v14846_v51, 4  ;;  %v14865_v42 = vadd.f32 %v10654_v11, %v14536_v40 }
 0x2ea   : > { %v6069_v18 = vpop.f32.mrf.mxu1  ;;  %v6409_v24 = vrot.slane %v14855_v46, 4  ;;  %v14867_v23 = vmax.f32 %v6198_v1, 0.0  ;;  %v14873_v39 = vsel %vm965_vm0, %v6404_v20, %v6406_v12  ;;  %v6368_v22 = vrot.slane %v14855_v46, 3 }
 0x2eb   : > { %v6227_v29 = vmax.f32 %v6197_v60, 0.0  ;;  %v10657_v3 = vpop.f32.mrf.mxu0  ;;  %v6200_v47 = vadd.f32 %v14615_v26, %v6163_v62  ;;  %16633 = vst [vmem:[#allocation17_spill] sm:$0xff] %v14873_v39  ;;  %10717 = vmatmul.mubr.msk.f32.gmra.mxu0 %vm874_vm1, %v14873_v39  ;;  %v14881_v40 = vsel %vm6351_vm8, %v6363_v19, %v6365_v38  ;;  %v6162_v15 = vadd.f32 %v6069_v18, %v14700_v32  ;;  %v16634_v62 = vld [vmem:[#allocation86_spill] sm:$0xff] }
 0x2ec   : > { %v10689_v63 = vpop.f32.mrf.mxu1  ;;  %v14887_v20 = vadd.f32 %v5863_v56, %v16634_v62  ;;  %v14894_v37 = vadd.f32 %v10657_v3, %v16635_v14  ;;  %10743 = vmatmul.mubr.msk.f32.gmra.mxu1 %vm874_vm1, %v14881_v40  ;;  %v6373_v32 = vrot.slane %v14867_v23, 3  ;;  %v14905_v14 = vsel %vm965_vm0, %v6408_v2, %v6409_v24 }
 0x2ed   : > { %v6165_v11 = vadd.f32 %v10689_v63, %v14714_v28  ;;  %v14891_v12 = vsel %vm6249_vm5, 0.0, %v6227_v29  ;;  %v5873_v19 = vpop.f32.mrf.mxu0  ;;  %v6414_v28 = vrot.slane %v14867_v23, 4  ;;  %v6230_v18 = vmax.f32 %v6200_v47, 0.0  ;;  %16636 = vst [vmem:[#allocation87_spill] sm:$0xff] %v14905_v14  ;;  %10719 = vmatprep.mubr.msk.f32.mxu0 %vm874_vm1, %v14905_v14 }
 0x2ee   : > { %v6079_v1 = vpop.f32.mrf.mxu1  ;;  %v6372_v38 = vrot.slane %v14891_v12, 3  ;;  %v6413_v63 = vrot.slane %v14891_v12, 4  ;;  %v6199_v29 = vadd.f32 %v14615_v26, %v6162_v15  ;;  %v14917_v47 = vsel %vm6351_vm8, %v6367_v41, %v6368_v22 }
 0x2ef   : > { %v10660_v62 = vpop.f32.mrf.mxu0  ;;  %v6202_v3 = vadd.f32 %v14615_v26, %v6165_v11  ;;  %v14910_v7 = vsel %vm6249_vm5, 0.0, %v6230_v18  ;;  %v14920_v15 = vsel %vm965_vm0, %v6409_v24, %v6411_v59  ;;  %v14924_v60 = vadd.f32 %v5873_v19, %v16638_v49  ;;  %10745 = vmatprep.mubr.msk.f32.mxu1 %vm874_vm1, %v14917_v47 }
 0x2f0   : > { %v10692_v56 = vpop.f32.mrf.mxu1  ;;  %16637 = vst [vmem:[#allocation19_spill] sm:$0xff] %v14920_v15  ;;  %v6229_v43 = vmax.f32 %v6199_v29, 0.0  ;;  %v14927_v18 = vadd.f32 %v10660_v62, %v14593_v4  ;;  %10720 = vmatmul.mubr.msk.f32.gmra.mxu0 %vm874_vm1, %v14920_v15  ;;  %v6377_v41 = vrot.slane %v14910_v7, 3  ;;  %v14935_v24 = vsel %vm6351_vm8, %v6368_v22, %v6370_v48 }
 0x2f1   : > { %v6232_v59 = vmax.f32 %v6202_v3, 0.0  ;;  %v5883_v2 = vpop.f32.mrf.mxu0  ;;  %v6164_v49 = vadd.f32 %v6079_v1, %v14730_v6  ;;  %10746 = vmatmul.mubr.msk.f32.gmra.mxu1 %vm874_vm1, %v14935_v24  ;;  %v6167_v29 = vadd.f32 %v10692_v56, %v14734_v55  ;;  %v14946_v62 = vsel %vm965_vm0, %v6413_v63, %v6414_v28 }
 0x2f2   : > { %v6089_v11 = vpop.f32.mrf.mxu1  ;;  %v14940_v4 = vsel %vm6254_vm6, 0.0, %v6229_v43  ;;  %16639 = vst [vmem:[#allocation88_spill] sm:$0xff] %v14946_v62  ;;  %v14949_v3 = vsel %vm6351_vm8, %v6372_v38, %v6373_v32  ;;  %v6418_v48 = vrot.slane %v14910_v7, 4  ;;  %10722 = vmatprep.mubr.msk.f32.mxu0 %vm874_vm1, %v14946_v62  ;;  %v14965_v56 = vadd.f32 %v5883_v2, %v14605_v30 }
 0x2f3   : > { %v6375_v6 = vrot.slane %v14940_v4, 3  ;;  %v6416_v22 = vrot.slane %v14940_v4, 4  ;;  %v14956_v43 = vsel %vm6254_vm6, 0.0, %v6232_v59  ;;  %10748 = vmatprep.mubr.msk.f32.mxu1 %vm874_vm1, %v14949_v3  ;;  %v6201_v63 = vadd.f32 %v14615_v26, %v6164_v49 }
 0x2f4   : > { %v10695_v19 = vpop.f32.mrf.mxu1  ;;  %v6380_v38 = vrot.slane %v14956_v43, 3  ;;  %v6204_v15 = vadd.f32 %v14615_v26, %v6167_v29  ;;  %v6166_v59 = vadd.f32 %v6089_v11, %v14801_v8  ;;  %v6421_v8 = vrot.slane %v14956_v43, 4 }
 0x2f5   : > { %v6169_v14 = vadd.f32 %v10695_v19, %v14806_v5  ;;  %v14972_v62 = vsel %vm965_vm0, %v6414_v28, %v6416_v22  ;;  %v14974_v57 = vmax.f32 %v6201_v63, 0.0  ;;  %v14979_v30 = vsel %vm6351_vm8, %v6373_v32, %v6375_v6 }
 0x2f6   : > { %v6099_v55 = vpop.f32.mrf.mxu1  ;;  %16640 = vst [vmem:[#allocation89_spill] sm:$0xff] %v14972_v62  ;;  %10723 = vmatmul.mubr.msk.f32.gmra.mxu0 %vm874_vm1, %v14972_v62  ;;  %v6203_v5 = vadd.f32 %v14615_v26, %v6166_v59  ;;  %10749 = vmatmul.mubr.msk.f32.gmra.mxu1 %vm874_vm1, %v14979_v30  ;;  %v16641_v19 = vrot.slane %v14694_v9, 5  ;;  %v16642_v32 = vrot.slane %v14661_v52, 5  ;;  %v16644_v1 = vstv %s14545_s15  ;;  %s8398_s15 = sshll.u32 %s16757_s18, 5 }
 0x2f7   : > { %v6168_v2 = vadd.f32 %v6099_v55, %v14815_v31  ;;  %v6206_v28 = vadd.f32 %v14615_v26, %v6169_v14  ;;  %v6378_v31 = vrot.slane %v14974_v57, 3  ;;  %vm15009_vm11 = vcmp.eq.s32.totalorder %v16644_v1, 1  ;;  %s734_s26 = sadd.s32 %s8398_s15, %s8397_s24 }
 0x2f8   : > { %v10698_v39 = vpop.f32.mrf.mxu1  ;;  %v14993_v29 = vsel %vm6795_vm10, %v16642_v32, %v16641_v19  ;;  %v6233_v9 = vmax.f32 %v6203_v5, 0.0  ;;  %vm6276_vm12 = vmor %vm6249_vm5, %vm15009_vm11  ;;  %s8399_s3 = sshll.u32 %s734_s26, 3 }
 0x2f9   : > { %v6171_v49 = vadd.f32 %v10698_v39, %v14842_v44  ;;  %v6419_v44 = vrot.slane %v14974_v57, 4  ;;  %v14997_v39 = vmax.f32 %v6204_v15, 0.0  ;;  %v6205_v14 = vadd.f32 %v14615_v26, %v6168_v2  ;;  %vm15139_vm13 = vmor %vm6254_vm6, %vm15009_vm11  ;;  %s15716_s28 = scalar_lea.vmem %s15835_s11, %s8399_s3 }
 0x2fa   : > { %v6109_v11 = vpop.f32.mrf.mxu1  ;;  %v6236_v52 = vmax.f32 %v6206_v28, 0.0  ;;  %v15015_v2 = vsel %vm6249_vm5, 0.0, %v6233_v9  ;;  %v15020_v5 = vsel %vm6351_vm8, %v6377_v41, %v6378_v31 }
 0x2fb   : > { %v6235_v59 = vmax.f32 %v6205_v14, 0.0  ;;  %v6208_v19 = vadd.f32 %v14615_v26, %v6171_v49  ;;  %v15005_v32 = vsel %vm965_vm0, %v6418_v48, %v6419_v44  ;;  %v15023_v49 = vsel %vm965_vm0, %v6419_v44, %v6421_v8  ;;  %10751 = vmatprep.mubr.msk.f32.mxu1 %vm874_vm1, %v15020_v5 }
 0x2fc   : > { %v10701_v63 = vpop.f32.mrf.mxu1  ;;  %16643 = vst [vmem:[#allocation90_spill] sm:$0xff] %v15005_v32  ;;  %10725 = vmatprep.mubr.msk.f32.mxu0 %vm874_vm1, %v15005_v32  ;;  %16647 = vst [vmem:[#allocation91_spill] sm:$0xff] %v15023_v49  ;;  %v15026_v48 = vsel %vm6351_vm8, %v6378_v31, %v6380_v38  ;;  %v6383_v28 = vrot.slane %v14997_v39, 3  ;;  %v6382_v14 = vrot.slane %v15015_v2, 3  ;;  %v6423_v9 = vrot.slane %v15015_v2, 4 }
 0x2fd   : > { %v15033_v22 = vsel %vm6249_vm5, 0.0, %v6236_v52  ;;  %10726 = vmatmul.mubr.msk.f32.gmra.mxu0 %vm874_vm1, %v15023_v49  ;;  %v6424_v41 = vrot.slane %v14997_v39, 4  ;;  %v15044_v31 = vsel %vm6254_vm6, 0.0, %v6235_v59  ;;  %10752 = vmatmul.mubr.msk.f32.gmra.mxu1 %vm874_vm1, %v15026_v48  ;;  %v6238_v49 = vmax.f32 %v6208_v19, 0.0 }
 0x2fe   : > { %v6119_v1 = vpop.f32.mrf.mxu1  ;;  %v6387_v52 = vrot.slane %v15033_v22, 3  ;;  %v6385_v55 = vrot.slane %v15044_v31, 3  ;;  %v6426_v6 = vrot.slane %v15044_v31, 4  ;;  %v6170_v32 = vadd.f32 %v6109_v11, %v14853_v21 }
 0x2ff   : > { %v6173_v38 = vadd.f32 %v10701_v63, %v14865_v42  ;;  %v15054_v8 = vsel %vm965_vm0, %v6423_v9, %v6424_v41  ;;  %v15057_v59 = vsel %vm6351_vm8, %v6382_v14, %v6383_v28  ;;  %v15061_v53 = vsel %vm6254_vm6, 0.0, %v6238_v49 }
 0x300   : > { %v10704_v44 = vpop.f32.mrf.mxu1  ;;  %16648 = vst [vmem:[#allocation30_spill] sm:$0xff] %v15054_v8  ;;  %10728 = vmatprep.mubr.msk.f32.mxu0 %vm874_vm1, %v15054_v8  ;;  %10754 = vmatprep.mubr.msk.f32.mxu1 %vm874_vm1, %v15057_v59  ;;  %v6172_v21 = vadd.f32 %v6119_v1, %v14887_v20  ;;  %v15070_v11 = vsel %vm965_vm0, %v6424_v41, %v6426_v6  ;;  %v6428_v63 = vrot.slane %v15033_v22, 4  ;;  %v6390_v1 = vrot.slane %v15061_v53, 3 }
 0x301   : > { %v6175_v42 = vadd.f32 %v10704_v44, %v14894_v37  ;;  %16649 = vst [vmem:[#allocation33_spill] sm:$0xff] %v15070_v11  ;;  %v6207_v14 = vadd.f32 %v14615_v26, %v6170_v32  ;;  %10729 = vmatmul.mubr.msk.f32.gmra.mxu0 %vm874_vm1, %v15070_v11  ;;  %v6210_v8 = vadd.f32 %v14615_v26, %v6173_v38  ;;  %v16650_v19 = vrot.slane %v14707_v58, 5 }
 0x302   : > { %v6129_v62 = vpop.f32.mrf.mxu1  ;;  %v6209_v20 = vadd.f32 %v14615_v26, %v6172_v21  ;;  %v15082_v6 = vsel %vm6351_vm8, %v6383_v28, %v6385_v55  ;;  %v16651_v38 = vrot.slane %v14685_v54, 5  ;;  %v6431_v55 = vrot.slane %v15061_v53, 4 }
 0x303   : > { %v6212_v37 = vadd.f32 %v14615_v26, %v6175_v42  ;;  %v15085_v41 = vmax.f32 %v6207_v14, 0.0  ;;  %10755 = vmatmul.mubr.msk.f32.gmra.mxu1 %vm874_vm1, %v15082_v6  ;;  %v6174_v32 = vadd.f32 %v6129_v62, %v14924_v60  ;;  %v15098_v28 = vmax.f32 %v6210_v8, 0.0 }
 0x304   : > { %v10707_v9 = vpop.f32.mrf.mxu1  ;;  %v15095_v21 = vsel %vm6795_vm10, %v16651_v38, %v16650_v19  ;;  %v6239_v42 = vmax.f32 %v6209_v20, 0.0  ;;  %v6834_v62 = vrot.slane %v15061_v53, 5 }
 0x305   : > { %v6242_v14 = vmax.f32 %v6212_v37, 0.0  ;;  %v6388_v49 = vrot.slane %v15085_v41, 3  ;;  %v6429_v11 = vrot.slane %v15085_v41, 4  ;;  %v6211_v54 = vadd.f32 %v14615_v26, %v6174_v32 }
 0x306   : > { %v6139_v44 = vpop.f32.mrf.mxu1  ;;  %v6177_v60 = vadd.f32 %v10707_v9, %v14927_v18  ;;  %v6832_v8 = vrot.slane %v15085_v41, 5  ;;  %v15112_v19 = vsel %vm6249_vm5, 0.0, %v6239_v42  ;;  %v7038_v37 = vrot.slane %v15098_v28, 3 }
 0x307   : > { %v6176_v20 = vadd.f32 %v6139_v44, %v14965_v56  ;;  %v7213_v38 = vrot.slane %v15098_v28, 4  ;;  %v7037_v32 = vrot.slane %v15112_v19, 3  ;;  %v7212_v18 = vrot.slane %v15112_v19, 4 }
 0x308   : > { %v7387_v53 = vrot.slane %v15112_v19, 5  ;;  %v15121_v9 = vsel %vm6276_vm12, 0.0, %v6242_v14  ;;  %v6241_v41 = vmax.f32 %v6211_v54, 0.0  ;;  %v6214_v50 = vadd.f32 %v14615_v26, %v6177_v60 }
 0x309   : > { %v15125_v42 = vsel %vm965_vm0, %v6428_v63, %v6429_v11  ;;  %v15128_v56 = vsel %vm6351_vm8, %v6387_v52, %v6388_v49  ;;  %v15131_v44 = vsel %vm965_vm0, %v6429_v11, %v6431_v55  ;;  %v15148_v52 = vsel %vm6351_vm8, %v6388_v49, %v6390_v1 }
 0x30a   : > { %v6323_v34 = vsel %vm6254_vm6, 0.0, %v6241_v41  ;;  %10731 = vmatprep.mubr.msk.f32.mxu0 %vm874_vm1, %v15125_v42  ;;  %10757 = vmatprep.mubr.msk.f32.mxu1 %vm874_vm1, %v15128_v56  ;;  %v6213_v11 = vadd.f32 %v14615_v26, %v6176_v20  ;;  %v16654_v63 = vrot.slane %v14705_v10, 5  ;;  %v16655_v55 = vrot.slane %v14707_v58, 5 }
 0x30b   : > { %v7565_v54 = vrot.slane %v15121_v9, 3  ;;  %v7740_v60 = vrot.slane %v15121_v9, 4  ;;  %v7040_v19 = vrot.slane %v6323_v34, 3  ;;  %v6244_v41 = vmax.f32 %v6214_v50, 0.0  ;;  %10732 = vmatmul.mubr.msk.f32.gmra.mxu0 %vm874_vm1, %v15131_v44  ;;  %10758 = vmatmul.mubr.msk.f32.gmra.mxu1 %vm874_vm1, %v15148_v52 }
 0x30c   : > { %v15156_v0 = vsel %vm6795_vm10, %v16655_v55, %v16654_v63  ;;  %v6243_v26 = vmax.f32 %v6213_v11, 0.0  ;;  %10762 = vmatprep.mubr.msk.f32.mxu0 %vm874_vm1, %v14796_v17  ;;  %10788 = vmatprep.mubr.msk.f32.mxu1 %vm874_vm1, %v14752_v13  ;;  %v16656_v10 = vrot.slane %v14721_v61, 5  ;;  %v16657_v58 = vrot.slane %v14783_v45, 5 }
 0x30d   : > { %v16658_v1 = vrot.slane %v14829_v35, 5  ;;  %v16660_v11 = vrot.slane %v14855_v46, 5  ;;  %v16661_v17 = vrot.slane %v14787_v36, 5  ;;  %v6326_v45 = vsel %vm15139_vm13, 0.0, %v6244_v41 }
 0x30e   : > { %v15173_v49 = vsel %vm6795_vm10, %v16657_v58, %v16656_v10  ;;  %v16659_v20 = vmov %v16656_v10  ;;  %v16662_v63 = vrot.slane %v14846_v51, 5  ;;  %v16664_v61 = vrot.slane %v14867_v23, 5 }
 0x30f   : > { %v15180_v50 = vsel %vm6795_vm10, %v16659_v20, %v16658_v1  ;;  %v15187_v13 = vsel %vm6795_vm10, %v16661_v17, %v16660_v11  ;;  %v16663_v55 = vmov %v16660_v11  ;;  %v16665_v10 = vrot.slane %v14891_v12, 5  ;;  %10763 = vmatmul.mubr.msk.f32.vlgmr.msra.gmra.mxu0 %vm874_vm1, %v14993_v29  ;;  %10789 = vmatmul.mubr.msk.f32.vlgmr.msra.gmra.mxu1 %vm874_vm1, %v14770_v33 }
 0x310   : > { %v15196_v35 = vsel %vm6795_vm10, %v16663_v55, %v16662_v63  ;;  %v16666_v36 = vrot.slane %v14940_v4, 5  ;;  %v16667_v1 = vmov %v16664_v61  ;;  %v7915_v51 = vrot.slane %v15121_v9, 5  ;;  %10813 = vmatpush3.msk.msra.mxu0 %vm965_vm0, %v14765_v25  ;;  %10765 = vmatprep.mubr.msk.f32.mxu0 %vm874_vm1, %v15095_v21 }
 0x311   : > { %v15203_v58 = vsel %vm6795_vm10, %v16665_v10, %v16664_v61  ;;  %v7215_v46 = vrot.slane %v6323_v34, 4  ;;  %v7390_v41 = vrot.slane %v6323_v34, 5  ;;  %v6325_v20 = vsel %vm15009_vm11, 0.0, %v6243_v26  ;;  %v9082_v34 = vld [vmem:[%s15833_s9 + $0x18] sm:$0xf]  ;;  %10791 = vmatprep.mubr.msk.f32.mxu1 %vm874_vm1, %v14836_v16  ;;  %10839 = vmatpush3.msk.msra.mxu1 %vm965_vm0, %v14778_v27 }
 0x312   : > { %v15210_v14 = vsel %vm6795_vm10, %v16667_v1, %v16666_v36  ;;  %v7568_v11 = vrot.slane %v6326_v45, 3  ;;  %v7566_v17 = vrot.slane %v6325_v20, 3  ;;  %v7741_v12 = vrot.slane %v6325_v20, 4  ;;  %10864 = vmatprep.subr.msk.mxu0 %vm965_vm0, %v9082_v34 }
 0x313   : > { %v16668_v23 = vrot.slane %v14974_v57, 5  ;;  %v16669_v4 = vrot.slane %v14910_v7, 5  ;;  %v7916_v15 = vrot.slane %v6325_v20, 5  ;;  %v16670_v33 = vrot.slane %v14956_v43, 5  ;;  %10766 = vmatmul.mubr.msk.f32.gmra.mxu0 %vm874_vm1, %v15156_v0  ;;  %10792 = vmatmul.mubr.msk.f32.gmra.mxu1 %vm874_vm1, %v14881_v40  ;;  %v16684_v20 = vld [vmem:[#allocation19_spill] sm:$0xff] }
 0x314   : > { %v16672_v26 = vrot.slane %v14997_v39, 5  ;;  %v16673_v63 = vrot.slane %v15015_v2, 5  ;;  %v16674_v61 = vrot.slane %v15044_v31, 5  ;;  %v16676_v57 = vrot.slane %v15033_v22, 5  ;;  %10768 = vmatprep.mubr.msk.f32.mxu0 %vm874_vm1, %v15173_v49  ;;  %10794 = vmatprep.mubr.msk.f32.mxu1 %vm874_vm1, %v14917_v47 }
 0x315   : > { %v15224_v9 = vsel %vm6795_vm10, %v16669_v4, %v16668_v23  ;;  %v16671_v29 = vmov %v16668_v23  ;;  %v15262_v2 = vsel %vm6351_vm8, %v7037_v32, %v7038_v37  ;;  %v15265_v36 = vsel %vm6795_vm10, %v6832_v8, %v6834_v62  ;;  %v16688_v23 = vld [vmem:[#allocation91_spill] sm:$0xff]  ;;  %v16689_v4 = vld [vmem:[#allocation30_spill] sm:$0xff] }
 0x316   : > { %v15238_v7 = vsel %vm6795_vm10, %v16671_v29, %v16670_v33  ;;  %v15245_v55 = vsel %vm6795_vm10, %v16673_v63, %v16672_v26  ;;  %v16675_v25 = vmov %v16672_v26  ;;  %v15259_v43 = vsel %vm6795_vm10, %v16676_v57, %v6832_v8  ;;  %v9100_v8 = vld [vmem:[%s15833_s9 + $0x1c] sm:$0xf] }
 0x317   : > { %v15252_v10 = vsel %vm6795_vm10, %v16675_v25, %v16674_v61  ;;  %v15268_v31 = vsel %vm6351_vm8, %v7038_v37, %v7040_v19  ;;  %v7743_v39 = vrot.slane %v6326_v45, 4  ;;  %v15274_v22 = vsel %vm965_vm0, %v7212_v18, %v7213_v38  ;;  %10890 = vmatprep.subr.msk.mxu1 %vm965_vm0, %v9100_v8  ;;  %10769 = vmatmul.mubr.msk.f32.gmra.mxu0 %vm874_vm1, %v15180_v50 }
 0x318   : > { %v16677_v1 = vrot.slane %v15098_v28, 5  ;;  %v15282_v62 = vsel %vm965_vm0, %v7213_v38, %v7215_v46  ;;  %v7918_v37 = vrot.slane %v6326_v45, 5  ;;  %v15300_v38 = vsel %vm965_vm0, %v7740_v60, %v7741_v12  ;;  %10795 = vmatmul.mubr.msk.f32.gmra.mxu1 %vm874_vm1, %v14935_v24  ;;  %10771 = vmatprep.mubr.msk.f32.mxu0 %vm874_vm1, %v15187_v13  ;;  %v16679_v60 = vld [vmem:[#allocation11_spill] sm:$0xff] }
 0x319   : > { %v15307_v19 = vsel %vm6351_vm8, %v7566_v17, %v7568_v11  ;;  %v15310_v28 = vsel %vm965_vm0, %v7741_v12, %v7743_v39  ;;  %v15313_v45 = vsel %vm6795_vm10, %v7915_v51, %v7916_v15  ;;  %10797 = vmatprep.mubr.msk.f32.mxu1 %vm874_vm1, %v14949_v3  ;;  %v16680_v51 = vld [vmem:[#allocation13_spill] sm:$0xff]  ;;  %v9118_v46 = vld [vmem:[%s15833_s9 + $0x20] sm:$0xf]  ;;  %v16685_v11 = vld [vmem:[#allocation88_spill] sm:$0xff] }
 0x31a   : > { %v15279_v32 = vsel %vm6795_vm10, %v7387_v53, %v16677_v1  ;;  %v16678_v27 = vmov %v16677_v1  ;;  %v15297_v53 = vsel %vm6351_vm8, %v7565_v54, %v7566_v17  ;;  %v15317_v54 = vsel %vm6795_vm10, %v7916_v15, %v7918_v37  ;;  %v16686_v17 = vld [vmem:[#allocation89_spill] sm:$0xff]  ;;  %v16687_v12 = vld [vmem:[#allocation90_spill] sm:$0xff] }
 0x31b   : > { %v15294_v18 = vsel %vm6795_vm10, %v16678_v27, %v7390_v41  ;;  %10772 = vmatmul.mubr.msk.f32.gmra.mxu0 %vm874_vm1, %v15196_v35  ;;  %v16681_v41 = vld [vmem:[#allocation24_spill] sm:$0xff] }
 0x31c   : > { %10798 = vmatmul.mubr.msk.f32.gmra.mxu1 %vm874_vm1, %v14979_v30  ;;  %10774 = vmatprep.mubr.msk.f32.mxu0 %vm874_vm1, %v15203_v58 }
 0x31d   : > { %10800 = vmatprep.mubr.msk.f32.mxu1 %vm874_vm1, %v15020_v5 }
 0x31f   : > { %10775 = vmatmul.mubr.msk.f32.gmra.mxu0 %vm874_vm1, %v15210_v14 }
 0x320   : > { %10801 = vmatmul.mubr.msk.f32.gmra.mxu1 %vm874_vm1, %v15026_v48  ;;  %10777 = vmatprep.mubr.msk.f32.mxu0 %vm874_vm1, %v15224_v9 }
 0x321   : > { %10803 = vmatprep.mubr.msk.f32.mxu1 %vm874_vm1, %v15057_v59 }
 0x323   : > { %10778 = vmatmul.mubr.msk.f32.gmra.mxu0 %vm874_vm1, %v15238_v7 }
 0x324   : > { %10804 = vmatmul.mubr.msk.f32.gmra.mxu1 %vm874_vm1, %v15082_v6  ;;  %10780 = vmatprep.mubr.msk.f32.mxu0 %vm874_vm1, %v15245_v55 }
 0x325   : > { %10806 = vmatprep.mubr.msk.f32.mxu1 %vm874_vm1, %v15128_v56 }
 0x327   : > { %10781 = vmatmul.mubr.msk.f32.gmra.mxu0 %vm874_vm1, %v15252_v10 }
 0x328   : > { %10807 = vmatmul.mubr.msk.f32.gmra.mxu1 %vm874_vm1, %v15148_v52  ;;  %10783 = vmatprep.mubr.msk.f32.mxu0 %vm874_vm1, %v15259_v43 }
 0x329   : > { %10809 = vmatprep.mubr.msk.f32.mxu1 %vm874_vm1, %v15262_v2 }
 0x32b   : > { %10784 = vmatmul.mubr.msk.f32.gmra.mxu0 %vm874_vm1, %v15265_v36 }
 0x32c   : > { %10810 = vmatmul.mubr.msk.f32.gmra.mxu1 %vm874_vm1, %v15268_v31  ;;  %10814 = vmatprep.mubr.msk.f32.mxu0 %vm874_vm1, %v16679_v60 }
 0x32d   : > { %10840 = vmatprep.mubr.msk.f32.mxu1 %vm874_vm1, %v15095_v21  ;;  %v16682_v21 = vld [vmem:[#allocation17_spill] sm:$0xff] }
 0x32f   : > { %10815 = vmatmul.mubr.msk.f32.vlgmr.msra.gmra.mxu0 %vm874_vm1, %v16680_v51 }
 0x330   : > { %10841 = vmatmul.mubr.msk.f32.vlgmr.msra.gmra.mxu1 %vm874_vm1, %v15156_v0  ;;  %10865 = vmatpush3.msk.msra.mxu0 %vm965_vm0, %v9082_v34  ;;  %v16683_v0 = vld [vmem:[#allocation87_spill] sm:$0xff]  ;;  %v16690_v34 = vld [vmem:[#allocation33_spill] sm:$0xff] }
 0x331   : > { %10817 = vmatprep.mubr.msk.f32.mxu0 %vm874_vm1, %v16681_v41  ;;  %10843 = vmatprep.mubr.msk.f32.mxu1 %vm874_vm1, %v15173_v49 }
 0x332   : > { %10891 = vmatpush3.msk.msra.mxu1 %vm965_vm0, %v9100_v8  ;;  %10916 = vmatprep.subr.msk.mxu0 %vm965_vm0, %v9118_v46 }
 0x333   : > { %10818 = vmatmul.mubr.msk.f32.gmra.mxu0 %vm874_vm1, %v16682_v21 }
 0x334   : > { %10844 = vmatmul.mubr.msk.f32.gmra.mxu1 %vm874_vm1, %v15180_v50  ;;  %10820 = vmatprep.mubr.msk.f32.mxu0 %vm874_vm1, %v16683_v0 }
 0x335   : > { %10846 = vmatprep.mubr.msk.f32.mxu1 %vm874_vm1, %v15187_v13 }
 0x337   : > { %10821 = vmatmul.mubr.msk.f32.gmra.mxu0 %vm874_vm1, %v16684_v20 }
 0x338   : > { %10847 = vmatmul.mubr.msk.f32.gmra.mxu1 %vm874_vm1, %v15196_v35  ;;  %10823 = vmatprep.mubr.msk.f32.mxu0 %vm874_vm1, %v16685_v11 }
 0x339   : > { %10849 = vmatprep.mubr.msk.f32.mxu1 %vm874_vm1, %v15203_v58 }
 0x33b   : > { %10824 = vmatmul.mubr.msk.f32.gmra.mxu0 %vm874_vm1, %v16686_v17 }
 0x33c   : > { %10850 = vmatmul.mubr.msk.f32.gmra.mxu1 %vm874_vm1, %v15210_v14  ;;  %10826 = vmatprep.mubr.msk.f32.mxu0 %vm874_vm1, %v16687_v12 }
 0x33d   : > { %10852 = vmatprep.mubr.msk.f32.mxu1 %vm874_vm1, %v15224_v9 }
 0x33f   : > { %10827 = vmatmul.mubr.msk.f32.gmra.mxu0 %vm874_vm1, %v16688_v23 }
 0x340   : > { %10853 = vmatmul.mubr.msk.f32.gmra.mxu1 %vm874_vm1, %v15238_v7  ;;  %10829 = vmatprep.mubr.msk.f32.mxu0 %vm874_vm1, %v16689_v4 }
 0x341   : > { %10855 = vmatprep.mubr.msk.f32.mxu1 %vm874_vm1, %v15245_v55 }
 0x343   : > { %10830 = vmatmul.mubr.msk.f32.gmra.mxu0 %vm874_vm1, %v16690_v34 }
 0x344   : > { %10856 = vmatmul.mubr.msk.f32.gmra.mxu1 %vm874_vm1, %v15252_v10  ;;  %10832 = vmatprep.mubr.msk.f32.mxu0 %vm874_vm1, %v15125_v42 }
 0x345   : > { %10858 = vmatprep.mubr.msk.f32.mxu1 %vm874_vm1, %v15259_v43 }
 0x347   : > { %10833 = vmatmul.mubr.msk.f32.gmra.mxu0 %vm874_vm1, %v15131_v44 }
 0x348   : > { %10859 = vmatmul.mubr.msk.f32.gmra.mxu1 %vm874_vm1, %v15265_v36  ;;  %10835 = vmatprep.mubr.msk.f32.mxu0 %vm874_vm1, %v15274_v22 }
 0x349   : > { %10861 = vmatprep.mubr.msk.f32.mxu1 %vm874_vm1, %v15279_v32 }
 0x34b   : > { %10836 = vmatmul.mubr.msk.f32.gmra.mxu0 %vm874_vm1, %v15282_v62 }
 0x34c   : > { %10862 = vmatmul.mubr.msk.f32.gmra.mxu1 %vm874_vm1, %v15294_v18  ;;  %10866 = vmatprep.mubr.msk.f32.mxu0 %vm874_vm1, %v14836_v16 }
 0x34d   : > { %10892 = vmatprep.mubr.msk.f32.mxu1 %vm874_vm1, %v16681_v41 }
 0x34f   : > { %10867 = vmatmul.mubr.msk.f32.vlgmr.msra.gmra.mxu0 %vm874_vm1, %v14881_v40 }
 0x350   : > { %10893 = vmatmul.mubr.msk.f32.vlgmr.msra.gmra.mxu1 %vm874_vm1, %v16682_v21  ;;  %10917 = vmatpush3.msk.msra.mxu0 %vm965_vm0, %v9118_v46 }
 0x351   : > { %10869 = vmatprep.mubr.msk.f32.mxu0 %vm874_vm1, %v14917_v47  ;;  %10895 = vmatprep.mubr.msk.f32.mxu1 %vm874_vm1, %v16683_v0 }
 0x353   : > { %10870 = vmatmul.mubr.msk.f32.gmra.mxu0 %vm874_vm1, %v14935_v24 }
 0x354   : > { %10896 = vmatmul.mubr.msk.f32.gmra.mxu1 %vm874_vm1, %v16684_v20  ;;  %10872 = vmatprep.mubr.msk.f32.mxu0 %vm874_vm1, %v14949_v3 }
 0x355   : > { %10898 = vmatprep.mubr.msk.f32.mxu1 %vm874_vm1, %v16685_v11 }
 0x357   : > { %10873 = vmatmul.mubr.msk.f32.gmra.mxu0 %vm874_vm1, %v14979_v30 }
 0x358   : > { %10899 = vmatmul.mubr.msk.f32.gmra.mxu1 %vm874_vm1, %v16686_v17  ;;  %10875 = vmatprep.mubr.msk.f32.mxu0 %vm874_vm1, %v15020_v5 }
 0x359   : > { %10901 = vmatprep.mubr.msk.f32.mxu1 %vm874_vm1, %v16687_v12 }
 0x35b   : > { %10876 = vmatmul.mubr.msk.f32.gmra.mxu0 %vm874_vm1, %v15026_v48 }
 0x35c   : > { %10902 = vmatmul.mubr.msk.f32.gmra.mxu1 %vm874_vm1, %v16688_v23  ;;  %10878 = vmatprep.mubr.msk.f32.mxu0 %vm874_vm1, %v15057_v59 }
 0x35d   : > { %10904 = vmatprep.mubr.msk.f32.mxu1 %vm874_vm1, %v16689_v4 }
 0x35f   : > { %10879 = vmatmul.mubr.msk.f32.gmra.mxu0 %vm874_vm1, %v15082_v6 }
 0x360   : > { %10905 = vmatmul.mubr.msk.f32.gmra.mxu1 %vm874_vm1, %v16690_v34  ;;  %10881 = vmatprep.mubr.msk.f32.mxu0 %vm874_vm1, %v15128_v56 }
 0x361   : > { %10907 = vmatprep.mubr.msk.f32.mxu1 %vm874_vm1, %v15125_v42 }
 0x363   : > { %10882 = vmatmul.mubr.msk.f32.gmra.mxu0 %vm874_vm1, %v15148_v52 }
 0x364   : > { %10908 = vmatmul.mubr.msk.f32.gmra.mxu1 %vm874_vm1, %v15131_v44  ;;  %10884 = vmatprep.mubr.msk.f32.mxu0 %vm874_vm1, %v15262_v2 }
 0x365   : > { %10910 = vmatprep.mubr.msk.f32.mxu1 %vm874_vm1, %v15274_v22 }
 0x367   : > { %10885 = vmatmul.mubr.msk.f32.gmra.mxu0 %vm874_vm1, %v15268_v31 }
 0x368   : > { %10911 = vmatmul.mubr.msk.f32.gmra.mxu1 %vm874_vm1, %v15282_v62  ;;  %10887 = vmatprep.mubr.msk.f32.mxu0 %vm874_vm1, %v15297_v53 }
 0x369   : > { %10913 = vmatprep.mubr.msk.f32.mxu1 %vm874_vm1, %v15300_v38 }
 0x36b   : > { %10888 = vmatmul.mubr.msk.f32.gmra.mxu0 %vm874_vm1, %v15307_v19 }
 0x36c   : > { %10914 = vmatmul.mubr.msk.f32.gmra.mxu1 %vm874_vm1, %v15310_v28  ;;  %10918 = vmatprep.mubr.msk.f32.mxu0 %vm874_vm1, %v15173_v49 }
 0x36f   : > { %10919 = vmatmul.mubr.msk.f32.vlgmr.msra.gmra.mxu0 %vm874_vm1, %v15180_v50 }
 0x370   : > { %10921 = vmatprep.mubr.msk.f32.mxu0 %vm874_vm1, %v15187_v13 }
 0x373   : > { %10922 = vmatmul.mubr.msk.f32.gmra.mxu0 %vm874_vm1, %v15196_v35 }
 0x374   : > { %10924 = vmatprep.mubr.msk.f32.mxu0 %vm874_vm1, %v15203_v58 }
 0x377   : > { %10925 = vmatmul.mubr.msk.f32.gmra.mxu0 %vm874_vm1, %v15210_v14 }
 0x378   : > { %10927 = vmatprep.mubr.msk.f32.mxu0 %vm874_vm1, %v15224_v9 }
 0x37b   : > { %10928 = vmatmul.mubr.msk.f32.gmra.mxu0 %vm874_vm1, %v15238_v7 }
 0x37c   : > { %10930 = vmatprep.mubr.msk.f32.mxu0 %vm874_vm1, %v15245_v55 }
 0x37f   : > { %10931 = vmatmul.mubr.msk.f32.gmra.mxu0 %vm874_vm1, %v15252_v10 }
 0x380   : > { %10933 = vmatprep.mubr.msk.f32.mxu0 %vm874_vm1, %v15259_v43 }
 0x383   : > { %10934 = vmatmul.mubr.msk.f32.gmra.mxu0 %vm874_vm1, %v15265_v36 }
 0x384   : > { %10936 = vmatprep.mubr.msk.f32.mxu0 %vm874_vm1, %v15279_v32 }
 0x387   : > { %10937 = vmatmul.mubr.msk.f32.gmra.mxu0 %vm874_vm1, %v15294_v18 }
 0x388   : > { %10939 = vmatprep.mubr.msk.f32.mxu0 %vm874_vm1, %v15313_v45 }
 0x38b   : > { %10940 = vmatmul.mubr.msk.f32.gmra.mxu0 %vm874_vm1, %v15317_v54 }
 0x39f   : > { %v10712_v16 = vpop.f32.mrf.mxu0  ;;  %v10738_v40 = vpop.f32.mrf.mxu1 }
 0x3a0   : > { %v6722_v47 = vadd.f32 %v10738_v40, %v10712_v16 }
 0x3a1   : > { %v6536_v24 = vpop.f32.mrf.mxu0  ;;  %v6716_v3 = vpop.f32.mrf.mxu1 }
 0x3a2   : > { %v6717_v30 = vadd.f32 %v6716_v3, %v6536_v24 }
 0x3a3   : > { %v10715_v5 = vpop.f32.mrf.mxu0  ;;  %v10741_v48 = vpop.f32.mrf.mxu1 }
 0x3a4   : > { %v6732_v59 = vadd.f32 %v10741_v48, %v10715_v5 }
 0x3a5   : > { %v6546_v6 = vpop.f32.mrf.mxu0  ;;  %v6726_v42 = vpop.f32.mrf.mxu1 }
 0x3a6   : > { %v6727_v56 = vadd.f32 %v6726_v42, %v6546_v6 }
 0x3ab   : > { %v10718_v44 = vpop.f32.mrf.mxu0 }
 0x3ac   : > { %v10744_v52 = vpop.f32.mrf.mxu1 }
 0x3ad   : > { %v6742_v49 = vadd.f32 %v10744_v52, %v10718_v44  ;;  %v6556_v50 = vpop.f32.mrf.mxu0 }
 0x3ae   : > { %v6736_v13 = vpop.f32.mrf.mxu1 }
 0x3af   : > { %v6737_v35 = vadd.f32 %v6736_v13, %v6556_v50 }
 0x3b0   : > { %v10721_v58 = vpop.f32.mrf.mxu0 }
 0x3b1   : > { %v10747_v14 = vpop.f32.mrf.mxu1 }
 0x3b2   : > { %v6566_v9 = vpop.f32.mrf.mxu0  ;;  %v6752_v15 = vadd.f32 %v10747_v14, %v10721_v58 }
 0x3b3   : > { %v6746_v33 = vpop.f32.mrf.mxu1 }
 0x3b4   : > { %v6747_v29 = vadd.f32 %v6746_v33, %v6566_v9 }
 0x3b6   : > { %v10724_v7 = vpop.f32.mrf.mxu0  ;;  %v10750_v26 = vpop.f32.mrf.mxu1 }
 0x3b7   : > { %v6762_v63 = vadd.f32 %v10750_v26, %v10724_v7 }
 0x3b8   : > { %v6576_v55 = vpop.f32.mrf.mxu0  ;;  %v6756_v61 = vpop.f32.mrf.mxu1 }
 0x3b9   : > { %v6757_v25 = vadd.f32 %v6756_v61, %v6576_v55 }
 0x3bd   : > { %v10727_v10 = vpop.f32.mrf.mxu0  ;;  %v10753_v57 = vpop.f32.mrf.mxu1 }
 0x3be   : > { %v6772_v43 = vadd.f32 %v10753_v57, %v10727_v10 }
 0x3bf   : > { %v6586_v2 = vpop.f32.mrf.mxu0  ;;  %v6766_v36 = vpop.f32.mrf.mxu1 }
 0x3c0   : > { %v6767_v31 = vadd.f32 %v6766_v36, %v6586_v2 }
 0x3c1   : > { %v10730_v39 = vpop.f32.mrf.mxu0 }
 0x3c3   : > { %v10756_v22 = vpop.f32.mrf.mxu1  ;;  %v6596_v1 = vpop.f32.mrf.mxu0 }
 0x3c4   : > { %v6782_v32 = vadd.f32 %v10756_v22, %v10730_v39 }
 0x3c5   : > { %v6776_v62 = vpop.f32.mrf.mxu1 }
 0x3c6   : > { %v6777_v8 = vadd.f32 %v6776_v62, %v6596_v1 }
 0x3cb   : > { %v10733_v37 = vpop.f32.mrf.mxu0  ;;  %v10759_v27 = vpop.f32.mrf.mxu1 }
 0x3cc   : > { %v6792_v18 = vadd.f32 %v10759_v27, %v10733_v37 }
 0x3cd   : > { %v6606_v53 = vpop.f32.mrf.mxu0  ;;  %v6786_v38 = vpop.f32.mrf.mxu1 }
 0x3ce   : > { %v6787_v19 = vadd.f32 %v6786_v38, %v6606_v53 }
 0x3cf   : > { %v10764_v28 = vpop.f32.mrf.mxu0  ;;  %v15530_v45 = vpop.f32.mrf.mxu1 }
 0x3d0   : > { %v15532_v54 = vadd.f32 %v10764_v28, %v6722_v47 }
 0x3d1   : > { %v6939_v60 = vpop.f32.mrf.mxu0  ;;  %v15534_v51 = vpop.f32.mrf.mxu1 }
 0x3d2   : > { %v15536_v46 = vadd.f32 %v6939_v60, %v6717_v30 }
 0x3d3   : > { %v10767_v41 = vpop.f32.mrf.mxu0  ;;  %v15538_v21 = vpop.f32.mrf.mxu1 }
 0x3d4   : > { %v15540_v0 = vadd.f32 %v10767_v41, %v6732_v59 }
 0x3d5   : > { %v6949_v20 = vpop.f32.mrf.mxu0  ;;  %v15542_v11 = vpop.f32.mrf.mxu1 }
 0x3d6   : > { %v15544_v17 = vadd.f32 %v6949_v20, %v6727_v56 }
 0x3d7   : > { %v10770_v12 = vpop.f32.mrf.mxu0 }
 0x3d8   : > { %v15546_v23 = vpop.f32.mrf.mxu1  ;;  %v15548_v4 = vadd.f32 %v10770_v12, %v6742_v49 }
 0x3d9   : > { %v6959_v34 = vpop.f32.mrf.mxu0 }
 0x3da   : > { %v15550_v16 = vpop.f32.mrf.mxu1  ;;  %v15552_v40 = vadd.f32 %v6959_v34, %v6737_v35 }
 0x3db   : > { %v10773_v47 = vpop.f32.mrf.mxu0 }
 0x3dc   : > { %v15554_v24 = vpop.f32.mrf.mxu1  ;;  %v15556_v3 = vadd.f32 %v10773_v47, %v6752_v15 }
 0x3dd   : > { %v6969_v30 = vpop.f32.mrf.mxu0 }
 0x3de   : > { %v15558_v5 = vpop.f32.mrf.mxu1  ;;  %v15560_v48 = vadd.f32 %v6969_v30, %v6747_v29 }
 0x3df   : > { %v10776_v59 = vpop.f32.mrf.mxu0 }
 0x3e0   : > { %v15562_v6 = vpop.f32.mrf.mxu1  ;;  %v15564_v42 = vadd.f32 %v10776_v59, %v6762_v63 }
 0x3e1   : > { %v6979_v56 = vpop.f32.mrf.mxu0 }
 0x3e2   : > { %v15566_v44 = vpop.f32.mrf.mxu1  ;;  %v15568_v52 = vadd.f32 %v6979_v56, %v6757_v25 }
 0x3e3   : > { %v10779_v49 = vpop.f32.mrf.mxu0 }
 0x3e4   : > { %v15570_v50 = vpop.f32.mrf.mxu1  ;;  %v15572_v13 = vadd.f32 %v10779_v49, %v6772_v43 }
 0x3e5   : > { %v6989_v35 = vpop.f32.mrf.mxu0 }
 0x3e6   : > { %v15574_v58 = vpop.f32.mrf.mxu1  ;;  %v15576_v14 = vadd.f32 %v6989_v35, %v6767_v31 }
 0x3e7   : > { %v10782_v9 = vpop.f32.mrf.mxu0 }
 0x3e8   : > { %v15578_v15 = vpop.f32.mrf.mxu1  ;;  %v15580_v33 = vadd.f32 %v10782_v9, %v6782_v32 }
 0x3e9   : > { %16691 = vst [vmem:[#allocation23_spill] sm:$0xff] %v15578_v15  ;;  %v6999_v29 = vpop.f32.mrf.mxu0  ;;  %v7196_v15 = vadd.f32 %v15534_v51, %v15536_v46  ;;  %v7201_v51 = vadd.f32 %v15546_v23, %v15548_v4  ;;  %v7203_v23 = vadd.f32 %v15554_v24, %v15556_v3  ;;  %v15702_v24 = vld [vmem:[%s15834_s10] ss:$0 sm:$0xff] }
 0x3ea   : > { %16692 = vst [vmem:[#allocation92_spill] sm:$0xff] %v15580_v33  ;;  %v15582_v7 = vpop.f32.mrf.mxu1  ;;  %v15584_v26 = vadd.f32 %v6999_v29, %v6777_v8 }
 0x3eb   : > { %16693 = vst [vmem:[#allocation94_spill] sm:$0xff] %v15582_v7  ;;  %v10785_v63 = vpop.f32.mrf.mxu0 }
 0x3ec   : > { %16694 = vst [vmem:[#allocation93_spill] sm:$0xff] %v15584_v26  ;;  %v15586_v55 = vpop.f32.mrf.mxu1  ;;  %v15588_v61 = vadd.f32 %v10785_v63, %v6792_v18  ;;  %v7197_v26 = vadd.f32 %v15530_v45, %v15532_v54  ;;  %v7198_v45 = vadd.f32 %v15542_v11, %v15544_v17 }
 0x3ed   : > { %16695 = vst [vmem:[#allocation67_spill] sm:$0xff] %v15586_v55  ;;  %v7009_v25 = vpop.f32.mrf.mxu0 }
 0x3ee   : > { %16696 = vst [vmem:[#allocation37_spill] sm:$0xff] %v15588_v61  ;;  %v15590_v10 = vpop.f32.mrf.mxu1  ;;  %v15592_v57 = vadd.f32 %v7009_v25, %v6787_v19 }
 0x3ef   : > { %16697 = vst [vmem:[#allocation95_spill] sm:$0xff] %v15590_v10  ;;  %v10816_v43 = vpop.f32.mrf.mxu0 }
 0x3f0   : > { %16698 = vst [vmem:[#allocation96_spill] sm:$0xff] %v15592_v57  ;;  %v10842_v2 = vpop.f32.mrf.mxu1  ;;  %v7372_v33 = vadd.f32 %v10816_v43, %v7197_v26 }
 0x3f1   : > { %v7292_v36 = vpop.f32.mrf.mxu0 }
 0x3f2   : > { %v7467_v31 = vpop.f32.mrf.mxu1  ;;  %v7547_v54 = vadd.f32 %v10842_v2, %v7372_v33 }
 0x3f3   : > { %v10819_v39 = vpop.f32.mrf.mxu0 }
 0x3f4   : > { %v15594_v22 = vpop.f32.mrf.mxu1 }
 0x3f5   : > { %v7302_v1 = vpop.f32.mrf.mxu0 }
 0x3f6   : > { %v15596_v32 = vpop.f32.mrf.mxu1  ;;  %v7373_v43 = vadd.f32 %v7302_v1, %v7198_v45 }
 0x3f7   : > { %v10822_v62 = vpop.f32.mrf.mxu0 }
 0x3f8   : > { %v15598_v8 = vpop.f32.mrf.mxu1 }
 0x3f9   : > { %v15600_v37 = vpop.f32.mrf.mxu0 }
 0x3fa   : > { %v15602_v27 = vpop.f32.mrf.mxu1 }
 0x3fb   : > { %v15604_v18 = vpop.f32.mrf.mxu0 }
 0x3fc   : > { %v15606_v53 = vpop.f32.mrf.mxu1 }
 0x3fd   : > { %v15608_v38 = vpop.f32.mrf.mxu0 }
 0x3fe   : > { %v15610_v19 = vpop.f32.mrf.mxu1 }
 0x3ff   : > { %v15612_v28 = vpop.f32.mrf.mxu0 }
 0x400   : > { %v15614_v60 = vpop.f32.mrf.mxu1 }
 0x401   : > { %16699 = vst [vmem:[#allocation97_spill] sm:$0xff] %v15614_v60  ;;  %v15616_v41 = vpop.f32.mrf.mxu0 }
 0x402   : > { %v15618_v20 = vpop.f32.mrf.mxu1 }
 0x403   : > { %16700 = vst [vmem:[#allocation98_spill] sm:$0xff] %v15618_v20  ;;  %v15620_v12 = vpop.f32.mrf.mxu0 }
 0x404   : > { %16701 = vst [vmem:[#allocation100_spill] sm:$0xff] %v15620_v12  ;;  %v15622_v34 = vpop.f32.mrf.mxu1  ;;  %v7371_v12 = vadd.f32 %v7292_v36, %v7196_v15 }
 0x405   : > { %16702 = vst [vmem:[#allocation46_spill] sm:$0xff] %v15622_v34  ;;  %v15624_v47 = vpop.f32.mrf.mxu0 }
 0x406   : > { %16703 = vst [vmem:[#allocation102_spill] sm:$0xff] %v15624_v47  ;;  %v15626_v30 = vpop.f32.mrf.mxu1  ;;  %v7546_v26 = vadd.f32 %v7467_v31, %v7371_v12 }
 0x407   : > { %16704 = vst [vmem:[#allocation48_spill] sm:$0xff] %v15626_v30  ;;  %v15628_v59 = vpop.f32.mrf.mxu0 }
 0x408   : > { %16705 = vst [vmem:[#allocation103_spill] sm:$0xff] %v15628_v59  ;;  %v15630_v56 = vpop.f32.mrf.mxu1 }
 0x409   : > { %16706 = vst [vmem:[#allocation4_spill] sm:$0xff] %v15630_v56  ;;  %v15632_v49 = vpop.f32.mrf.mxu0 }
 0x40a   : > { %16707 = vst [vmem:[#allocation104_spill] sm:$0xff] %v15632_v49  ;;  %v15634_v35 = vpop.f32.mrf.mxu1 }
 0x40b   : > { %16708 = vst [vmem:[#allocation12_spill] sm:$0xff] %v15634_v35  ;;  %v15636_v9 = vpop.f32.mrf.mxu0 }
 0x40c   : > { %16709 = vst [vmem:[#allocation3_spill] sm:$0xff] %v15636_v9  ;;  %v15638_v29 = vpop.f32.mrf.mxu1 }
 0x40d   : > { %16710 = vst [vmem:[#allocation10_spill] sm:$0xff] %v15638_v29  ;;  %v15640_v63 = vpop.f32.mrf.mxu0 }
 0x40e   : > { %16711 = vst [vmem:[#allocation14_spill] sm:$0xff] %v15640_v63  ;;  %v15642_v25 = vpop.f32.mrf.mxu1 }
 0x40f   : > { %16712 = vst [vmem:[#allocation15_spill] sm:$0xff] %v15642_v25  ;;  %v10868_v10 = vpop.f32.mrf.mxu0 }
 0x410   : > { %v10894_v57 = vpop.f32.mrf.mxu1 }
 0x411   : > { %v7645_v55 = vpop.f32.mrf.mxu0 }
 0x412   : > { %v7820_v30 = vpop.f32.mrf.mxu1  ;;  %v7724_v17 = vadd.f32 %v7645_v55, %v7546_v26 }
 0x413   : > { %v10871_v61 = vpop.f32.mrf.mxu0 }
 0x414   : > { %v10897_v34 = vpop.f32.mrf.mxu1  ;;  %v7899_v3 = vadd.f32 %v7820_v30, %v7724_v17  ;;  %v16721_v17 = vld [vmem:[#allocation92_spill] sm:$0xff] }
 0x415   : > { %v7655_v59 = vpop.f32.mrf.mxu0 }
 0x416   : > { %v15644_v49 = vpop.f32.mrf.mxu1 }
 0x417   : > { %v10874_v56 = vpop.f32.mrf.mxu0 }
 0x418   : > { %v15650_v29 = vpop.f32.mrf.mxu1 }
 0x419   : > { %v7665_v7 = vpop.f32.mrf.mxu0 }
 0x41a   : > { %v15658_v47 = vpop.f32.mrf.mxu1 }
 0x41b   : > { %v15646_v35 = vpop.f32.mrf.mxu0 }
 0x41d   : > { %v15648_v9 = vpop.f32.mrf.mxu0 }
 0x41e   : > { %16713 = vst [vmem:[#allocation105_spill] sm:$0xff] %v15648_v9 }
 0x41f   : > { %v15652_v63 = vpop.f32.mrf.mxu0 }
 0x420   : > { %16714 = vst [vmem:[#allocation28_spill] sm:$0xff] %v15652_v63  ;;  %v7199_v63 = vadd.f32 %v15538_v21, %v15540_v0  ;;  %v7200_v21 = vadd.f32 %v15550_v16, %v15552_v40  ;;  %v7376_v0 = vadd.f32 %v10822_v62, %v7201_v51  ;;  %v7202_v40 = vadd.f32 %v15558_v5, %v15560_v48 }
 0x421   : > { %v15654_v25 = vpop.f32.mrf.mxu0 }
 0x422   : > { %16715 = vst [vmem:[#allocation5_spill] sm:$0xff] %v15654_v25  ;;  %v15668_v25 = vpop.f32.mrf.mxu1  ;;  %v7375_v4 = vadd.f32 %v15600_v37, %v7200_v21  ;;  %v7551_v31 = vadd.f32 %v15598_v8, %v7376_v0  ;;  %v7377_v48 = vadd.f32 %v15608_v38, %v7202_v40 }
 0x423   : > { %v15660_v20 = vpop.f32.mrf.mxu0 }
 0x424   : > { %16716 = vst [vmem:[#allocation21_spill] sm:$0xff] %v15660_v20  ;;  %v7374_v20 = vadd.f32 %v10819_v39, %v7199_v63  ;;  %v15682_v15 = vpop.f32.mrf.mxu1  ;;  %v7378_v39 = vadd.f32 %v15604_v18, %v7203_v23  ;;  %v7550_v5 = vadd.f32 %v15602_v27, %v7375_v4  ;;  %v16722_v23 = vld [vmem:[#allocation23_spill] sm:$0xff] }
 0x425   : > { %v15664_v9 = vpop.f32.mrf.mxu0 }
 0x426   : > { %16717 = vst [vmem:[#allocation20_spill] sm:$0xff] %v15664_v9  ;;  %v7725_v9 = vadd.f32 %v10868_v10, %v7547_v54  ;;  %v7549_v11 = vadd.f32 %v15594_v22, %v7374_v20  ;;  %v7548_v10 = vadd.f32 %v15596_v32, %v7373_v43  ;;  %v15697_v55 = vpop.f32.mrf.mxu1  ;;  %v7729_v32 = vadd.f32 %v10874_v56, %v7551_v31  ;;  %v16720_v43 = vld [vmem:[#allocation105_spill] sm:$0xff] }
 0x427   : > { %v15670_v60 = vpop.f32.mrf.mxu0  ;;  %v7204_v20 = vadd.f32 %v15566_v44, %v15568_v52  ;;  %v7553_v12 = vadd.f32 %v15606_v53, %v7378_v39  ;;  %v7207_v44 = vadd.f32 %v15570_v50, %v15572_v13  ;;  %v7552_v52 = vadd.f32 %v15610_v19, %v7377_v48  ;;  %v16718_v50 = vld [vmem:[#allocation97_spill] sm:$0xff]  ;;  %v16719_v19 = vld [vmem:[#allocation100_spill] sm:$0xff] }
 0x428   : > { %v7900_v2 = vadd.f32 %v10894_v57, %v7725_v9  ;;  %v7727_v16 = vadd.f32 %v10871_v61, %v7549_v11  ;;  %v7726_v1 = vadd.f32 %v7655_v59, %v7548_v10  ;;  %v7205_v61 = vadd.f32 %v15562_v6, %v15564_v42  ;;  %v7860_v9 = vpop.f32.mrf.mxu1  ;;  %v16724_v10 = vld [vmem:[#allocation102_spill] sm:$0xff] }
 0x429   : > { %v15676_v46 = vpop.f32.mrf.mxu0  ;;  %v7728_v59 = vadd.f32 %v7665_v7, %v7550_v5  ;;  %v7379_v7 = vadd.f32 %v15616_v41, %v7204_v20  ;;  %v7904_v53 = vadd.f32 %v15650_v29, %v7729_v32  ;;  %v7731_v56 = vadd.f32 %v15646_v35, %v7553_v12  ;;  %v16728_v5 = vld [vmem:[#allocation46_spill] sm:$0xff]  ;;  %v16729_v32 = vld [vmem:[#allocation103_spill] sm:$0xff] }
 0x42a   : > { %v7902_v8 = vadd.f32 %v10897_v34, %v7727_v16  ;;  %v7380_v30 = vadd.f32 %v15612_v28, %v7205_v61  ;;  %v7901_v42 = vadd.f32 %v15644_v49, %v7726_v1  ;;  %v7206_v54 = vadd.f32 %v15574_v58, %v15576_v14  ;;  %v10909_v29 = vpop.f32.mrf.mxu1  ;;  %v16723_v14 = vld [vmem:[#allocation98_spill] sm:$0xff]  ;;  %v16725_v16 = vld [vmem:[#allocation28_spill] sm:$0xff]  ;;  %v16726_v1 = vld [vmem:[#allocation93_spill] sm:$0xff] }
 0x42b   : > { %v15684_v36 = vpop.f32.mrf.mxu0  ;;  %v7382_v51 = vadd.f32 %v16719_v19, %v7207_v44  ;;  %v7903_v41 = vadd.f32 %v15658_v47, %v7728_v59  ;;  %v7730_v35 = vadd.f32 %v16720_v43, %v7552_v52  ;;  %v7209_v58 = vadd.f32 %v16722_v23, %v16721_v17  ;;  %v16734_v44 = vld [vmem:[#allocation104_spill] sm:$0xff] }
 0x42c   : > { %v7555_v13 = vadd.f32 %v16718_v50, %v7380_v30  ;;  %v7554_v4 = vadd.f32 %v16723_v14, %v7379_v7  ;;  %v7906_v31 = vadd.f32 %v15668_v25, %v7731_v56  ;;  %v16741_v23 = vld [vmem:[#allocation12_spill] sm:$0xff]  ;;  %v16742_v14 = vld [vmem:[#allocation14_spill] sm:$0xff] }
 0x42d   : > { %v15690_v33 = vpop.f32.mrf.mxu0  ;;  %v7557_v48 = vadd.f32 %v16728_v5, %v7382_v51  ;;  %v7905_v25 = vadd.f32 %v15682_v15, %v7730_v35  ;;  %v16739_v51 = vld [vmem:[#allocation3_spill] sm:$0xff]  ;;  %v16740_v35 = vld [vmem:[#allocation20_spill] sm:$0xff] }
 0x42e   : > { %v7733_v47 = vadd.f32 %v16725_v16, %v7555_v13  ;;  %v16738_v13 = vld [vmem:[#allocation4_spill] sm:$0xff]  ;;  %v16744_v5 = vld [vmem:[#allocation15_spill] sm:$0xff] }
 0x42f   : > { %v10920_v22 = vpop.f32.mrf.mxu0 }
 0x430   : > { %v8075_v57 = vadd.f32 %v10920_v22, %v7900_v2  ;;  %v7381_v2 = vadd.f32 %v16724_v10, %v7206_v54  ;;  %v7908_v7 = vadd.f32 %v15697_v55, %v7733_v47  ;;  %v16737_v54 = vld [vmem:[#allocation95_spill] sm:$0xff] }
 0x431   : > { %v7995_v62 = vpop.f32.mrf.mxu0 }
 0x432   : > { %v8098_v37 = vadd.f32 %v15702_v24, %v8075_v57  ;;  %v8074_v18 = vadd.f32 %v7995_v62, %v7899_v3  ;;  %v16727_v57 = vld [vmem:[#allocation94_spill] sm:$0xff]  ;;  %v7384_v62 = vadd.f32 %v16729_v32, %v7209_v58 }
 0x433   : > { %v10923_v6 = vpop.f32.mrf.mxu0  ;;  %v7208_v61 = vadd.f32 %v16727_v57, %v16726_v1 }
 0x434   : > { %v8114_v27 = vmax.f32 %v8098_v37, 0.0  ;;  %v8097_v38 = vadd.f32 %v15702_v24, %v8074_v18  ;;  %v8077_v34 = vadd.f32 %v10923_v6, %v7902_v8  ;;  %v16730_v8 = vld [vmem:[#allocation5_spill] sm:$0xff]  ;;  %v7870_v18 = vpop.f32.mrf.mxu1  ;;  %v7559_v19 = vadd.f32 %v16738_v13, %v7384_v62 }
 0x435   : > { %v8005_v28 = vpop.f32.mrf.mxu0  ;;  %v7732_v37 = vadd.f32 %v16730_v8, %v7554_v4  ;;  %v16731_v6 = vld [vmem:[#allocation37_spill] sm:$0xff]  ;;  %v7383_v52 = vadd.f32 %v16734_v44, %v7208_v61 }
 0x436   : > { %8130 = vst.msk [vmem:[%s15716_s28 + $0x8] sm:$0xff] %vm874_vm1, %v8114_v27  ;;  %v8113_v49 = vmax.f32 %v8097_v38, 0.0  ;;  %v8100_v63 = vadd.f32 %v15702_v24, %v8077_v34  ;;  %v8076_v45 = vadd.f32 %v8005_v28, %v7901_v42  ;;  %v16732_v42 = vld [vmem:[#allocation67_spill] sm:$0xff]  ;;  %v16733_v38 = vld [vmem:[#allocation48_spill] sm:$0xff]  ;;  %v16735_v28 = vld [vmem:[#allocation21_spill] sm:$0xff]  ;;  %v10912_v43 = vpop.f32.mrf.mxu1  ;;  %v7737_v10 = vadd.f32 %v15670_v60, %v7559_v19 }
 0x437   : > { %v10926_v26 = vpop.f32.mrf.mxu0  ;;  %v7211_v27 = vadd.f32 %v16732_v42, %v16731_v6  ;;  %v7556_v34 = vadd.f32 %v16733_v38, %v7381_v2  ;;  %v7735_v56 = vadd.f32 %v16735_v28, %v7557_v48  ;;  %v7558_v58 = vadd.f32 %v16741_v23, %v7383_v52 }
 0x438   : > { %8129 = vst.msk [vmem:[%s15716_s28] sm:$0xff] %vm874_vm1, %v8113_v49  ;;  %v8116_v21 = vmax.f32 %v8100_v63, 0.0  ;;  %v8099_v0 = vadd.f32 %v15702_v24, %v8076_v45  ;;  %v8079_v11 = vadd.f32 %v10926_v26, %v7904_v53  ;;  %v16736_v45 = vld [vmem:[#allocation96_spill] sm:$0xff]  ;;  %v7907_v26 = vadd.f32 %v7860_v9, %v7732_v37 }
 0x439   : > { %v8015_v40 = vpop.f32.mrf.mxu0  ;;  %v7210_v50 = vadd.f32 %v16737_v54, %v16736_v45  ;;  %v7910_v16 = vadd.f32 %v10909_v29, %v7735_v56  ;;  %v7912_v32 = vadd.f32 %v10912_v43, %v7737_v10 }
 0x43a   : > { %8132 = vst.msk [vmem:[%s15716_s28 + $0x18] sm:$0xff] %vm874_vm1, %v8116_v21  ;;  %v8115_v39 = vmax.f32 %v8099_v0, 0.0  ;;  %v8102_v22 = vadd.f32 %v15702_v24, %v8079_v11  ;;  %v8078_v3 = vadd.f32 %v8015_v40, %v7903_v41  ;;  %v7386_v41 = vadd.f32 %v16739_v51, %v7211_v27 }
 0x43b   : > { %v10929_v20 = vpop.f32.mrf.mxu0  ;;  %v7734_v21 = vadd.f32 %v16740_v35, %v7556_v34  ;;  %v7385_v4 = vadd.f32 %v16742_v14, %v7210_v50 }
 0x43c   : > { %8131 = vst.msk [vmem:[%s15716_s28 + $0x10] sm:$0xff] %vm874_vm1, %v8115_v39  ;;  %v8118_v12 = vmax.f32 %v8102_v22, 0.0  ;;  %v8101_v30 = vadd.f32 %v15702_v24, %v8078_v3  ;;  %v8081_v59 = vadd.f32 %v10929_v20, %v7906_v31  ;;  %v16743_v31 = vld [vmem:[#allocation10_spill] sm:$0xff]  ;;  %v7736_v22 = vadd.f32 %v15676_v46, %v7558_v58  ;;  %v7880_v3 = vpop.f32.mrf.mxu1 }
 0x43d   : > { %v8025_v53 = vpop.f32.mrf.mxu0  ;;  %v7561_v39 = vadd.f32 %v16743_v31, %v7386_v41  ;;  %v7909_v57 = vadd.f32 %v7870_v18, %v7734_v21  ;;  %v7560_v48 = vadd.f32 %v16744_v5, %v7385_v4 }
 0x43e   : > { %8134 = vst.msk [vmem:[%s15716_s28 + $0x28] sm:$0xff] %vm874_vm1, %v8118_v12  ;;  %v8117_v15 = vmax.f32 %v8101_v30, 0.0  ;;  %v8104_v49 = vadd.f32 %v15702_v24, %v8081_v59  ;;  %v8080_v63 = vadd.f32 %v8025_v53, %v7905_v25  ;;  %v7911_v20 = vadd.f32 %v7880_v3, %v7736_v22  ;;  %v10915_v25 = vpop.f32.mrf.mxu1 }
 0x43f   : > { %v10932_v55 = vpop.f32.mrf.mxu0  ;;  %v7739_v8 = vadd.f32 %v15684_v36, %v7561_v39  ;;  %v7738_v30 = vadd.f32 %v15690_v33, %v7560_v48 }
 0x440   : > { %8133 = vst.msk [vmem:[%s15716_s28 + $0x20] sm:$0xff] %vm874_vm1, %v8117_v15  ;;  %v8120_v0 = vmax.f32 %v8104_v49, 0.0  ;;  %v8103_v11 = vadd.f32 %v15702_v24, %v8080_v63  ;;  %v8083_v17 = vadd.f32 %v10932_v55, %v7908_v7  ;;  %v7890_v52 = vpop.f32.mrf.mxu1 }
 0x441   : > { %v8035_v2 = vpop.f32.mrf.mxu0  ;;  %v7914_v27 = vadd.f32 %v10915_v25, %v7739_v8  ;;  %v7913_v33 = vadd.f32 %v7890_v52, %v7738_v30 }
 0x442   : > { %8136 = vst.msk [vmem:[%s15716_s28 + $0x38] sm:$0xff] %vm874_vm1, %v8120_v0  ;;  %v8119_v9 = vmax.f32 %v8103_v11, 0.0  ;;  %v8106_v47 = vadd.f32 %v15702_v24, %v8083_v17  ;;  %v8082_v40 = vadd.f32 %v8035_v2, %v7907_v26 }
 0x443   : > { %v10935_v1 = vpop.f32.mrf.mxu0 }
 0x444   : > { %8135 = vst.msk [vmem:[%s15716_s28 + $0x30] sm:$0xff] %vm874_vm1, %v8119_v9  ;;  %v8122_v60 = vmax.f32 %v8106_v47, 0.0  ;;  %v8105_v29 = vadd.f32 %v15702_v24, %v8082_v40  ;;  %v8085_v61 = vadd.f32 %v10935_v1, %v7910_v16 }
 0x445   : > { %v8045_v62 = vpop.f32.mrf.mxu0 }
 0x446   : > { %8138 = vst.msk [vmem:[%s15716_s28 + $0x48] sm:$0xff] %vm874_vm1, %v8122_v60  ;;  %v8121_v46 = vmax.f32 %v8105_v29, 0.0  ;;  %v8108_v37 = vadd.f32 %v15702_v24, %v8085_v61  ;;  %v8084_v18 = vadd.f32 %v8045_v62, %v7909_v57 }
 0x447   : > { %v10938_v12 = vpop.f32.mrf.mxu0 }
 0x448   : > { %8137 = vst.msk [vmem:[%s15716_s28 + $0x40] sm:$0xff] %vm874_vm1, %v8121_v46  ;;  %v8124_v59 = vmax.f32 %v8108_v37, 0.0  ;;  %v8107_v6 = vadd.f32 %v15702_v24, %v8084_v18  ;;  %v8087_v42 = vadd.f32 %v10938_v12, %v7912_v32 }
 0x449   : > { %v8055_v36 = vpop.f32.mrf.mxu0 }
 0x44a   : > { %8140 = vst.msk [vmem:[%s15716_s28 + $0x58] sm:$0xff] %vm874_vm1, %v8124_v59  ;;  %v8123_v38 = vmax.f32 %v8107_v6, 0.0  ;;  %v8110_v34 = vadd.f32 %v15702_v24, %v8087_v42  ;;  %v8086_v44 = vadd.f32 %v8055_v36, %v7911_v20 }
 0x44b   : > { %v10941_v7 = vpop.f32.mrf.mxu0 }
 0x44c   : > { %8139 = vst.msk [vmem:[%s15716_s28 + $0x50] sm:$0xff] %vm874_vm1, %v8123_v38  ;;  %v8126_v53 = vmax.f32 %v8110_v34, 0.0  ;;  %v8109_v28 = vadd.f32 %v15702_v24, %v8086_v44  ;;  %v8089_v56 = vadd.f32 %v10941_v7, %v7914_v27 }
 0x44d   : > { %v8065_v15 = vpop.f32.mrf.mxu0 }
 0x44e   : > { %8142 = vst.msk [vmem:[%s15716_s28 + $0x68] sm:$0xff] %vm874_vm1, %v8126_v53  ;;  %v8125_v49 = vmax.f32 %v8109_v28, 0.0  ;;  %v8112_v63 = vadd.f32 %v15702_v24, %v8089_v56  ;;  %v8088_v45 = vadd.f32 %v8065_v15, %v7913_v33 }
 0x450   : > { %8141 = vst.msk [vmem:[%s15716_s28 + $0x60] sm:$0xff] %vm874_vm1, %v8125_v49  ;;  %v8128_v54 = vmax.f32 %v8112_v63, 0.0  ;;  %v8111_v50 = vadd.f32 %v15702_v24, %v8088_v45 }
 0x452   : > { %8144 = vst.msk [vmem:[%s15716_s28 + $0x78] sm:$0xff] %vm874_vm1, %v8128_v54  ;;  %v8127_v13 = vmax.f32 %v8111_v50, 0.0 }
 0x454   : > { %8143 = vst.msk [vmem:[%s15716_s28 + $0x70] sm:$0xff] %vm874_vm1, %v8127_v13 }
 0x455 PF: > { %s21_s21 = sadd.s32 1, %s11094_s21   ;;  %s16745_s12 = sld [smem:[#allocation2_spill]] }
 0x456   : > { %p18_p13 = scmp.ge.s32.totalorder %s21_s21, 6   ;;  %s16746_s17 = smov %s11086_s19 }
 0x457   : > { %s16747_s18 = smov %s11090_s20  ;;  %s16748_s19 = smov %s16751_s22 }
 0x458   :  { %20 = sbr.rel (!%p18_p13) target bundleno = 3 (0x3), region = 133 }
 0x45b   : > { %s16749_s20 = smov %s16745_s12 }

</bundles_post_ra>
